<compile_context>
chip_gen: v5e
topology: v5e:2x2
jax: 0.10.0
libtpu: 0.0.40
codegen_flags: <defaults>
</compile_context>

<pallas_src>
import functools

import jax
import jax.numpy as jnp
from jax import lax
from jax.experimental import pallas as pl
from jax.experimental.pallas import tpu as pltpu


# ----------------------------------------------------------------------------
# Fused conv (im2col matmul) + BatchNorm + ReLU + 2x2 max-pool kernel
# ----------------------------------------------------------------------------
def _conv_bn_pool_kernel(cols_ref, w_ref, g_ref, b_ref, o_ref,
                         z_ref, s_ref, ss_ref, *, eps, inv_n):
    q = pl.program_id(0)

    # Quadrant matmul on the MXU: bf16 x bf16 -> f32 accumulate.
    z = jnp.dot(cols_ref[...], w_ref[...], preferred_element_type=jnp.float32)
    z_ref[q] = z

    @pl.when(q == 0)
    def _init():
        s_ref[...] = jnp.zeros_like(s_ref)
        ss_ref[...] = jnp.zeros_like(ss_ref)

    # Running per-channel stats for training-mode BatchNorm (biased variance).
    s_ref[...] += jnp.sum(z, axis=0, keepdims=True)
    ss_ref[...] += jnp.sum(z * z, axis=0, keepdims=True)

    @pl.when(q == pl.num_programs(0) - 1)
    def _finalize():
        mean = s_ref[...] * inv_n
        var = ss_ref[...] * inv_n - mean * mean
        scale = g_ref[...] * lax.rsqrt(var + eps)
        shift = b_ref[...] - mean * scale
        # BN + ReLU per quadrant, then elementwise max over quadrants == 2x2 pool.
        pooled = jnp.maximum(z_ref[0] * scale + shift, 0.0)
        for i in range(1, z_ref.shape[0]):
            yi = jnp.maximum(z_ref[i] * scale + shift, 0.0)
            pooled = jnp.maximum(pooled, yi)
        o_ref[...] = pooled.astype(o_ref.dtype)


def conv_bn_relu_pool(cols, w, gamma, beta, *, eps=1e-5):
    """cols: [4, Q, K] bf16 quadrant-ordered patches; w: [K, C] bf16.

    Returns pooled activations [Q, C] f32 with row order (b, i, j)."""
    nq, Q, K = cols.shape
    K2, C = w.shape
    assert K == K2, (K, K2)
    kernel = functools.partial(_conv_bn_pool_kernel, eps=eps,
                               inv_n=1.0 / float(nq * Q))
    return pl.pallas_call(
        kernel,
        out_shape=jax.ShapeDtypeStruct((Q, C), jnp.float32),
        grid=(nq,),
        in_specs=[
            pl.BlockSpec((None, Q, K), lambda q: (q, 0, 0)),   # one quadrant slab / step
            pl.BlockSpec((K, C), lambda q: (0, 0)),            # weights stay resident
            pl.BlockSpec((1, C), lambda q: (0, 0)),            # gamma
            pl.BlockSpec((1, C), lambda q: (0, 0)),            # beta
        ],
        out_specs=pl.BlockSpec((Q, C), lambda q: (0, 0)),      # written at last step only
        scratch_shapes=[
            pltpu.VMEM((nq, Q, C), jnp.float32),   # full pre-pool conv activation
            pltpu.VMEM((1, C), jnp.float32),       # per-channel sum
            pltpu.VMEM((1, C), jnp.float32),       # per-channel sum of squares
        ],
        compiler_params=pltpu.CompilerParams(
            # BN needs global batch stats => accumulate across the whole grid,
            # so the quadrant axis must be "arbitrary" (no megacore split here).
            dimension_semantics=("arbitrary",),
            vmem_limit_bytes=32 * 1024 * 1024,
        ),
    )(cols, w, gamma.reshape(1, C), beta.reshape(1, C))


# ----------------------------------------------------------------------------
# Fused fc1 -> relu -> fc2 -> relu -> fc3 kernel (single pallas_call)
# ----------------------------------------------------------------------------
def _mlp_kernel(x_ref, w1_ref, b1_ref, w2_ref, b2_ref, w3_ref, b3_ref, o_ref):
    h = jnp.dot(x_ref[...], w1_ref[...], preferred_element_type=jnp.float32)
    h = jnp.maximum(h + b1_ref[...], 0.0).astype(w2_ref.dtype)
    h = jnp.dot(h, w2_ref[...], preferred_element_type=jnp.float32)
    h = jnp.maximum(h + b2_ref[...], 0.0).astype(w3_ref.dtype)
    o = jnp.dot(h, w3_ref[...], preferred_element_type=jnp.float32) + b3_ref[...]
    o_ref[...] = o.astype(o_ref.dtype)


def _full2d(shape):
    return pl.BlockSpec(tuple(shape), lambda i: (0, 0))


def fused_mlp(x, w1, b1, w2, b2, w3, b3):
    """x: [B, K1] bf16; weights bf16 [K, N]; biases f32. All three layers in one call."""
    M = x.shape[0]
    N = w3.shape[1]
    b1 = b1.reshape(1, -1)
    b2 = b2.reshape(1, -1)
    b3 = b3.reshape(1, -1)
    # All operands (<2.5 MB total) fit in VMEM simultaneously; at B=2 the FLOPs
    # are negligible so the win is one launch + no HBM round trips for h1/h2.
    return pl.pallas_call(
        _mlp_kernel,
        out_shape=jax.ShapeDtypeStruct((M, N), jnp.float32),
        grid=(1,),
        in_specs=[_full2d(x.shape),
                  _full2d(w1.shape), _full2d(b1.shape),
                  _full2d(w2.shape), _full2d(b2.shape),
                  _full2d(w3.shape), _full2d(b3.shape)],
        out_specs=_full2d((M, N)),
        compiler_params=pltpu.CompilerParams(
            dimension_semantics=("arbitrary",),
            vmem_limit_bytes=32 * 1024 * 1024,
        ),
    )(x, w1, b1, w2, b2, w3, b3)


# ----------------------------------------------------------------------------
# Plain-JAX glue (data reorganization only)
# ----------------------------------------------------------------------------
def quadrant_im2col(x, k, *, pool=2, k_pad=None, out_dtype=jnp.bfloat16):
    """x: [B, H, W, C] NHWC -> cols [pool*pool, B*Hp*Wp, K(padded)] in bf16.

    Quadrant q = qh*pool + qw, row = (b, i, j) holds the conv patch for output
    pixel (b, pool*i+qh, pool*j+qw); columns are in (ky, kx, c) order to match
    the reshaped conv weights."""
    B, H, W, C = x.shape
    Ho, Wo = H - k + 1, W - k + 1
    Hp, Wp = Ho // pool, Wo // pool
    K = k * k * C
    taps = [x[:, ky:ky + Ho, kx:kx + Wo, :] for ky in range(k) for kx in range(k)]
    p = jnp.stack(taps, axis=3)                           # [B, Ho, Wo, k*k, C]
    p = p.reshape(B, Ho, Wo, K)                           # (ky, kx, c) minor order
    p = p.reshape(B, Hp, pool, Wp, pool, K)
    p = jnp.transpose(p, (2, 4, 0, 1, 3, 5))              # [qh, qw, B, Hp, Wp, K]
    p = p.reshape(pool * pool, B * Hp * Wp, K)
    if k_pad is not None and k_pad > K:
        p = jnp.pad(p, ((0, 0), (0, 0), (0, k_pad - K)))  # zero-pad contraction dim
    return p.astype(out_dtype), (B, Hp, Wp)


# ----------------------------------------------------------------------------
# Forward pass (mirrors the PyTorch module)
# ----------------------------------------------------------------------------
def cnn_forward(x_nchw, p):
    B = x_nchw.shape[0]
    x = jnp.transpose(x_nchw, (0, 2, 3, 1))               # NCHW -> NHWC

    # conv1 (3->64, k=5) + bn1 + relu + pool, fused.  K padded 75 -> 128.
    # conv biases are intentionally unused: batch-stat BN cancels them exactly.
    w1 = jnp.transpose(p["conv1_w"], (2, 3, 1, 0)).reshape(75, 64)
    w1 = jnp.pad(w1, ((0, 128 - 75), (0, 0))).astype(jnp.bfloat16)
    cols1, (_, Hp1, Wp1) = quadrant_im2col(x, 5, k_pad=128)      # [4, B*14*14, 128]
    y1 = conv_bn_relu_pool(cols1, w1, p["bn1_g"], p["bn1_b"])    # [B*14*14, 64]
    y1 = y1.reshape(B, Hp1, Wp1, 64)

    # conv2 (64->64, k=5) + bn2 + relu + pool, fused.  K = 1600.
    w2 = jnp.transpose(p["conv2_w"], (2, 3, 1, 0)).reshape(1600, 64).astype(jnp.bfloat16)
    cols2, (_, Hp2, Wp2) = quadrant_im2col(y1, 5)                # [4, B*5*5, 1600]
    y2 = conv_bn_relu_pool(cols2, w2, p["bn2_g"], p["bn2_b"])    # [B*5*5, 64]

    # Flatten: our rows are (b, h, w) with channels minor -> feat[b, h*5*64 + w*64 + c].
    feat = y2.reshape(B, Hp2 * Wp2 * 64).astype(jnp.bfloat16)

    # fc1 weight columns permuted from torch's (c, h, w) flatten order to our
    # (h, w, c) order, so no activation transpose is needed before the MLP.
    hw = Hp2 * Wp2
    fc1 = jnp.transpose(p["fc1_w"].reshape(384, 64, hw), (2, 1, 0))
    fc1 = fc1.reshape(hw * 64, 384).astype(jnp.bfloat16)
    fc2 = p["fc2_w"].T.astype(jnp.bfloat16)
    fc3 = p["fc3_w"].T.astype(jnp.bfloat16)
    return fused_mlp(feat, fc1, p["fc1_b"], fc2, p["fc2_b"], fc3, p["fc3_b"])


# ----------------------------------------------------------------------------
# Pure-JAX reference (for a sanity check; f32, HIGHEST precision, with biases)
# ----------------------------------------------------------------------------
def maxpool2x2(x):
    B, H, W, C = x.shape
    x = x.reshape(B, H // 2, 2, W // 2, 2, C)
    return jnp.max(x, axis=(2, 4))


def reference_forward(x_nchw, p):
    x = jnp.transpose(x_nchw, (0, 2, 3, 1))

    def conv(x, w_pt, b):
        w = jnp.transpose(w_pt, (2, 3, 1, 0))              # HWIO
        y = lax.conv_general_dilated(
            x, w, (1, 1), "VALID",
            dimension_numbers=("NHWC", "HWIO", "NHWC"),
            precision=lax.Precision.HIGHEST)
        return y + b

    def bn_relu(y, g, be, eps=1e-5):
        mean = jnp.mean(y, axis=(0, 1, 2), keepdims=True)
        var = jnp.mean(jnp.square(y - mean), axis=(0, 1, 2), keepdims=True)
        return jnp.maximum((y - mean) * lax.rsqrt(var + eps) * g + be, 0.0)

    y = maxpool2x2(bn_relu(conv(x, p["conv1_w"], p["conv1_b"]), p["bn1_g"], p["bn1_b"]))
    y = maxpool2x2(bn_relu(conv(y, p["conv2_w"], p["conv2_b"]), p["bn2_g"], p["bn2_b"]))
    feat = jnp.transpose(y, (0, 3, 1, 2)).reshape(y.shape[0], 64 * 5 * 5)

    def fc(h, w_pt, b, relu):
        o = jnp.dot(h, w_pt.T, precision=lax.Precision.HIGHEST) + b
        return jnp.maximum(o, 0.0) if relu else o

    h = fc(feat, p["fc1_w"], p["fc1_b"], True)
    h = fc(h, p["fc2_w"], p["fc2_b"], True)
    return fc(h, p["fc3_w"], p["fc3_b"], False)


# ----------------------------------------------------------------------------
# Deterministic parameter init (PyTorch-layout shapes)
# ----------------------------------------------------------------------------
def init_params(key):
    ks = jax.random.split(key, 8)
    n = lambda k, shape, s: (s * jax.random.normal(k, shape)).astype(jnp.float32)
    return {
        "conv1_w": n(ks[0], (64, 3, 5, 5), 0.05),
        "conv1_b": n(ks[1], (64,), 0.05),
        "bn1_g": jnp.ones((64,), jnp.float32),
        "bn1_b": jnp.zeros((64,), jnp.float32),
        "conv2_w": n(ks[2], (64, 64, 5, 5), 0.05),
        "conv2_b": n(ks[3], (64,), 0.05),
        "bn2_g": jnp.ones((64,), jnp.float32),
        "bn2_b": jnp.zeros((64,), jnp.float32),
        "fc1_w": n(ks[4], (384, 64 * 5 * 5), 0.05),
        "fc1_b": jnp.zeros((384,), jnp.float32),
        "fc2_w": n(ks[5], (192, 384), 0.05),
        "fc2_b": jnp.zeros((192,), jnp.float32),
        "fc3_w": n(ks[6], (10, 192), 0.05),
        "fc3_b": jnp.zeros((10,), jnp.float32),
    }


if __name__ == "__main__":
    key = jax.random.PRNGKey(0)
    kx, kp = jax.random.split(key)
    # 32x32 spatial is required by the module (32 -> 28 -> 14 -> 10 -> 5 -> 64*5*5).
    x = jax.random.normal(kx, (2, 3, 32, 32), dtype=jnp.float32)
    params = init_params(kp)

    out = jax.jit(cnn_forward)(x, params)
    out = jax.block_until_ready(out)
    assert out.shape == (2, 10), out.shape

    # bf16 MXU operands (per perf feedback) vs the f32 HIGHEST reference -> use a
    # slightly relaxed tolerance.
    ref = reference_forward(x, params)
    if not jnp.allclose(out, ref, atol=3e-2, rtol=3e-2):
        raise AssertionError(
            f"mismatch vs reference: max abs err = {jnp.max(jnp.abs(out - ref))}")

    print("KERNEL_OK")
</pallas_src>

<mosaic_0001>
module attributes {stable_mosaic.version = 11 : i64} {
  func.func @_conv_bn_pool_kernel(%arg0: i32, %arg1: memref<1x392x128xbf16, #tpu.memory_space<vmem>>, %arg2: memref<128x64xbf16, #tpu.memory_space<vmem>>, %arg3: memref<1x64xf32, #tpu.memory_space<vmem>>, %arg4: memref<1x64xf32, #tpu.memory_space<vmem>>, %arg5: memref<392x64xf32, #tpu.memory_space<vmem>>, %arg6: memref<4x392x64xf32, #tpu.memory_space<vmem>>, %arg7: memref<1x64xf32, #tpu.memory_space<vmem>>, %arg8: memref<1x64xf32, #tpu.memory_space<vmem>>) attributes {dimension_semantics = [#tpu.dimension_semantics<arbitrary>], iteration_bounds = array<i64: 4>, scalar_prefetch = 0 : i64, scratch_operands = 3 : i64, tpu.core_type = #tpu.core_type<tc>, window_params = [{transform_indices = @transform_0, window_bounds = array<i64: 1, 392, 128>}, {pipeline_mode = #tpu.pipeline_mode<synchronous>, transform_indices = @transform_1, window_bounds = array<i64: 128, 64>}, {pipeline_mode = #tpu.pipeline_mode<synchronous>, transform_indices = @transform_2, window_bounds = array<i64: 1, 64>}, {pipeline_mode = #tpu.pipeline_mode<synchronous>, transform_indices = @transform_3, window_bounds = array<i64: 1, 64>}, {pipeline_mode = #tpu.pipeline_mode<synchronous>, transform_indices = @transform_4, window_bounds = array<i64: 392, 64>}]} {
    %c0 = arith.constant 0 : index
    %c0_0 = arith.constant 0 : index
    %c0_1 = arith.constant 0 : index
    %0 = vector.load %arg1[%c0, %c0_0, %c0_1] : memref<1x392x128xbf16, #tpu.memory_space<vmem>>, vector<1x392x128xbf16>
    %1 = vector.shape_cast %0 : vector<1x392x128xbf16> to vector<392x128xbf16>
    %c0_2 = arith.constant 0 : index
    %c0_3 = arith.constant 0 : index
    %2 = vector.load %arg2[%c0_2, %c0_3] : memref<128x64xbf16, #tpu.memory_space<vmem>>, vector<128x64xbf16>
    %cst = arith.constant dense<0.000000e+00> : vector<392x64xf32>
    %3 = tpu.matmul %1, %2, %cst {dimension_numbers = #tpu.dot_dimension_numbers<[1], [0], [0], [1], [0, 0, 1, 1], [], []>} : vector<392x128xbf16>, vector<128x64xbf16>, vector<392x64xf32> -> vector<392x64xf32>
    %4 = arith.index_cast %arg0 : i32 to index
    %c0_4 = arith.constant 0 : index
    %c0_5 = arith.constant 0 : index
    %5 = vector.load %arg6[%4, %c0_4, %c0_5] : memref<4x392x64xf32, #tpu.memory_space<vmem>>, vector<1x392x64xf32>
    %6 = vector.shape_cast %5 : vector<1x392x64xf32> to vector<392x64xf32>
    %7 = vector.shape_cast %3 : vector<392x64xf32> to vector<1x392x64xf32>
    tpu.vector_store %arg6[%4, %c0_4, %c0_5], %7 {strides = array<i32>} : memref<4x392x64xf32, #tpu.memory_space<vmem>>, vector<1x392x64xf32>,
    %c0_i32 = arith.constant 0 : i32
    %8 = arith.cmpi eq, %arg0, %c0_i32 : i32
    %9 = arith.extui %8 : i1 to i32
    %c0_i32_6 = arith.constant 0 : i32
    %10 = arith.cmpi ne, %9, %c0_i32_6 : i32
    scf.if %10 {
      %cst_18 = arith.constant 0.000000e+00 : f32
      %25 = vector.broadcast %cst_18 : f32 to vector<1x64xf32>
      %c0_19 = arith.constant 0 : index
      %c0_20 = arith.constant 0 : index
      %26 = vector.load %arg7[%c0_19, %c0_20] : memref<1x64xf32, #tpu.memory_space<vmem>>, vector<1x64xf32>
      tpu.vector_store %arg7[%c0_19, %c0_20], %25 {strides = array<i32>} : memref<1x64xf32, #tpu.memory_space<vmem>>, vector<1x64xf32>,
      %cst_21 = arith.constant 0.000000e+00 : f32
      %27 = vector.broadcast %cst_21 : f32 to vector<1x64xf32>
      %c0_22 = arith.constant 0 : index
      %c0_23 = arith.constant 0 : index
      %28 = vector.load %arg8[%c0_22, %c0_23] : memref<1x64xf32, #tpu.memory_space<vmem>>, vector<1x64xf32>
      tpu.vector_store %arg8[%c0_22, %c0_23], %27 {strides = array<i32>} : memref<1x64xf32, #tpu.memory_space<vmem>>, vector<1x64xf32>,
    } else {
    }
    %c0_7 = arith.constant 0 : index
    %c0_8 = arith.constant 0 : index
    %11 = vector.load %arg7[%c0_7, %c0_8] : memref<1x64xf32, #tpu.memory_space<vmem>>, vector<1x64xf32>
    %cst_9 = arith.constant dense<0.000000e+00> : vector<64xf32>
    %12 = vector.multi_reduction <add>, %3, %cst_9 [0] : vector<392x64xf32> to vector<64xf32>
    %13 = vector.shape_cast %12 : vector<64xf32> to vector<1x64xf32>
    %14 = arith.addf %11, %13 : vector<1x64xf32>
    %c0_10 = arith.constant 0 : index
    %c0_11 = arith.constant 0 : index
    %15 = vector.load %arg7[%c0_10, %c0_11] : memref<1x64xf32, #tpu.memory_space<vmem>>, vector<1x64xf32>
    tpu.vector_store %arg7[%c0_10, %c0_11], %14 {strides = array<i32>} : memref<1x64xf32, #tpu.memory_space<vmem>>, vector<1x64xf32>,
    %c0_12 = arith.constant 0 : index
    %c0_13 = arith.constant 0 : index
    %16 = vector.load %arg8[%c0_12, %c0_13] : memref<1x64xf32, #tpu.memory_space<vmem>>, vector<1x64xf32>
    %17 = arith.mulf %3, %3 : vector<392x64xf32>
    %cst_14 = arith.constant dense<0.000000e+00> : vector<64xf32>
    %18 = vector.multi_reduction <add>, %17, %cst_14 [0] : vector<392x64xf32> to vector<64xf32>
    %19 = vector.shape_cast %18 : vector<64xf32> to vector<1x64xf32>
    %20 = arith.addf %16, %19 : vector<1x64xf32>
    %c0_15 = arith.constant 0 : index
    %c0_16 = arith.constant 0 : index
    %21 = vector.load %arg8[%c0_15, %c0_16] : memref<1x64xf32, #tpu.memory_space<vmem>>, vector<1x64xf32>
    tpu.vector_store %arg8[%c0_15, %c0_16], %20 {strides = array<i32>} : memref<1x64xf32, #tpu.memory_space<vmem>>, vector<1x64xf32>,
    %c3_i32 = arith.constant 3 : i32
    %22 = arith.cmpi eq, %arg0, %c3_i32 : i32
    %23 = arith.extui %22 : i1 to i32
    %c0_i32_17 = arith.constant 0 : i32
    %24 = arith.cmpi ne, %23, %c0_i32_17 : i32
    scf.if %24 {
      %c0_18 = arith.constant 0 : index
      %c0_19 = arith.constant 0 : index
      %25 = vector.load %arg7[%c0_18, %c0_19] : memref<1x64xf32, #tpu.memory_space<vmem>>, vector<1x64xf32>
      %cst_20 = arith.constant 6.37755089E-4 : f32
      %26 = vector.broadcast %cst_20 : f32 to vector<1x64xf32>
      %27 = arith.mulf %25, %26 : vector<1x64xf32>
      %c0_21 = arith.constant 0 : index
      %c0_22 = arith.constant 0 : index
      %28 = vector.load %arg8[%c0_21, %c0_22] : memref<1x64xf32, #tpu.memory_space<vmem>>, vector<1x64xf32>
      %cst_23 = arith.constant 6.37755089E-4 : f32
      %29 = vector.broadcast %cst_23 : f32 to vector<1x64xf32>
      %30 = arith.mulf %28, %29 : vector<1x64xf32>
      %31 = arith.mulf %27, %27 : vector<1x64xf32>
      %32 = arith.subf %30, %31 : vector<1x64xf32>
      %c0_24 = arith.constant 0 : index
      %c0_25 = arith.constant 0 : index
      %33 = vector.load %arg3[%c0_24, %c0_25] : memref<1x64xf32, #tpu.memory_space<vmem>>, vector<1x64xf32>
      %cst_26 = arith.constant 9.99999974E-6 : f32
      %34 = vector.broadcast %cst_26 : f32 to vector<1x64xf32>
      %35 = arith.addf %32, %34 : vector<1x64xf32>
      %36 = math.rsqrt %35 : vector<1x64xf32>
      %37 = arith.mulf %33, %36 : vector<1x64xf32>
      %c0_27 = arith.constant 0 : index
      %c0_28 = arith.constant 0 : index
      %38 = vector.load %arg4[%c0_27, %c0_28] : memref<1x64xf32, #tpu.memory_space<vmem>>, vector<1x64xf32>
      %39 = arith.mulf %27, %37 : vector<1x64xf32>
      %40 = arith.subf %38, %39 : vector<1x64xf32>
      %c0_29 = arith.constant 0 : index
      %c0_30 = arith.constant 0 : index
      %c0_31 = arith.constant 0 : index
      %41 = vector.load %arg6[%c0_29, %c0_30, %c0_31] : memref<4x392x64xf32, #tpu.memory_space<vmem>>, vector<1x392x64xf32>
      %42 = vector.shape_cast %41 : vector<1x392x64xf32> to vector<392x64xf32>
      %43 = vector.broadcast %37 : vector<1x64xf32> to vector<392x64xf32>
      %44 = arith.mulf %42, %43 : vector<392x64xf32>
      %45 = vector.broadcast %40 : vector<1x64xf32> to vector<392x64xf32>
      %46 = arith.addf %44, %45 : vector<392x64xf32>
      %cst_32 = arith.constant 0.000000e+00 : f32
      %47 = vector.broadcast %cst_32 : f32 to vector<392x64xf32>
      %48 = arith.maximumf %46, %47 : vector<392x64xf32>
      %c1 = arith.constant 1 : index
      %c0_33 = arith.constant 0 : index
      %c0_34 = arith.constant 0 : index
      %49 = vector.load %arg6[%c1, %c0_33, %c0_34] : memref<4x392x64xf32, #tpu.memory_space<vmem>>, vector<1x392x64xf32>
      %50 = vector.shape_cast %49 : vector<1x392x64xf32> to vector<392x64xf32>
      %51 = vector.broadcast %37 : vector<1x64xf32> to vector<392x64xf32>
      %52 = arith.mulf %50, %51 : vector<392x64xf32>
      %53 = vector.broadcast %40 : vector<1x64xf32> to vector<392x64xf32>
      %54 = arith.addf %52, %53 : vector<392x64xf32>
      %cst_35 = arith.constant 0.000000e+00 : f32
      %55 = vector.broadcast %cst_35 : f32 to vector<392x64xf32>
      %56 = arith.maximumf %54, %55 : vector<392x64xf32>
      %57 = arith.maximumf %48, %56 : vector<392x64xf32>
      %c2 = arith.constant 2 : index
      %c0_36 = arith.constant 0 : index
      %c0_37 = arith.constant 0 : index
      %58 = vector.load %arg6[%c2, %c0_36, %c0_37] : memref<4x392x64xf32, #tpu.memory_space<vmem>>, vector<1x392x64xf32>
      %59 = vector.shape_cast %58 : vector<1x392x64xf32> to vector<392x64xf32>
      %60 = vector.broadcast %37 : vector<1x64xf32> to vector<392x64xf32>
      %61 = arith.mulf %59, %60 : vector<392x64xf32>
      %62 = vector.broadcast %40 : vector<1x64xf32> to vector<392x64xf32>
      %63 = arith.addf %61, %62 : vector<392x64xf32>
      %cst_38 = arith.constant 0.000000e+00 : f32
      %64 = vector.broadcast %cst_38 : f32 to vector<392x64xf32>
      %65 = arith.maximumf %63, %64 : vector<392x64xf32>
      %66 = arith.maximumf %57, %65 : vector<392x64xf32>
      %c3 = arith.constant 3 : index
      %c0_39 = arith.constant 0 : index
      %c0_40 = arith.constant 0 : index
      %67 = vector.load %arg6[%c3, %c0_39, %c0_40] : memref<4x392x64xf32, #tpu.memory_space<vmem>>, vector<1x392x64xf32>
      %68 = vector.shape_cast %67 : vector<1x392x64xf32> to vector<392x64xf32>
      %69 = vector.broadcast %37 : vector<1x64xf32> to vector<392x64xf32>
      %70 = arith.mulf %68, %69 : vector<392x64xf32>
      %71 = vector.broadcast %40 : vector<1x64xf32> to vector<392x64xf32>
      %72 = arith.addf %70, %71 : vector<392x64xf32>
      %cst_41 = arith.constant 0.000000e+00 : f32
      %73 = vector.broadcast %cst_41 : f32 to vector<392x64xf32>
      %74 = arith.maximumf %72, %73 : vector<392x64xf32>
      %75 = arith.maximumf %66, %74 : vector<392x64xf32>
      %c0_42 = arith.constant 0 : index
      %c0_43 = arith.constant 0 : index
      %76 = vector.load %arg5[%c0_42, %c0_43] : memref<392x64xf32, #tpu.memory_space<vmem>>, vector<392x64xf32>
      tpu.vector_store %arg5[%c0_42, %c0_43], %75 {strides = array<i32>} : memref<392x64xf32, #tpu.memory_space<vmem>>, vector<392x64xf32>,
    } else {
    }
    return
  }
  func.func @transform_0(%arg0: i32) -> (i32, i32, i32) {
    %c0_i32 = arith.constant 0 : i32
    %c0_i32_0 = arith.constant 0 : i32
    %c0_i32_1 = arith.constant 0 : i32
    return %arg0, %c0_i32, %c0_i32_0 : i32, i32, i32
  }
  func.func @transform_1(%arg0: i32) -> (i32, i32) {
    %c0_i32 = arith.constant 0 : i32
    %c0_i32_0 = arith.constant 0 : i32
    %c0_i32_1 = arith.constant 0 : i32
    return %c0_i32, %c0_i32_0 : i32, i32
  }
  func.func @transform_2(%arg0: i32) -> (i32, i32) {
    %c0_i32 = arith.constant 0 : i32
    %c0_i32_0 = arith.constant 0 : i32
    %c0_i32_1 = arith.constant 0 : i32
    return %c0_i32, %c0_i32_0 : i32, i32
  }
  func.func @transform_3(%arg0: i32) -> (i32, i32) {
    %c0_i32 = arith.constant 0 : i32
    %c0_i32_0 = arith.constant 0 : i32
    %c0_i32_1 = arith.constant 0 : i32
    return %c0_i32, %c0_i32_0 : i32, i32
  }
  func.func @transform_4(%arg0: i32) -> (i32, i32) {
    %c0_i32 = arith.constant 0 : i32
    %c0_i32_0 = arith.constant 0 : i32
    %c0_i32_1 = arith.constant 0 : i32
    return %c0_i32, %c0_i32_0 : i32, i32
  }
}

module attributes {stable_mosaic.version = 11 : i64} {
  func.func @_conv_bn_pool_kernel(%arg0: i32, %arg1: memref<1x50x1600xbf16, #tpu.memory_space<vmem>>, %arg2: memref<1600x64xbf16, #tpu.memory_space<vmem>>, %arg3: memref<1x64xf32, #tpu.memory_space<vmem>>, %arg4: memref<1x64xf32, #tpu.memory_space<vmem>>, %arg5: memref<50x64xf32, #tpu.memory_space<vmem>>, %arg6: memref<4x50x64xf32, #tpu.memory_space<vmem>>, %arg7: memref<1x64xf32, #tpu.memory_space<vmem>>, %arg8: memref<1x64xf32, #tpu.memory_space<vmem>>) attributes {dimension_semantics = [#tpu.dimension_semantics<arbitrary>], iteration_bounds = array<i64: 4>, scalar_prefetch = 0 : i64, scratch_operands = 3 : i64, tpu.core_type = #tpu.core_type<tc>, window_params = [{transform_indices = @transform_0, window_bounds = array<i64: 1, 50, 1600>}, {pipeline_mode = #tpu.pipeline_mode<synchronous>, transform_indices = @transform_1, window_bounds = array<i64: 1600, 64>}, {pipeline_mode = #tpu.pipeline_mode<synchronous>, transform_indices = @transform_2, window_bounds = array<i64: 1, 64>}, {pipeline_mode = #tpu.pipeline_mode<synchronous>, transform_indices = @transform_3, window_bounds = array<i64: 1, 64>}, {pipeline_mode = #tpu.pipeline_mode<synchronous>, transform_indices = @transform_4, window_bounds = array<i64: 50, 64>}]} {
    %c0 = arith.constant 0 : index
    %c0_0 = arith.constant 0 : index
    %c0_1 = arith.constant 0 : index
    %0 = vector.load %arg1[%c0, %c0_0, %c0_1] : memref<1x50x1600xbf16, #tpu.memory_space<vmem>>, vector<1x50x1600xbf16>
    %1 = vector.shape_cast %0 : vector<1x50x1600xbf16> to vector<50x1600xbf16>
    %c0_2 = arith.constant 0 : index
    %c0_3 = arith.constant 0 : index
    %2 = vector.load %arg2[%c0_2, %c0_3] : memref<1600x64xbf16, #tpu.memory_space<vmem>>, vector<1600x64xbf16>
    %cst = arith.constant dense<0.000000e+00> : vector<50x64xf32>
    %3 = tpu.matmul %1, %2, %cst {dimension_numbers = #tpu.dot_dimension_numbers<[1], [0], [0], [1], [0, 0, 1, 1], [], []>} : vector<50x1600xbf16>, vector<1600x64xbf16>, vector<50x64xf32> -> vector<50x64xf32>
    %4 = arith.index_cast %arg0 : i32 to index
    %c0_4 = arith.constant 0 : index
    %c0_5 = arith.constant 0 : index
    %5 = vector.load %arg6[%4, %c0_4, %c0_5] : memref<4x50x64xf32, #tpu.memory_space<vmem>>, vector<1x50x64xf32>
    %6 = vector.shape_cast %5 : vector<1x50x64xf32> to vector<50x64xf32>
    %7 = vector.shape_cast %3 : vector<50x64xf32> to vector<1x50x64xf32>
    tpu.vector_store %arg6[%4, %c0_4, %c0_5], %7 {strides = array<i32>} : memref<4x50x64xf32, #tpu.memory_space<vmem>>, vector<1x50x64xf32>,
    %c0_i32 = arith.constant 0 : i32
    %8 = arith.cmpi eq, %arg0, %c0_i32 : i32
    %9 = arith.extui %8 : i1 to i32
    %c0_i32_6 = arith.constant 0 : i32
    %10 = arith.cmpi ne, %9, %c0_i32_6 : i32
    scf.if %10 {
      %cst_18 = arith.constant 0.000000e+00 : f32
      %25 = vector.broadcast %cst_18 : f32 to vector<1x64xf32>
      %c0_19 = arith.constant 0 : index
      %c0_20 = arith.constant 0 : index
      %26 = vector.load %arg7[%c0_19, %c0_20] : memref<1x64xf32, #tpu.memory_space<vmem>>, vector<1x64xf32>
      tpu.vector_store %arg7[%c0_19, %c0_20], %25 {strides = array<i32>} : memref<1x64xf32, #tpu.memory_space<vmem>>, vector<1x64xf32>,
      %cst_21 = arith.constant 0.000000e+00 : f32
      %27 = vector.broadcast %cst_21 : f32 to vector<1x64xf32>
      %c0_22 = arith.constant 0 : index
      %c0_23 = arith.constant 0 : index
      %28 = vector.load %arg8[%c0_22, %c0_23] : memref<1x64xf32, #tpu.memory_space<vmem>>, vector<1x64xf32>
      tpu.vector_store %arg8[%c0_22, %c0_23], %27 {strides = array<i32>} : memref<1x64xf32, #tpu.memory_space<vmem>>, vector<1x64xf32>,
    } else {
    }
    %c0_7 = arith.constant 0 : index
    %c0_8 = arith.constant 0 : index
    %11 = vector.load %arg7[%c0_7, %c0_8] : memref<1x64xf32, #tpu.memory_space<vmem>>, vector<1x64xf32>
    %cst_9 = arith.constant dense<0.000000e+00> : vector<64xf32>
    %12 = vector.multi_reduction <add>, %3, %cst_9 [0] : vector<50x64xf32> to vector<64xf32>
    %13 = vector.shape_cast %12 : vector<64xf32> to vector<1x64xf32>
    %14 = arith.addf %11, %13 : vector<1x64xf32>
    %c0_10 = arith.constant 0 : index
    %c0_11 = arith.constant 0 : index
    %15 = vector.load %arg7[%c0_10, %c0_11] : memref<1x64xf32, #tpu.memory_space<vmem>>, vector<1x64xf32>
    tpu.vector_store %arg7[%c0_10, %c0_11], %14 {strides = array<i32>} : memref<1x64xf32, #tpu.memory_space<vmem>>, vector<1x64xf32>,
    %c0_12 = arith.constant 0 : index
    %c0_13 = arith.constant 0 : index
    %16 = vector.load %arg8[%c0_12, %c0_13] : memref<1x64xf32, #tpu.memory_space<vmem>>, vector<1x64xf32>
    %17 = arith.mulf %3, %3 : vector<50x64xf32>
    %cst_14 = arith.constant dense<0.000000e+00> : vector<64xf32>
    %18 = vector.multi_reduction <add>, %17, %cst_14 [0] : vector<50x64xf32> to vector<64xf32>
    %19 = vector.shape_cast %18 : vector<64xf32> to vector<1x64xf32>
    %20 = arith.addf %16, %19 : vector<1x64xf32>
    %c0_15 = arith.constant 0 : index
    %c0_16 = arith.constant 0 : index
    %21 = vector.load %arg8[%c0_15, %c0_16] : memref<1x64xf32, #tpu.memory_space<vmem>>, vector<1x64xf32>
    tpu.vector_store %arg8[%c0_15, %c0_16], %20 {strides = array<i32>} : memref<1x64xf32, #tpu.memory_space<vmem>>, vector<1x64xf32>,
    %c3_i32 = arith.constant 3 : i32
    %22 = arith.cmpi eq, %arg0, %c3_i32 : i32
    %23 = arith.extui %22 : i1 to i32
    %c0_i32_17 = arith.constant 0 : i32
    %24 = arith.cmpi ne, %23, %c0_i32_17 : i32
    scf.if %24 {
      %c0_18 = arith.constant 0 : index
      %c0_19 = arith.constant 0 : index
      %25 = vector.load %arg7[%c0_18, %c0_19] : memref<1x64xf32, #tpu.memory_space<vmem>>, vector<1x64xf32>
      %cst_20 = arith.constant 5.000000e-03 : f32
      %26 = vector.broadcast %cst_20 : f32 to vector<1x64xf32>
      %27 = arith.mulf %25, %26 : vector<1x64xf32>
      %c0_21 = arith.constant 0 : index
      %c0_22 = arith.constant 0 : index
      %28 = vector.load %arg8[%c0_21, %c0_22] : memref<1x64xf32, #tpu.memory_space<vmem>>, vector<1x64xf32>
      %cst_23 = arith.constant 5.000000e-03 : f32
      %29 = vector.broadcast %cst_23 : f32 to vector<1x64xf32>
      %30 = arith.mulf %28, %29 : vector<1x64xf32>
      %31 = arith.mulf %27, %27 : vector<1x64xf32>
      %32 = arith.subf %30, %31 : vector<1x64xf32>
      %c0_24 = arith.constant 0 : index
      %c0_25 = arith.constant 0 : index
      %33 = vector.load %arg3[%c0_24, %c0_25] : memref<1x64xf32, #tpu.memory_space<vmem>>, vector<1x64xf32>
      %cst_26 = arith.constant 9.99999974E-6 : f32
      %34 = vector.broadcast %cst_26 : f32 to vector<1x64xf32>
      %35 = arith.addf %32, %34 : vector<1x64xf32>
      %36 = math.rsqrt %35 : vector<1x64xf32>
      %37 = arith.mulf %33, %36 : vector<1x64xf32>
      %c0_27 = arith.constant 0 : index
      %c0_28 = arith.constant 0 : index
      %38 = vector.load %arg4[%c0_27, %c0_28] : memref<1x64xf32, #tpu.memory_space<vmem>>, vector<1x64xf32>
      %39 = arith.mulf %27, %37 : vector<1x64xf32>
      %40 = arith.subf %38, %39 : vector<1x64xf32>
      %c0_29 = arith.constant 0 : index
      %c0_30 = arith.constant 0 : index
      %c0_31 = arith.constant 0 : index
      %41 = vector.load %arg6[%c0_29, %c0_30, %c0_31] : memref<4x50x64xf32, #tpu.memory_space<vmem>>, vector<1x50x64xf32>
      %42 = vector.shape_cast %41 : vector<1x50x64xf32> to vector<50x64xf32>
      %43 = vector.broadcast %37 : vector<1x64xf32> to vector<50x64xf32>
      %44 = arith.mulf %42, %43 : vector<50x64xf32>
      %45 = vector.broadcast %40 : vector<1x64xf32> to vector<50x64xf32>
      %46 = arith.addf %44, %45 : vector<50x64xf32>
      %cst_32 = arith.constant 0.000000e+00 : f32
      %47 = vector.broadcast %cst_32 : f32 to vector<50x64xf32>
      %48 = arith.maximumf %46, %47 : vector<50x64xf32>
      %c1 = arith.constant 1 : index
      %c0_33 = arith.constant 0 : index
      %c0_34 = arith.constant 0 : index
      %49 = vector.load %arg6[%c1, %c0_33, %c0_34] : memref<4x50x64xf32, #tpu.memory_space<vmem>>, vector<1x50x64xf32>
      %50 = vector.shape_cast %49 : vector<1x50x64xf32> to vector<50x64xf32>
      %51 = vector.broadcast %37 : vector<1x64xf32> to vector<50x64xf32>
      %52 = arith.mulf %50, %51 : vector<50x64xf32>
      %53 = vector.broadcast %40 : vector<1x64xf32> to vector<50x64xf32>
      %54 = arith.addf %52, %53 : vector<50x64xf32>
      %cst_35 = arith.constant 0.000000e+00 : f32
      %55 = vector.broadcast %cst_35 : f32 to vector<50x64xf32>
      %56 = arith.maximumf %54, %55 : vector<50x64xf32>
      %57 = arith.maximumf %48, %56 : vector<50x64xf32>
      %c2 = arith.constant 2 : index
      %c0_36 = arith.constant 0 : index
      %c0_37 = arith.constant 0 : index
      %58 = vector.load %arg6[%c2, %c0_36, %c0_37] : memref<4x50x64xf32, #tpu.memory_space<vmem>>, vector<1x50x64xf32>
      %59 = vector.shape_cast %58 : vector<1x50x64xf32> to vector<50x64xf32>
      %60 = vector.broadcast %37 : vector<1x64xf32> to vector<50x64xf32>
      %61 = arith.mulf %59, %60 : vector<50x64xf32>
      %62 = vector.broadcast %40 : vector<1x64xf32> to vector<50x64xf32>
      %63 = arith.addf %61, %62 : vector<50x64xf32>
      %cst_38 = arith.constant 0.000000e+00 : f32
      %64 = vector.broadcast %cst_38 : f32 to vector<50x64xf32>
      %65 = arith.maximumf %63, %64 : vector<50x64xf32>
      %66 = arith.maximumf %57, %65 : vector<50x64xf32>
      %c3 = arith.constant 3 : index
      %c0_39 = arith.constant 0 : index
      %c0_40 = arith.constant 0 : index
      %67 = vector.load %arg6[%c3, %c0_39, %c0_40] : memref<4x50x64xf32, #tpu.memory_space<vmem>>, vector<1x50x64xf32>
      %68 = vector.shape_cast %67 : vector<1x50x64xf32> to vector<50x64xf32>
      %69 = vector.broadcast %37 : vector<1x64xf32> to vector<50x64xf32>
      %70 = arith.mulf %68, %69 : vector<50x64xf32>
      %71 = vector.broadcast %40 : vector<1x64xf32> to vector<50x64xf32>
      %72 = arith.addf %70, %71 : vector<50x64xf32>
      %cst_41 = arith.constant 0.000000e+00 : f32
      %73 = vector.broadcast %cst_41 : f32 to vector<50x64xf32>
      %74 = arith.maximumf %72, %73 : vector<50x64xf32>
      %75 = arith.maximumf %66, %74 : vector<50x64xf32>
      %c0_42 = arith.constant 0 : index
      %c0_43 = arith.constant 0 : index
      %76 = vector.load %arg5[%c0_42, %c0_43] : memref<50x64xf32, #tpu.memory_space<vmem>>, vector<50x64xf32>
      tpu.vector_store %arg5[%c0_42, %c0_43], %75 {strides = array<i32>} : memref<50x64xf32, #tpu.memory_space<vmem>>, vector<50x64xf32>,
    } else {
    }
    return
  }
  func.func @transform_0(%arg0: i32) -> (i32, i32, i32) {
    %c0_i32 = arith.constant 0 : i32
    %c0_i32_0 = arith.constant 0 : i32
    %c0_i32_1 = arith.constant 0 : i32
    return %arg0, %c0_i32, %c0_i32_0 : i32, i32, i32
  }
  func.func @transform_1(%arg0: i32) -> (i32, i32) {
    %c0_i32 = arith.constant 0 : i32
    %c0_i32_0 = arith.constant 0 : i32
    %c0_i32_1 = arith.constant 0 : i32
    return %c0_i32, %c0_i32_0 : i32, i32
  }
  func.func @transform_2(%arg0: i32) -> (i32, i32) {
    %c0_i32 = arith.constant 0 : i32
    %c0_i32_0 = arith.constant 0 : i32
    %c0_i32_1 = arith.constant 0 : i32
    return %c0_i32, %c0_i32_0 : i32, i32
  }
  func.func @transform_3(%arg0: i32) -> (i32, i32) {
    %c0_i32 = arith.constant 0 : i32
    %c0_i32_0 = arith.constant 0 : i32
    %c0_i32_1 = arith.constant 0 : i32
    return %c0_i32, %c0_i32_0 : i32, i32
  }
  func.func @transform_4(%arg0: i32) -> (i32, i32) {
    %c0_i32 = arith.constant 0 : i32
    %c0_i32_0 = arith.constant 0 : i32
    %c0_i32_1 = arith.constant 0 : i32
    return %c0_i32, %c0_i32_0 : i32, i32
  }
}

module attributes {stable_mosaic.version = 11 : i64} {
  func.func @_mlp_kernel(%arg0: i32, %arg1: memref<2x1600xbf16, #tpu.memory_space<vmem>>, %arg2: memref<1600x384xbf16, #tpu.memory_space<vmem>>, %arg3: memref<1x384xf32, #tpu.memory_space<vmem>>, %arg4: memref<384x192xbf16, #tpu.memory_space<vmem>>, %arg5: memref<1x192xf32, #tpu.memory_space<vmem>>, %arg6: memref<192x10xbf16, #tpu.memory_space<vmem>>, %arg7: memref<1x10xf32, #tpu.memory_space<vmem>>, %arg8: memref<2x10xf32, #tpu.memory_space<vmem>>) attributes {dimension_semantics = [#tpu.dimension_semantics<arbitrary>], iteration_bounds = array<i64: 1>, scalar_prefetch = 0 : i64, scratch_operands = 0 : i64, tpu.core_type = #tpu.core_type<tc>, window_params = [{pipeline_mode = #tpu.pipeline_mode<synchronous>, transform_indices = @transform_0, window_bounds = array<i64: 2, 1600>}, {pipeline_mode = #tpu.pipeline_mode<synchronous>, transform_indices = @transform_1, window_bounds = array<i64: 1600, 384>}, {pipeline_mode = #tpu.pipeline_mode<synchronous>, transform_indices = @transform_2, window_bounds = array<i64: 1, 384>}, {pipeline_mode = #tpu.pipeline_mode<synchronous>, transform_indices = @transform_3, window_bounds = array<i64: 384, 192>}, {pipeline_mode = #tpu.pipeline_mode<synchronous>, transform_indices = @transform_4, window_bounds = array<i64: 1, 192>}, {pipeline_mode = #tpu.pipeline_mode<synchronous>, transform_indices = @transform_5, window_bounds = array<i64: 192, 10>}, {pipeline_mode = #tpu.pipeline_mode<synchronous>, transform_indices = @transform_6, window_bounds = array<i64: 1, 10>}, {pipeline_mode = #tpu.pipeline_mode<synchronous>, transform_indices = @transform_7, window_bounds = array<i64: 2, 10>}]} {
    %c0 = arith.constant 0 : index
    %c0_0 = arith.constant 0 : index
    %0 = vector.load %arg1[%c0, %c0_0] : memref<2x1600xbf16, #tpu.memory_space<vmem>>, vector<2x1600xbf16>
    %c0_1 = arith.constant 0 : index
    %c0_2 = arith.constant 0 : index
    %1 = vector.load %arg2[%c0_1, %c0_2] : memref<1600x384xbf16, #tpu.memory_space<vmem>>, vector<1600x384xbf16>
    %cst = arith.constant dense<0.000000e+00> : vector<2x384xf32>
    %2 = tpu.matmul %0, %1, %cst {dimension_numbers = #tpu.dot_dimension_numbers<[1], [0], [0], [1], [0, 0, 1, 1], [], []>} : vector<2x1600xbf16>, vector<1600x384xbf16>, vector<2x384xf32> -> vector<2x384xf32>
    %c0_3 = arith.constant 0 : index
    %c0_4 = arith.constant 0 : index
    %3 = vector.load %arg3[%c0_3, %c0_4] : memref<1x384xf32, #tpu.memory_space<vmem>>, vector<1x384xf32>
    %4 = vector.broadcast %3 : vector<1x384xf32> to vector<2x384xf32>
    %5 = arith.addf %2, %4 : vector<2x384xf32>
    %cst_5 = arith.constant 0.000000e+00 : f32
    %6 = vector.broadcast %cst_5 : f32 to vector<2x384xf32>
    %7 = arith.maximumf %5, %6 : vector<2x384xf32>
    %8 = arith.truncf %7 : vector<2x384xf32> to vector<2x384xbf16>
    %c0_6 = arith.constant 0 : index
    %c0_7 = arith.constant 0 : index
    %9 = vector.load %arg4[%c0_6, %c0_7] : memref<384x192xbf16, #tpu.memory_space<vmem>>, vector<384x192xbf16>
    %cst_8 = arith.constant dense<0.000000e+00> : vector<2x192xf32>
    %10 = tpu.matmul %8, %9, %cst_8 {dimension_numbers = #tpu.dot_dimension_numbers<[1], [0], [0], [1], [0, 0, 1, 1], [], []>} : vector<2x384xbf16>, vector<384x192xbf16>, vector<2x192xf32> -> vector<2x192xf32>
    %c0_9 = arith.constant 0 : index
    %c0_10 = arith.constant 0 : index
    %11 = vector.load %arg5[%c0_9, %c0_10] : memref<1x192xf32, #tpu.memory_space<vmem>>, vector<1x192xf32>
    %12 = vector.broadcast %11 : vector<1x192xf32> to vector<2x192xf32>
    %13 = arith.addf %10, %12 : vector<2x192xf32>
    %cst_11 = arith.constant 0.000000e+00 : f32
    %14 = vector.broadcast %cst_11 : f32 to vector<2x192xf32>
    %15 = arith.maximumf %13, %14 : vector<2x192xf32>
    %16 = arith.truncf %15 : vector<2x192xf32> to vector<2x192xbf16>
    %c0_12 = arith.constant 0 : index
    %c0_13 = arith.constant 0 : index
    %17 = vector.load %arg6[%c0_12, %c0_13] : memref<192x10xbf16, #tpu.memory_space<vmem>>, vector<192x10xbf16>
    %cst_14 = arith.constant dense<0.000000e+00> : vector<2x10xf32>
    %18 = tpu.matmul %16, %17, %cst_14 {dimension_numbers = #tpu.dot_dimension_numbers<[1], [0], [0], [1], [0, 0, 1, 1], [], []>} : vector<2x192xbf16>, vector<192x10xbf16>, vector<2x10xf32> -> vector<2x10xf32>
    %c0_15 = arith.constant 0 : index
    %c0_16 = arith.constant 0 : index
    %19 = vector.load %arg7[%c0_15, %c0_16] : memref<1x10xf32, #tpu.memory_space<vmem>>, vector<1x10xf32>
    %20 = vector.broadcast %19 : vector<1x10xf32> to vector<2x10xf32>
    %21 = arith.addf %18, %20 : vector<2x10xf32>
    %c0_17 = arith.constant 0 : index
    %c0_18 = arith.constant 0 : index
    %22 = vector.load %arg8[%c0_17, %c0_18] : memref<2x10xf32, #tpu.memory_space<vmem>>, vector<2x10xf32>
    tpu.vector_store %arg8[%c0_17, %c0_18], %21 {strides = array<i32>} : memref<2x10xf32, #tpu.memory_space<vmem>>, vector<2x10xf32>,
    return
  }
  func.func @transform_0(%arg0: i32) -> (i32, i32) {
    %c0_i32 = arith.constant 0 : i32
    %c0_i32_0 = arith.constant 0 : i32
    %c0_i32_1 = arith.constant 0 : i32
    return %c0_i32, %c0_i32_0 : i32, i32
  }
  func.func @transform_1(%arg0: i32) -> (i32, i32) {
    %c0_i32 = arith.constant 0 : i32
    %c0_i32_0 = arith.constant 0 : i32
    %c0_i32_1 = arith.constant 0 : i32
    return %c0_i32, %c0_i32_0 : i32, i32
  }
  func.func @transform_2(%arg0: i32) -> (i32, i32) {
    %c0_i32 = arith.constant 0 : i32
    %c0_i32_0 = arith.constant 0 : i32
    %c0_i32_1 = arith.constant 0 : i32
    return %c0_i32, %c0_i32_0 : i32, i32
  }
  func.func @transform_3(%arg0: i32) -> (i32, i32) {
    %c0_i32 = arith.constant 0 : i32
    %c0_i32_0 = arith.constant 0 : i32
    %c0_i32_1 = arith.constant 0 : i32
    return %c0_i32, %c0_i32_0 : i32, i32
  }
  func.func @transform_4(%arg0: i32) -> (i32, i32) {
    %c0_i32 = arith.constant 0 : i32
    %c0_i32_0 = arith.constant 0 : i32
    %c0_i32_1 = arith.constant 0 : i32
    return %c0_i32, %c0_i32_0 : i32, i32
  }
  func.func @transform_5(%arg0: i32) -> (i32, i32) {
    %c0_i32 = arith.constant 0 : i32
    %c0_i32_0 = arith.constant 0 : i32
    %c0_i32_1 = arith.constant 0 : i32
    return %c0_i32, %c0_i32_0 : i32, i32
  }
  func.func @transform_6(%arg0: i32) -> (i32, i32) {
    %c0_i32 = arith.constant 0 : i32
    %c0_i32_0 = arith.constant 0 : i32
    %c0_i32_1 = arith.constant 0 : i32
    return %c0_i32, %c0_i32_0 : i32, i32
  }
  func.func @transform_7(%arg0: i32) -> (i32, i32) {
    %c0_i32 = arith.constant 0 : i32
    %c0_i32_0 = arith.constant 0 : i32
    %c0_i32_1 = arith.constant 0 : i32
    return %c0_i32, %c0_i32_0 : i32, i32
  }
}

</mosaic_0001>

<bundles_post_ra>
// kernel: cnn_forward.3
= control target key start
LH: loop header
LB: loop body
LE: loop exit
PB: predicated region body
PF: predicated region fallthrough
CT: control target
= control target key end

     0   :  { %s2182_s15 = smov 0   ;;  %s3344_s0 = inlined_call_operand.vmem [shape: bf16[4,392,128], index: 0, kind: input, shape index: {}]   ;;  %s3345_s1 = inlined_call_operand.vmem [shape: bf16[128,64], index: 1, kind: input, shape index: {}]   ;;  %s3346_s2 = inlined_call_operand.vmem [shape: f32[1,64], index: 2, kind: input, shape index: {}]   ;;  %s3347_s3 = inlined_call_operand.vmem [shape: f32[1,64], index: 3, kind: input, shape index: {}]   ;;  %s3348_s4 = inlined_call_operand.vmem [shape: f32[392,64], index: 4, kind: output, shape index: {}]  }
   0x1 LB: > { %s2188_s16 = sadd.s32 4294967295, %s2154_s15   ;;  %p1946_p0 = scmp.ge.s32.totalorder %s2154_s15, 1  ;;  %s2154_s15 = sphi %s2182_s15, %s14_s15  }
   0x2   : > { %p157_p1 = scmp.lt.s32.totalorder %s2154_s15, 5 }
   0x4   : > { %p158_p2 = pnand %p1946_p0, %p157_p1 }
   0x5   : > { %p178_p3 = scmp.lt.s32.totalorder (!%p158_p2), %s2188_s16, 3  ;;  %s577_s12 = smul.u32 (!%p158_p2), 392, %s2188_s16 }
   0x6   : > { %161 = sbr.rel (%p158_p2) target bundleno = 629 (0x275), region = 36  ;;  %p2076_p4 = scmp.ne.s32.totalorder (!%p158_p2), %s2188_s16, 0 }
   0x7   : > { %s2253_s13 = scalar_lea.vmem (!%p158_p2), [#allocation2], %s577_s12 }
   0xb   : > { %v2111_v0 = vld [vmem:[%s3345_s1 + $0x38] sm:$0xff]  ;;  %v2110_v1 = vld [vmem:[%s3345_s1 + $0x30] sm:$0xff]  ;;  %v2109_v2 = vld [vmem:[%s3345_s1 + $0x28] sm:$0xff]  ;;  %s179_s29 = scalar_select %p178_p3, %s2188_s16, 3  ;;  %vm579_vm0 = vcmask 523264  }
   0xc   : > { %2113 = vmatpush.bf16.msra.mxu2 %v2111_v0  ;;  %2114 = vmatpush.bf16.msra.mxu3 %v2111_v0  ;;  %v2108_v3 = vld [vmem:[%s3345_s1 + $0x20] sm:$0xff]  ;;  %v2107_v4 = vld [vmem:[%s3345_s1 + $0x18] sm:$0xff]  ;;  %v2106_v5 = vld [vmem:[%s3345_s1 + $0x10] sm:$0xff] }
   0xd   : > { %444 = vmatpush.bf16.msra.mxu0 %v2111_v0  ;;  %2112 = vmatpush.bf16.msra.mxu1 %v2111_v0  ;;  %v2105_v6 = vld [vmem:[%s3345_s1 + $0x8] sm:$0xff]  ;;  %s2136_s6 = smul.u32 196, %s179_s29  ;;  %v2104_v7 = vld [vmem:[%s3345_s1] sm:$0xff] }
   0xf   : > { %s2221_s11 = scalar_lea.vmem %s3344_s0, %s2136_s6 }
  0x10   : > { %2116 = vmatpush.bf16.msra.mxu2 %v2110_v1  ;;  %2117 = vmatpush.bf16.msra.mxu3 %v2110_v1  ;;  %v2092_v8 = vld [vmem:[%s2221_s11 + $0x60] sm:$0xff]  ;;  %v2099_v9 = vld [vmem:[%s2221_s11 + $0x98] sm:$0xff]  ;;  %v2086_v11 = vld [vmem:[%s2221_s11 + $0x30] sm:$0xff] }
  0x11   : > { %445 = vmatpush.bf16.msra.mxu0 %v2110_v1  ;;  %2115 = vmatpush.bf16.msra.mxu1 %v2110_v1  ;;  %v2080_v10 = vld [vmem:[%s2221_s11] sm:$0xff]  ;;  %v2093_v12 = vld [vmem:[%s2221_s11 + $0x68] sm:$0xff]  ;;  %v2087_v15 = vld [vmem:[%s2221_s11 + $0x38] sm:$0xff] }
  0x12   : > { %v2100_v13 = vld [vmem:[%s2221_s11 + $0xa0] sm:$0xff]  ;;  %v2081_v14 = vld [vmem:[%s2221_s11 + $0x8] sm:$0xff]  ;;  %v2094_v16 = vld [vmem:[%s2221_s11 + $0x70] sm:$0xff] }
  0x13   : > { %v2101_v17 = vld [vmem:[%s2221_s11 + $0xa8] sm:$0xff]  ;;  %v2082_v18 = vld [vmem:[%s2221_s11 + $0x10] sm:$0xff]  ;;  %v2088_v19 = vld [vmem:[%s2221_s11 + $0x40] sm:$0xff] }
  0x14   : > { %2119 = vmatpush.bf16.msra.mxu2 %v2109_v2  ;;  %2120 = vmatpush.bf16.msra.mxu3 %v2109_v2  ;;  %v2095_v20 = vld [vmem:[%s2221_s11 + $0x78] sm:$0xff]  ;;  %v2102_v21 = vld [vmem:[%s2221_s11 + $0xb0] sm:$0xff]  ;;  %v2089_v23 = vld [vmem:[%s2221_s11 + $0x48] sm:$0xff] }
  0x15   : > { %446 = vmatpush.bf16.msra.mxu0 %v2109_v2  ;;  %2118 = vmatpush.bf16.msra.mxu1 %v2109_v2  ;;  %v2083_v22 = vld [vmem:[%s2221_s11 + $0x18] sm:$0xff]  ;;  %v2096_v24 = vld [vmem:[%s2221_s11 + $0x80] sm:$0xff]  ;;  %v2090_v27 = vld [vmem:[%s2221_s11 + $0x50] sm:$0xff] }
  0x16   : > { %v2103_v25 = vld [vmem:[%s2221_s11 + $0xb8] sm:$0xff]  ;;  %v2084_v26 = vld [vmem:[%s2221_s11 + $0x20] sm:$0xff]  ;;  %v2097_v30 = vld [vmem:[%s2221_s11 + $0x88] sm:$0xff] }
  0x17   : > { %v231_v28 = vld [vmem:[%s2221_s11 + $0xc0] sm:$0xf]  ;;  %v2085_v32 = vld [vmem:[%s2221_s11 + $0x28] sm:$0xff]  ;;  %v2091_v33 = vld [vmem:[%s2221_s11 + $0x58] sm:$0xff] }
  0x18   : > { %2122 = vmatpush.bf16.msra.mxu2 %v2108_v3  ;;  %2123 = vmatpush.bf16.msra.mxu3 %v2108_v3  ;;  %v345_v29 = vunpack.c.l.b16 %v231_v28  ;;  %v2098_v34 = vld [vmem:[%s2221_s11 + $0x90] sm:$0xff] }
  0x19   : > { %447 = vmatpush.bf16.msra.mxu0 %v2108_v3  ;;  %2121 = vmatpush.bf16.msra.mxu1 %v2108_v3 }
  0x1a   : > { %v370_v31 = vpack.c.b16 %v345_v29, %v345_v29 }
  0x1c   : > { %2125 = vmatpush.bf16.msra.mxu2 %v2107_v4  ;;  %2126 = vmatpush.bf16.msra.mxu3 %v2107_v4 }
  0x1d   : > { %448 = vmatpush.bf16.msra.mxu0 %v2107_v4  ;;  %2124 = vmatpush.bf16.msra.mxu1 %v2107_v4 }
  0x20   : > { %2128 = vmatpush.bf16.msra.mxu2 %v2106_v5  ;;  %2129 = vmatpush.bf16.msra.mxu3 %v2106_v5 }
  0x21   : > { %449 = vmatpush.bf16.msra.mxu0 %v2106_v5  ;;  %2127 = vmatpush.bf16.msra.mxu1 %v2106_v5 }
  0x24   : > { %2131 = vmatpush.bf16.msra.mxu2 %v2105_v6  ;;  %2132 = vmatpush.bf16.msra.mxu3 %v2105_v6 }
  0x25   : > { %450 = vmatpush.bf16.msra.mxu0 %v2105_v6  ;;  %2130 = vmatpush.bf16.msra.mxu1 %v2105_v6 }
  0x28   : > { %2134 = vmatpush.bf16.msra.mxu2 %v2104_v7  ;;  %2135 = vmatpush.bf16.msra.mxu3 %v2104_v7 }
  0x29   : > { %451 = vmatpush.bf16.msra.mxu0 %v2104_v7  ;;  %2133 = vmatpush.bf16.msra.mxu1 %v2104_v7 }
  0x2b   : > { %512 = vmatmul.bf16.vlgmr.msra.gmra.mxu2 %v2092_v8  ;;  %547 = vmatmul.bf16.vlgmr.msra.gmra.mxu3 %v2099_v9 }
  0x2c   : > { %452 = vmatmul.bf16.vlgmr.msra.gmra.mxu0 %v2080_v10  ;;  %482 = vmatmul.bf16.vlgmr.msra.gmra.mxu1 %v2086_v11 }
  0x3b   : > { %517 = vmatmul.bf16.gmra.mxu2 %v2093_v12  ;;  %552 = vmatmul.bf16.gmra.mxu3 %v2100_v13 }
  0x3c   : > { %457 = vmatmul.bf16.gmra.mxu0 %v2081_v14  ;;  %487 = vmatmul.bf16.gmra.mxu1 %v2087_v15 }
  0x4b   : > { %522 = vmatmul.bf16.gmra.mxu2 %v2094_v16  ;;  %557 = vmatmul.bf16.gmra.mxu3 %v2101_v17 }
  0x4c   : > { %462 = vmatmul.bf16.gmra.mxu0 %v2082_v18  ;;  %492 = vmatmul.bf16.gmra.mxu1 %v2088_v19 }
  0x5b   : > { %527 = vmatmul.bf16.gmra.mxu2 %v2095_v20  ;;  %562 = vmatmul.bf16.gmra.mxu3 %v2102_v21 }
  0x5c   : > { %467 = vmatmul.bf16.gmra.mxu0 %v2083_v22  ;;  %497 = vmatmul.bf16.gmra.mxu1 %v2089_v23 }
  0x6b   : > { %532 = vmatmul.bf16.gmra.mxu2 %v2096_v24  ;;  %567 = vmatmul.bf16.gmra.mxu3 %v2103_v25 }
  0x6c   : > { %472 = vmatmul.bf16.gmra.mxu0 %v2084_v26  ;;  %502 = vmatmul.bf16.gmra.mxu1 %v2090_v27 }
  0x7b   : > { %537 = vmatmul.bf16.gmra.mxu2 %v2097_v30  ;;  %572 = vmatmul.bf16.gmra.mxu3 %v370_v31 }
  0x7c   : > { %477 = vmatmul.bf16.gmra.mxu0 %v2085_v32  ;;  %507 = vmatmul.bf16.gmra.mxu1 %v2091_v33 }
  0x8b   : > { %542 = vmatmul.bf16.gmra.mxu2 %v2098_v34 }
  0xa9   : > { %v2249_v35 = vpop.f32.mrf.mxu0  ;;  %v2251_v36 = vpop.f32.mrf.mxu1 }
  0xaa   : > { %580 = vst.msk [vmem:[%s2253_s13] sm:$0xff] %vm579_vm0, %v2249_v35 }
  0xab   : > { %592 = vst.msk [vmem:[%s2253_s13 + $0x60] sm:$0xff] %vm579_vm0, %v2251_v36 }
  0xae   : > { %v2261_v37 = vpop.f32.mrf.mxu2  ;;  %v2263_v38 = vpop.f32.mrf.mxu3 }
  0xaf   : > { %604 = vst.msk [vmem:[%s2253_s13 + $0xc0] sm:$0xff] %vm579_vm0, %v2261_v37 }
  0xb0   : > { %618 = vst.msk [vmem:[%s2253_s13 + $0x130] sm:$0xff] %vm579_vm0, %v2263_v38 }
  0xb1   : > { %v2271_v39 = vpop.f32.mrf.mxu0  ;;  %v2273_v40 = vpop.f32.mrf.mxu1 }
  0xb2   : > { %581 = vst.msk [vmem:[%s2253_s13 + $0x8] sm:$0xff] %vm579_vm0, %v2271_v39 }
  0xb3   : > { %593 = vst.msk [vmem:[%s2253_s13 + $0x68] sm:$0xff] %vm579_vm0, %v2273_v40 }
  0xb6   : > { %v2281_v41 = vpop.f32.mrf.mxu2  ;;  %v2283_v42 = vpop.f32.mrf.mxu3 }
  0xb7   : > { %605 = vst.msk [vmem:[%s2253_s13 + $0xc8] sm:$0xff] %vm579_vm0, %v2281_v41 }
  0xb8   : > { %619 = vst.msk [vmem:[%s2253_s13 + $0x138] sm:$0xff] %vm579_vm0, %v2283_v42 }
  0xb9   : > { %v2291_v43 = vpop.f32.mrf.mxu0  ;;  %v2293_v44 = vpop.f32.mrf.mxu1 }
  0xba   : > { %582 = vst.msk [vmem:[%s2253_s13 + $0x10] sm:$0xff] %vm579_vm0, %v2291_v43 }
  0xbb   : > { %594 = vst.msk [vmem:[%s2253_s13 + $0x70] sm:$0xff] %vm579_vm0, %v2293_v44 }
  0xbe   : > { %v2301_v45 = vpop.f32.mrf.mxu2  ;;  %v2303_v46 = vpop.f32.mrf.mxu3 }
  0xbf   : > { %606 = vst.msk [vmem:[%s2253_s13 + $0xd0] sm:$0xff] %vm579_vm0, %v2301_v45 }
  0xc0   : > { %620 = vst.msk [vmem:[%s2253_s13 + $0x140] sm:$0xff] %vm579_vm0, %v2303_v46 }
  0xc1   : > { %v2311_v47 = vpop.f32.mrf.mxu0  ;;  %v2313_v48 = vpop.f32.mrf.mxu1 }
  0xc2   : > { %583 = vst.msk [vmem:[%s2253_s13 + $0x18] sm:$0xff] %vm579_vm0, %v2311_v47 }
  0xc3   : > { %595 = vst.msk [vmem:[%s2253_s13 + $0x78] sm:$0xff] %vm579_vm0, %v2313_v48 }
  0xc6   : > { %v2321_v49 = vpop.f32.mrf.mxu2  ;;  %v2323_v50 = vpop.f32.mrf.mxu3 }
  0xc7   : > { %607 = vst.msk [vmem:[%s2253_s13 + $0xd8] sm:$0xff] %vm579_vm0, %v2321_v49 }
  0xc8   : > { %621 = vst.msk [vmem:[%s2253_s13 + $0x148] sm:$0xff] %vm579_vm0, %v2323_v50 }
  0xc9   : > { %v2331_v51 = vpop.f32.mrf.mxu0  ;;  %v2333_v52 = vpop.f32.mrf.mxu1 }
  0xca   : > { %584 = vst.msk [vmem:[%s2253_s13 + $0x20] sm:$0xff] %vm579_vm0, %v2331_v51 }
  0xcb   : > { %596 = vst.msk [vmem:[%s2253_s13 + $0x80] sm:$0xff] %vm579_vm0, %v2333_v52 }
  0xce   : > { %v2341_v53 = vpop.f32.mrf.mxu2  ;;  %v2343_v54 = vpop.f32.mrf.mxu3 }
  0xcf   : > { %608 = vst.msk [vmem:[%s2253_s13 + $0xe0] sm:$0xff] %vm579_vm0, %v2341_v53 }
  0xd0   : > { %622 = vst.msk [vmem:[%s2253_s13 + $0x150] sm:$0xff] %vm579_vm0, %v2343_v54 }
  0xd1   : > { %v2351_v55 = vpop.f32.mrf.mxu0  ;;  %v2353_v56 = vpop.f32.mrf.mxu1 }
  0xd2   : > { %585 = vst.msk [vmem:[%s2253_s13 + $0x28] sm:$0xff] %vm579_vm0, %v2351_v55 }
  0xd3   : > { %597 = vst.msk [vmem:[%s2253_s13 + $0x88] sm:$0xff] %vm579_vm0, %v2353_v56 }
  0xd6   : > { %v2361_v57 = vpop.f32.mrf.mxu2  ;;  %v2363_v58 = vpop.f32.mrf.mxu3 }
  0xd7   : > { %609 = vst.msk [vmem:[%s2253_s13 + $0xe8] sm:$0xff] %vm579_vm0, %v2361_v57 }
  0xd8   : > { %623 = vst.msk [vmem:[%s2253_s13 + $0x158] sm:$0xff] %vm579_vm0, %v2363_v58 }
  0xd9   : > { %v2371_v59 = vpop.f32.mrf.mxu0  ;;  %v2373_v60 = vpop.f32.mrf.mxu1 }
  0xda   : > { %586 = vst.msk [vmem:[%s2253_s13 + $0x30] sm:$0xff] %vm579_vm0, %v2371_v59 }
  0xdb   : > { %598 = vst.msk [vmem:[%s2253_s13 + $0x90] sm:$0xff] %vm579_vm0, %v2373_v60 }
  0xde   : > { %v2381_v61 = vpop.f32.mrf.mxu2  ;;  %v2383_v62 = vpop.f32.mrf.mxu3 }
  0xdf   : > { %610 = vst.msk [vmem:[%s2253_s13 + $0xf0] sm:$0xff] %vm579_vm0, %v2381_v61 }
  0xe0   : > { %624 = vst.msk [vmem:[%s2253_s13 + $0x160] sm:$0xff] %vm579_vm0, %v2383_v62 }
  0xe1   : > { %v2391_v63 = vpop.f32.mrf.mxu0  ;;  %v2393_v0 = vpop.f32.mrf.mxu1 }
  0xe2   : > { %587 = vst.msk [vmem:[%s2253_s13 + $0x38] sm:$0xff] %vm579_vm0, %v2391_v63 }
  0xe3   : > { %599 = vst.msk [vmem:[%s2253_s13 + $0x98] sm:$0xff] %vm579_vm0, %v2393_v0 }
  0xe6   : > { %v2401_v1 = vpop.f32.mrf.mxu2  ;;  %v2403_v2 = vpop.f32.mrf.mxu3 }
  0xe7   : > { %611 = vst.msk [vmem:[%s2253_s13 + $0xf8] sm:$0xff] %vm579_vm0, %v2401_v1 }
  0xe8   : > { %625 = vst.msk [vmem:[%s2253_s13 + $0x168] sm:$0xff] %vm579_vm0, %v2403_v2 }
  0xe9   : > { %v2411_v3 = vpop.f32.mrf.mxu0  ;;  %v2413_v4 = vpop.f32.mrf.mxu1 }
  0xea   : > { %588 = vst.msk [vmem:[%s2253_s13 + $0x40] sm:$0xff] %vm579_vm0, %v2411_v3 }
  0xeb   : > { %600 = vst.msk [vmem:[%s2253_s13 + $0xa0] sm:$0xff] %vm579_vm0, %v2413_v4 }
  0xee   : > { %v2421_v5 = vpop.f32.mrf.mxu2  ;;  %v2423_v6 = vpop.f32.mrf.mxu3 }
  0xef   : > { %612 = vst.msk [vmem:[%s2253_s13 + $0x100] sm:$0xff] %vm579_vm0, %v2421_v5 }
  0xf0   : > { %626 = vst.msk [vmem:[%s2253_s13 + $0x170] sm:$0xff] %vm579_vm0, %v2423_v6 }
  0xf1   : > { %v2431_v7 = vpop.f32.mrf.mxu0  ;;  %v2433_v8 = vpop.f32.mrf.mxu1 }
  0xf2   : > { %589 = vst.msk [vmem:[%s2253_s13 + $0x48] sm:$0xff] %vm579_vm0, %v2431_v7 }
  0xf3   : > { %601 = vst.msk [vmem:[%s2253_s13 + $0xa8] sm:$0xff] %vm579_vm0, %v2433_v8 }
  0xf6   : > { %v2441_v9 = vpop.f32.mrf.mxu2  ;;  %v2443_v10 = vpop.f32.mrf.mxu3 }
  0xf7   : > { %613 = vst.msk [vmem:[%s2253_s13 + $0x108] sm:$0xff] %vm579_vm0, %v2441_v9 }
  0xf8   : > { %627 = vst.msk [vmem:[%s2253_s13 + $0x178] sm:$0xff] %vm579_vm0, %v2443_v10 }
  0xf9   : > { %v2451_v11 = vpop.f32.mrf.mxu0  ;;  %v2453_v12 = vpop.f32.mrf.mxu1 }
  0xfa   : > { %590 = vst.msk [vmem:[%s2253_s13 + $0x50] sm:$0xff] %vm579_vm0, %v2451_v11 }
  0xfb   : > { %602 = vst.msk [vmem:[%s2253_s13 + $0xb0] sm:$0xff] %vm579_vm0, %v2453_v12 }
  0xfe   : > { %v2461_v13 = vpop.f32.mrf.mxu2  ;;  %v2463_v14 = vpop.f32.mrf.mxu3 }
  0xff   : > { %614 = vst.msk [vmem:[%s2253_s13 + $0x110] sm:$0xff] %vm579_vm0, %v2461_v13 }
 0x100   : > { %628 = vst.msk [vmem:[%s2253_s13 + $0x180] sm:$0xff] %vm579_vm0, %v2463_v14 }
 0x101   : > { %v2471_v15 = vpop.f32.mrf.mxu0  ;;  %v2473_v16 = vpop.f32.mrf.mxu1 }
 0x102   : > { %591 = vst.msk [vmem:[%s2253_s13 + $0x58] sm:$0xff] %vm579_vm0, %v2471_v15 }
 0x103   : > { %603 = vst.msk [vmem:[%s2253_s13 + $0xb8] sm:$0xff] %vm579_vm0, %v2473_v16 }
 0x106   : > { %v2481_v17 = vpop.f32.mrf.mxu2  ;;  %v575_v18 = vpop.f32.mrf.mxu3 }
 0x107   : > { %615 = vst.msk [vmem:[%s2253_s13 + $0x118] sm:$0xff] %vm579_vm0, %v2481_v17 }
 0x10e   : > { %v2486_v19 = vpop.f32.mrf.mxu2 }
 0x10f   : > { %616 = vst.msk [vmem:[%s2253_s13 + $0x120] sm:$0xff] %vm579_vm0, %v2486_v19 }
 0x113   : > { %632 = sbr.rel (%p2076_p4) target bundleno = 283 (0x11b), region = 40 }
 0x116   : > { %v2491_v20 = vpop.f32.mrf.mxu2 }
 0x117   : > { %617 = vst.msk [vmem:[%s2253_s13 + $0x128] sm:$0xff] %vm579_vm0, %v2491_v20 }
 0x118   : > { %vm633_vm1 = vcmask 516096   ;;  %v2156_v21 = vmov 0.0  }
 0x119   : > { %634 = vst.msk [vmem:[#allocation3] sm:$0x1] %vm633_vm1, %v2156_v21 }
 0x11a   : > { %635 = vst.msk [vmem:[#allocation4] sm:$0x1] %vm633_vm1, %v2156_v21 }
 0x11b PF: > { %v637_v22 = vsel %vm579_vm0, %v2249_v35, 0.0  ;;  %v638_v23 = vsel %vm579_vm0, %v2271_v39, 0.0  ;;  %v640_v24 = vsel %vm579_vm0, %v2291_v43, 0.0  ;;  %v642_v26 = vsel %vm579_vm0, %v2311_v47, 0.0  ;;  %p2077_p5 = scmp.ne.s32.totalorder %s2188_s16, 3 }
 0x11c   : > { %v639_v25 = vadd.f32 %v638_v23, %v637_v22  ;;  %v644_v28 = vsel %vm579_vm0, %v2331_v51, 0.0  ;;  %v646_v30 = vsel %vm579_vm0, %v2351_v55, 0.0  ;;  %v648_v32 = vsel %vm579_vm0, %v2371_v59, 0.0 }
 0x11d   : > { %v744_v33 = vmul.f32 %v2249_v35, %v2249_v35  ;;  %v745_v18 = vmul.f32 %v2271_v39, %v2271_v39  ;;  %v746_v21 = vmul.f32 %v2291_v43, %v2291_v43  ;;  %v650_v22 = vsel %vm579_vm0, %v2391_v63, 0.0 }
 0x11e   : > { %v641_v27 = vadd.f32 %v640_v24, %v639_v25  ;;  %v747_v24 = vmul.f32 %v2311_v47, %v2311_v47  ;;  %v652_v25 = vsel %vm579_vm0, %v2411_v3, 0.0  ;;  %v749_v47 = vmul.f32 %v2351_v55, %v2351_v55 }
 0x11f   : > { %v794_v39 = vsel %vm579_vm0, %v745_v18, 0.0  ;;  %v796_v43 = vsel %vm579_vm0, %v746_v21, 0.0  ;;  %v658_v21 = vsel %vm579_vm0, %v2471_v15, 0.0  ;;  %v751_v55 = vmul.f32 %v2391_v63, %v2391_v63 }
 0x120   : > { %v643_v29 = vadd.f32 %v642_v26, %v641_v27  ;;  %v793_v26 = vsel %vm579_vm0, %v744_v33, 0.0  ;;  %v748_v27 = vmul.f32 %v2331_v51, %v2331_v51  ;;  %v750_v51 = vmul.f32 %v2371_v59, %v2371_v59 }
 0x121   : > { %v752_v59 = vmul.f32 %v2411_v3, %v2411_v3  ;;  %v753_v63 = vmul.f32 %v2431_v7, %v2431_v7  ;;  %v754_v3 = vmul.f32 %v2451_v11, %v2451_v11  ;;  %vm741_vm2 = vcmask 516096  }
 0x122   : > { %v645_v31 = vadd.f32 %v644_v28, %v643_v29  ;;  %v654_v28 = vsel %vm579_vm0, %v2431_v7, 0.0  ;;  %v795_v29 = vadd.f32 %v794_v39, %v793_v26  ;;  %v800_v18 = vsel %vm579_vm0, %v748_v27, 0.0 }
 0x123   : > { %v804_v27 = vsel %vm579_vm0, %v750_v51, 0.0  ;;  %v662_v39 = vsel %vm579_vm0, %v2273_v40, 0.0  ;;  %v755_v7 = vmul.f32 %v2471_v15, %v2471_v15  ;;  %v757_v15 = vmul.f32 %v2273_v40, %v2273_v40 }
 0x124   : > { %v647_v34 = vadd.f32 %v646_v30, %v645_v31  ;;  %v798_v31 = vsel %vm579_vm0, %v747_v24, 0.0  ;;  %v797_v33 = vadd.f32 %v796_v43, %v795_v29  ;;  %v802_v24 = vsel %vm579_vm0, %v749_v47, 0.0 }
 0x125   : > { %v806_v29 = vsel %vm579_vm0, %v751_v55, 0.0  ;;  %v812_v55 = vsel %vm579_vm0, %v754_v3, 0.0  ;;  %v759_v40 = vmul.f32 %v2313_v48, %v2313_v48 }
 0x126   : > { %v649_v23 = vadd.f32 %v648_v32, %v647_v34  ;;  %v656_v32 = vsel %vm579_vm0, %v2451_v11, 0.0  ;;  %v756_v11 = vmul.f32 %v2251_v36, %v2251_v36 }
 0x128   : > { %v651_v35 = vadd.f32 %v650_v22, %v649_v23  ;;  %v799_v22 = vadd.f32 %v798_v31, %v797_v33  ;;  %v666_v33 = vsel %vm579_vm0, %v2313_v48, 0.0  ;;  %v761_v48 = vmul.f32 %v2353_v56, %v2353_v56 }
 0x12a   : > { %v653_v30 = vadd.f32 %v652_v25, %v651_v35  ;;  %v660_v25 = vsel %vm579_vm0, %v2251_v36, 0.0  ;;  %v801_v26 = vadd.f32 %v800_v18, %v799_v22  ;;  %v810_v18 = vsel %vm579_vm0, %v753_v63, 0.0 }
 0x12b   : > { %v758_v36 = vmul.f32 %v2293_v44, %v2293_v44 }
 0x12c   : > { %v655_v34 = vadd.f32 %v654_v28, %v653_v30  ;;  %v803_v43 = vadd.f32 %v802_v24, %v801_v26  ;;  %v664_v30 = vsel %vm579_vm0, %v2293_v44, 0.0  ;;  %v670_v24 = vsel %vm579_vm0, %v2353_v56, 0.0 }
 0x12d   : > { %v760_v44 = vmul.f32 %v2333_v52, %v2333_v52  ;;  %v763_v56 = vmul.f32 %v2393_v0, %v2393_v0 }
 0x12e   : > { %v657_v23 = vadd.f32 %v656_v32, %v655_v34  ;;  %v805_v47 = vadd.f32 %v804_v27, %v803_v43  ;;  %v808_v32 = vsel %vm579_vm0, %v752_v59, 0.0  ;;  %v672_v59 = vsel %vm579_vm0, %v2373_v60, 0.0 }
 0x12f   : > { %v816_v43 = vsel %vm579_vm0, %v756_v11, 0.0  ;;  %v682_v11 = vsel %vm579_vm0, %v2473_v16, 0.0 }
 0x130   : > { %v659_v35 = vadd.f32 %v658_v21, %v657_v23  ;;  %v807_v34 = vadd.f32 %v806_v29, %v805_v47  ;;  %v668_v21 = vsel %vm579_vm0, %v2333_v52, 0.0  ;;  %v676_v47 = vsel %vm579_vm0, %v2413_v4, 0.0 }
 0x131   : > { %v762_v52 = vmul.f32 %v2373_v60, %v2373_v60  ;;  %v764_v60 = vmul.f32 %v2413_v4, %v2413_v4  ;;  %v766_v4 = vmul.f32 %v2453_v12, %v2453_v12 }
 0x132   : > { %v661_v28 = vadd.f32 %v660_v25, %v659_v35  ;;  %v809_v22 = vadd.f32 %v808_v32, %v807_v34  ;;  %v814_v35 = vsel %vm579_vm0, %v755_v7, 0.0  ;;  %v820_v32 = vsel %vm579_vm0, %v758_v36, 0.0 }
 0x133   : > { %v822_v7 = vsel %vm579_vm0, %v759_v40, 0.0  ;;  %v832_v40 = vsel %vm579_vm0, %v764_v60, 0.0  ;;  %v702_v60 = vsel %vm579_vm0, %v2441_v9, 0.0 }
 0x134   : > { %v663_v31 = vadd.f32 %v662_v39, %v661_v28  ;;  %v811_v25 = vadd.f32 %v810_v18, %v809_v22  ;;  %v674_v28 = vsel %vm579_vm0, %v2393_v0, 0.0  ;;  %v680_v18 = vsel %vm579_vm0, %v2453_v12, 0.0 }
 0x135   : > { %v765_v0 = vmul.f32 %v2433_v8, %v2433_v8  ;;  %v768_v12 = vmul.f32 %v2261_v37, %v2261_v37 }
 0x136   : > { %v665_v51 = vadd.f32 %v664_v30, %v663_v31  ;;  %v813_v27 = vadd.f32 %v812_v55, %v811_v25  ;;  %v818_v30 = vsel %vm579_vm0, %v757_v15, 0.0  ;;  %v826_v25 = vsel %vm579_vm0, %v761_v48, 0.0 }
 0x138   : > { %v667_v23 = vadd.f32 %v666_v33, %v665_v51  ;;  %v815_v63 = vadd.f32 %v814_v35, %v813_v27  ;;  %v678_v33 = vsel %vm579_vm0, %v2433_v8, 0.0  ;;  %v686_v27 = vsel %vm579_vm0, %v2281_v41, 0.0 }
 0x139   : > { %v767_v8 = vmul.f32 %v2473_v16, %v2473_v16  ;;  %v769_v16 = vmul.f32 %v2281_v41, %v2281_v41  ;;  %v771_v41 = vmul.f32 %v2321_v49, %v2321_v49 }
 0x13a   : > { %v669_v26 = vadd.f32 %v668_v21, %v667_v23  ;;  %v817_v31 = vadd.f32 %v816_v43, %v815_v63  ;;  %v824_v23 = vsel %vm579_vm0, %v760_v44, 0.0  ;;  %v830_v43 = vsel %vm579_vm0, %v763_v56, 0.0 }
 0x13b   : > { %v692_v44 = vsel %vm579_vm0, %v2341_v53, 0.0  ;;  %v842_v56 = vsel %vm579_vm0, %v769_v16, 0.0 }
 0x13c   : > { %v671_v39 = vadd.f32 %v670_v24, %v669_v26  ;;  %v819_v34 = vadd.f32 %v818_v30, %v817_v31  ;;  %v684_v26 = vsel %vm579_vm0, %v2261_v37, 0.0  ;;  %v690_v30 = vsel %vm579_vm0, %v2321_v49, 0.0 }
 0x13d   : > { %v770_v37 = vmul.f32 %v2301_v45, %v2301_v45  ;;  %v773_v49 = vmul.f32 %v2361_v57, %v2361_v57 }
 0x13e   : > { %v673_v29 = vadd.f32 %v672_v59, %v671_v39  ;;  %v821_v21 = vadd.f32 %v820_v32, %v819_v34  ;;  %v828_v59 = vsel %vm579_vm0, %v762_v52, 0.0  ;;  %v836_v34 = vsel %vm579_vm0, %v766_v4, 0.0 }
 0x140   : > { %v675_v3 = vadd.f32 %v674_v28, %v673_v29  ;;  %v823_v55 = vadd.f32 %v822_v7, %v821_v21  ;;  %v688_v28 = vsel %vm579_vm0, %v2301_v45, 0.0  ;;  %v696_v21 = vsel %vm579_vm0, %v2381_v61, 0.0 }
 0x141   : > { %v772_v45 = vmul.f32 %v2341_v53, %v2341_v53  ;;  %v774_v53 = vmul.f32 %v2381_v61, %v2381_v61  ;;  %v776_v61 = vmul.f32 %v2421_v5, %v2421_v5 }
 0x142   : > { %v677_v51 = vadd.f32 %v676_v47, %v675_v3  ;;  %v825_v15 = vadd.f32 %v824_v23, %v823_v55  ;;  %v834_v3 = vsel %vm579_vm0, %v765_v0, 0.0  ;;  %v840_v23 = vsel %vm579_vm0, %v768_v12, 0.0 }
 0x143   : > { %v712_v12 = vsel %vm579_vm0, %v2263_v38, 0.0 }
 0x144   : > { %v679_v22 = vadd.f32 %v678_v33, %v677_v51  ;;  %v827_v39 = vadd.f32 %v826_v25, %v825_v15  ;;  %v694_v51 = vsel %vm579_vm0, %v2361_v57, 0.0  ;;  %v700_v25 = vsel %vm579_vm0, %v2421_v5, 0.0 }
 0x145   : > { %v775_v57 = vmul.f32 %v2401_v1, %v2401_v1  ;;  %v778_v5 = vmul.f32 %v2461_v13, %v2461_v13 }
 0x146   : > { %v681_v24 = vadd.f32 %v680_v18, %v679_v22  ;;  %v829_v63 = vadd.f32 %v828_v59, %v827_v39  ;;  %v838_v18 = vsel %vm579_vm0, %v767_v8, 0.0  ;;  %v846_v39 = vsel %vm579_vm0, %v771_v41, 0.0 }
 0x147   : > { %v852_v8 = vsel %vm579_vm0, %v774_v53, 0.0 }
 0x148   : > { %v683_v35 = vadd.f32 %v682_v11, %v681_v24  ;;  %v831_v47 = vadd.f32 %v830_v43, %v829_v63  ;;  %v698_v11 = vsel %vm579_vm0, %v2401_v1, 0.0  ;;  %v706_v63 = vsel %vm579_vm0, %v2481_v17, 0.0 }
 0x149   : > { %v777_v1 = vmul.f32 %v2441_v9, %v2441_v9  ;;  %v779_v9 = vmul.f32 %v2481_v17, %v2481_v17  ;;  %v781_v17 = vmul.f32 %v2491_v20, %v2491_v20 }
 0x14a   : > { %v685_v36 = vadd.f32 %v684_v26, %v683_v35  ;;  %v833_v32 = vadd.f32 %v832_v40, %v831_v47  ;;  %v844_v35 = vsel %vm579_vm0, %v770_v37, 0.0  ;;  %v850_v40 = vsel %vm579_vm0, %v773_v49, 0.0 }
 0x14b   : > { %v862_v41 = vsel %vm579_vm0, %v779_v9, 0.0 }
 0x14c   : > { %v687_v29 = vadd.f32 %v686_v27, %v685_v36  ;;  %v835_v48 = vadd.f32 %v834_v3, %v833_v32  ;;  %v704_v36 = vsel %vm579_vm0, %v2461_v13, 0.0  ;;  %v710_v3 = vsel %vm579_vm0, %v2491_v20, 0.0 }
 0x14d   : > { %v780_v13 = vmul.f32 %v2486_v19, %v2486_v19  ;;  %v783_v20 = vmul.f32 %v2283_v42, %v2283_v42 }
 0x14e   : > { %v689_v31 = vadd.f32 %v688_v28, %v687_v29  ;;  %v837_v22 = vadd.f32 %v836_v34, %v835_v48  ;;  %v848_v28 = vsel %vm579_vm0, %v772_v45, 0.0  ;;  %v856_v48 = vsel %vm579_vm0, %v776_v61, 0.0 }
 0x14f   : > { %v722_v45 = vsel %vm579_vm0, %v2363_v58, 0.0  ;;  %v732_v61 = vsel %vm579_vm0, %v2463_v14, 0.0 }
 0x150   : > { %v691_v33 = vadd.f32 %v690_v30, %v689_v31  ;;  %v839_v55 = vadd.f32 %v838_v18, %v837_v22  ;;  %v708_v30 = vsel %vm579_vm0, %v2486_v19, 0.0  ;;  %v716_v22 = vsel %vm579_vm0, %v2303_v46, 0.0 }
 0x151   : > { %v782_v19 = vmul.f32 %v2263_v38, %v2263_v38  ;;  %v784_v38 = vmul.f32 %v2303_v46, %v2303_v46  ;;  %v786_v46 = vmul.f32 %v2343_v54, %v2343_v54 }
 0x152   : > { %v693_v7 = vadd.f32 %v692_v44, %v691_v33  ;;  %v841_v26 = vadd.f32 %v840_v23, %v839_v55  ;;  %v854_v33 = vsel %vm579_vm0, %v775_v57, 0.0  ;;  %v860_v23 = vsel %vm579_vm0, %v778_v5, 0.0 }
 0x153   : > { %v872_v57 = vsel %vm579_vm0, %v784_v38, 0.0 }
 0x154   : > { %v695_v52 = vadd.f32 %v694_v51, %v693_v7  ;;  %v843_v59 = vadd.f32 %v842_v56, %v841_v26  ;;  %v714_v7 = vsel %vm579_vm0, %v2283_v42, 0.0  ;;  %v720_v56 = vsel %vm579_vm0, %v2343_v54, 0.0 }
 0x155   : > { %v785_v42 = vmul.f32 %v2323_v50, %v2323_v50  ;;  %v788_v54 = vmul.f32 %v2383_v62, %v2383_v62 }
 0x156   : > { %v697_v24 = vadd.f32 %v696_v21, %v695_v52  ;;  %v845_v0 = vadd.f32 %v844_v35, %v843_v59  ;;  %v858_v21 = vsel %vm579_vm0, %v777_v1, 0.0  ;;  %v866_v59 = vsel %vm579_vm0, %v781_v17, 0.0 }
 0x157   : > { %v880_v5 = vsel %vm579_vm0, %v788_v54, 0.0 }
 0x158   : > { %v699_v15 = vadd.f32 %v698_v11, %v697_v24  ;;  %v847_v29 = vadd.f32 %v846_v39, %v845_v0  ;;  %v718_v11 = vsel %vm579_vm0, %v2323_v50, 0.0  ;;  %v726_v0 = vsel %vm579_vm0, %v2403_v2, 0.0 }
 0x159   : > { %v787_v50 = vmul.f32 %v2363_v58, %v2363_v58 }
 0x15a   : > { %v701_v27 = vadd.f32 %v700_v25, %v699_v15  ;;  %v849_v47 = vadd.f32 %v848_v28, %v847_v29  ;;  %v864_v15 = vsel %vm579_vm0, %v780_v13, 0.0  ;;  %v870_v28 = vsel %vm579_vm0, %v783_v20, 0.0 }
 0x15c   : > { %v703_v43 = vadd.f32 %v702_v60, %v701_v27  ;;  %v851_v44 = vadd.f32 %v850_v40, %v849_v47  ;;  %v724_v27 = vsel %vm579_vm0, %v2383_v62, 0.0  ;;  %v730_v40 = vsel %vm579_vm0, %v2443_v10, 0.0 }
 0x15d   : > { %v791_v62 = vmul.f32 %v2443_v10, %v2443_v10 }
 0x15e   : > { %v705_v4 = vadd.f32 %v704_v36, %v703_v43  ;;  %v853_v34 = vadd.f32 %v852_v8, %v851_v44  ;;  %v868_v36 = vsel %vm579_vm0, %v782_v19, 0.0  ;;  %v876_v44 = vsel %vm579_vm0, %v786_v46, 0.0  ;;  %v743_v19 = vld [vmem:[#allocation4] sm:$0x1] }
 0x160   : > { %v707_v31 = vadd.f32 %v706_v63, %v705_v4  ;;  %v855_v16 = vadd.f32 %v854_v33, %v853_v34  ;;  %v728_v63 = vsel %vm579_vm0, %v2423_v6, 0.0  ;;  %v789_v33 = vmul.f32 %v2403_v2, %v2403_v2 }
 0x161   : > { %v792_v2 = vmul.f32 %v2463_v14, %v2463_v14 }
 0x162   : > { %v709_v32 = vadd.f32 %v708_v30, %v707_v31  ;;  %v857_v52 = vadd.f32 %v856_v48, %v855_v16  ;;  %v874_v31 = vsel %vm579_vm0, %v785_v42, 0.0  ;;  %v882_v16 = vsel %vm579_vm0, %v789_v33, 0.0 }
 0x164   : > { %v711_v51 = vadd.f32 %v710_v3, %v709_v32  ;;  %v859_v55 = vadd.f32 %v858_v21, %v857_v52 }
 0x166   : > { %v713_v18 = vadd.f32 %v712_v12, %v711_v51  ;;  %v861_v25 = vadd.f32 %v860_v23, %v859_v55  ;;  %v878_v12 = vsel %vm579_vm0, %v787_v50, 0.0  ;;  %v790_v51 = vmul.f32 %v2423_v6, %v2423_v6 }
 0x167   : > { %v886_v6 = vsel %vm579_vm0, %v791_v62, 0.0  ;;  %v888_v23 = vsel %vm579_vm0, %v792_v2, 0.0 }
 0x168   : > { %v715_v37 = vadd.f32 %v714_v7, %v713_v18  ;;  %v863_v35 = vadd.f32 %v862_v41, %v861_v25  ;;  %v884_v21 = vsel %vm579_vm0, %v790_v51, 0.0 }
 0x16a   : > { %v717_v24 = vadd.f32 %v716_v22, %v715_v37  ;;  %v865_v49 = vadd.f32 %v864_v15, %v863_v35 }
 0x16c   : > { %v719_v26 = vadd.f32 %v718_v11, %v717_v24  ;;  %v867_v43 = vadd.f32 %v866_v59, %v865_v49  ;;  %v636_v11 = vld [vmem:[#allocation3] sm:$0x1] }
 0x16e   : > { %v721_v60 = vadd.f32 %v720_v56, %v719_v26  ;;  %v869_v29 = vadd.f32 %v868_v36, %v867_v43 }
 0x170   : > { %v723_v39 = vadd.f32 %v722_v45, %v721_v60  ;;  %v871_v30 = vadd.f32 %v870_v28, %v869_v29 }
 0x172   : > { %v725_v53 = vadd.f32 %v724_v27, %v723_v39  ;;  %v873_v8 = vadd.f32 %v872_v57, %v871_v30 }
 0x174   : > { %v727_v4 = vadd.f32 %v726_v0, %v725_v53  ;;  %v875_v32 = vadd.f32 %v874_v31, %v873_v8 }
 0x176   : > { %v729_v47 = vadd.f32 %v728_v63, %v727_v4  ;;  %v877_v58 = vadd.f32 %v876_v44, %v875_v32 }
 0x178   : > { %v731_v3 = vadd.f32 %v730_v40, %v729_v47  ;;  %v879_v48 = vadd.f32 %v878_v12, %v877_v58 }
 0x17a   : > { %v733_v1 = vadd.f32 %v732_v61, %v731_v3  ;;  %v881_v18 = vadd.f32 %v880_v5, %v879_v48 }
 0x17c   : > { %v734_v34 = vrot.slane %v733_v1, 4  ;;  %v883_v22 = vadd.f32 %v882_v16, %v881_v18 }
 0x17e   : > { %v735_v7 = vadd.f32 %v734_v34, %v733_v1  ;;  %v885_v37 = vadd.f32 %v884_v21, %v883_v22 }
 0x180   : > { %v736_v9 = vrot.slane %v735_v7, 2  ;;  %v887_v55 = vadd.f32 %v886_v6, %v885_v37 }
 0x182   : > { %v737_v52 = vadd.f32 %v736_v9, %v735_v7  ;;  %v889_v24 = vadd.f32 %v888_v23, %v887_v55 }
 0x184   : > { %v738_v13 = vrot.slane %v737_v52, 1  ;;  %v890_v41 = vrot.slane %v889_v24, 4 }
 0x186   : > { %v739_v10 = vadd.f32 %v738_v13, %v737_v52  ;;  %v891_v56 = vadd.f32 %v890_v41, %v889_v24 }
 0x188   : > { %v740_v17 = vadd.f32 %v739_v10, %v636_v11  ;;  %v892_v14 = vrot.slane %v891_v56, 2 }
 0x18a   : > { %742 = vst.msk [vmem:[#allocation3] sm:$0x1] %vm741_vm2, %v740_v17  ;;  %v893_v25 = vadd.f32 %v892_v14, %v891_v56 }
 0x18c   : > { %v894_v26 = vrot.slane %v893_v25, 1 }
 0x18e   : > { %v895_v15 = vadd.f32 %v894_v26, %v893_v25  ;;  %901 = sbr.rel (%p2077_p5) target bundleno = 629 (0x275), region = 44 }
 0x190   : > { %v896_v45 = vadd.f32 %v895_v15, %v743_v19 }
 0x192   : > { %897 = vst.msk [vmem:[#allocation4] sm:$0x1] %vm741_vm2, %v896_v45 }
 0x193   : > { %v902_v35 = vld [vmem:[#allocation3] sm:$0x1]  ;;  %v1127_v57 = vld [vmem:[#allocation2 + $0x188] sm:$0xff]  ;;  %v1373_v40 = vld [vmem:[#allocation2 + $0x310] sm:$0xff] }
 0x194   : > { %v903_v20 = vmul.f32 0.0006377551, %v902_v35  ;;  %v908_v42 = vld [vmem:[%s3346_s2] sm:$0x1]  ;;  %v925_v30 = vld [vmem:[#allocation2 + $0x8] sm:$0xff]  ;;  %v1128_v47 = vld [vmem:[#allocation2 + $0x190] sm:$0xff] }
 0x195   : > { %v921_v4 = vld [vmem:[%s3347_s3] sm:$0x1]  ;;  %v1619_v61 = vld [vmem:[#allocation2 + $0x498] sm:$0xff]  ;;  %v926_v3 = vld [vmem:[#allocation2 + $0x10] sm:$0xff] }
 0x196   : > { %v906_v27 = vmul.f32 %v903_v20, %v903_v20  ;;  %v924_v46 = vld [vmem:[#allocation2] sm:$0xff]  ;;  %v1374_v8 = vld [vmem:[#allocation2 + $0x318] sm:$0xff]  ;;  %v1621_v51 = vld [vmem:[#allocation2 + $0x4a8] sm:$0xff] }
 0x197   : > { %v1620_v54 = vld [vmem:[#allocation2 + $0x4a0] sm:$0xff]  ;;  %v1129_v44 = vld [vmem:[#allocation2 + $0x198] sm:$0xff] }
 0x198   : > { %v927_v32 = vld [vmem:[#allocation2 + $0x18] sm:$0xff]  ;;  %v1375_v34 = vld [vmem:[#allocation2 + $0x320] sm:$0xff] }
 0x199   : > { %v904_v60 = vld [vmem:[#allocation4] sm:$0x1] }
 0x19a   : > { %v905_v59 = vmul.f32 0.0006377551, %v904_v60  ;;  %v1130_v5 = vld [vmem:[#allocation2 + $0x1a0] sm:$0xff] }
 0x19c   : > { %v907_v49 = vsub.f32 %v905_v59, %v906_v27 }
 0x19e   : > { %v909_v39 = vadd.f32 1e-05, %v907_v49 }
 0x1a0   : > { %2146 = vrsqrt.f32 %v909_v39  ;;  %vm916_vm3 = vweird.f32 %v909_v39 }
 0x1a6   : > { %v2147_v38 = vpop.eup %2146 }
 0x1a7   : > { %v911_v36 = vmul.f32 %v2147_v38, %v909_v39  ;;  %vm917_vm4 = vweird.f32 %v2147_v38 }
 0x1a8   : > { %vm918_vm5 = vmor %vm916_vm3, %vm917_vm4 }
 0x1a9   : > { %v912_v0 = vmul.f32 %v2147_v38, %v911_v36 }
 0x1ab   : > { %v913_v43 = vmul.f32 0.5, %v912_v0  ;;  %v1376_v0 = vld [vmem:[#allocation2 + $0x328] sm:$0xff] }
 0x1ad   : > { %v914_v53 = vsub.f32 1.5, %v913_v43  ;;  %v1622_v43 = vld [vmem:[#allocation2 + $0x4b0] sm:$0xff] }
 0x1af   : > { %v915_v28 = vmul.f32 %v2147_v38, %v914_v53 }
 0x1b1   : > { %v919_v63 = vsel %vm918_vm5, %v2147_v38, %v915_v28 }
 0x1b2   : > { %v920_v29 = vmul.f32 %v919_v63, %v908_v42 }
 0x1b4   : > { %v922_v50 = vmul.f32 %v920_v29, %v903_v20  ;;  %v2749_v31 = vperm.slane %v920_v29, 0  ;;  %v928_v29 = vld [vmem:[#allocation2 + $0x20] sm:$0xff] }
 0x1b6   : > { %v923_v1 = vsub.f32 %v921_v4, %v922_v50  ;;  %v976_v33 = vmul.f32 %v2749_v31, %v924_v46  ;;  %v1176_v12 = vmul.f32 %v1127_v57, %v2749_v31  ;;  %v1422_v58 = vmul.f32 %v1373_v40, %v2749_v31  ;;  %v1131_v4 = vld [vmem:[#allocation2 + $0x1a8] sm:$0xff] }
 0x1b7   : > { %v1668_v48 = vmul.f32 %v1619_v61, %v2749_v31  ;;  %v977_v7 = vmul.f32 %v2749_v31, %v925_v30  ;;  %v1177_v62 = vmul.f32 %v1128_v47, %v2749_v31  ;;  %v1423_v16 = vmul.f32 %v1374_v8, %v2749_v31  ;;  %v1377_v47 = vld [vmem:[#allocation2 + $0x330] sm:$0xff] }
 0x1b8   : > { %v2758_v18 = vperm.slane %v923_v1, 0  ;;  %v1669_v9 = vmul.f32 %v1620_v54, %v2749_v31  ;;  %v978_v2 = vmul.f32 %v2749_v31, %v926_v3  ;;  %v1178_v21 = vmul.f32 %v1129_v44, %v2749_v31  ;;  %v1623_v54 = vld [vmem:[#allocation2 + $0x4b8] sm:$0xff]  ;;  %v929_v44 = vld [vmem:[#allocation2 + $0x28] sm:$0xff] }
 0x1b9   : > { %v1424_v22 = vmul.f32 %v1375_v34, %v2749_v31  ;;  %v1670_v52 = vmul.f32 %v1621_v51, %v2749_v31  ;;  %v979_v6 = vmul.f32 %v2749_v31, %v927_v32  ;;  %v1179_v37 = vmul.f32 %v1130_v5, %v2749_v31 }
 0x1ba   : > { %v1028_v13 = vadd.f32 %v2758_v18, %v976_v33  ;;  %v1225_v23 = vadd.f32 %v1176_v12, %v2758_v18  ;;  %v1471_v11 = vadd.f32 %v1422_v58, %v2758_v18  ;;  %v1717_v55 = vadd.f32 %v1668_v48, %v2758_v18 }
 0x1bb   : > { %v1029_v10 = vadd.f32 %v2758_v18, %v977_v7  ;;  %v1226_v24 = vadd.f32 %v1177_v62, %v2758_v18  ;;  %v1472_v17 = vadd.f32 %v1423_v16, %v2758_v18  ;;  %v1718_v41 = vadd.f32 %v1669_v9, %v2758_v18  ;;  %v1132_v9 = vld [vmem:[#allocation2 + $0x1b0] sm:$0xff] }
 0x1bc   : > { %v1077_v56 = vmax.f32 %v1028_v13, 0.0  ;;  %v1274_v14 = vmax.f32 %v1225_v23, 0.0  ;;  %v1520_v25 = vmax.f32 %v1471_v11, 0.0  ;;  %v1766_v26 = vmax.f32 %v1717_v55, 0.0 }
 0x1bd   : > { %v1078_v19 = vmax.f32 %v1029_v10, 0.0  ;;  %v1275_v15 = vmax.f32 %v1226_v24, 0.0  ;;  %v1521_v45 = vmax.f32 %v1472_v17, 0.0  ;;  %v1767_v35 = vmax.f32 %v1718_v41, 0.0  ;;  %v930_v10 = vld [vmem:[#allocation2 + $0x30] sm:$0xff] }
 0x1be   : > { %v1323_v60 = vmax.f32 %v1077_v56, %v1274_v14  ;;  %v1030_v20 = vadd.f32 %v2758_v18, %v978_v2  ;;  %v1227_v59 = vadd.f32 %v1178_v21, %v2758_v18  ;;  %v1473_v27 = vadd.f32 %v1424_v22, %v2758_v18  ;;  %v1378_v2 = vld [vmem:[#allocation2 + $0x338] sm:$0xff] }
 0x1bf   : > { %v1324_v49 = vmax.f32 %v1078_v19, %v1275_v15  ;;  %v1719_v39 = vadd.f32 %v1670_v52, %v2758_v18  ;;  %v1031_v38 = vadd.f32 %v2758_v18, %v979_v6  ;;  %v1228_v36 = vadd.f32 %v1179_v37, %v2758_v18  ;;  %v1624_v37 = vld [vmem:[#allocation2 + $0x4c0] sm:$0xff]  ;;  %v1133_v14 = vld [vmem:[#allocation2 + $0x1b8] sm:$0xff] }
 0x1c0   : > { %v1569_v53 = vmax.f32 %v1323_v60, %v1520_v25  ;;  %v1079_v42 = vmax.f32 %v1030_v20, 0.0  ;;  %v1276_v28 = vmax.f32 %v1227_v59, 0.0  ;;  %v1522_v63 = vmax.f32 %v1473_v27, 0.0  ;;  %v1379_v25 = vld [vmem:[#allocation2 + $0x340] sm:$0xff] }
 0x1c1   : > { %v1570_v46 = vmax.f32 %v1324_v49, %v1521_v45  ;;  %v1768_v57 = vmax.f32 %v1719_v39, 0.0  ;;  %v1080_v40 = vmax.f32 %v1031_v38, 0.0  ;;  %v1277_v30 = vmax.f32 %v1228_v36, 0.0 }
 0x1c2   : > { %v1815_v50 = vmax.f32 %v1569_v53, %v1766_v26  ;;  %v1325_v61 = vmax.f32 %v1079_v42, %v1276_v28  ;;  %v1425_v8 = vmul.f32 %v1376_v0, %v2749_v31  ;;  %v1671_v3 = vmul.f32 %v1622_v43, %v2749_v31  ;;  %v931_v0 = vld [vmem:[#allocation2 + $0x38] sm:$0xff] }
 0x1c3   : > { %v1816_v32 = vmax.f32 %v1570_v46, %v1767_v35  ;;  %v1326_v1 = vmax.f32 %v1080_v40, %v1277_v30  ;;  %v980_v33 = vmul.f32 %v2749_v31, %v928_v29  ;;  %v1180_v12 = vmul.f32 %v1131_v4, %v2749_v31  ;;  %v1625_v35 = vld [vmem:[#allocation2 + $0x4c8] sm:$0xff]  ;;  %v1626_v30 = vld [vmem:[#allocation2 + $0x4d0] sm:$0xff] }
 0x1c4   : > { %1864 = vst.msk [vmem:[%s3348_s4] sm:$0xff] %vm579_vm0, %v1815_v50  ;;  %v1571_v58 = vmax.f32 %v1325_v61, %v1522_v63  ;;  %v1474_v34 = vadd.f32 %v1425_v8, %v2758_v18  ;;  %v1720_v51 = vadd.f32 %v1671_v3, %v2758_v18  ;;  %v1426_v5 = vmul.f32 %v1377_v47, %v2749_v31  ;;  %v1134_v63 = vld [vmem:[#allocation2 + $0x1c0] sm:$0xff]  ;;  %v1380_v29 = vld [vmem:[#allocation2 + $0x348] sm:$0xff] }
 0x1c5   : > { %1865 = vst.msk [vmem:[%s3348_s4 + $0x8] sm:$0xff] %vm579_vm0, %v1816_v32  ;;  %v1032_v48 = vadd.f32 %v2758_v18, %v980_v33  ;;  %v1229_v7 = vadd.f32 %v1180_v12, %v2758_v18  ;;  %v1672_v62 = vmul.f32 %v1623_v54, %v2749_v31  ;;  %v981_v16 = vmul.f32 %v2749_v31, %v929_v44  ;;  %v932_v3 = vld [vmem:[#allocation2 + $0x40] sm:$0xff]  ;;  %v1135_v33 = vld [vmem:[#allocation2 + $0x1c8] sm:$0xff] }
 0x1c6   : > { %v1817_v21 = vmax.f32 %v1571_v58, %v1768_v57  ;;  %v1523_v22 = vmax.f32 %v1474_v34, 0.0  ;;  %v1769_v52 = vmax.f32 %v1720_v51, 0.0  ;;  %v1475_v6 = vadd.f32 %v1426_v5, %v2758_v18 }
 0x1c7   : > { %v1081_v13 = vmax.f32 %v1032_v48, 0.0  ;;  %v1278_v23 = vmax.f32 %v1229_v7, 0.0  ;;  %v1721_v11 = vadd.f32 %v1672_v62, %v2758_v18  ;;  %v1033_v55 = vadd.f32 %v2758_v18, %v981_v16  ;;  %v1381_v16 = vld [vmem:[#allocation2 + $0x350] sm:$0xff] }
 0x1c8   : > { %1866 = vst.msk [vmem:[%s3348_s4 + $0x10] sm:$0xff] %vm579_vm0, %v1817_v21  ;;  %v1572_v24 = vmax.f32 %v1326_v1, %v1523_v22  ;;  %v1524_v17 = vmax.f32 %v1475_v6, 0.0  ;;  %v1181_v41 = vmul.f32 %v1132_v9, %v2749_v31  ;;  %v1427_v56 = vmul.f32 %v1378_v2, %v2749_v31  ;;  %v1627_v9 = vld [vmem:[#allocation2 + $0x4d8] sm:$0xff]  ;;  %v933_v6 = vld [vmem:[#allocation2 + $0x48] sm:$0xff] }
 0x1c9   : > { %v1327_v26 = vmax.f32 %v1081_v13, %v1278_v23  ;;  %v1770_v19 = vmax.f32 %v1721_v11, 0.0  ;;  %v1082_v15 = vmax.f32 %v1033_v55, 0.0  ;;  %v1673_v45 = vmul.f32 %v1624_v37, %v2749_v31  ;;  %v1136_v55 = vld [vmem:[#allocation2 + $0x1d0] sm:$0xff] }
 0x1ca   : > { %v1818_v60 = vmax.f32 %v1572_v24, %v1769_v52  ;;  %v1230_v20 = vadd.f32 %v1181_v41, %v2758_v18  ;;  %v1476_v59 = vadd.f32 %v1427_v56, %v2758_v18  ;;  %v982_v27 = vmul.f32 %v2749_v31, %v930_v10  ;;  %v1382_v56 = vld [vmem:[#allocation2 + $0x358] sm:$0xff] }
 0x1cb   : > { %v1573_v49 = vmax.f32 %v1327_v26, %v1524_v17  ;;  %v1722_v39 = vadd.f32 %v1673_v45, %v2758_v18  ;;  %v1182_v38 = vmul.f32 %v1133_v14, %v2749_v31  ;;  %v1428_v36 = vmul.f32 %v1379_v25, %v2749_v31  ;;  %v1628_v14 = vld [vmem:[#allocation2 + $0x4e0] sm:$0xff] }
 0x1cc   : > { %1867 = vst.msk [vmem:[%s3348_s4 + $0x18] sm:$0xff] %vm579_vm0, %v1818_v60  ;;  %v1279_v43 = vmax.f32 %v1230_v20, 0.0  ;;  %v1525_v53 = vmax.f32 %v1476_v59, 0.0  ;;  %v1034_v42 = vadd.f32 %v2758_v18, %v982_v27  ;;  %v1674_v28 = vmul.f32 %v1625_v35, %v2749_v31 }
 0x1cd   : > { %v1819_v4 = vmax.f32 %v1573_v49, %v1770_v19  ;;  %v1771_v46 = vmax.f32 %v1722_v39, 0.0  ;;  %v1231_v57 = vadd.f32 %v1182_v38, %v2758_v18  ;;  %v1477_v40 = vadd.f32 %v1428_v36, %v2758_v18  ;;  %v934_v38 = vld [vmem:[#allocation2 + $0x50] sm:$0xff]  ;;  %v1137_v36 = vld [vmem:[#allocation2 + $0x1d8] sm:$0xff] }
 0x1ce   : > { %v1328_v47 = vmax.f32 %v1082_v15, %v1279_v43  ;;  %v1083_v50 = vmax.f32 %v1034_v42, 0.0  ;;  %v1723_v61 = vadd.f32 %v1674_v28, %v2758_v18  ;;  %v983_v8 = vmul.f32 %v2749_v31, %v931_v0  ;;  %v1383_v28 = vld [vmem:[#allocation2 + $0x360] sm:$0xff] }
 0x1cf   : > { %1868 = vst.msk [vmem:[%s3348_s4 + $0x20] sm:$0xff] %vm579_vm0, %v1819_v4  ;;  %v1280_v54 = vmax.f32 %v1231_v57, 0.0  ;;  %v1526_v44 = vmax.f32 %v1477_v40, 0.0  ;;  %v1183_v32 = vmul.f32 %v1134_v63, %v2749_v31  ;;  %v1429_v1 = vmul.f32 %v1380_v29, %v2749_v31  ;;  %v1629_v63 = vld [vmem:[#allocation2 + $0x4e8] sm:$0xff] }
 0x1d0   : > { %v1574_v12 = vmax.f32 %v1328_v47, %v1525_v53  ;;  %v1772_v58 = vmax.f32 %v1723_v61, 0.0  ;;  %v1035_v34 = vadd.f32 %v2758_v18, %v983_v8  ;;  %v1675_v51 = vmul.f32 %v1626_v30, %v2749_v31  ;;  %v935_v61 = vld [vmem:[#allocation2 + $0x58] sm:$0xff]  ;;  %v1138_v8 = vld [vmem:[#allocation2 + $0x1e0] sm:$0xff] }
 0x1d1   : > { %v1329_v5 = vmax.f32 %v1083_v50, %v1280_v54  ;;  %v1232_v48 = vadd.f32 %v1183_v32, %v2758_v18  ;;  %v1478_v7 = vadd.f32 %v1429_v1, %v2758_v18  ;;  %v984_v62 = vmul.f32 %v2749_v31, %v932_v3  ;;  %v1384_v1 = vld [vmem:[#allocation2 + $0x368] sm:$0xff] }
 0x1d2   : > { %v1820_v2 = vmax.f32 %v1574_v12, %v1771_v46  ;;  %v1084_v21 = vmax.f32 %v1035_v34, 0.0  ;;  %v1724_v22 = vadd.f32 %v1675_v51, %v2758_v18  ;;  %v1184_v52 = vmul.f32 %v1135_v33, %v2749_v31 }
 0x1d3   : > { %v1575_v37 = vmax.f32 %v1329_v5, %v1526_v44  ;;  %v1281_v13 = vmax.f32 %v1232_v48, 0.0  ;;  %v1527_v23 = vmax.f32 %v1478_v7, 0.0  ;;  %v1036_v11 = vadd.f32 %v2758_v18, %v984_v62  ;;  %v1630_v62 = vld [vmem:[#allocation2 + $0x4f0] sm:$0xff] }
 0x1d4   : > { %1869 = vst.msk [vmem:[%s3348_s4 + $0x28] sm:$0xff] %vm579_vm0, %v1820_v2  ;;  %v1773_v10 = vmax.f32 %v1724_v22, 0.0  ;;  %v1233_v24 = vadd.f32 %v1184_v52, %v2758_v18  ;;  %v1430_v17 = vmul.f32 %v1381_v16, %v2749_v31  ;;  %v1676_v41 = vmul.f32 %v1627_v9, %v2749_v31  ;;  %v936_v22 = vld [vmem:[#allocation2 + $0x60] sm:$0xff]  ;;  %v1139_v52 = vld [vmem:[#allocation2 + $0x1e8] sm:$0xff] }
 0x1d5   : > { %v1821_v25 = vmax.f32 %v1575_v37, %v1772_v58  ;;  %v1330_v26 = vmax.f32 %v1084_v21, %v1281_v13  ;;  %v1085_v19 = vmax.f32 %v1036_v11, 0.0  ;;  %v985_v15 = vmul.f32 %v2749_v31, %v933_v6  ;;  %v1385_v11 = vld [vmem:[#allocation2 + $0x370] sm:$0xff] }
 0x1d6   : > { %v1282_v45 = vmax.f32 %v1233_v24, 0.0  ;;  %v1479_v35 = vadd.f32 %v1430_v17, %v2758_v18  ;;  %v1725_v60 = vadd.f32 %v1676_v41, %v2758_v18  ;;  %v1185_v20 = vmul.f32 %v1136_v55, %v2749_v31  ;;  %v1631_v41 = vld [vmem:[#allocation2 + $0x4f8] sm:$0xff] }
 0x1d7   : > { %1870 = vst.msk [vmem:[%s3348_s4 + $0x30] sm:$0xff] %vm579_vm0, %v1821_v25  ;;  %v1576_v59 = vmax.f32 %v1330_v26, %v1527_v23  ;;  %v1037_v27 = vadd.f32 %v2758_v18, %v985_v15  ;;  %v1431_v49 = vmul.f32 %v1382_v56, %v2749_v31  ;;  %v1677_v39 = vmul.f32 %v1628_v14, %v2749_v31 }
 0x1d8   : > { %v1331_v0 = vmax.f32 %v1085_v19, %v1282_v45  ;;  %v1528_v43 = vmax.f32 %v1479_v35, 0.0  ;;  %v1774_v53 = vmax.f32 %v1725_v60, 0.0  ;;  %v1234_v42 = vadd.f32 %v1185_v20, %v2758_v18  ;;  %v937_v19 = vld [vmem:[#allocation2 + $0x68] sm:$0xff] }
 0x1d9   : > { %v1822_v29 = vmax.f32 %v1576_v59, %v1773_v10  ;;  %v1086_v4 = vmax.f32 %v1037_v27, 0.0  ;;  %v1480_v46 = vadd.f32 %v1431_v49, %v2758_v18  ;;  %v1726_v57 = vadd.f32 %v1677_v39, %v2758_v18  ;;  %v1140_v39 = vld [vmem:[#allocation2 + $0x1f0] sm:$0xff] }
 0x1da   : > { %v1577_v40 = vmax.f32 %v1331_v0, %v1528_v43  ;;  %v1283_v30 = vmax.f32 %v1234_v42, 0.0  ;;  %v986_v47 = vmul.f32 %v2749_v31, %v934_v38  ;;  %v1186_v50 = vmul.f32 %v1137_v36, %v2749_v31  ;;  %v1386_v38 = vld [vmem:[#allocation2 + $0x378] sm:$0xff]  ;;  %v1632_v42 = vld [vmem:[#allocation2 + $0x500] sm:$0xff] }
 0x1db   : > { %1871 = vst.msk [vmem:[%s3348_s4 + $0x38] sm:$0xff] %vm579_vm0, %v1822_v29  ;;  %v1529_v3 = vmax.f32 %v1480_v46, 0.0  ;;  %v1775_v54 = vmax.f32 %v1726_v57, 0.0  ;;  %v1432_v44 = vmul.f32 %v1383_v28, %v2749_v31  ;;  %v1678_v32 = vmul.f32 %v1629_v63, %v2749_v31  ;;  %v938_v46 = vld [vmem:[#allocation2 + $0x70] sm:$0xff] }
 0x1dc   : > { %v1823_v33 = vmax.f32 %v1577_v40, %v1774_v53  ;;  %v1332_v12 = vmax.f32 %v1086_v4, %v1283_v30  ;;  %v1038_v58 = vadd.f32 %v2758_v18, %v986_v47  ;;  %v1235_v34 = vadd.f32 %v1186_v50, %v2758_v18  ;;  %v1141_v50 = vld [vmem:[#allocation2 + $0x1f8] sm:$0xff] }
 0x1dd   : > { %v1481_v51 = vadd.f32 %v1432_v44, %v2758_v18  ;;  %v1727_v5 = vadd.f32 %v1678_v32, %v2758_v18  ;;  %v987_v48 = vmul.f32 %v2749_v31, %v935_v61  ;;  %v1187_v7 = vmul.f32 %v1138_v8, %v2749_v31  ;;  %v1387_v61 = vld [vmem:[#allocation2 + $0x380] sm:$0xff]  ;;  %v1633_v32 = vld [vmem:[#allocation2 + $0x508] sm:$0xff] }
 0x1de   : > { %1872 = vst.msk [vmem:[%s3348_s4 + $0x40] sm:$0xff] %vm579_vm0, %v1823_v33  ;;  %v1578_v16 = vmax.f32 %v1332_v12, %v1529_v3  ;;  %v1087_v9 = vmax.f32 %v1038_v58, 0.0  ;;  %v1284_v2 = vmax.f32 %v1235_v34, 0.0  ;;  %v1433_v21 = vmul.f32 %v1384_v1, %v2749_v31 }
 0x1df   : > { %v1530_v6 = vmax.f32 %v1481_v51, 0.0  ;;  %v1776_v37 = vmax.f32 %v1727_v5, 0.0  ;;  %v1039_v13 = vadd.f32 %v2758_v18, %v987_v48  ;;  %v1236_v23 = vadd.f32 %v1187_v7, %v2758_v18  ;;  %v939_v7 = vld [vmem:[#allocation2 + $0x78] sm:$0xff] }
 0x1e0   : > { %v1824_v55 = vmax.f32 %v1578_v16, %v1775_v54  ;;  %v1333_v10 = vmax.f32 %v1087_v9, %v1284_v2  ;;  %v1482_v24 = vadd.f32 %v1433_v21, %v2758_v18  ;;  %v1679_v17 = vmul.f32 %v1630_v62, %v2749_v31  ;;  %v1142_v21 = vld [vmem:[#allocation2 + $0x200] sm:$0xff] }
 0x1e1   : > { %v1088_v56 = vmax.f32 %v1039_v13, 0.0  ;;  %v1285_v14 = vmax.f32 %v1236_v23, 0.0  ;;  %v988_v25 = vmul.f32 %v2749_v31, %v936_v22  ;;  %v1188_v26 = vmul.f32 %v1139_v52, %v2749_v31  ;;  %v1388_v22 = vld [vmem:[#allocation2 + $0x388] sm:$0xff]  ;;  %v1634_v23 = vld [vmem:[#allocation2 + $0x510] sm:$0xff] }
 0x1e2   : > { %1873 = vst.msk [vmem:[%s3348_s4 + $0x48] sm:$0xff] %vm579_vm0, %v1824_v55  ;;  %v1579_v15 = vmax.f32 %v1333_v10, %v1530_v6  ;;  %v1531_v45 = vmax.f32 %v1482_v24, 0.0  ;;  %v1728_v35 = vadd.f32 %v1679_v17, %v2758_v18  ;;  %v1434_v60 = vmul.f32 %v1385_v11, %v2749_v31  ;;  %v940_v17 = vld [vmem:[#allocation2 + $0x80] sm:$0xff] }
 0x1e3   : > { %v1334_v20 = vmax.f32 %v1088_v56, %v1285_v14  ;;  %v1040_v59 = vadd.f32 %v2758_v18, %v988_v25  ;;  %v1237_v27 = vadd.f32 %v1188_v26, %v2758_v18  ;;  %v1680_v49 = vmul.f32 %v1631_v41, %v2749_v31  ;;  %v1143_v26 = vld [vmem:[#allocation2 + $0x208] sm:$0xff] }
 0x1e4   : > { %v1825_v36 = vmax.f32 %v1579_v15, %v1776_v37  ;;  %v1777_v0 = vmax.f32 %v1728_v35, 0.0  ;;  %v1483_v43 = vadd.f32 %v1434_v60, %v2758_v18  ;;  %v989_v53 = vmul.f32 %v2749_v31, %v937_v19 }
 0x1e5   : > { %v1580_v28 = vmax.f32 %v1334_v20, %v1531_v45  ;;  %v1089_v63 = vmax.f32 %v1040_v59, 0.0  ;;  %v1286_v29 = vmax.f32 %v1237_v27, 0.0  ;;  %v1729_v4 = vadd.f32 %v1680_v49, %v2758_v18  ;;  %v1389_v49 = vld [vmem:[#allocation2 + $0x390] sm:$0xff] }
 0x1e6   : > { %1874 = vst.msk [vmem:[%s3348_s4 + $0x50] sm:$0xff] %vm579_vm0, %v1825_v36  ;;  %v1532_v57 = vmax.f32 %v1483_v43, 0.0  ;;  %v1041_v40 = vadd.f32 %v2758_v18, %v989_v53  ;;  %v1189_v30 = vmul.f32 %v1140_v39, %v2749_v31  ;;  %v1435_v47 = vmul.f32 %v1386_v38, %v2749_v31  ;;  %v1635_v39 = vld [vmem:[#allocation2 + $0x518] sm:$0xff]  ;;  %v941_v53 = vld [vmem:[#allocation2 + $0x88] sm:$0xff] }
 0x1e7   : > { %v1826_v8 = vmax.f32 %v1580_v28, %v1777_v0  ;;  %v1335_v3 = vmax.f32 %v1089_v63, %v1286_v29  ;;  %v1778_v54 = vmax.f32 %v1729_v4, 0.0  ;;  %v1681_v44 = vmul.f32 %v1632_v42, %v2749_v31  ;;  %v1144_v4 = vld [vmem:[#allocation2 + $0x210] sm:$0xff] }
 0x1e8   : > { %v1090_v1 = vmax.f32 %v1041_v40, 0.0  ;;  %v1238_v33 = vadd.f32 %v1189_v30, %v2758_v18  ;;  %v1484_v12 = vadd.f32 %v1435_v47, %v2758_v18  ;;  %v990_v58 = vmul.f32 %v2749_v31, %v938_v46  ;;  %v1390_v47 = vld [vmem:[#allocation2 + $0x398] sm:$0xff] }
 0x1e9   : > { %1875 = vst.msk [vmem:[%s3348_s4 + $0x58] sm:$0xff] %vm579_vm0, %v1826_v8  ;;  %v1581_v34 = vmax.f32 %v1335_v3, %v1532_v57  ;;  %v1730_v51 = vadd.f32 %v1681_v44, %v2758_v18  ;;  %v1190_v5 = vmul.f32 %v1141_v50, %v2749_v31  ;;  %v1436_v48 = vmul.f32 %v1387_v61, %v2749_v31  ;;  %v1636_v50 = vld [vmem:[#allocation2 + $0x520] sm:$0xff] }
 0x1ea   : > { %v1287_v62 = vmax.f32 %v1238_v33, 0.0  ;;  %v1533_v16 = vmax.f32 %v1484_v12, 0.0  ;;  %v1042_v9 = vadd.f32 %v2758_v18, %v990_v58  ;;  %v1682_v2 = vmul.f32 %v1633_v32, %v2749_v31 }
 0x1eb   : > { %v1827_v52 = vmax.f32 %v1581_v34, %v1778_v54  ;;  %v1779_v6 = vmax.f32 %v1730_v51, 0.0  ;;  %v1239_v37 = vadd.f32 %v1190_v5, %v2758_v18  ;;  %v1485_v13 = vadd.f32 %v1436_v48, %v2758_v18  ;;  %v942_v5 = vld [vmem:[#allocation2 + $0x90] sm:$0xff]  ;;  %v1145_v48 = vld [vmem:[#allocation2 + $0x218] sm:$0xff] }
 0x1ec   : > { %v1336_v11 = vmax.f32 %v1090_v1, %v1287_v62  ;;  %v1091_v55 = vmax.f32 %v1042_v9, 0.0  ;;  %v1731_v10 = vadd.f32 %v1682_v2, %v2758_v18  ;;  %v991_v24 = vmul.f32 %v2749_v31, %v939_v7  ;;  %v1391_v2 = vld [vmem:[#allocation2 + $0x3a0] sm:$0xff] }
 0x1ed   : > { %1876 = vst.msk [vmem:[%s3348_s4 + $0x60] sm:$0xff] %vm579_vm0, %v1827_v52  ;;  %v1288_v41 = vmax.f32 %v1239_v37, 0.0  ;;  %v1534_v56 = vmax.f32 %v1485_v13, 0.0  ;;  %v1191_v14 = vmul.f32 %v1142_v21, %v2749_v31  ;;  %v1437_v25 = vmul.f32 %v1388_v22, %v2749_v31  ;;  %v1637_v21 = vld [vmem:[#allocation2 + $0x528] sm:$0xff] }
 0x1ee   : > { %v1582_v19 = vmax.f32 %v1336_v11, %v1533_v16  ;;  %v1780_v15 = vmax.f32 %v1731_v10, 0.0  ;;  %v1043_v45 = vadd.f32 %v2758_v18, %v991_v24  ;;  %v1683_v35 = vmul.f32 %v1634_v23, %v2749_v31  ;;  %v943_v10 = vld [vmem:[#allocation2 + $0x98] sm:$0xff]  ;;  %v1146_v24 = vld [vmem:[#allocation2 + $0x220] sm:$0xff] }
 0x1ef   : > { %v1337_v60 = vmax.f32 %v1091_v55, %v1288_v41  ;;  %v1240_v20 = vadd.f32 %v1191_v14, %v2758_v18  ;;  %v1486_v59 = vadd.f32 %v1437_v25, %v2758_v18  ;;  %v992_v27 = vmul.f32 %v2749_v31, %v940_v17  ;;  %v1392_v25 = vld [vmem:[#allocation2 + $0x3a8] sm:$0xff] }
 0x1f0   : > { %v1828_v38 = vmax.f32 %v1582_v19, %v1779_v6  ;;  %v1092_v36 = vmax.f32 %v1043_v45, 0.0  ;;  %v1732_v0 = vadd.f32 %v1683_v35, %v2758_v18  ;;  %v1192_v43 = vmul.f32 %v1143_v26, %v2749_v31 }
 0x1f1   : > { %v1583_v42 = vmax.f32 %v1337_v60, %v1534_v56  ;;  %v1289_v28 = vmax.f32 %v1240_v20, 0.0  ;;  %v1535_v63 = vmax.f32 %v1486_v59, 0.0  ;;  %v1044_v29 = vadd.f32 %v2758_v18, %v992_v27  ;;  %v1638_v27 = vld [vmem:[#allocation2 + $0x530] sm:$0xff] }
 0x1f2   : > { %1877 = vst.msk [vmem:[%s3348_s4 + $0x68] sm:$0xff] %vm579_vm0, %v1828_v38  ;;  %v1781_v46 = vmax.f32 %v1732_v0, 0.0  ;;  %v1241_v57 = vadd.f32 %v1192_v43, %v2758_v18  ;;  %v1438_v40 = vmul.f32 %v1389_v49, %v2749_v31  ;;  %v1684_v30 = vmul.f32 %v1635_v39, %v2749_v31  ;;  %v944_v0 = vld [vmem:[#allocation2 + $0xa0] sm:$0xff]  ;;  %v1147_v43 = vld [vmem:[#allocation2 + $0x228] sm:$0xff] }
 0x1f3   : > { %v1829_v61 = vmax.f32 %v1583_v42, %v1780_v15  ;;  %v1338_v8 = vmax.f32 %v1092_v36, %v1289_v28  ;;  %v1093_v3 = vmax.f32 %v1044_v29, 0.0  ;;  %v993_v54 = vmul.f32 %v2749_v31, %v941_v53  ;;  %v1393_v29 = vld [vmem:[#allocation2 + $0x3b0] sm:$0xff] }
 0x1f4   : > { %v1290_v44 = vmax.f32 %v1241_v57, 0.0  ;;  %v1487_v32 = vadd.f32 %v1438_v40, %v2758_v18  ;;  %v1733_v1 = vadd.f32 %v1684_v30, %v2758_v18  ;;  %v1193_v33 = vmul.f32 %v1144_v4, %v2749_v31  ;;  %v1639_v30 = vld [vmem:[#allocation2 + $0x538] sm:$0xff] }
 0x1f5   : > { %1878 = vst.msk [vmem:[%s3348_s4 + $0x70] sm:$0xff] %vm579_vm0, %v1829_v61  ;;  %v1584_v12 = vmax.f32 %v1338_v8, %v1535_v63  ;;  %v1045_v58 = vadd.f32 %v2758_v18, %v993_v54  ;;  %v1439_v34 = vmul.f32 %v1390_v47, %v2749_v31  ;;  %v1685_v51 = vmul.f32 %v1636_v50, %v2749_v31 }
 0x1f6   : > { %v1339_v7 = vmax.f32 %v1093_v3, %v1290_v44  ;;  %v1536_v62 = vmax.f32 %v1487_v32, 0.0  ;;  %v1782_v16 = vmax.f32 %v1733_v1, 0.0  ;;  %v1242_v9 = vadd.f32 %v1193_v33, %v2758_v18  ;;  %v945_v3 = vld [vmem:[#allocation2 + $0xa8] sm:$0xff] }
 0x1f7   : > { %v1830_v22 = vmax.f32 %v1584_v12, %v1781_v46  ;;  %v1094_v52 = vmax.f32 %v1045_v58, 0.0  ;;  %v1488_v6 = vadd.f32 %v1439_v34, %v2758_v18  ;;  %v1734_v37 = vadd.f32 %v1685_v51, %v2758_v18  ;;  %v1148_v51 = vld [vmem:[#allocation2 + $0x230] sm:$0xff] }
 0x1f8   : > { %v1585_v13 = vmax.f32 %v1339_v7, %v1536_v62  ;;  %v1291_v23 = vmax.f32 %v1242_v9, 0.0  ;;  %v994_v11 = vmul.f32 %v2749_v31, %v942_v5  ;;  %v1194_v55 = vmul.f32 %v1145_v48, %v2749_v31  ;;  %v1394_v5 = vld [vmem:[#allocation2 + $0x3b8] sm:$0xff]  ;;  %v1640_v9 = vld [vmem:[#allocation2 + $0x540] sm:$0xff] }
 0x1f9   : > { %1879 = vst.msk [vmem:[%s3348_s4 + $0x78] sm:$0xff] %vm579_vm0, %v1830_v22  ;;  %v1537_v17 = vmax.f32 %v1488_v6, 0.0  ;;  %v1783_v41 = vmax.f32 %v1734_v37, 0.0  ;;  %v1440_v56 = vmul.f32 %v1391_v2, %v2749_v31  ;;  %v1686_v14 = vmul.f32 %v1637_v21, %v2749_v31  ;;  %v946_v6 = vld [vmem:[#allocation2 + $0xb0] sm:$0xff] }
 0x1fa   : > { %v1831_v26 = vmax.f32 %v1585_v13, %v1782_v16  ;;  %v1340_v19 = vmax.f32 %v1094_v52, %v1291_v23  ;;  %v1046_v15 = vadd.f32 %v2758_v18, %v994_v11  ;;  %v1243_v45 = vadd.f32 %v1194_v55, %v2758_v18  ;;  %v1149_v55 = vld [vmem:[#allocation2 + $0x238] sm:$0xff] }
 0x1fb   : > { %v1489_v35 = vadd.f32 %v1440_v56, %v2758_v18  ;;  %v1735_v60 = vadd.f32 %v1686_v14, %v2758_v18  ;;  %v995_v20 = vmul.f32 %v2749_v31, %v943_v10  ;;  %v1195_v59 = vmul.f32 %v1146_v24, %v2749_v31  ;;  %v1395_v10 = vld [vmem:[#allocation2 + $0x3c0] sm:$0xff]  ;;  %v1641_v14 = vld [vmem:[#allocation2 + $0x548] sm:$0xff] }
 0x1fc   : > { %1880 = vst.msk [vmem:[%s3348_s4 + $0x80] sm:$0xff] %vm579_vm0, %v1831_v26  ;;  %v1586_v49 = vmax.f32 %v1340_v19, %v1537_v17  ;;  %v1095_v39 = vmax.f32 %v1046_v15, 0.0  ;;  %v1292_v38 = vmax.f32 %v1243_v45, 0.0  ;;  %v1441_v36 = vmul.f32 %v1392_v25, %v2749_v31 }
 0x1fd   : > { %v1538_v53 = vmax.f32 %v1489_v35, 0.0  ;;  %v1784_v42 = vmax.f32 %v1735_v60, 0.0  ;;  %v1047_v28 = vadd.f32 %v2758_v18, %v995_v20  ;;  %v1244_v63 = vadd.f32 %v1195_v59, %v2758_v18  ;;  %v947_v59 = vld [vmem:[#allocation2 + $0xb8] sm:$0xff] }
 0x1fe   : > { %v1832_v4 = vmax.f32 %v1586_v49, %v1783_v41  ;;  %v1341_v46 = vmax.f32 %v1095_v39, %v1292_v38  ;;  %v1490_v57 = vadd.f32 %v1441_v36, %v2758_v18  ;;  %v1687_v40 = vmul.f32 %v1638_v27, %v2749_v31  ;;  %v1150_v36 = vld [vmem:[#allocation2 + $0x240] sm:$0xff] }
 0x1ff   : > { %v1096_v47 = vmax.f32 %v1047_v28, 0.0  ;;  %v1293_v50 = vmax.f32 %v1244_v63, 0.0  ;;  %v996_v61 = vmul.f32 %v2749_v31, %v944_v0  ;;  %v1196_v8 = vmul.f32 %v1147_v43, %v2749_v31  ;;  %v1396_v0 = vld [vmem:[#allocation2 + $0x3c8] sm:$0xff]  ;;  %v1642_v63 = vld [vmem:[#allocation2 + $0x550] sm:$0xff] }
 0x200   : > { %1881 = vst.msk [vmem:[%s3348_s4 + $0x88] sm:$0xff] %vm579_vm0, %v1832_v4  ;;  %v1587_v54 = vmax.f32 %v1341_v46, %v1538_v53  ;;  %v1539_v44 = vmax.f32 %v1490_v57, 0.0  ;;  %v1736_v32 = vadd.f32 %v1687_v40, %v2758_v18  ;;  %v1442_v1 = vmul.f32 %v1393_v29, %v2749_v31  ;;  %v948_v40 = vld [vmem:[#allocation2 + $0xc0] sm:$0xff] }
 0x201   : > { %v1342_v33 = vmax.f32 %v1096_v47, %v1293_v50  ;;  %v1048_v12 = vadd.f32 %v2758_v18, %v996_v61  ;;  %v1245_v58 = vadd.f32 %v1196_v8, %v2758_v18  ;;  %v1688_v34 = vmul.f32 %v1639_v30, %v2749_v31  ;;  %v1151_v8 = vld [vmem:[#allocation2 + $0x248] sm:$0xff] }
 0x202   : > { %v1833_v48 = vmax.f32 %v1587_v54, %v1784_v42  ;;  %v1785_v7 = vmax.f32 %v1736_v32, 0.0  ;;  %v1491_v62 = vadd.f32 %v1442_v1, %v2758_v18  ;;  %v997_v16 = vmul.f32 %v2749_v31, %v945_v3 }
 0x203   : > { %v1588_v2 = vmax.f32 %v1342_v33, %v1539_v44  ;;  %v1097_v21 = vmax.f32 %v1048_v12, 0.0  ;;  %v1294_v22 = vmax.f32 %v1245_v58, 0.0  ;;  %v1737_v52 = vadd.f32 %v1688_v34, %v2758_v18  ;;  %v1397_v34 = vld [vmem:[#allocation2 + $0x3d0] sm:$0xff] }
 0x204   : > { %1882 = vst.msk [vmem:[%s3348_s4 + $0x90] sm:$0xff] %vm579_vm0, %v1833_v48  ;;  %v1540_v37 = vmax.f32 %v1491_v62, 0.0  ;;  %v1049_v13 = vadd.f32 %v2758_v18, %v997_v16  ;;  %v1197_v23 = vmul.f32 %v1148_v51, %v2749_v31  ;;  %v1443_v11 = vmul.f32 %v1394_v5, %v2749_v31  ;;  %v1643_v51 = vld [vmem:[#allocation2 + $0x558] sm:$0xff]  ;;  %v949_v16 = vld [vmem:[#allocation2 + $0xc8] sm:$0xff] }
 0x205   : > { %v1834_v24 = vmax.f32 %v1588_v2, %v1785_v7  ;;  %v1343_v17 = vmax.f32 %v1097_v21, %v1294_v22  ;;  %v1786_v41 = vmax.f32 %v1737_v52, 0.0  ;;  %v1689_v56 = vmul.f32 %v1640_v9, %v2749_v31  ;;  %v1152_v52 = vld [vmem:[#allocation2 + $0x250] sm:$0xff] }
 0x206   : > { %v1098_v25 = vmax.f32 %v1049_v13, 0.0  ;;  %v1246_v26 = vadd.f32 %v1197_v23, %v2758_v18  ;;  %v1492_v19 = vadd.f32 %v1443_v11, %v2758_v18  ;;  %v998_v15 = vmul.f32 %v2749_v31, %v946_v6  ;;  %v1398_v11 = vld [vmem:[#allocation2 + $0x3d8] sm:$0xff] }
 0x207   : > { %1883 = vst.msk [vmem:[%s3348_s4 + $0x98] sm:$0xff] %vm579_vm0, %v1834_v24  ;;  %v1589_v45 = vmax.f32 %v1343_v17, %v1540_v37  ;;  %v1738_v35 = vadd.f32 %v1689_v56, %v2758_v18  ;;  %v1198_v60 = vmul.f32 %v1149_v55, %v2749_v31  ;;  %v1444_v20 = vmul.f32 %v1395_v10, %v2749_v31  ;;  %v1644_v55 = vld [vmem:[#allocation2 + $0x560] sm:$0xff] }
 0x208   : > { %v1295_v27 = vmax.f32 %v1246_v26, 0.0  ;;  %v1541_v49 = vmax.f32 %v1492_v19, 0.0  ;;  %v1050_v39 = vadd.f32 %v2758_v18, %v998_v15  ;;  %v1690_v38 = vmul.f32 %v1641_v14, %v2749_v31 }
 0x209   : > { %v1835_v43 = vmax.f32 %v1589_v45, %v1786_v41  ;;  %v1787_v53 = vmax.f32 %v1738_v35, 0.0  ;;  %v1247_v42 = vadd.f32 %v1198_v60, %v2758_v18  ;;  %v1493_v28 = vadd.f32 %v1444_v20, %v2758_v18  ;;  %v950_v60 = vld [vmem:[#allocation2 + $0xd0] sm:$0xff]  ;;  %v1153_v20 = vld [vmem:[#allocation2 + $0x258] sm:$0xff] }
 0x20a   : > { %v1344_v29 = vmax.f32 %v1098_v25, %v1295_v27  ;;  %v1099_v4 = vmax.f32 %v1050_v39, 0.0  ;;  %v1739_v46 = vadd.f32 %v1690_v38, %v2758_v18  ;;  %v999_v57 = vmul.f32 %v2749_v31, %v947_v59  ;;  %v1399_v38 = vld [vmem:[#allocation2 + $0x3e0] sm:$0xff] }
 0x20b   : > { %1884 = vst.msk [vmem:[%s3348_s4 + $0xa0] sm:$0xff] %vm579_vm0, %v1835_v43  ;;  %v1296_v30 = vmax.f32 %v1247_v42, 0.0  ;;  %v1542_v47 = vmax.f32 %v1493_v28, 0.0  ;;  %v1199_v50 = vmul.f32 %v1150_v36, %v2749_v31  ;;  %v1445_v61 = vmul.f32 %v1396_v0, %v2749_v31  ;;  %v1645_v36 = vld [vmem:[#allocation2 + $0x568] sm:$0xff] }
 0x20c   : > { %v1590_v3 = vmax.f32 %v1344_v29, %v1541_v49  ;;  %v1788_v54 = vmax.f32 %v1739_v46, 0.0  ;;  %v1051_v44 = vadd.f32 %v2758_v18, %v999_v57  ;;  %v1691_v32 = vmul.f32 %v1642_v63, %v2749_v31  ;;  %v951_v46 = vld [vmem:[#allocation2 + $0xd8] sm:$0xff]  ;;  %v1154_v57 = vld [vmem:[#allocation2 + $0x260] sm:$0xff] }
 0x20d   : > { %v1345_v1 = vmax.f32 %v1099_v4, %v1296_v30  ;;  %v1248_v33 = vadd.f32 %v1199_v50, %v2758_v18  ;;  %v1494_v12 = vadd.f32 %v1445_v61, %v2758_v18  ;;  %v1000_v58 = vmul.f32 %v2749_v31, %v948_v40  ;;  %v1400_v61 = vld [vmem:[#allocation2 + $0x3e8] sm:$0xff] }
 0x20e   : > { %v1836_v5 = vmax.f32 %v1590_v3, %v1787_v53  ;;  %v1100_v48 = vmax.f32 %v1051_v44, 0.0  ;;  %v1740_v7 = vadd.f32 %v1691_v32, %v2758_v18  ;;  %v1200_v62 = vmul.f32 %v1151_v8, %v2749_v31 }
 0x20f   : > { %v1591_v9 = vmax.f32 %v1345_v1, %v1542_v47  ;;  %v1297_v2 = vmax.f32 %v1248_v33, 0.0  ;;  %v1543_v21 = vmax.f32 %v1494_v12, 0.0  ;;  %v1052_v22 = vadd.f32 %v2758_v18, %v1000_v58  ;;  %v1646_v58 = vld [vmem:[#allocation2 + $0x570] sm:$0xff] }
 0x210   : > { %1885 = vst.msk [vmem:[%s3348_s4 + $0xa8] sm:$0xff] %vm579_vm0, %v1836_v5  ;;  %v1789_v6 = vmax.f32 %v1740_v7, 0.0  ;;  %v1249_v37 = vadd.f32 %v1200_v62, %v2758_v18  ;;  %v1446_v13 = vmul.f32 %v1397_v34, %v2749_v31  ;;  %v1692_v23 = vmul.f32 %v1643_v51, %v2749_v31  ;;  %v952_v7 = vld [vmem:[#allocation2 + $0xe0] sm:$0xff]  ;;  %v1155_v62 = vld [vmem:[#allocation2 + $0x268] sm:$0xff] }
 0x211   : > { %v1837_v10 = vmax.f32 %v1591_v9, %v1788_v54  ;;  %v1346_v24 = vmax.f32 %v1100_v48, %v1297_v2  ;;  %v1101_v17 = vmax.f32 %v1052_v22, 0.0  ;;  %v1001_v41 = vmul.f32 %v2749_v31, %v949_v16  ;;  %v1401_v22 = vld [vmem:[#allocation2 + $0x3f0] sm:$0xff] }
 0x212   : > { %v1298_v56 = vmax.f32 %v1249_v37, 0.0  ;;  %v1495_v14 = vadd.f32 %v1446_v13, %v2758_v18  ;;  %v1741_v25 = vadd.f32 %v1692_v23, %v2758_v18  ;;  %v1201_v26 = vmul.f32 %v1152_v52, %v2749_v31  ;;  %v1647_v23 = vld [vmem:[#allocation2 + $0x578] sm:$0xff] }
 0x213   : > { %1886 = vst.msk [vmem:[%s3348_s4 + $0xb0] sm:$0xff] %vm579_vm0, %v1837_v10  ;;  %v1592_v19 = vmax.f32 %v1346_v24, %v1543_v21  ;;  %v1053_v15 = vadd.f32 %v2758_v18, %v1001_v41  ;;  %v1447_v45 = vmul.f32 %v1398_v11, %v2749_v31  ;;  %v1693_v35 = vmul.f32 %v1644_v55, %v2749_v31 }
 0x214   : > { %v1347_v59 = vmax.f32 %v1101_v17, %v1298_v56  ;;  %v1544_v27 = vmax.f32 %v1495_v14, 0.0  ;;  %v1790_v49 = vmax.f32 %v1741_v25, 0.0  ;;  %v1250_v39 = vadd.f32 %v1201_v26, %v2758_v18  ;;  %v953_v17 = vld [vmem:[#allocation2 + $0xe8] sm:$0xff] }
 0x215   : > { %v1838_v0 = vmax.f32 %v1592_v19, %v1789_v6  ;;  %v1102_v43 = vmax.f32 %v1053_v15, 0.0  ;;  %v1496_v53 = vadd.f32 %v1447_v45, %v2758_v18  ;;  %v1742_v42 = vadd.f32 %v1693_v35, %v2758_v18  ;;  %v1156_v35 = vld [vmem:[#allocation2 + $0x270] sm:$0xff] }
 0x216   : > { %v1593_v28 = vmax.f32 %v1347_v59, %v1544_v27  ;;  %v1299_v63 = vmax.f32 %v1250_v39, 0.0  ;;  %v1002_v29 = vmul.f32 %v2749_v31, %v950_v60  ;;  %v1202_v4 = vmul.f32 %v1153_v20, %v2749_v31  ;;  %v1402_v60 = vld [vmem:[#allocation2 + $0x3f8] sm:$0xff]  ;;  %v1648_v39 = vld [vmem:[#allocation2 + $0x580] sm:$0xff] }
 0x217   : > { %1887 = vst.msk [vmem:[%s3348_s4 + $0xb8] sm:$0xff] %vm579_vm0, %v1838_v0  ;;  %v1545_v40 = vmax.f32 %v1496_v53, 0.0  ;;  %v1791_v30 = vmax.f32 %v1742_v42, 0.0  ;;  %v1448_v47 = vmul.f32 %v1399_v38, %v2749_v31  ;;  %v1694_v50 = vmul.f32 %v1645_v36, %v2749_v31  ;;  %v954_v53 = vld [vmem:[#allocation2 + $0xf0] sm:$0xff] }
 0x218   : > { %v1839_v8 = vmax.f32 %v1593_v28, %v1790_v49  ;;  %v1348_v3 = vmax.f32 %v1102_v43, %v1299_v63  ;;  %v1054_v54 = vadd.f32 %v2758_v18, %v1002_v29  ;;  %v1251_v44 = vadd.f32 %v1202_v4, %v2758_v18  ;;  %v1157_v4 = vld [vmem:[#allocation2 + $0x278] sm:$0xff] }
 0x219   : > { %v1497_v32 = vadd.f32 %v1448_v47, %v2758_v18  ;;  %v1743_v1 = vadd.f32 %v1694_v50, %v2758_v18  ;;  %v1003_v33 = vmul.f32 %v2749_v31, %v951_v46  ;;  %v1203_v12 = vmul.f32 %v1154_v57, %v2749_v31  ;;  %v1403_v46 = vld [vmem:[#allocation2 + $0x400] sm:$0xff]  ;;  %v1649_v50 = vld [vmem:[#allocation2 + $0x588] sm:$0xff] }
 0x21a   : > { %1888 = vst.msk [vmem:[%s3348_s4 + $0xc0] sm:$0xff] %vm579_vm0, %v1839_v8  ;;  %v1594_v34 = vmax.f32 %v1348_v3, %v1545_v40  ;;  %v1103_v51 = vmax.f32 %v1054_v54, 0.0  ;;  %v1300_v5 = vmax.f32 %v1251_v44, 0.0  ;;  %v1449_v48 = vmul.f32 %v1400_v61, %v2749_v31 }
 0x21b   : > { %v1546_v16 = vmax.f32 %v1497_v32, 0.0  ;;  %v1792_v9 = vmax.f32 %v1743_v1, 0.0  ;;  %v1055_v2 = vadd.f32 %v2758_v18, %v1003_v33  ;;  %v1252_v21 = vadd.f32 %v1203_v12, %v2758_v18  ;;  %v955_v12 = vld [vmem:[#allocation2 + $0xf8] sm:$0xff] }
 0x21c   : > { %v1840_v52 = vmax.f32 %v1594_v34, %v1791_v30  ;;  %v1349_v6 = vmax.f32 %v1103_v51, %v1300_v5  ;;  %v1498_v37 = vadd.f32 %v1449_v48, %v2758_v18  ;;  %v1695_v13 = vmul.f32 %v1646_v58, %v2749_v31  ;;  %v1158_v48 = vld [vmem:[#allocation2 + $0x280] sm:$0xff] }
 0x21d   : > { %v1104_v11 = vmax.f32 %v1055_v2, 0.0  ;;  %v1301_v55 = vmax.f32 %v1252_v21, 0.0  ;;  %v1004_v10 = vmul.f32 %v2749_v31, %v952_v7  ;;  %v1204_v24 = vmul.f32 %v1155_v62, %v2749_v31  ;;  %v1404_v7 = vld [vmem:[#allocation2 + $0x408] sm:$0xff]  ;;  %v1650_v21 = vld [vmem:[#allocation2 + $0x590] sm:$0xff] }
 0x21e   : > { %1889 = vst.msk [vmem:[%s3348_s4 + $0xc8] sm:$0xff] %vm579_vm0, %v1840_v52  ;;  %v1595_v41 = vmax.f32 %v1349_v6, %v1546_v16  ;;  %v1547_v56 = vmax.f32 %v1498_v37, 0.0  ;;  %v1744_v14 = vadd.f32 %v1695_v13, %v2758_v18  ;;  %v1450_v25 = vmul.f32 %v1401_v22, %v2749_v31  ;;  %v956_v13 = vld [vmem:[#allocation2 + $0x100] sm:$0xff] }
 0x21f   : > { %v1350_v26 = vmax.f32 %v1104_v11, %v1301_v55  ;;  %v1056_v19 = vadd.f32 %v2758_v18, %v1004_v10  ;;  %v1253_v15 = vadd.f32 %v1204_v24, %v2758_v18  ;;  %v1696_v45 = vmul.f32 %v1647_v23, %v2749_v31  ;;  %v1159_v24 = vld [vmem:[#allocation2 + $0x288] sm:$0xff] }
 0x220   : > { %v1841_v20 = vmax.f32 %v1595_v41, %v1792_v9  ;;  %v1793_v59 = vmax.f32 %v1744_v14, 0.0  ;;  %v1499_v27 = vadd.f32 %v1450_v25, %v2758_v18  ;;  %v1005_v49 = vmul.f32 %v2749_v31, %v953_v17 }
 0x221   : > { %v1596_v38 = vmax.f32 %v1350_v26, %v1547_v56  ;;  %v1105_v36 = vmax.f32 %v1056_v19, 0.0  ;;  %v1302_v0 = vmax.f32 %v1253_v15, 0.0  ;;  %v1745_v43 = vadd.f32 %v1696_v45, %v2758_v18  ;;  %v1405_v45 = vld [vmem:[#allocation2 + $0x410] sm:$0xff] }
 0x222   : > { %1890 = vst.msk [vmem:[%s3348_s4 + $0xd0] sm:$0xff] %vm579_vm0, %v1841_v20  ;;  %v1548_v42 = vmax.f32 %v1499_v27, 0.0  ;;  %v1057_v28 = vadd.f32 %v2758_v18, %v1005_v49  ;;  %v1205_v63 = vmul.f32 %v1156_v35, %v2749_v31  ;;  %v1451_v29 = vmul.f32 %v1402_v60, %v2749_v31  ;;  %v1651_v35 = vld [vmem:[#allocation2 + $0x598] sm:$0xff]  ;;  %v957_v49 = vld [vmem:[#allocation2 + $0x108] sm:$0xff] }
 0x223   : > { %v1842_v57 = vmax.f32 %v1596_v38, %v1793_v59  ;;  %v1351_v40 = vmax.f32 %v1105_v36, %v1302_v0  ;;  %v1794_v30 = vmax.f32 %v1745_v43, 0.0  ;;  %v1697_v47 = vmul.f32 %v1648_v39, %v2749_v31  ;;  %v1160_v43 = vld [vmem:[#allocation2 + $0x290] sm:$0xff] }
 0x224   : > { %v1106_v61 = vmax.f32 %v1057_v28, 0.0  ;;  %v1254_v8 = vadd.f32 %v1205_v63, %v2758_v18  ;;  %v1500_v3 = vadd.f32 %v1451_v29, %v2758_v18  ;;  %v1006_v54 = vmul.f32 %v2749_v31, %v954_v53  ;;  %v1406_v29 = vld [vmem:[#allocation2 + $0x418] sm:$0xff] }
 0x225   : > { %1891 = vst.msk [vmem:[%s3348_s4 + $0xd8] sm:$0xff] %vm579_vm0, %v1842_v57  ;;  %v1597_v44 = vmax.f32 %v1351_v40, %v1548_v42  ;;  %v1746_v32 = vadd.f32 %v1697_v47, %v2758_v18  ;;  %v1206_v1 = vmul.f32 %v1157_v4, %v2749_v31  ;;  %v1452_v33 = vmul.f32 %v1403_v46, %v2749_v31  ;;  %v1652_v4 = vld [vmem:[#allocation2 + $0x5a0] sm:$0xff] }
 0x226   : > { %v1303_v58 = vmax.f32 %v1254_v8, 0.0  ;;  %v1549_v34 = vmax.f32 %v1500_v3, 0.0  ;;  %v1058_v51 = vadd.f32 %v2758_v18, %v1006_v54  ;;  %v1698_v5 = vmul.f32 %v1649_v50, %v2749_v31 }
 0x227   : > { %v1843_v62 = vmax.f32 %v1597_v44, %v1794_v30  ;;  %v1795_v16 = vmax.f32 %v1746_v32, 0.0  ;;  %v1255_v9 = vadd.f32 %v1206_v1, %v2758_v18  ;;  %v1501_v2 = vadd.f32 %v1452_v33, %v2758_v18  ;;  %v958_v1 = vld [vmem:[#allocation2 + $0x110] sm:$0xff]  ;;  %v1161_v33 = vld [vmem:[#allocation2 + $0x298] sm:$0xff] }
 0x228   : > { %v1352_v22 = vmax.f32 %v1106_v61, %v1303_v58  ;;  %v1107_v52 = vmax.f32 %v1058_v51, 0.0  ;;  %v1747_v6 = vadd.f32 %v1698_v5, %v2758_v18  ;;  %v1007_v37 = vmul.f32 %v2749_v31, %v955_v12  ;;  %v1407_v5 = vld [vmem:[#allocation2 + $0x420] sm:$0xff] }
 0x229   : > { %1892 = vst.msk [vmem:[%s3348_s4 + $0xe0] sm:$0xff] %vm579_vm0, %v1843_v62  ;;  %v1304_v23 = vmax.f32 %v1255_v9, 0.0  ;;  %v1550_v11 = vmax.f32 %v1501_v2, 0.0  ;;  %v1207_v55 = vmul.f32 %v1158_v48, %v2749_v31  ;;  %v1453_v10 = vmul.f32 %v1404_v7, %v2749_v31  ;;  %v1653_v48 = vld [vmem:[#allocation2 + $0x5a8] sm:$0xff] }
 0x22a   : > { %v1598_v17 = vmax.f32 %v1352_v22, %v1549_v34  ;;  %v1796_v41 = vmax.f32 %v1747_v6, 0.0  ;;  %v1059_v56 = vadd.f32 %v2758_v18, %v1007_v37  ;;  %v1699_v14 = vmul.f32 %v1650_v21, %v2749_v31  ;;  %v959_v6 = vld [vmem:[#allocation2 + $0x118] sm:$0xff]  ;;  %v1162_v37 = vld [vmem:[#allocation2 + $0x2a0] sm:$0xff] }
 0x22b   : > { %v1353_v25 = vmax.f32 %v1107_v52, %v1304_v23  ;;  %v1256_v26 = vadd.f32 %v1207_v55, %v2758_v18  ;;  %v1502_v19 = vadd.f32 %v1453_v10, %v2758_v18  ;;  %v1008_v15 = vmul.f32 %v2749_v31, %v956_v13  ;;  %v1408_v10 = vld [vmem:[#allocation2 + $0x428] sm:$0xff] }
 0x22c   : > { %v1844_v60 = vmax.f32 %v1598_v17, %v1795_v16  ;;  %v1108_v20 = vmax.f32 %v1059_v56, 0.0  ;;  %v1748_v59 = vadd.f32 %v1699_v14, %v2758_v18  ;;  %v1208_v27 = vmul.f32 %v1159_v24, %v2749_v31 }
 0x22d   : > { %v1599_v39 = vmax.f32 %v1353_v25, %v1550_v11  ;;  %v1305_v38 = vmax.f32 %v1256_v26, 0.0  ;;  %v1551_v36 = vmax.f32 %v1502_v19, 0.0  ;;  %v1060_v0 = vadd.f32 %v2758_v18, %v1008_v15  ;;  %v1654_v15 = vld [vmem:[#allocation2 + $0x5b0] sm:$0xff] }
 0x22e   : > { %1893 = vst.msk [vmem:[%s3348_s4 + $0xe8] sm:$0xff] %vm579_vm0, %v1844_v60  ;;  %v1797_v53 = vmax.f32 %v1748_v59, 0.0  ;;  %v1257_v42 = vadd.f32 %v1208_v27, %v2758_v18  ;;  %v1454_v28 = vmul.f32 %v1405_v45, %v2749_v31  ;;  %v1700_v63 = vmul.f32 %v1651_v35, %v2749_v31  ;;  %v960_v59 = vld [vmem:[#allocation2 + $0x120] sm:$0xff]  ;;  %v1163_v27 = vld [vmem:[#allocation2 + $0x2a8] sm:$0xff] }
 0x22f   : > { %v1845_v46 = vmax.f32 %v1599_v39, %v1796_v41  ;;  %v1354_v57 = vmax.f32 %v1108_v20, %v1305_v38  ;;  %v1109_v40 = vmax.f32 %v1060_v0, 0.0  ;;  %v1009_v30 = vmul.f32 %v2749_v31, %v957_v49  ;;  %v1409_v0 = vld [vmem:[#allocation2 + $0x430] sm:$0xff] }
 0x230   : > { %v1306_v47 = vmax.f32 %v1257_v42, 0.0  ;;  %v1503_v50 = vadd.f32 %v1454_v28, %v2758_v18  ;;  %v1749_v61 = vadd.f32 %v1700_v63, %v2758_v18  ;;  %v1209_v8 = vmul.f32 %v1160_v43, %v2749_v31  ;;  %v1655_v63 = vld [vmem:[#allocation2 + $0x5b8] sm:$0xff] }
 0x231   : > { %1894 = vst.msk [vmem:[%s3348_s4 + $0xf0] sm:$0xff] %vm579_vm0, %v1845_v46  ;;  %v1600_v3 = vmax.f32 %v1354_v57, %v1551_v36  ;;  %v1061_v54 = vadd.f32 %v2758_v18, %v1009_v30  ;;  %v1455_v44 = vmul.f32 %v1406_v29, %v2749_v31  ;;  %v1701_v32 = vmul.f32 %v1652_v4, %v2749_v31 }
 0x232   : > { %v1355_v12 = vmax.f32 %v1109_v40, %v1306_v47  ;;  %v1552_v58 = vmax.f32 %v1503_v50, 0.0  ;;  %v1798_v34 = vmax.f32 %v1749_v61, 0.0  ;;  %v1258_v51 = vadd.f32 %v1209_v8, %v2758_v18  ;;  %v961_v40 = vld [vmem:[#allocation2 + $0x128] sm:$0xff] }
 0x233   : > { %v1846_v7 = vmax.f32 %v1600_v3, %v1797_v53  ;;  %v1110_v62 = vmax.f32 %v1061_v54, 0.0  ;;  %v1504_v16 = vadd.f32 %v1455_v44, %v2758_v18  ;;  %v1750_v9 = vadd.f32 %v1701_v32, %v2758_v18  ;;  %v1164_v32 = vld [vmem:[#allocation2 + $0x2b0] sm:$0xff] }
 0x234   : > { %v1601_v2 = vmax.f32 %v1355_v12, %v1552_v58  ;;  %v1307_v21 = vmax.f32 %v1258_v51, 0.0  ;;  %v1010_v22 = vmul.f32 %v2749_v31, %v958_v1  ;;  %v1210_v52 = vmul.f32 %v1161_v33, %v2749_v31  ;;  %v1410_v1 = vld [vmem:[#allocation2 + $0x438] sm:$0xff]  ;;  %v1656_v51 = vld [vmem:[#allocation2 + $0x5c0] sm:$0xff] }
 0x235   : > { %1895 = vst.msk [vmem:[%s3348_s4 + $0xf8] sm:$0xff] %vm579_vm0, %v1846_v7  ;;  %v1553_v13 = vmax.f32 %v1504_v16, 0.0  ;;  %v1799_v23 = vmax.f32 %v1750_v9, 0.0  ;;  %v1456_v11 = vmul.f32 %v1407_v5, %v2749_v31  ;;  %v1702_v55 = vmul.f32 %v1653_v48, %v2749_v31  ;;  %v962_v16 = vld [vmem:[#allocation2 + $0x130] sm:$0xff] }
 0x236   : > { %v1847_v24 = vmax.f32 %v1601_v2, %v1798_v34  ;;  %v1356_v17 = vmax.f32 %v1110_v62, %v1307_v21  ;;  %v1062_v41 = vadd.f32 %v2758_v18, %v1010_v22  ;;  %v1259_v56 = vadd.f32 %v1210_v52, %v2758_v18  ;;  %v1165_v52 = vld [vmem:[#allocation2 + $0x2b8] sm:$0xff] }
 0x237   : > { %v1505_v14 = vadd.f32 %v1456_v11, %v2758_v18  ;;  %v1751_v25 = vadd.f32 %v1702_v55, %v2758_v18  ;;  %v1011_v26 = vmul.f32 %v2749_v31, %v959_v6  ;;  %v1211_v19 = vmul.f32 %v1162_v37, %v2749_v31  ;;  %v1411_v6 = vld [vmem:[#allocation2 + $0x440] sm:$0xff]  ;;  %v1657_v55 = vld [vmem:[#allocation2 + $0x5c8] sm:$0xff] }
 0x238   : > { %1896 = vst.msk [vmem:[%s3348_s4 + $0x100] sm:$0xff] %vm579_vm0, %v1847_v24  ;;  %v1602_v45 = vmax.f32 %v1356_v17, %v1553_v13  ;;  %v1111_v35 = vmax.f32 %v1062_v41, 0.0  ;;  %v1308_v60 = vmax.f32 %v1259_v56, 0.0  ;;  %v1457_v20 = vmul.f32 %v1408_v10, %v2749_v31 }
 0x239   : > { %v1554_v49 = vmax.f32 %v1505_v14, 0.0  ;;  %v1800_v39 = vmax.f32 %v1751_v25, 0.0  ;;  %v1063_v38 = vadd.f32 %v2758_v18, %v1011_v26  ;;  %v1260_v36 = vadd.f32 %v1211_v19, %v2758_v18  ;;  %v963_v19 = vld [vmem:[#allocation2 + $0x138] sm:$0xff] }
 0x23a   : > { %v1848_v43 = vmax.f32 %v1602_v45, %v1799_v23  ;;  %v1357_v53 = vmax.f32 %v1111_v35, %v1308_v60  ;;  %v1506_v42 = vadd.f32 %v1457_v20, %v2758_v18  ;;  %v1703_v28 = vmul.f32 %v1654_v15, %v2749_v31  ;;  %v1166_v20 = vld [vmem:[#allocation2 + $0x2c0] sm:$0xff] }
 0x23b   : > { %v1112_v29 = vmax.f32 %v1063_v38, 0.0  ;;  %v1309_v4 = vmax.f32 %v1260_v36, 0.0  ;;  %v1012_v46 = vmul.f32 %v2749_v31, %v960_v59  ;;  %v1212_v57 = vmul.f32 %v1163_v27, %v2749_v31  ;;  %v1412_v59 = vld [vmem:[#allocation2 + $0x448] sm:$0xff]  ;;  %v1658_v36 = vld [vmem:[#allocation2 + $0x5d0] sm:$0xff] }
 0x23c   : > { %1897 = vst.msk [vmem:[%s3348_s4 + $0x108] sm:$0xff] %vm579_vm0, %v1848_v43  ;;  %v1603_v30 = vmax.f32 %v1357_v53, %v1554_v49  ;;  %v1555_v47 = vmax.f32 %v1506_v42, 0.0  ;;  %v1752_v50 = vadd.f32 %v1703_v28, %v2758_v18  ;;  %v1458_v61 = vmul.f32 %v1409_v0, %v2749_v31  ;;  %v964_v28 = vld [vmem:[#allocation2 + $0x140] sm:$0xff] }
 0x23d   : > { %v1358_v8 = vmax.f32 %v1112_v29, %v1309_v4  ;;  %v1064_v3 = vadd.f32 %v2758_v18, %v1012_v46  ;;  %v1261_v54 = vadd.f32 %v1212_v57, %v2758_v18  ;;  %v1704_v44 = vmul.f32 %v1655_v63, %v2749_v31  ;;  %v1167_v57 = vld [vmem:[#allocation2 + $0x2c8] sm:$0xff] }
 0x23e   : > { %v1849_v33 = vmax.f32 %v1603_v30, %v1800_v39  ;;  %v1801_v12 = vmax.f32 %v1752_v50, 0.0  ;;  %v1507_v58 = vadd.f32 %v1458_v61, %v2758_v18  ;;  %v1013_v34 = vmul.f32 %v2749_v31, %v961_v40 }
 0x23f   : > { %v1604_v5 = vmax.f32 %v1358_v8, %v1555_v47  ;;  %v1113_v48 = vmax.f32 %v1064_v3, 0.0  ;;  %v1310_v7 = vmax.f32 %v1261_v54, 0.0  ;;  %v1753_v62 = vadd.f32 %v1704_v44, %v2758_v18  ;;  %v1413_v44 = vld [vmem:[#allocation2 + $0x450] sm:$0xff] }
 0x240   : > { %1898 = vst.msk [vmem:[%s3348_s4 + $0x110] sm:$0xff] %vm579_vm0, %v1849_v33  ;;  %v1556_v9 = vmax.f32 %v1507_v58, 0.0  ;;  %v1065_v2 = vadd.f32 %v2758_v18, %v1013_v34  ;;  %v1213_v21 = vmul.f32 %v1164_v32, %v2749_v31  ;;  %v1459_v22 = vmul.f32 %v1410_v1, %v2749_v31  ;;  %v1659_v32 = vld [vmem:[#allocation2 + $0x5d8] sm:$0xff]  ;;  %v965_v34 = vld [vmem:[#allocation2 + $0x148] sm:$0xff] }
 0x241   : > { %v1850_v37 = vmax.f32 %v1604_v5, %v1801_v12  ;;  %v1359_v13 = vmax.f32 %v1113_v48, %v1310_v7  ;;  %v1802_v23 = vmax.f32 %v1753_v62, 0.0  ;;  %v1705_v11 = vmul.f32 %v1656_v51, %v2749_v31  ;;  %v1168_v62 = vld [vmem:[#allocation2 + $0x2d0] sm:$0xff] }
 0x242   : > { %v1114_v10 = vmax.f32 %v1065_v2, 0.0  ;;  %v1262_v24 = vadd.f32 %v1213_v21, %v2758_v18  ;;  %v1508_v17 = vadd.f32 %v1459_v22, %v2758_v18  ;;  %v1014_v41 = vmul.f32 %v2749_v31, %v962_v16  ;;  %v1414_v22 = vld [vmem:[#allocation2 + $0x458] sm:$0xff] }
 0x243   : > { %1899 = vst.msk [vmem:[%s3348_s4 + $0x118] sm:$0xff] %vm579_vm0, %v1850_v37  ;;  %v1605_v56 = vmax.f32 %v1359_v13, %v1556_v9  ;;  %v1754_v14 = vadd.f32 %v1705_v11, %v2758_v18  ;;  %v1214_v25 = vmul.f32 %v1165_v52, %v2749_v31  ;;  %v1460_v26 = vmul.f32 %v1411_v6, %v2749_v31  ;;  %v1660_v52 = vld [vmem:[#allocation2 + $0x5e0] sm:$0xff] }
 0x244   : > { %v1311_v15 = vmax.f32 %v1262_v24, 0.0  ;;  %v1557_v45 = vmax.f32 %v1508_v17, 0.0  ;;  %v1066_v35 = vadd.f32 %v2758_v18, %v1014_v41  ;;  %v1706_v60 = vmul.f32 %v1657_v55, %v2749_v31 }
 0x245   : > { %v1851_v27 = vmax.f32 %v1605_v56, %v1802_v23  ;;  %v1803_v49 = vmax.f32 %v1754_v14, 0.0  ;;  %v1263_v39 = vadd.f32 %v1214_v25, %v2758_v18  ;;  %v1509_v38 = vadd.f32 %v1460_v26, %v2758_v18  ;;  %v966_v25 = vld [vmem:[#allocation2 + $0x150] sm:$0xff]  ;;  %v1169_v26 = vld [vmem:[#allocation2 + $0x2d8] sm:$0xff] }
 0x246   : > { %v1360_v0 = vmax.f32 %v1114_v10, %v1311_v15  ;;  %v1115_v43 = vmax.f32 %v1066_v35, 0.0  ;;  %v1755_v53 = vadd.f32 %v1706_v60, %v2758_v18  ;;  %v1015_v42 = vmul.f32 %v2749_v31, %v963_v19  ;;  %v1415_v60 = vld [vmem:[#allocation2 + $0x460] sm:$0xff] }
 0x247   : > { %1900 = vst.msk [vmem:[%s3348_s4 + $0x120] sm:$0xff] %vm579_vm0, %v1851_v27  ;;  %v1312_v63 = vmax.f32 %v1263_v39, 0.0  ;;  %v1558_v29 = vmax.f32 %v1509_v38, 0.0  ;;  %v1215_v4 = vmul.f32 %v1166_v20, %v2749_v31  ;;  %v1461_v46 = vmul.f32 %v1412_v59, %v2749_v31  ;;  %v1661_v20 = vld [vmem:[#allocation2 + $0x5e8] sm:$0xff] }
 0x248   : > { %v1606_v40 = vmax.f32 %v1360_v0, %v1557_v45  ;;  %v1804_v30 = vmax.f32 %v1755_v53, 0.0  ;;  %v1067_v47 = vadd.f32 %v2758_v18, %v1015_v42  ;;  %v1707_v50 = vmul.f32 %v1658_v36, %v2749_v31  ;;  %v967_v53 = vld [vmem:[#allocation2 + $0x158] sm:$0xff]  ;;  %v1170_v42 = vld [vmem:[#allocation2 + $0x2e0] sm:$0xff] }
 0x249   : > { %v1361_v61 = vmax.f32 %v1115_v43, %v1312_v63  ;;  %v1264_v8 = vadd.f32 %v1215_v4, %v2758_v18  ;;  %v1510_v3 = vadd.f32 %v1461_v46, %v2758_v18  ;;  %v1016_v54 = vmul.f32 %v2749_v31, %v964_v28  ;;  %v1416_v46 = vld [vmem:[#allocation2 + $0x468] sm:$0xff] }
 0x24a   : > { %v1852_v1 = vmax.f32 %v1606_v40, %v1803_v49  ;;  %v1116_v33 = vmax.f32 %v1067_v47, 0.0  ;;  %v1756_v12 = vadd.f32 %v1707_v50, %v2758_v18  ;;  %v1216_v58 = vmul.f32 %v1167_v57, %v2749_v31 }
 0x24b   : > { %v1607_v51 = vmax.f32 %v1361_v61, %v1558_v29  ;;  %v1313_v5 = vmax.f32 %v1264_v8, 0.0  ;;  %v1559_v48 = vmax.f32 %v1510_v3, 0.0  ;;  %v1068_v7 = vadd.f32 %v2758_v18, %v1016_v54  ;;  %v1662_v54 = vld [vmem:[#allocation2 + $0x5f0] sm:$0xff] }
 0x24c   : > { %1901 = vst.msk [vmem:[%s3348_s4 + $0x128] sm:$0xff] %vm579_vm0, %v1852_v1  ;;  %v1805_v16 = vmax.f32 %v1756_v12, 0.0  ;;  %v1265_v9 = vadd.f32 %v1216_v58, %v2758_v18  ;;  %v1462_v2 = vmul.f32 %v1413_v44, %v2749_v31  ;;  %v1708_v21 = vmul.f32 %v1659_v32, %v2749_v31  ;;  %v968_v12 = vld [vmem:[#allocation2 + $0x160] sm:$0xff]  ;;  %v1171_v58 = vld [vmem:[#allocation2 + $0x2e8] sm:$0xff] }
 0x24d   : > { %v1853_v6 = vmax.f32 %v1607_v51, %v1804_v30  ;;  %v1362_v37 = vmax.f32 %v1116_v33, %v1313_v5  ;;  %v1117_v13 = vmax.f32 %v1068_v7, 0.0  ;;  %v1017_v23 = vmul.f32 %v2749_v31, %v965_v34  ;;  %v1417_v7 = vld [vmem:[#allocation2 + $0x470] sm:$0xff] }
 0x24e   : > { %v1314_v11 = vmax.f32 %v1265_v9, 0.0  ;;  %v1511_v55 = vadd.f32 %v1462_v2, %v2758_v18  ;;  %v1757_v10 = vadd.f32 %v1708_v21, %v2758_v18  ;;  %v1217_v24 = vmul.f32 %v1168_v62, %v2749_v31  ;;  %v1663_v21 = vld [vmem:[#allocation2 + $0x5f8] sm:$0xff] }
 0x24f   : > { %1902 = vst.msk [vmem:[%s3348_s4 + $0x130] sm:$0xff] %vm579_vm0, %v1853_v6  ;;  %v1608_v17 = vmax.f32 %v1362_v37, %v1559_v48  ;;  %v1069_v41 = vadd.f32 %v2758_v18, %v1017_v23  ;;  %v1463_v56 = vmul.f32 %v1414_v22, %v2749_v31  ;;  %v1709_v14 = vmul.f32 %v1660_v52, %v2749_v31 }
 0x250   : > { %v1363_v19 = vmax.f32 %v1117_v13, %v1314_v11  ;;  %v1560_v15 = vmax.f32 %v1511_v55, 0.0  ;;  %v1806_v45 = vmax.f32 %v1757_v10, 0.0  ;;  %v1266_v35 = vadd.f32 %v1217_v24, %v2758_v18  ;;  %v969_v13 = vld [vmem:[#allocation2 + $0x168] sm:$0xff] }
 0x251   : > { %v1854_v59 = vmax.f32 %v1608_v17, %v1805_v16  ;;  %v1118_v27 = vmax.f32 %v1069_v41, 0.0  ;;  %v1512_v49 = vadd.f32 %v1463_v56, %v2758_v18  ;;  %v1758_v39 = vadd.f32 %v1709_v14, %v2758_v18  ;;  %v1172_v14 = vld [vmem:[#allocation2 + $0x2f0] sm:$0xff] }
 0x252   : > { %v1609_v38 = vmax.f32 %v1363_v19, %v1560_v15  ;;  %v1315_v36 = vmax.f32 %v1266_v35, 0.0  ;;  %v1018_v0 = vmul.f32 %v2749_v31, %v966_v25  ;;  %v1218_v43 = vmul.f32 %v1169_v26, %v2749_v31  ;;  %v1418_v25 = vld [vmem:[#allocation2 + $0x478] sm:$0xff]  ;;  %v1664_v35 = vld [vmem:[#allocation2 + $0x600] sm:$0xff] }
 0x253   : > { %1903 = vst.msk [vmem:[%s3348_s4 + $0x138] sm:$0xff] %vm579_vm0, %v1854_v59  ;;  %v1561_v28 = vmax.f32 %v1512_v49, 0.0  ;;  %v1807_v63 = vmax.f32 %v1758_v39, 0.0  ;;  %v1464_v29 = vmul.f32 %v1415_v60, %v2749_v31  ;;  %v1710_v4 = vmul.f32 %v1661_v20, %v2749_v31  ;;  %v970_v49 = vld [vmem:[#allocation2 + $0x170] sm:$0xff] }
 0x254   : > { %v1855_v57 = vmax.f32 %v1609_v38, %v1806_v45  ;;  %v1364_v40 = vmax.f32 %v1118_v27, %v1315_v36  ;;  %v1070_v30 = vadd.f32 %v2758_v18, %v1018_v0  ;;  %v1267_v47 = vadd.f32 %v1218_v43, %v2758_v18  ;;  %v1173_v43 = vld [vmem:[#allocation2 + $0x2f8] sm:$0xff] }
 0x255   : > { %v1513_v50 = vadd.f32 %v1464_v29, %v2758_v18  ;;  %v1759_v61 = vadd.f32 %v1710_v4, %v2758_v18  ;;  %v1019_v8 = vmul.f32 %v2749_v31, %v967_v53  ;;  %v1219_v3 = vmul.f32 %v1170_v42, %v2749_v31  ;;  %v1419_v53 = vld [vmem:[#allocation2 + $0x480] sm:$0xff]  ;;  %v1665_v4 = vld [vmem:[#allocation2 + $0x608] sm:$0xff] }
 0x256   : > { %1904 = vst.msk [vmem:[%s3348_s4 + $0x140] sm:$0xff] %vm579_vm0, %v1855_v57  ;;  %v1610_v44 = vmax.f32 %v1364_v40, %v1561_v28  ;;  %v1119_v32 = vmax.f32 %v1070_v30, 0.0  ;;  %v1316_v1 = vmax.f32 %v1267_v47, 0.0  ;;  %v1465_v33 = vmul.f32 %v1416_v46, %v2749_v31 }
 0x257   : > { %v1562_v34 = vmax.f32 %v1513_v50, 0.0  ;;  %v1808_v51 = vmax.f32 %v1759_v61, 0.0  ;;  %v1071_v5 = vadd.f32 %v2758_v18, %v1019_v8  ;;  %v1268_v48 = vadd.f32 %v1219_v3, %v2758_v18  ;;  %v971_v3 = vld [vmem:[#allocation2 + $0x178] sm:$0xff] }
 0x258   : > { %v1856_v62 = vmax.f32 %v1610_v44, %v1807_v63  ;;  %v1365_v16 = vmax.f32 %v1119_v32, %v1316_v1  ;;  %v1514_v9 = vadd.f32 %v1465_v33, %v2758_v18  ;;  %v1711_v2 = vmul.f32 %v1662_v54, %v2749_v31  ;;  %v1174_v33 = vld [vmem:[#allocation2 + $0x300] sm:$0xff] }
 0x259   : > { %v1120_v22 = vmax.f32 %v1071_v5, 0.0  ;;  %v1317_v52 = vmax.f32 %v1268_v48, 0.0  ;;  %v1020_v6 = vmul.f32 %v2749_v31, %v968_v12  ;;  %v1220_v37 = vmul.f32 %v1171_v58, %v2749_v31  ;;  %v1420_v12 = vld [vmem:[#allocation2 + $0x488] sm:$0xff]  ;;  %v1666_v48 = vld [vmem:[#allocation2 + $0x610] sm:$0xff] }
 0x25a   : > { %1905 = vst.msk [vmem:[%s3348_s4 + $0x148] sm:$0xff] %vm579_vm0, %v1856_v62  ;;  %v1611_v23 = vmax.f32 %v1365_v16, %v1562_v34  ;;  %v1563_v11 = vmax.f32 %v1514_v9, 0.0  ;;  %v1760_v55 = vadd.f32 %v1711_v2, %v2758_v18  ;;  %v1466_v10 = vmul.f32 %v1417_v7, %v2749_v31  ;;  %v972_v2 = vld [vmem:[#allocation2 + $0x180] sm:$0xff] }
 0x25b   : > { %v1366_v24 = vmax.f32 %v1120_v22, %v1317_v52  ;;  %v1072_v17 = vadd.f32 %v2758_v18, %v1020_v6  ;;  %v1269_v41 = vadd.f32 %v1220_v37, %v2758_v18  ;;  %v1712_v56 = vmul.f32 %v1663_v21, %v2749_v31  ;;  %v1175_v37 = vld [vmem:[#allocation2 + $0x308] sm:$0xff] }
 0x25c   : > { %v1857_v26 = vmax.f32 %v1611_v23, %v1808_v51  ;;  %v1809_v19 = vmax.f32 %v1760_v55, 0.0  ;;  %v1515_v15 = vadd.f32 %v1466_v10, %v2758_v18  ;;  %v1021_v45 = vmul.f32 %v2749_v31, %v969_v13 }
 0x25d   : > { %v1612_v60 = vmax.f32 %v1366_v24, %v1563_v11  ;;  %v1121_v20 = vmax.f32 %v1072_v17, 0.0  ;;  %v1318_v59 = vmax.f32 %v1269_v41, 0.0  ;;  %v1761_v27 = vadd.f32 %v1712_v56, %v2758_v18  ;;  %v1421_v56 = vld [vmem:[#allocation2 + $0x490] sm:$0xff] }
 0x25e   : > { %1906 = vst.msk [vmem:[%s3348_s4 + $0x150] sm:$0xff] %vm579_vm0, %v1857_v26  ;;  %v1564_v39 = vmax.f32 %v1515_v15, 0.0  ;;  %v1073_v38 = vadd.f32 %v2758_v18, %v1021_v45  ;;  %v1221_v36 = vmul.f32 %v1172_v14, %v2749_v31  ;;  %v1467_v0 = vmul.f32 %v1418_v25, %v2749_v31  ;;  %v1667_v14 = vld [vmem:[#allocation2 + $0x618] sm:$0xff] }
 0x25f   : > { %v1858_v42 = vmax.f32 %v1612_v60, %v1809_v19  ;;  %v1367_v28 = vmax.f32 %v1121_v20, %v1318_v59  ;;  %v1810_v63 = vmax.f32 %v1761_v27, 0.0  ;;  %v1713_v29 = vmul.f32 %v1664_v35, %v2749_v31 }
 0x260   : > { %v1122_v46 = vmax.f32 %v1073_v38, 0.0  ;;  %v1270_v57 = vadd.f32 %v1221_v36, %v2758_v18  ;;  %v1516_v40 = vadd.f32 %v1467_v0, %v2758_v18  ;;  %v1022_v30 = vmul.f32 %v2749_v31, %v970_v49 }
 0x261   : > { %1907 = vst.msk [vmem:[%s3348_s4 + $0x158] sm:$0xff] %vm579_vm0, %v1858_v42  ;;  %v1613_v47 = vmax.f32 %v1367_v28, %v1564_v39  ;;  %v1762_v50 = vadd.f32 %v1713_v29, %v2758_v18  ;;  %v1222_v61 = vmul.f32 %v1173_v43, %v2749_v31  ;;  %v1468_v8 = vmul.f32 %v1419_v53, %v2749_v31 }
 0x262   : > { %v1319_v54 = vmax.f32 %v1270_v57, 0.0  ;;  %v1565_v44 = vmax.f32 %v1516_v40, 0.0  ;;  %v1074_v32 = vadd.f32 %v2758_v18, %v1022_v30  ;;  %v1714_v1 = vmul.f32 %v1665_v4, %v2749_v31 }
 0x263   : > { %v1859_v58 = vmax.f32 %v1613_v47, %v1810_v63  ;;  %v1811_v34 = vmax.f32 %v1762_v50, 0.0  ;;  %v1271_v51 = vadd.f32 %v1222_v61, %v2758_v18  ;;  %v1517_v5 = vadd.f32 %v1468_v8, %v2758_v18 }
 0x264   : > { %v1368_v7 = vmax.f32 %v1122_v46, %v1319_v54  ;;  %v1123_v62 = vmax.f32 %v1074_v32, 0.0  ;;  %v1763_v16 = vadd.f32 %v1714_v1, %v2758_v18  ;;  %v1023_v9 = vmul.f32 %v2749_v31, %v971_v3 }
 0x265   : > { %1908 = vst.msk [vmem:[%s3348_s4 + $0x160] sm:$0xff] %vm579_vm0, %v1859_v58  ;;  %v1320_v21 = vmax.f32 %v1271_v51, 0.0  ;;  %v1566_v22 = vmax.f32 %v1517_v5, 0.0  ;;  %v1223_v52 = vmul.f32 %v1174_v33, %v2749_v31  ;;  %v1469_v6 = vmul.f32 %v1420_v12, %v2749_v31 }
 0x266   : > { %v1614_v13 = vmax.f32 %v1368_v7, %v1565_v44  ;;  %v1812_v23 = vmax.f32 %v1763_v16, 0.0  ;;  %v1075_v11 = vadd.f32 %v2758_v18, %v1023_v9  ;;  %v1715_v55 = vmul.f32 %v1666_v48, %v2749_v31 }
 0x267   : > { %v1369_v10 = vmax.f32 %v1123_v62, %v1320_v21  ;;  %v1272_v24 = vadd.f32 %v1223_v52, %v2758_v18  ;;  %v1518_v17 = vadd.f32 %v1469_v6, %v2758_v18  ;;  %v1024_v41 = vmul.f32 %v2749_v31, %v972_v2 }
 0x268   : > { %v1860_v25 = vmax.f32 %v1614_v13, %v1811_v34  ;;  %v1124_v26 = vmax.f32 %v1075_v11, 0.0  ;;  %v1764_v19 = vadd.f32 %v1715_v55, %v2758_v18  ;;  %v1224_v15 = vmul.f32 %v1175_v37, %v2749_v31 }
 0x269   : > { %v1615_v45 = vmax.f32 %v1369_v10, %v1566_v22  ;;  %v1321_v35 = vmax.f32 %v1272_v24, 0.0  ;;  %v1567_v60 = vmax.f32 %v1518_v17, 0.0  ;;  %v1076_v20 = vadd.f32 %v2758_v18, %v1024_v41 }
 0x26a   : > { %1909 = vst.msk [vmem:[%s3348_s4 + $0x168] sm:$0xff] %vm579_vm0, %v1860_v25  ;;  %v1273_v59 = vadd.f32 %v1224_v15, %v2758_v18  ;;  %v1470_v27 = vmul.f32 %v1421_v56, %v2749_v31  ;;  %v1716_v49 = vmul.f32 %v1667_v14, %v2749_v31  ;;  %v1813_v36 = vmax.f32 %v1764_v19, 0.0 }
 0x26b   : > { %v1861_v39 = vmax.f32 %v1615_v45, %v1812_v23  ;;  %v1370_v38 = vmax.f32 %v1124_v26, %v1321_v35  ;;  %v1125_v0 = vmax.f32 %v1076_v20, 0.0 }
 0x26c   : > { %v1322_v43 = vmax.f32 %v1273_v59, 0.0  ;;  %v1519_v53 = vadd.f32 %v1470_v27, %v2758_v18  ;;  %v1765_v42 = vadd.f32 %v1716_v49, %v2758_v18 }
 0x26d   : > { %1910 = vst.msk [vmem:[%s3348_s4 + $0x170] sm:$0xff] %vm579_vm0, %v1861_v39  ;;  %v1616_v28 = vmax.f32 %v1370_v38, %v1567_v60 }
 0x26e   : > { %v1371_v63 = vmax.f32 %v1125_v0, %v1322_v43  ;;  %v1568_v29 = vmax.f32 %v1519_v53, 0.0  ;;  %v1814_v4 = vmax.f32 %v1765_v42, 0.0 }
 0x26f   : > { %v1862_v46 = vmax.f32 %v1616_v28, %v1813_v36 }
 0x270   : > { %v1617_v31 = vmax.f32 %v1371_v63, %v1568_v29 }
 0x271   : > { %1911 = vst.msk [vmem:[%s3348_s4 + $0x178] sm:$0xff] %vm579_vm0, %v1862_v46 }
 0x272   : > { %v1863_v57 = vmax.f32 %v1617_v31, %v1814_v4 }
 0x274   : > { %1912 = vst.msk [vmem:[%s3348_s4 + $0x180] sm:$0xff] %vm579_vm0, %v1863_v57 }
 0x275 PF: > { %s14_s15 = sadd.s32 1, %s2154_s15  }
 0x276   : > { %p11_p6 = scmp.ge.s32.totalorder %s14_s15, 6  }
 0x278   :  { %13 = sbr.rel (!%p11_p6) target bundleno = 1 (0x1), region = 74 }

// kernel: cnn_forward.4
= control target key start
LH: loop header
LB: loop body
LE: loop exit
PB: predicated region body
PF: predicated region fallthrough
CT: control target
= control target key end

     0   :  { %s2690_s15 = smov 0   ;;  %s3277_s0 = inlined_call_operand.vmem [shape: bf16[4,50,1600], index: 0, kind: input, shape index: {}]   ;;  %s3278_s1 = inlined_call_operand.vmem [shape: bf16[1600,64], index: 1, kind: input, shape index: {}]   ;;  %s3279_s2 = inlined_call_operand.vmem [shape: f32[1,64], index: 2, kind: input, shape index: {}]   ;;  %s3280_s3 = inlined_call_operand.vmem [shape: f32[1,64], index: 3, kind: input, shape index: {}]   ;;  %s3281_s4 = inlined_call_operand.vmem [shape: f32[50,64], index: 4, kind: output, shape index: {}]  }
   0x1 LB: > { %s2696_s16 = sadd.s32 4294967295, %s2662_s15   ;;  %p1927_p0 = scmp.ge.s32.totalorder %s2662_s15, 1  ;;  %s2662_s15 = sphi %s2690_s15, %s14_s15  }
   0x2   : > { %p157_p1 = scmp.lt.s32.totalorder %s2662_s15, 5 }
   0x4   : > { %p158_p2 = pnand %p1927_p0, %p157_p1 }
   0x5   : > { %p178_p3 = scmp.lt.s32.totalorder (!%p158_p2), %s2696_s16, 3  ;;  %p2489_p4 = scmp.ne.s32.totalorder (!%p158_p2), %s2696_s16, 0 }
   0x6   : > { %161 = sbr.rel (%p158_p2) target bundleno = 489 (0x1e9), region = 36 }
   0xb   : > { %v2539_v0 = vld [vmem:[%s3278_s1 + $0x38] sm:$0xff]  ;;  %v2538_v2 = vld [vmem:[%s3278_s1 + $0x30] sm:$0xff]  ;;  %v2537_v6 = vld [vmem:[%s3278_s1 + $0x28] sm:$0xff]  ;;  %s179_s21 = scalar_select %p178_p3, %s2696_s16, 3  ;;  %vm1273_vm0 = vcmask 523264   ;;  %vm1658_vm1 = vcmask 517120  }
   0xc   : > { %v2555_v1 = vld [vmem:[%s3278_s1 + $0xb8] sm:$0xff]  ;;  %2632 = vmatpush.bf16.msra.mxu1 %v2539_v0  ;;  %v2554_v3 = vld [vmem:[%s3278_s1 + $0xb0] sm:$0xff]  ;;  %1286 = vmatpush.bf16.msra.mxu0 %v2539_v0  ;;  %v2553_v7 = vld [vmem:[%s3278_s1 + $0xa8] sm:$0xff] }
   0xd   : > { %1342 = vmatpush.bf16.msra.mxu2 %v2555_v1  ;;  %v2563_v4 = vld [vmem:[%s3278_s1 + $0xf8] sm:$0xff]  ;;  %v2562_v5 = vld [vmem:[%s3278_s1 + $0xf0] sm:$0xff]  ;;  %v2561_v8 = vld [vmem:[%s3278_s1 + $0xe8] sm:$0xff]  ;;  %s2644_s28 = smul.u32 364, %s179_s21 }
   0xe   : > { %1370 = vmatpush.bf16.msra.mxu3 %v2563_v4  ;;  %v2536_v9 = vld [vmem:[%s3278_s1 + $0x20] sm:$0xff]  ;;  %v2535_v12 = vld [vmem:[%s3278_s1 + $0x18] sm:$0xff]  ;;  %v2534_v15 = vld [vmem:[%s3278_s1 + $0x10] sm:$0xff] }
   0xf   : > { %v2552_v10 = vld [vmem:[%s3278_s1 + $0xa0] sm:$0xff]  ;;  %v2551_v13 = vld [vmem:[%s3278_s1 + $0x98] sm:$0xff]  ;;  %v2550_v16 = vld [vmem:[%s3278_s1 + $0x90] sm:$0xff]  ;;  %s2765_s11 = scalar_lea.vmem %s3277_s0, %s2644_s28 }
  0x10   : > { %2633 = vmatpush.bf16.msra.mxu1 %v2538_v2  ;;  %1287 = vmatpush.bf16.msra.mxu0 %v2538_v2  ;;  %v2560_v11 = vld [vmem:[%s3278_s1 + $0xe0] sm:$0xff]  ;;  %v2559_v14 = vld [vmem:[%s3278_s1 + $0xd8] sm:$0xff]  ;;  %v2558_v17 = vld [vmem:[%s3278_s1 + $0xd0] sm:$0xff] }
  0x11   : > { %1343 = vmatpush.bf16.msra.mxu2 %v2554_v3  ;;  %v2533_v18 = vld [vmem:[%s3278_s1 + $0x8] sm:$0xff]  ;;  %v2532_v20 = vld [vmem:[%s3278_s1] sm:$0xff]  ;;  %v2035_v21 = vld [vmem:[%s2765_s11 + $0xd0] sm:$0xf] }
  0x12   : > { %1371 = vmatpush.bf16.msra.mxu3 %v2562_v5  ;;  %v2549_v19 = vld [vmem:[%s3278_s1 + $0x88] sm:$0xff]  ;;  %v2548_v22 = vld [vmem:[%s3278_s1 + $0x80] sm:$0xff]  ;;  %v2500_v26 = vld [vmem:[%s2765_s11 + $0x38] sm:$0xf0] }
  0x13   : > { %v2557_v23 = vld [vmem:[%s3278_s1 + $0xc8] sm:$0xff]  ;;  %v2525_v24 = vld [vmem:[%s2765_s11 + $0x100] sm:$0xf0]  ;;  %v2547_v27 = vld [vmem:[%s3278_s1 + $0x78] sm:$0xff] }
  0x14   : > { %2634 = vmatpush.bf16.msra.mxu1 %v2537_v6  ;;  %1288 = vmatpush.bf16.msra.mxu0 %v2537_v6  ;;  %v1939_v25 = vld [vmem:[%s2765_s11 + $0x8] sm:$0xf]  ;;  %v1931_v28 = vld [vmem:[%s2765_s11] sm:$0xf]  ;;  %v2499_v29 = vld [vmem:[%s2765_s11 + $0x30] sm:$0xf0]  ;;  %v2036_v32 = vor.u32 %v2525_v24, %v2035_v21 }
  0x15   : > { %1344 = vmatpush.bf16.msra.mxu2 %v2553_v7  ;;  %v2571_v30 = vld [vmem:[%s3278_s1 + $0x138] sm:$0xff]  ;;  %v1940_v33 = vor.u32 %v2500_v26, %v1939_v25  ;;  %v1932_v34 = vor.u32 %v2499_v29, %v1931_v28  ;;  %v2556_v35 = vld [vmem:[%s3278_s1 + $0xc0] sm:$0xff]  ;;  %v2494_v36 = vld [vmem:[%s2765_s11 + $0xc] sm:$0xf] }
  0x16   : > { %1372 = vmatpush.bf16.msra.mxu3 %v2561_v8  ;;  %v2587_v31 = vld [vmem:[%s3278_s1 + $0x1b8] sm:$0xff]  ;;  %v1941_v37 = vld [vmem:[%s2765_s11 + $0x3c] sm:$0xf0]  ;;  %v2546_v38 = vld [vmem:[%s3278_s1 + $0x70] sm:$0xff] }
  0x17   : > { %v2595_v39 = vld [vmem:[%s3278_s1 + $0x1f8] sm:$0xff]  ;;  %v2570_v40 = vld [vmem:[%s3278_s1 + $0x130] sm:$0xff]  ;;  %v1944_v42 = vor.u32 %v2494_v36, %v1941_v37  ;;  %v2545_v43 = vld [vmem:[%s3278_s1 + $0x68] sm:$0xff] }
  0x18   : > { %2635 = vmatpush.bf16.msra.mxu1 %v2536_v9  ;;  %1289 = vmatpush.bf16.msra.mxu0 %v2536_v9  ;;  %v2586_v41 = vld [vmem:[%s3278_s1 + $0x1b0] sm:$0xff]  ;;  %v2569_v45 = vld [vmem:[%s3278_s1 + $0x128] sm:$0xff]  ;;  %v2821_v47 = vld [vmem:[%s2765_s11 + $0x138] sm:$0x11] }
  0x19   : > { %1345 = vmatpush.bf16.msra.mxu2 %v2552_v10  ;;  %v2594_v44 = vld [vmem:[%s3278_s1 + $0x1f0] sm:$0xff]  ;;  %v2585_v46 = vld [vmem:[%s3278_s1 + $0x1a8] sm:$0xff]  ;;  %v2544_v48 = vld [vmem:[%s3278_s1 + $0x60] sm:$0xff]  ;;  %v560_v52 = vunpack.c.l.b16 %v2821_v47 }
  0x1a   : > { %1373 = vmatpush.bf16.msra.mxu3 %v2560_v11  ;;  %v2593_v49 = vld [vmem:[%s3278_s1 + $0x1e8] sm:$0xff]  ;;  %v2568_v50 = vld [vmem:[%s3278_s1 + $0x120] sm:$0xff]  ;;  %v1991_v53 = vld [vmem:[%s2765_s11 + $0x70] sm:$0xf] }
  0x1b   : > { %v2584_v51 = vld [vmem:[%s3278_s1 + $0x1a0] sm:$0xff]  ;;  %v2543_v55 = vld [vmem:[%s3278_s1 + $0x58] sm:$0xff]  ;;  %v1983_v56 = vld [vmem:[%s2765_s11 + $0x68] sm:$0xf]  ;;  %v612_v60 = vpack.c.b16 %v560_v52, %v560_v52 }
  0x1c   : > { %2636 = vmatpush.bf16.msra.mxu1 %v2535_v12  ;;  %1290 = vmatpush.bf16.msra.mxu0 %v2535_v12  ;;  %v2513_v54 = vld [vmem:[%s2765_s11 + $0xa0] sm:$0xf0]  ;;  %v2512_v57 = vld [vmem:[%s2765_s11 + $0x98] sm:$0xf0]  ;;  %v2507_v63 = vld [vmem:[%s2765_s11 + $0x74] sm:$0xf] }
  0x1d   : > { %1346 = vmatpush.bf16.msra.mxu2 %v2551_v13  ;;  %v2567_v58 = vld [vmem:[%s3278_s1 + $0x118] sm:$0xff]  ;;  %v1992_v61 = vor.u32 %v2513_v54, %v1991_v53  ;;  %v1984_v62 = vor.u32 %v2512_v57, %v1983_v56  ;;  %v1993_v0 = vld [vmem:[%s2765_s11 + $0xa4] sm:$0xf0]  ;;  %v2542_v1 = vld [vmem:[%s3278_s1 + $0x50] sm:$0xff] }
  0x1e   : > { %1374 = vmatpush.bf16.msra.mxu3 %v2559_v14  ;;  %v2583_v59 = vld [vmem:[%s3278_s1 + $0x198] sm:$0xff]  ;;  %v2566_v2 = vld [vmem:[%s3278_s1 + $0x110] sm:$0xff]  ;;  %v1996_v3 = vor.u32 %v2507_v63, %v1993_v0  ;;  %v2592_v5 = vld [vmem:[%s3278_s1 + $0x1e0] sm:$0xff] }
  0x1f   : > { %v2582_v4 = vld [vmem:[%s3278_s1 + $0x190] sm:$0xff]  ;;  %v2541_v6 = vld [vmem:[%s3278_s1 + $0x48] sm:$0xff]  ;;  %v2591_v9 = vld [vmem:[%s3278_s1 + $0x1d8] sm:$0xff] }
  0x20   : > { %2637 = vmatpush.bf16.msra.mxu1 %v2534_v15  ;;  %1291 = vmatpush.bf16.msra.mxu0 %v2534_v15  ;;  %v2565_v7 = vld [vmem:[%s3278_s1 + $0x108] sm:$0xff]  ;;  %v2540_v10 = vld [vmem:[%s3278_s1 + $0x40] sm:$0xff]  ;;  %v2579_v11 = vld [vmem:[%s3278_s1 + $0x178] sm:$0xff] }
  0x21   : > { %1347 = vmatpush.bf16.msra.mxu2 %v2550_v16  ;;  %v2581_v8 = vld [vmem:[%s3278_s1 + $0x188] sm:$0xff]  ;;  %v2564_v12 = vld [vmem:[%s3278_s1 + $0x100] sm:$0xff]  ;;  %v2603_v14 = vld [vmem:[%s3278_s1 + $0x238] sm:$0xff] }
  0x22   : > { %1375 = vmatpush.bf16.msra.mxu3 %v2558_v17  ;;  %v2493_v13 = vld [vmem:[%s2765_s11 + $0x4] sm:$0xf]  ;;  %v1933_v15 = vld [vmem:[%s2765_s11 + $0x34] sm:$0xf0]  ;;  %v2526_v17 = vld [vmem:[%s2765_s11 + $0x108] sm:$0xf0] }
  0x23   : > { %v2043_v16 = vld [vmem:[%s2765_s11 + $0xd8] sm:$0xf]  ;;  %v1936_v21 = vor.u32 %v2493_v13, %v1933_v15  ;;  %v2520_v24 = vld [vmem:[%s2765_s11 + $0xdc] sm:$0xf]  ;;  %v2045_v25 = vld [vmem:[%s2765_s11 + $0x10c] sm:$0xf0] }
  0x24   : > { %2638 = vmatpush.bf16.msra.mxu1 %v2533_v18  ;;  %1292 = vmatpush.bf16.msra.mxu0 %v2533_v18  ;;  %v1947_v18 = vld [vmem:[%s2765_s11 + $0x10] sm:$0xf]  ;;  %v2577_v28 = vld [vmem:[%s3278_s1 + $0x168] sm:$0xff]  ;;  %v2048_v29 = vor.u32 %v2520_v24, %v2045_v25  ;;  %v2600_v36 = vld [vmem:[%s3278_s1 + $0x220] sm:$0xff] }
  0x25   : > { %1348 = vmatpush.bf16.msra.mxu2 %v2549_v19  ;;  %v2501_v19 = vld [vmem:[%s2765_s11 + $0x40] sm:$0xf0]  ;;  %v2602_v26 = vld [vmem:[%s3278_s1 + $0x230] sm:$0xff]  ;;  %v2575_v37 = vld [vmem:[%s3278_s1 + $0x158] sm:$0xff] }
  0x26   : > { %1376 = vmatpush.bf16.msra.mxu3 %v2557_v23  ;;  %v1948_v23 = vor.u32 %v2501_v19, %v1947_v18  ;;  %v2573_v52 = vld [vmem:[%s3278_s1 + $0x148] sm:$0xff]  ;;  %v2618_v53 = vld [vmem:[%s3278_s1 + $0x2b0] sm:$0xff]  ;;  %v2627_v57 = vld [vmem:[%s3278_s1 + $0x2f8] sm:$0xff] }
  0x27   : > { %v2598_v54 = vld [vmem:[%s3278_s1 + $0x210] sm:$0xff]  ;;  %v2617_v56 = vld [vmem:[%s3278_s1 + $0x2a8] sm:$0xff]  ;;  %v2051_v63 = vld [vmem:[%s2765_s11 + $0xe0] sm:$0xf] }
  0x28   : > { %2639 = vmatpush.bf16.msra.mxu1 %v2532_v20  ;;  %1293 = vmatpush.bf16.msra.mxu0 %v2532_v20  ;;  %v2578_v20 = vld [vmem:[%s3278_s1 + $0x170] sm:$0xff]  ;;  %v2631_v13 = vld [vmem:[%s3278_s1 + $0x318] sm:$0xff]  ;;  %v2996_v15 = vld [vmem:[%s2765_s11 + $0x148] sm:$0x11] }
  0x29   : > { %1349 = vmatpush.bf16.msra.mxu2 %v2548_v22  ;;  %v2044_v22 = vor.u32 %v2526_v17, %v2043_v16  ;;  %v2527_v0 = vld [vmem:[%s2765_s11 + $0x110] sm:$0xf0]  ;;  %v561_v16 = vunpack.c.h.b16 %v2821_v47  ;;  %v2007_v17 = vld [vmem:[%s2765_s11 + $0x80] sm:$0xf]  ;;  %v564_v19 = vunpack.c.l.b16 %v2996_v15  ;;  %v2009_v24 = vld [vmem:[%s2765_s11 + $0xb4] sm:$0xf0] }
  0x2a   : > { %1377 = vmatpush.bf16.msra.mxu3 %v2556_v35  ;;  %v227_v35 = vld [vmem:[%s2765_s11 + $0x140] sm:$0x11]  ;;  %v2515_v18 = vld [vmem:[%s2765_s11 + $0xb0] sm:$0xf0]  ;;  %v2609_v47 = vld [vmem:[%s3278_s1 + $0x268] sm:$0xff] }
  0x2b   : > { %1304 = vmatmul.bf16.vlgmr.msra.gmra.mxu1 %v2036_v32  ;;  %1294 = vmatmul.bf16.vlgmr.msra.gmra.mxu0 %v1932_v34  ;;  %v2576_v32 = vld [vmem:[%s3278_s1 + $0x160] sm:$0xff]  ;;  %v2619_v34 = vld [vmem:[%s3278_s1 + $0x2b8] sm:$0xff] }
  0x2c   : > { %1314 = vmatpush.bf16.msrb.mxu1 %v2547_v27  ;;  %1398 = vmatpush.bf16.msrb.mxu0 %v2571_v30  ;;  %v2580_v27 = vld [vmem:[%s3278_s1 + $0x180] sm:$0xff]  ;;  %v2590_v30 = vld [vmem:[%s3278_s1 + $0x1d0] sm:$0xff] }
  0x2d   : > { %1454 = vmatpush.bf16.msrb.mxu2 %v2587_v31  ;;  %1378 = vmatmul.bf16.vlgmr.msra.gmra.mxu3 %v1944_v42  ;;  %v2601_v31 = vld [vmem:[%s3278_s1 + $0x228] sm:$0xff] }
  0x2e   : > { %1350 = vmatmul.bf16.vlgmr.msra.gmra.mxu2 %v1940_v33  ;;  %1482 = vmatpush.bf16.msrb.mxu3 %v2595_v39  ;;  %v2589_v33 = vld [vmem:[%s3278_s1 + $0x1c8] sm:$0xff] }
  0x2f   : > { %v2506_v39 = vld [vmem:[%s2765_s11 + $0x6c] sm:$0xf] }
  0x30   : > { %1315 = vmatpush.bf16.msrb.mxu1 %v2546_v38  ;;  %1399 = vmatpush.bf16.msrb.mxu0 %v2570_v40  ;;  %v562_v38 = vunpack.c.l.b16 %v227_v35  ;;  %v1985_v40 = vld [vmem:[%s2765_s11 + $0x9c] sm:$0xf0]  ;;  %v2514_v42 = vld [vmem:[%s2765_s11 + $0xa8] sm:$0xf0] }
  0x31   : > { %1455 = vmatpush.bf16.msrb.mxu2 %v2586_v41  ;;  %v1999_v41 = vld [vmem:[%s2765_s11 + $0x78] sm:$0xf] }
  0x32   : > { %1483 = vmatpush.bf16.msrb.mxu3 %v2594_v44  ;;  %v2574_v44 = vld [vmem:[%s3278_s1 + $0x150] sm:$0xff] }
  0x34   : > { %1316 = vmatpush.bf16.msrb.mxu1 %v2545_v43  ;;  %1400 = vmatpush.bf16.msrb.mxu0 %v2569_v45  ;;  %v2599_v43 = vld [vmem:[%s3278_s1 + $0x218] sm:$0xff]  ;;  %v1988_v45 = vor.u32 %v2506_v39, %v1985_v40  ;;  %v2522_v40 = vld [vmem:[%s2765_s11 + $0xec] sm:$0xf] }
  0x35   : > { %1456 = vmatpush.bf16.msrb.mxu2 %v2585_v46  ;;  %v614_v46 = vpack.c.b16 %v562_v38, %v562_v38 }
  0x36   : > { %1484 = vmatpush.bf16.msrb.mxu3 %v2593_v49  ;;  %v2000_v49 = vor.u32 %v2514_v42, %v1999_v41  ;;  %v2061_v41 = vld [vmem:[%s2765_s11 + $0x11c] sm:$0xf0]  ;;  %v2630_v42 = vld [vmem:[%s3278_s1 + $0x310] sm:$0xff] }
  0x38   : > { %1317 = vmatpush.bf16.msrb.mxu1 %v2544_v48  ;;  %1401 = vmatpush.bf16.msrb.mxu0 %v2568_v50  ;;  %v563_v48 = vunpack.c.h.b16 %v227_v35  ;;  %v2588_v50 = vld [vmem:[%s3278_s1 + $0x1c0] sm:$0xff] }
  0x39   : > { %1457 = vmatpush.bf16.msrb.mxu2 %v2584_v51  ;;  %v1963_v35 = vld [vmem:[%s2765_s11 + $0x20] sm:$0xf] }
  0x3a   : > { %1485 = vmatpush.bf16.msrb.mxu3 %v2592_v5  ;;  %v615_v51 = vpack.c.b16 %v563_v48, %v563_v48  ;;  %v1957_v5 = vld [vmem:[%s2765_s11 + $0x4c] sm:$0xf0] }
  0x3b   : > { %1309 = vmatmul.bf16.gmra.mxu1 %v612_v60  ;;  %1299 = vmatmul.bf16.gmra.mxu0 %v1984_v62  ;;  %v2037_v60 = vld [vmem:[%s2765_s11 + $0x104] sm:$0xf0]  ;;  %v2502_v62 = vld [vmem:[%s2765_s11 + $0x48] sm:$0xf0]  ;;  %v229_v48 = vld [vmem:[%s2765_s11 + $0x150] sm:$0x11] }
  0x3c   : > { %1318 = vmatpush.bf16.msrb.mxu1 %v2543_v55  ;;  %1402 = vmatpush.bf16.msrb.mxu0 %v2567_v58  ;;  %v2572_v55 = vld [vmem:[%s3278_s1 + $0x140] sm:$0xff]  ;;  %v2597_v58 = vld [vmem:[%s3278_s1 + $0x208] sm:$0xff] }
  0x3d   : > { %1458 = vmatpush.bf16.msrb.mxu2 %v2583_v59  ;;  %1383 = vmatmul.bf16.gmra.mxu3 %v1996_v3  ;;  %v2519_v59 = vld [vmem:[%s2765_s11 + $0xd4] sm:$0xf]  ;;  %v2052_v3 = vor.u32 %v2527_v0, %v2051_v63  ;;  %v2605_v63 = vld [vmem:[%s3278_s1 + $0x248] sm:$0xff]  ;;  %v2604_v0 = vld [vmem:[%s3278_s1 + $0x240] sm:$0xff] }
  0x3e   : > { %1355 = vmatmul.bf16.gmra.mxu2 %v1992_v61  ;;  %1486 = vmatpush.bf16.msrb.mxu3 %v2591_v9  ;;  %v1955_v61 = vld [vmem:[%s2765_s11 + $0x18] sm:$0xf]  ;;  %v2616_v9 = vld [vmem:[%s3278_s1 + $0x2a0] sm:$0xff] }
  0x40   : > { %1319 = vmatpush.bf16.msrb.mxu1 %v2542_v1  ;;  %1403 = vmatpush.bf16.msrb.mxu0 %v2566_v2  ;;  %v2040_v1 = vor.u32 %v2519_v59, %v2037_v60  ;;  %v1956_v2 = vor.u32 %v2502_v62, %v1955_v61  ;;  %v2629_v60 = vld [vmem:[%s3278_s1 + $0x308] sm:$0xff]  ;;  %v2620_v61 = vld [vmem:[%s3278_s1 + $0x2c0] sm:$0xff] }
  0x41   : > { %1459 = vmatpush.bf16.msrb.mxu2 %v2582_v4  ;;  %v2496_v4 = vld [vmem:[%s2765_s11 + $0x1c] sm:$0xf] }
  0x42   : > { %1487 = vmatpush.bf16.msrb.mxu3 %v2590_v30  ;;  %v2623_v30 = vld [vmem:[%s3278_s1 + $0x2d8] sm:$0xff] }
  0x44   : > { %1320 = vmatpush.bf16.msrb.mxu1 %v2541_v6  ;;  %1404 = vmatpush.bf16.msrb.mxu0 %v2565_v7  ;;  %v1960_v6 = vor.u32 %v2496_v4, %v1957_v5  ;;  %v2611_v7 = vld [vmem:[%s3278_s1 + $0x278] sm:$0xff]  ;;  %v2067_v5 = vld [vmem:[%s2765_s11 + $0xf0] sm:$0xf] }
  0x45   : > { %1460 = vmatpush.bf16.msrb.mxu2 %v2581_v8  ;;  %v2596_v8 = vld [vmem:[%s3278_s1 + $0x200] sm:$0xff]  ;;  %v2504_v4 = vld [vmem:[%s2765_s11 + $0x58] sm:$0xf0] }
  0x46   : > { %1488 = vmatpush.bf16.msrb.mxu3 %v2589_v33  ;;  %v2059_v33 = vld [vmem:[%s2765_s11 + $0xe8] sm:$0xf] }
  0x48   : > { %1321 = vmatpush.bf16.msrb.mxu1 %v2540_v10  ;;  %1405 = vmatpush.bf16.msrb.mxu0 %v2564_v12  ;;  %v2626_v10 = vld [vmem:[%s3278_s1 + $0x2f0] sm:$0xff]  ;;  %v2615_v12 = vld [vmem:[%s3278_s1 + $0x298] sm:$0xff] }
  0x49   : > { %1461 = vmatpush.bf16.msrb.mxu2 %v2580_v27  ;;  %v2624_v27 = vld [vmem:[%s3278_s1 + $0x2e0] sm:$0xff] }
  0x4a   : > { %1489 = vmatpush.bf16.msrb.mxu3 %v2588_v50  ;;  %v2621_v50 = vld [vmem:[%s3278_s1 + $0x2c8] sm:$0xff] }
  0x4b   : > { %1322 = vmatmul.bf16.vlgmr.msrb.gmra.mxu1 %v1936_v21  ;;  %1406 = vmatmul.bf16.vlgmr.msrb.gmra.mxu0 %v1948_v23  ;;  %v2008_v21 = vor.u32 %v2515_v18, %v2007_v17  ;;  %v2509_v23 = vld [vmem:[%s2765_s11 + $0x84] sm:$0xf] }
  0x4c   : > { %1426 = vmatpush.bf16.msra.mxu1 %v2579_v11  ;;  %1510 = vmatpush.bf16.msra.mxu0 %v2603_v14  ;;  %v2610_v11 = vld [vmem:[%s3278_s1 + $0x270] sm:$0xff]  ;;  %v2625_v14 = vld [vmem:[%s3278_s1 + $0x2e8] sm:$0xff]  ;;  %v2012_v25 = vor.u32 %v2509_v23, %v2009_v24  ;;  %v2517_v24 = vld [vmem:[%s2765_s11 + $0xc0] sm:$0xf0] }
  0x4d   : > { %1388 = vmatmul.bf16.gmra.mxu3 %v2048_v29  ;;  %1566 = vmatpush.bf16.msra.mxu2 %v2619_v34  ;;  %v2613_v29 = vld [vmem:[%s3278_s1 + $0x288] sm:$0xff]  ;;  %v2528_v34 = vld [vmem:[%s2765_s11 + $0x118] sm:$0xf0]  ;;  %v2023_v23 = vld [vmem:[%s2765_s11 + $0x90] sm:$0xf] }
  0x4e   : > { %1360 = vmatmul.bf16.gmra.mxu2 %v2044_v22  ;;  %1594 = vmatpush.bf16.msra.mxu3 %v2627_v57  ;;  %v616_v22 = vpack.c.b16 %v564_v19, %v564_v19  ;;  %v2060_v38 = vor.u32 %v2528_v34, %v2059_v33 }
  0x50   : > { %1427 = vmatpush.bf16.msra.mxu1 %v2578_v20  ;;  %1511 = vmatpush.bf16.msra.mxu0 %v2602_v26  ;;  %v613_v20 = vpack.c.b16 %v561_v16, %v561_v16  ;;  %v2614_v26 = vld [vmem:[%s3278_s1 + $0x290] sm:$0xff]  ;;  %v2628_v16 = vld [vmem:[%s3278_s1 + $0x300] sm:$0xff] }
  0x51   : > { %1567 = vmatpush.bf16.msra.mxu2 %v2618_v53  ;;  %v2001_v53 = vld [vmem:[%s2765_s11 + $0xac] sm:$0xf0] }
  0x52   : > { %1595 = vmatpush.bf16.msra.mxu3 %v2626_v10 }
  0x54   : > { %1428 = vmatpush.bf16.msra.mxu1 %v2577_v28  ;;  %1512 = vmatpush.bf16.msra.mxu0 %v2601_v31  ;;  %v2608_v28 = vld [vmem:[%s3278_s1 + $0x260] sm:$0xff]  ;;  %v2495_v31 = vld [vmem:[%s2765_s11 + $0x14] sm:$0xf] }
  0x55   : > { %1568 = vmatpush.bf16.msra.mxu2 %v2617_v56 }
  0x56   : > { %1596 = vmatpush.bf16.msra.mxu3 %v2625_v14 }
  0x58   : > { %1429 = vmatpush.bf16.msra.mxu1 %v2576_v32  ;;  %1513 = vmatpush.bf16.msra.mxu0 %v2600_v36  ;;  %v1949_v32 = vld [vmem:[%s2765_s11 + $0x44] sm:$0xf0]  ;;  %v2503_v36 = vld [vmem:[%s2765_s11 + $0x50] sm:$0xf0] }
  0x59   : > { %1569 = vmatpush.bf16.msra.mxu2 %v2616_v9  ;;  %v1964_v39 = vor.u32 %v2503_v36, %v1963_v35 }
  0x5a   : > { %1597 = vmatpush.bf16.msra.mxu3 %v2624_v27  ;;  %v2024_v27 = vor.u32 %v2517_v24, %v2023_v23 }
  0x5b   : > { %1327 = vmatmul.bf16.gmra.mxu1 %v1988_v45  ;;  %1411 = vmatmul.bf16.gmra.mxu0 %v2000_v49  ;;  %v2607_v45 = vld [vmem:[%s3278_s1 + $0x258] sm:$0xff]  ;;  %v2606_v49 = vld [vmem:[%s3278_s1 + $0x250] sm:$0xff] }
  0x5c   : > { %1430 = vmatpush.bf16.msra.mxu1 %v2575_v37  ;;  %1514 = vmatpush.bf16.msra.mxu0 %v2599_v43  ;;  %v1952_v37 = vor.u32 %v2495_v31, %v1949_v32  ;;  %v2612_v43 = vld [vmem:[%s3278_s1 + $0x280] sm:$0xff]  ;;  %v2025_v31 = vld [vmem:[%s2765_s11 + $0xc4] sm:$0xf0] }
  0x5d   : > { %1393 = vmatmul.bf16.gmra.mxu3 %v615_v51  ;;  %1570 = vmatpush.bf16.msra.mxu2 %v2615_v12  ;;  %v566_v51 = vunpack.c.l.b16 %v229_v48  ;;  %v1973_v12 = vld [vmem:[%s2765_s11 + $0x5c] sm:$0xf0] }
  0x5e   : > { %1365 = vmatmul.bf16.gmra.mxu2 %v614_v46  ;;  %1598 = vmatpush.bf16.msra.mxu3 %v2623_v30  ;;  %v2622_v46 = vld [vmem:[%s3278_s1 + $0x2d0] sm:$0xff] }
  0x5f   : > { %v618_v57 = vpack.c.b16 %v566_v51, %v566_v51  ;;  %v2511_v30 = vld [vmem:[%s2765_s11 + $0x94] sm:$0xf]  ;;  %v2077_v51 = vld [vmem:[%s2765_s11 + $0x12c] sm:$0xf0] }
  0x60   : > { %1431 = vmatpush.bf16.msra.mxu1 %v2574_v44  ;;  %1515 = vmatpush.bf16.msra.mxu0 %v2598_v54  ;;  %v2064_v44 = vor.u32 %v2522_v40, %v2061_v41  ;;  %v2015_v54 = vld [vmem:[%s2765_s11 + $0x88] sm:$0xf]  ;;  %v2028_v33 = vor.u32 %v2511_v30, %v2025_v31  ;;  %v2075_v40 = vld [vmem:[%s2765_s11 + $0xf8] sm:$0xf]  ;;  %v2530_v41 = vld [vmem:[%s2765_s11 + $0x128] sm:$0xf0] }
  0x61   : > { %1571 = vmatpush.bf16.msra.mxu2 %v2614_v26 }
  0x62   : > { %1599 = vmatpush.bf16.msra.mxu3 %v2622_v46  ;;  %v2076_v46 = vor.u32 %v2530_v41, %v2075_v40 }
  0x64   : > { %1432 = vmatpush.bf16.msra.mxu1 %v2573_v52  ;;  %1516 = vmatpush.bf16.msra.mxu0 %v2597_v58  ;;  %v2508_v52 = vld [vmem:[%s2765_s11 + $0x7c] sm:$0xf]  ;;  %v567_v58 = vunpack.c.h.b16 %v229_v48 }
  0x65   : > { %1572 = vmatpush.bf16.msra.mxu2 %v2613_v29  ;;  %v2004_v56 = vor.u32 %v2508_v52, %v2001_v53 }
  0x66   : > { %1600 = vmatpush.bf16.msra.mxu3 %v2621_v50  ;;  %v619_v62 = vpack.c.b16 %v567_v58, %v567_v58  ;;  %v2524_v50 = vld [vmem:[%s2765_s11 + $0xfc] sm:$0xf] }
  0x68   : > { %1433 = vmatpush.bf16.msra.mxu1 %v2572_v55  ;;  %1517 = vmatpush.bf16.msra.mxu0 %v2596_v8  ;;  %v2516_v55 = vld [vmem:[%s2765_s11 + $0xb8] sm:$0xf0] }
  0x69   : > { %1573 = vmatpush.bf16.msra.mxu2 %v2612_v43  ;;  %v2016_v59 = vor.u32 %v2516_v55, %v2015_v54  ;;  %v2505_v43 = vld [vmem:[%s2765_s11 + $0x60] sm:$0xf0] }
  0x6a   : > { %1601 = vmatpush.bf16.msra.mxu3 %v2620_v61  ;;  %v231_v61 = vld [vmem:[%s2765_s11 + $0x160] sm:$0x11] }
  0x6b   : > { %1332 = vmatmul.bf16.gmra.mxu1 %v2040_v1  ;;  %1416 = vmatmul.bf16.gmra.mxu0 %v2052_v3  ;;  %v2521_v1 = vld [vmem:[%s2765_s11 + $0xe4] sm:$0xf]  ;;  %v1971_v3 = vld [vmem:[%s2765_s11 + $0x28] sm:$0xf] }
  0x6c   : > { %1538 = vmatpush.bf16.msrb.mxu1 %v2611_v7  ;;  %1626 = vmatpush.bf16.msrb.mxu0 %v2631_v13  ;;  %v1972_v8 = vor.u32 %v2504_v4, %v1971_v3  ;;  %v2510_v3 = vld [vmem:[%s2765_s11 + $0x8c] sm:$0xf]  ;;  %v2017_v4 = vld [vmem:[%s2765_s11 + $0xbc] sm:$0xf0] }
  0x6d   : > { %1490 = vmatmul.bf16.vlgmr.msrb.gmra.mxu3 %v1960_v6  ;;  %v2529_v6 = vld [vmem:[%s2765_s11 + $0x120] sm:$0xf0] }
  0x6e   : > { %1462 = vmatmul.bf16.vlgmr.msrb.gmra.mxu2 %v1956_v2  ;;  %v2053_v2 = vld [vmem:[%s2765_s11 + $0x114] sm:$0xf0]  ;;  %v2068_v10 = vor.u32 %v2529_v6, %v2067_v5 }
  0x6f   : > { %2640 = vmatpush.bf16.msrb.mxu2 %v2631_v13  ;;  %v2056_v7 = vor.u32 %v2521_v1, %v2053_v2  ;;  %v570_v2 = vunpack.c.l.b16 %v231_v61  ;;  %v2031_v6 = vld [vmem:[%s2765_s11 + $0x98] sm:$0xf] }
  0x70   : > { %1539 = vmatpush.bf16.msrb.mxu1 %v2610_v11  ;;  %1627 = vmatpush.bf16.msrb.mxu0 %v2630_v42  ;;  %v2498_v11 = vld [vmem:[%s2765_s11 + $0x2c] sm:$0xf] }
  0x71   : > { %v1976_v14 = vor.u32 %v2498_v11, %v1973_v12  ;;  %v2020_v11 = vor.u32 %v2510_v3, %v2017_v4  ;;  %v622_v12 = vpack.c.b16 %v570_v2, %v570_v2 }
  0x73   : > { %2641 = vmatpush.bf16.msrb.mxu2 %v2630_v42  ;;  %v1979_v42 = vld [vmem:[%s2765_s11 + $0x30] sm:$0xf] }
  0x74   : > { %1540 = vmatpush.bf16.msrb.mxu1 %v2609_v47  ;;  %1628 = vmatpush.bf16.msrb.mxu0 %v2629_v60 }
  0x77   : > { %2642 = vmatpush.bf16.msrb.mxu2 %v2629_v60 }
  0x78   : > { %1541 = vmatpush.bf16.msrb.mxu1 %v2608_v28  ;;  %1629 = vmatpush.bf16.msrb.mxu0 %v2628_v16 }
  0x7b   : > { %1337 = vmatmul.bf16.gmra.mxu1 %v613_v20  ;;  %1421 = vmatmul.bf16.gmra.mxu0 %v616_v22  ;;  %v3081_v20 = vld [vmem:[%s2765_s11 + $0x158] sm:$0x11]  ;;  %v565_v22 = vunpack.c.h.b16 %v2996_v15 }
  0x7c   : > { %1542 = vmatpush.bf16.msrb.mxu1 %v2607_v45  ;;  %2643 = vmatpush.bf16.msrb.mxu2 %v2628_v16 }
  0x7d   : > { %1495 = vmatmul.bf16.gmra.mxu3 %v2012_v25  ;;  %v568_v25 = vunpack.c.l.b16 %v3081_v20  ;;  %v617_v26 = vpack.c.b16 %v565_v22, %v565_v22 }
  0x7e   : > { %1467 = vmatmul.bf16.gmra.mxu2 %v2008_v21 }
  0x7f   : > { %v620_v29 = vpack.c.b16 %v568_v25, %v568_v25 }
  0x80   : > { %1543 = vmatpush.bf16.msrb.mxu1 %v2606_v49  ;;  %v1980_v49 = vor.u32 %v2505_v43, %v1979_v42 }
  0x84   : > { %1544 = vmatpush.bf16.msrb.mxu1 %v2605_v63 }
  0x88   : > { %1545 = vmatpush.bf16.msrb.mxu1 %v2604_v0 }
  0x8b   : > { %1434 = vmatmul.bf16.vlgmr.msra.gmra.mxu1 %v1952_v37  ;;  %1518 = vmatmul.bf16.vlgmr.msra.gmra.mxu0 %v1964_v39  ;;  %v1965_v39 = vld [vmem:[%s2765_s11 + $0x54] sm:$0xf0] }
  0x8d   : > { %1500 = vmatmul.bf16.gmra.mxu3 %v2064_v44 }
  0x8e   : > { %1472 = vmatmul.bf16.gmra.mxu2 %v2060_v38  ;;  %v2497_v38 = vld [vmem:[%s2765_s11 + $0x24] sm:$0xf] }
  0x8f   : > { %v1968_v45 = vor.u32 %v2497_v38, %v1965_v39  ;;  %v2083_v38 = vld [vmem:[%s2765_s11 + $0x100] sm:$0xf]  ;;  %v2531_v39 = vld [vmem:[%s2765_s11 + $0x130] sm:$0xf0] }
  0x9b   : > { %1439 = vmatmul.bf16.gmra.mxu1 %v2004_v56  ;;  %1523 = vmatmul.bf16.gmra.mxu0 %v2016_v59  ;;  %v2080_v56 = vor.u32 %v2524_v50, %v2077_v51 }
  0x9d   : > { %1505 = vmatmul.bf16.gmra.mxu3 %v619_v62 }
  0x9e   : > { %1477 = vmatmul.bf16.gmra.mxu2 %v618_v57 }
  0xa8   : > { %v3071_v9 = vpop.f32.mrf.mxu1  ;;  %v1295_v13 = vpop.f32.mrf.mxu0 }
  0xab   : > { %1444 = vmatmul.bf16.gmra.mxu1 %v2056_v7  ;;  %1528 = vmatmul.bf16.gmra.mxu0 %v2068_v10  ;;  %v2518_v7 = vld [vmem:[%s2765_s11 + $0xc8] sm:$0xf0] }
  0xac   : > { %v2032_v16 = vor.u32 %v2518_v7, %v2031_v6 }
  0xad   : > { %1602 = vmatmul.bf16.vlgmr.msra.gmra.mxu3 %v1976_v14 }
  0xae   : > { %1574 = vmatmul.bf16.vlgmr.msra.gmra.mxu2 %v1972_v8 }
  0xb0   : > { %v3078_v18 = vpop.f32.mrf.mxu1  ;;  %v1297_v19 = vpop.f32.mrf.mxu0 }
  0xb1   : > { %v1351_v17 = vpop.f32.mrf.mxu2  ;;  %v1379_v21 = vpop.f32.mrf.mxu3 }
  0xb8   : > { %v3087_v28 = vpop.f32.mrf.mxu1  ;;  %v1300_v32 = vpop.f32.mrf.mxu0 }
  0xb9   : > { %v1353_v47 = vpop.f32.mrf.mxu2  ;;  %v1381_v15 = vpop.f32.mrf.mxu3 }
  0xbb   : > { %1449 = vmatmul.bf16.gmra.mxu1 %v617_v26  ;;  %1533 = vmatmul.bf16.gmra.mxu0 %v620_v29 }
  0xbd   : > { %1607 = vmatmul.bf16.gmra.mxu3 %v2028_v33  ;;  %v2523_v33 = vld [vmem:[%s2765_s11 + $0xf4] sm:$0xf] }
  0xbe   : > { %1579 = vmatmul.bf16.gmra.mxu2 %v2024_v27  ;;  %v232_v27 = vld [vmem:[%s2765_s11 + $0x168] sm:$0x1] }
  0xc0   : > { %v1312_v35 = vpop.f32.mrf.mxu1  ;;  %v1302_v36 = vpop.f32.mrf.mxu0 }
  0xc1   : > { %v1356_v34 = vpop.f32.mrf.mxu2  ;;  %v1384_v37 = vpop.f32.mrf.mxu3 }
  0xc8   : > { %v1323_v48 = vpop.f32.mrf.mxu1  ;;  %v1407_v53 = vpop.f32.mrf.mxu0 }
  0xc9   : > { %v1358_v44 = vpop.f32.mrf.mxu2  ;;  %v1324_v52 = vadd.f32 %v1323_v48, %v1295_v13  ;;  %v1386_v54 = vpop.f32.mrf.mxu3  ;;  %v571_v13 = vunpack.c.h.b16 %v231_v61 }
  0xcb   : > { %v1352_v55 = vadd.f32 %v1351_v17, %v1324_v52  ;;  %1546 = vmatmul.bf16.vlgmr.msrb.gmra.mxu1 %v1968_v45  ;;  %2485 = vmatmul.msk.bf16.vlgmr.msrb.gmra.mxu0 %vm1273_vm0, %v1980_v49  ;;  %v623_v23 = vpack.c.b16 %v571_v13, %v571_v13  ;;  %v2084_v45 = vor.u32 %v2531_v39, %v2083_v38 }
  0xcd   : > { %v1380_v57 = vadd.f32 %v1379_v21, %v1352_v55  ;;  %1612 = vmatmul.bf16.gmra.mxu3 %v2080_v56  ;;  %v569_v56 = vunpack.c.h.b16 %v3081_v20 }
  0xce   : > { %1584 = vmatmul.bf16.gmra.mxu2 %v2076_v46 }
  0xcf   : > { %v3100_v59 = vadd.f32 %v1407_v53, %v1380_v57 }
  0xd0   : > { %v1325_v60 = vpop.f32.mrf.mxu1  ;;  %v1409_v63 = vpop.f32.mrf.mxu0 }
  0xd1   : > { %v1361_v58 = vpop.f32.mrf.mxu2  ;;  %v1326_v62 = vadd.f32 %v1325_v60, %v1297_v19  ;;  %v1389_v0 = vpop.f32.mrf.mxu3 }
  0xd3   : > { %v1354_v1 = vadd.f32 %v1353_v47, %v1326_v62 }
  0xd5   : > { %v1382_v5 = vadd.f32 %v1381_v15, %v1354_v1  ;;  %v572_v15 = vunpack.c.l.b16 %v232_v27 }
  0xd7   : > { %v3107_v10 = vadd.f32 %v1409_v63, %v1382_v5 }
  0xd8   : > { %v1328_v14 = vpop.f32.mrf.mxu1  ;;  %v1412_v19 = vpop.f32.mrf.mxu0 }
  0xd9   : > { %v1363_v8 = vpop.f32.mrf.mxu2  ;;  %v1329_v17 = vadd.f32 %v1328_v14, %v1300_v32  ;;  %v1391_v21 = vpop.f32.mrf.mxu3 }
  0xdb   : > { %v1357_v22 = vadd.f32 %v1356_v34, %v1329_v17  ;;  %1551 = vmatmul.bf16.gmra.mxu1 %v2020_v11  ;;  %2486 = vmatmul.msk.bf16.gmra.mxu0 %vm1273_vm0, %v2032_v16  ;;  %v2069_v34 = vld [vmem:[%s2765_s11 + $0x124] sm:$0xf0]  ;;  %s1650_s11 = smul.u32 56, %s2696_s16 }
  0xdc   : > { %v2072_v42 = vor.u32 %v2523_v33, %v2069_v34 }
  0xdd   : > { %v1385_v24 = vadd.f32 %v1384_v37, %v1357_v22  ;;  %1617 = vmatmul.bf16.gmra.mxu3 %v623_v23  ;;  %v624_v37 = vpack.c.b16 %v572_v15, %v572_v15  ;;  %s3139_s10 = scalar_lea.vmem [#allocation2], %s1650_s11 }
  0xde   : > { %1589 = vmatmul.bf16.gmra.mxu2 %v622_v12 }
  0xdf   : > { %v3110_v47 = vadd.f32 %v1412_v19, %v1385_v24 }
  0xe0   : > { %v1330_v26 = vpop.f32.mrf.mxu1  ;;  %v1414_v30 = vpop.f32.mrf.mxu0 }
  0xe1   : > { %v1366_v25 = vpop.f32.mrf.mxu2  ;;  %v1331_v29 = vadd.f32 %v1330_v26, %v1302_v36  ;;  %v1394_v31 = vpop.f32.mrf.mxu3 }
  0xe3   : > { %v1359_v32 = vadd.f32 %v1358_v44, %v1331_v29 }
  0xe5   : > { %v1387_v35 = vadd.f32 %v1386_v54, %v1359_v32 }
  0xe7   : > { %v1415_v41 = vadd.f32 %v1414_v30, %v1387_v35 }
  0xe8   : > { %v1333_v43 = vpop.f32.mrf.mxu1  ;;  %v1417_v48 = vpop.f32.mrf.mxu0 }
  0xe9   : > { %v1368_v40 = vpop.f32.mrf.mxu2  ;;  %v1334_v46 = vadd.f32 %v1333_v43, %v3071_v9  ;;  %v1396_v49 = vpop.f32.mrf.mxu3 }
  0xeb   : > { %v1362_v36 = vadd.f32 %v1361_v58, %v1334_v46  ;;  %1556 = vmatmul.bf16.gmra.mxu1 %v2072_v42  ;;  %2487 = vmatmul.msk.bf16.gmra.mxu0 %vm1273_vm0, %v2084_v45  ;;  %v621_v58 = vpack.c.b16 %v569_v56, %v569_v56 }
  0xed   : > { %v1390_v44 = vadd.f32 %v1389_v0, %v1362_v36 }
  0xee   : > { %2488 = vmatmul.msk.bf16.vlgmr.msrb.gmra.mxu2 %vm1273_vm0, %v624_v37 }
  0xef   : > { %v1418_v51 = vadd.f32 %v1417_v48, %v1390_v44 }
  0xf0   : > { %v1335_v52 = vpop.f32.mrf.mxu1  ;;  %v1419_v54 = vpop.f32.mrf.mxu0 }
  0xf1   : > { %v1463_v50 = vpop.f32.mrf.mxu2  ;;  %v1336_v53 = vadd.f32 %v1335_v52, %v3078_v18  ;;  %v1491_v55 = vpop.f32.mrf.mxu3 }
  0xf3   : > { %v1364_v57 = vadd.f32 %v1363_v8, %v1336_v53 }
  0xf5   : > { %v1392_v9 = vadd.f32 %v1391_v21, %v1364_v57 }
  0xf7   : > { %v1420_v61 = vadd.f32 %v1419_v54, %v1392_v9 }
  0xf8   : > { %v1338_v62 = vpop.f32.mrf.mxu1  ;;  %v1422_v1 = vpop.f32.mrf.mxu0 }
  0xf9   : > { %v1465_v60 = vpop.f32.mrf.mxu2  ;;  %v1339_v63 = vadd.f32 %v1338_v62, %v3087_v28  ;;  %v1493_v2 = vpop.f32.mrf.mxu3 }
  0xfb   : > { %v1367_v0 = vadd.f32 %v1366_v25, %v1339_v63  ;;  %1561 = vmatmul.bf16.gmra.mxu1 %v621_v58 }
  0xfd   : > { %v1395_v3 = vadd.f32 %v1394_v31, %v1367_v0 }
  0xff   : > { %v1423_v5 = vadd.f32 %v1422_v1, %v1395_v3 }
 0x100   : > { %v1340_v18 = vpop.f32.mrf.mxu1  ;;  %v1424_v6 = vpop.f32.mrf.mxu0 }
 0x101   : > { %v1468_v4 = vpop.f32.mrf.mxu2  ;;  %v1496_v7 = vpop.f32.mrf.mxu3 }
 0x108   : > { %v1435_v20 = vpop.f32.mrf.mxu1  ;;  %v1519_v12 = vpop.f32.mrf.mxu0 }
 0x109   : > { %v1470_v11 = vpop.f32.mrf.mxu2  ;;  %v1436_v8 = vadd.f32 %v1435_v20, %v3100_v59  ;;  %v1498_v13 = vpop.f32.mrf.mxu3 }
 0x10b   : > { %v1464_v14 = vadd.f32 %v1463_v50, %v1436_v8 }
 0x10d   : > { %v1492_v16 = vadd.f32 %v1491_v55, %v1464_v14 }
 0x10f   : > { %v1520_v63 = vadd.f32 %v1519_v12, %v1492_v16 }
 0x110   : > { %v1437_v28 = vpop.f32.mrf.mxu1  ;;  %v1521_v21 = vpop.f32.mrf.mxu0 }
 0x111   : > { %v1473_v17 = vpop.f32.mrf.mxu2  ;;  %v1438_v19 = vadd.f32 %v1437_v28, %v3107_v10  ;;  %v1501_v22 = vpop.f32.mrf.mxu3 }
 0x113   : > { %v1466_v23 = vadd.f32 %v1465_v60, %v1438_v19 }
 0x115   : > { %v1494_v24 = vadd.f32 %v1493_v2, %v1466_v23 }
 0x117   : > { %v1522_v6 = vadd.f32 %v1521_v21, %v1494_v24 }
 0x118   : > { %v1440_v26 = vpop.f32.mrf.mxu1  ;;  %v1524_v29 = vpop.f32.mrf.mxu0 }
 0x119   : > { %v1475_v25 = vpop.f32.mrf.mxu2  ;;  %v1441_v27 = vadd.f32 %v1440_v26, %v3110_v47  ;;  %v1503_v30 = vpop.f32.mrf.mxu3 }
 0x11b   : > { %v1469_v31 = vadd.f32 %v1468_v4, %v1441_v27 }
 0x11d   : > { %v1497_v59 = vadd.f32 %v1496_v7, %v1469_v31 }
 0x120   : > { %v1442_v15 = vpop.f32.mrf.mxu1  ;;  %v1526_v34 = vpop.f32.mrf.mxu0 }
 0x121   : > { %v1478_v32 = vpop.f32.mrf.mxu2  ;;  %v1443_v33 = vadd.f32 %v1442_v15, %v1415_v41  ;;  %v1506_v35 = vpop.f32.mrf.mxu3 }
 0x123   : > { %v1471_v38 = vadd.f32 %v1470_v11, %v1443_v33 }
 0x125   : > { %v1499_v39 = vadd.f32 %v1498_v13, %v1471_v38 }
 0x127   : > { %v1527_v27 = vadd.f32 %v1526_v34, %v1499_v39 }
 0x128   : > { %v1445_v40 = vpop.f32.mrf.mxu1  ;;  %v3126_v37 = vpop.f32.mrf.mxu0 }
 0x129   : > { %v1480_v10 = vpop.f32.mrf.mxu2  ;;  %v1446_v42 = vadd.f32 %v1445_v40, %v1418_v51  ;;  %v1508_v43 = vpop.f32.mrf.mxu3 }
 0x12b   : > { %v1474_v45 = vadd.f32 %v1473_v17, %v1446_v42  ;;  %v1525_v17 = vadd.f32 %v1524_v29, %v1497_v59 }
 0x12d   : > { %v1502_v46 = vadd.f32 %v1501_v22, %v1474_v45 }
 0x12f   : > { %v1530_v38 = vadd.f32 %v3126_v37, %v1502_v46 }
 0x130   : > { %v1447_v48 = vpop.f32.mrf.mxu1  ;;  %v3128_v36 = vpop.f32.mrf.mxu0 }
 0x131   : > { %v1575_v47 = vpop.f32.mrf.mxu2  ;;  %v1448_v49 = vadd.f32 %v1447_v48, %v1420_v61  ;;  %v1603_v44 = vpop.f32.mrf.mxu3 }
 0x133   : > { %v1476_v50 = vadd.f32 %v1475_v25, %v1448_v49 }
 0x135   : > { %v3130_v41 = vadd.f32 %v1503_v30, %v1476_v50 }
 0x137   : > { %v1532_v48 = vadd.f32 %v3128_v36, %v3130_v41 }
 0x138   : > { %v1450_v53 = vpop.f32.mrf.mxu1  ;;  %v3132_v55 = vpop.f32.mrf.mxu0 }
 0x139   : > { %v1577_v52 = vpop.f32.mrf.mxu2  ;;  %v1451_v54 = vadd.f32 %v1450_v53, %v1423_v5  ;;  %v1605_v51 = vpop.f32.mrf.mxu3 }
 0x13b   : > { %v1479_v56 = vadd.f32 %v1478_v32, %v1451_v54 }
 0x13d   : > { %v3134_v57 = vadd.f32 %v1506_v35, %v1479_v56 }
 0x13f   : > { %v1535_v54 = vadd.f32 %v3132_v55, %v3134_v57 }
 0x140   : > { %v1452_v60 = vpop.f32.mrf.mxu1  ;;  %v1536_v58 = vpop.f32.mrf.mxu0 }
 0x141   : > { %v1580_v9 = vpop.f32.mrf.mxu2  ;;  %v1608_v61 = vpop.f32.mrf.mxu3 }
 0x148   : > { %v1547_v1 = vpop.f32.mrf.mxu1  ;;  %v1631_v0 = vpop.f32.mrf.mxu0 }
 0x149   : > { %v1582_v62 = vpop.f32.mrf.mxu2  ;;  %v1548_v2 = vadd.f32 %v1547_v1, %v1520_v63  ;;  %v1610_v3 = vpop.f32.mrf.mxu3 }
 0x14b   : > { %v1576_v4 = vadd.f32 %v1575_v47, %v1548_v2 }
 0x14d   : > { %v1604_v18 = vadd.f32 %v1603_v44, %v1576_v4 }
 0x14f   : > { %v3137_v7 = vadd.f32 %v1631_v0, %v1604_v18 }
 0x150   : > { %v1549_v11 = vpop.f32.mrf.mxu1  ;;  %v1633_v8 = vpop.f32.mrf.mxu0 }
 0x151   : > { %v1585_v5 = vpop.f32.mrf.mxu2  ;;  %1652 = vst.msk [vmem:[%s3139_s10] sm:$0xff] %vm1273_vm0, %v3137_v7  ;;  %v1550_v20 = vadd.f32 %v1549_v11, %v1522_v6  ;;  %v1613_v12 = vpop.f32.mrf.mxu3 }
 0x153   : > { %v1578_v13 = vadd.f32 %v1577_v52, %v1550_v20 }
 0x155   : > { %v1606_v14 = vadd.f32 %v1605_v51, %v1578_v13 }
 0x157   : > { %v1634_v28 = vadd.f32 %v1633_v8, %v1606_v14 }
 0x158   : > { %v1552_v19 = vpop.f32.mrf.mxu1  ;;  %v1636_v22 = vpop.f32.mrf.mxu0 }
 0x159   : > { %v1587_v16 = vpop.f32.mrf.mxu2  ;;  %1653 = vst.msk [vmem:[%s3139_s10 + $0x8] sm:$0xff] %vm1273_vm0, %v1634_v28  ;;  %v1553_v21 = vadd.f32 %v1552_v19, %v1525_v17  ;;  %v1615_v23 = vpop.f32.mrf.mxu3 }
 0x15b   : > { %v1581_v24 = vadd.f32 %v1580_v9, %v1553_v21 }
 0x15d   : > { %v1609_v25 = vadd.f32 %v1608_v61, %v1581_v24 }
 0x15f   : > { %v1637_v30 = vadd.f32 %v1636_v22, %v1609_v25 }
 0x160   : > { %v1554_v31 = vpop.f32.mrf.mxu1  ;;  %v1638_v15 = vpop.f32.mrf.mxu0 }
 0x161   : > { %v1590_v26 = vpop.f32.mrf.mxu2  ;;  %1654 = vst.msk [vmem:[%s3139_s10 + $0x10] sm:$0xff] %vm1273_vm0, %v1637_v30  ;;  %v1555_v32 = vadd.f32 %v1554_v31, %v1527_v27  ;;  %v1618_v33 = vpop.f32.mrf.mxu3 }
 0x163   : > { %v1583_v29 = vadd.f32 %v1582_v62, %v1555_v32 }
 0x165   : > { %v1611_v59 = vadd.f32 %v1610_v3, %v1583_v29 }
 0x167   : > { %v1639_v10 = vadd.f32 %v1638_v15, %v1611_v59 }
 0x168   : > { %v1557_v40 = vpop.f32.mrf.mxu1  ;;  %v1641_v43 = vpop.f32.mrf.mxu0 }
 0x169   : > { %v1592_v35 = vpop.f32.mrf.mxu2  ;;  %1655 = vst.msk [vmem:[%s3139_s10 + $0x18] sm:$0xff] %vm1273_vm0, %v1639_v10  ;;  %v1558_v42 = vadd.f32 %v1557_v40, %v1530_v38  ;;  %v1620_v34 = vpop.f32.mrf.mxu3 }
 0x16b   : > { %v1586_v39 = vadd.f32 %v1585_v5, %v1558_v42 }
 0x16d   : > { %v1614_v45 = vadd.f32 %v1613_v12, %v1586_v39 }
 0x16f   : > { %v1642_v49 = vadd.f32 %v1641_v43, %v1614_v45 }
 0x170   : > { %v1559_v44 = vpop.f32.mrf.mxu1  ;;  %v1643_v50 = vpop.f32.mrf.mxu0 }
 0x171   : > { %v1646_v47 = vpop.f32.mrf.mxu2  ;;  %1656 = vst.msk [vmem:[%s3139_s10 + $0x20] sm:$0xff] %vm1273_vm0, %v1642_v49  ;;  %v1560_v37 = vadd.f32 %v1559_v44, %v1532_v48 }
 0x173   : > { %v1588_v46 = vadd.f32 %v1587_v16, %v1560_v37 }
 0x175   : > { %v1616_v52 = vadd.f32 %v1615_v23, %v1588_v46 }
 0x177   : > { %v1644_v51 = vadd.f32 %v1643_v50, %v1616_v52 }
 0x178   : > { %v1562_v56 = vpop.f32.mrf.mxu1 }
 0x179   : > { %v1648_v53 = vpop.f32.mrf.mxu2  ;;  %1657 = vst.msk [vmem:[%s3139_s10 + $0x28] sm:$0xff] %vm1273_vm0, %v1644_v51  ;;  %v1563_v9 = vadd.f32 %v1562_v56, %v1535_v54 }
 0x17b   : > { %v1591_v60 = vadd.f32 %v1590_v26, %v1563_v9 }
 0x17d   : > { %v1619_v36 = vadd.f32 %v1618_v33, %v1591_v60  ;;  %1663 = sbr.rel (%p2489_p4) target bundleno = 389 (0x185), region = 40 }
 0x17f   : > { %v1647_v41 = vadd.f32 %v1646_v47, %v1619_v36 }
 0x180   : > { %v1564_v58 = vpop.f32.mrf.mxu1 }
 0x181   : > { %1659 = vst.msk [vmem:[%s3139_s10 + $0x30] sm:$0x3] %vm1658_vm1, %v1647_v41 }
 0x182   : > { %vm1664_vm2 = vcmask 516096   ;;  %v2664_v61 = vmov 0.0  }
 0x183   : > { %1665 = vst.msk [vmem:[#allocation3] sm:$0x1] %vm1664_vm2, %v2664_v61 }
 0x184   : > { %1666 = vst.msk [vmem:[#allocation4] sm:$0x1] %vm1664_vm2, %v2664_v61 }
 0x185 PF: > { %v1668_v55 = vsel %vm1273_vm0, %v3137_v7, 0.0  ;;  %v1669_v57 = vsel %vm1273_vm0, %v1634_v28, 0.0  ;;  %v1671_v62 = vsel %vm1273_vm0, %v1637_v30, 0.0  ;;  %v1673_v1 = vsel %vm1273_vm0, %v1639_v10, 0.0  ;;  %p2490_p5 = scmp.ne.s32.totalorder %s2696_s16, 3 }
 0x186   : > { %v1670_v63 = vadd.f32 %v1669_v57, %v1668_v55  ;;  %v1691_v2 = vmul.f32 %v3137_v7, %v3137_v7  ;;  %v1692_v0 = vmul.f32 %v1634_v28, %v1634_v28  ;;  %v1693_v3 = vmul.f32 %v1637_v30, %v1637_v30 }
 0x187   : > { %v1675_v18 = vsel %vm1273_vm0, %v1642_v49, 0.0  ;;  %v1694_v5 = vmul.f32 %v1639_v10, %v1639_v10  ;;  %v1695_v6 = vmul.f32 %v1642_v49, %v1642_v49  ;;  %v1677_v14 = vsel %vm1273_vm0, %v1644_v51, 0.0 }
 0x188   : > { %v1672_v4 = vadd.f32 %v1671_v62, %v1670_v63  ;;  %v1698_v11 = vsel %vm1273_vm0, %v1691_v2, 0.0  ;;  %v1699_v20 = vsel %vm1273_vm0, %v1692_v0, 0.0  ;;  %v1701_v8 = vsel %vm1273_vm0, %v1693_v3, 0.0 }
 0x189   : > { %v1700_v13 = vadd.f32 %v1699_v20, %v1698_v11  ;;  %v1696_v16 = vmul.f32 %v1644_v51, %v1644_v51  ;;  %v1703_v7 = vsel %vm1273_vm0, %v1694_v5, 0.0  ;;  %v1679_v19 = vsel %vm1658_vm1, %v1647_v41, 0.0 }
 0x18a   : > { %v1674_v12 = vadd.f32 %v1673_v1, %v1672_v4  ;;  %v1697_v21 = vmul.f32 %v1647_v41, %v1647_v41  ;;  %v1705_v22 = vsel %vm1273_vm0, %v1695_v6, 0.0  ;;  %v1667_v42 = vld [vmem:[#allocation3] sm:$0x1]  ;;  %vm1688_vm3 = vcmask 516096  }
 0x18b   : > { %v1702_v28 = vadd.f32 %v1701_v8, %v1700_v13  ;;  %v1707_v25 = vsel %vm1273_vm0, %v1696_v16, 0.0  ;;  %v1690_v47 = vld [vmem:[#allocation4] sm:$0x1] }
 0x18c   : > { %v1676_v17 = vadd.f32 %v1675_v18, %v1674_v12  ;;  %v1709_v30 = vsel %vm1658_vm1, %v1697_v21, 0.0 }
 0x18d   : > { %v1704_v24 = vadd.f32 %v1703_v7, %v1702_v28 }
 0x18e   : > { %v1678_v23 = vadd.f32 %v1677_v14, %v1676_v17 }
 0x18f   : > { %v1706_v27 = vadd.f32 %v1705_v22, %v1704_v24 }
 0x190   : > { %v1680_v26 = vadd.f32 %v1679_v19, %v1678_v23 }
 0x191   : > { %v1708_v32 = vadd.f32 %v1707_v25, %v1706_v27 }
 0x192   : > { %v1681_v31 = vrot.slane %v1680_v26, 4 }
 0x193   : > { %v1710_v33 = vadd.f32 %v1709_v30, %v1708_v32 }
 0x194   : > { %v1682_v15 = vadd.f32 %v1681_v31, %v1680_v26 }
 0x195   : > { %v1711_v59 = vrot.slane %v1710_v33, 4 }
 0x196   : > { %v1683_v29 = vrot.slane %v1682_v15, 2 }
 0x197   : > { %v1712_v38 = vadd.f32 %v1711_v59, %v1710_v33 }
 0x198   : > { %v1684_v35 = vadd.f32 %v1683_v29, %v1682_v15 }
 0x199   : > { %v1713_v40 = vrot.slane %v1712_v38, 2 }
 0x19a   : > { %v1685_v10 = vrot.slane %v1684_v35, 1 }
 0x19b   : > { %v1714_v34 = vadd.f32 %v1713_v40, %v1712_v38 }
 0x19c   : > { %v1686_v43 = vadd.f32 %v1685_v10, %v1684_v35 }
 0x19d   : > { %v1715_v45 = vrot.slane %v1714_v34, 1 }
 0x19e   : > { %v1687_v39 = vadd.f32 %v1686_v43, %v1667_v42 }
 0x19f   : > { %v1716_v48 = vadd.f32 %v1715_v45, %v1714_v34  ;;  %1722 = sbr.rel (%p2490_p5) target bundleno = 489 (0x1e9), region = 44 }
 0x1a0   : > { %1689 = vst.msk [vmem:[#allocation3] sm:$0x1] %vm1688_vm3, %v1687_v39 }
 0x1a1   : > { %v1717_v49 = vadd.f32 %v1716_v48, %v1690_v47 }
 0x1a3   : > { %1718 = vst.msk [vmem:[#allocation4] sm:$0x1] %vm1688_vm3, %v1717_v49 }
 0x1a4   : > { %v1729_v41 = vld [vmem:[%s3279_s2] sm:$0x1]  ;;  %v1780_v63 = vld [vmem:[#allocation2 + $0x38] sm:$0xff]  ;;  %v1816_v1 = vld [vmem:[#allocation2 + $0x70] sm:$0xff] }
 0x1a5   : > { %v1742_v57 = vld [vmem:[%s3280_s3] sm:$0x1]  ;;  %v1746_v2 = vld [vmem:[#allocation2 + $0x8] sm:$0xff]  ;;  %v1817_v5 = vld [vmem:[#allocation2 + $0x78] sm:$0xff] }
 0x1a6   : > { %v1745_v62 = vld [vmem:[#allocation2] sm:$0xff]  ;;  %v1852_v18 = vld [vmem:[#allocation2 + $0xa8] sm:$0xff]  ;;  %v1747_v6 = vld [vmem:[#allocation2 + $0x10] sm:$0xff] }
 0x1a7   : > { %v1723_v44 = vld [vmem:[#allocation3] sm:$0x1]  ;;  %v1853_v11 = vld [vmem:[#allocation2 + $0xb0] sm:$0xff]  ;;  %v1782_v20 = vld [vmem:[#allocation2 + $0x48] sm:$0xff] }
 0x1a8   : > { %v1724_v46 = vmul.f32 0.005, %v1723_v44  ;;  %v1781_v0 = vld [vmem:[#allocation2 + $0x40] sm:$0xff]  ;;  %v1748_v8 = vld [vmem:[#allocation2 + $0x18] sm:$0xff]  ;;  %v1783_v28 = vld [vmem:[#allocation2 + $0x50] sm:$0xff] }
 0x1a9   : > { %v1818_v7 = vld [vmem:[#allocation2 + $0x80] sm:$0xff]  ;;  %v1854_v17 = vld [vmem:[#allocation2 + $0xb8] sm:$0xff] }
 0x1aa   : > { %v1725_v37 = vld [vmem:[#allocation4] sm:$0x1]  ;;  %v1727_v52 = vmul.f32 %v1724_v46, %v1724_v46 }
 0x1ab   : > { %v1726_v50 = vmul.f32 0.005, %v1725_v37 }
 0x1ad   : > { %v1728_v53 = vsub.f32 %v1726_v50, %v1727_v52 }
 0x1af   : > { %v1730_v54 = vadd.f32 1e-05, %v1728_v53 }
 0x1b1   : > { %2654 = vrsqrt.f32 %v1730_v54  ;;  %vm1737_vm4 = vweird.f32 %v1730_v54 }
 0x1b7   : > { %v2655_v51 = vpop.eup %2654 }
 0x1b8   : > { %v1732_v56 = vmul.f32 %v2655_v51, %v1730_v54  ;;  %vm1738_vm5 = vweird.f32 %v2655_v51 }
 0x1b9   : > { %vm1739_vm6 = vmor %vm1737_vm4, %vm1738_vm5 }
 0x1ba   : > { %v1733_v9 = vmul.f32 %v2655_v51, %v1732_v56 }
 0x1bc   : > { %v1734_v60 = vmul.f32 0.5, %v1733_v9  ;;  %v1819_v9 = vld [vmem:[#allocation2 + $0x88] sm:$0xff] }
 0x1be   : > { %v1735_v36 = vsub.f32 1.5, %v1734_v60  ;;  %v1855_v60 = vld [vmem:[#allocation2 + $0xc0] sm:$0xff] }
 0x1c0   : > { %v1736_v58 = vmul.f32 %v2655_v51, %v1735_v36 }
 0x1c2   : > { %v1740_v61 = vsel %vm1739_vm6, %v2655_v51, %v1736_v58 }
 0x1c3   : > { %v1741_v55 = vmul.f32 %v1740_v61, %v1729_v41 }
 0x1c5   : > { %v1743_v3 = vmul.f32 %v1741_v55, %v1724_v46  ;;  %v3186_v4 = vperm.slane %v1741_v55, 0  ;;  %v1749_v55 = vld [vmem:[#allocation2 + $0x20] sm:$0xff] }
 0x1c7   : > { %v1744_v12 = vsub.f32 %v1742_v57, %v1743_v3  ;;  %v1755_v13 = vmul.f32 %v3186_v4, %v1745_v62  ;;  %v1787_v14 = vmul.f32 %v1780_v63, %v3186_v4  ;;  %v1823_v16 = vmul.f32 %v1816_v1, %v3186_v4  ;;  %v1784_v57 = vld [vmem:[#allocation2 + $0x58] sm:$0xff] }
 0x1c8   : > { %v1859_v19 = vmul.f32 %v1852_v18, %v3186_v4  ;;  %v1756_v21 = vmul.f32 %v3186_v4, %v1746_v2  ;;  %v1788_v22 = vmul.f32 %v1781_v0, %v3186_v4  ;;  %v1824_v23 = vmul.f32 %v1817_v5, %v3186_v4  ;;  %v1820_v0 = vld [vmem:[#allocation2 + $0x90] sm:$0xff] }
 0x1c9   : > { %v3195_v24 = vperm.slane %v1744_v12, 0  ;;  %v1860_v25 = vmul.f32 %v1853_v11, %v3186_v4  ;;  %v1757_v26 = vmul.f32 %v3186_v4, %v1747_v6  ;;  %v1789_v27 = vmul.f32 %v1782_v20, %v3186_v4  ;;  %v1856_v11 = vld [vmem:[#allocation2 + $0xc8] sm:$0xff] }
 0x1ca   : > { %v1825_v30 = vmul.f32 %v1818_v7, %v3186_v4  ;;  %v1861_v31 = vmul.f32 %v1854_v17, %v3186_v4  ;;  %v1758_v32 = vmul.f32 %v3186_v4, %v1748_v8  ;;  %v1790_v15 = vmul.f32 %v1783_v28, %v3186_v4  ;;  %v1750_v20 = vld [vmem:[#allocation2 + $0x28] sm:$0xff] }
 0x1cb   : > { %v1765_v33 = vadd.f32 %v3195_v24, %v1755_v13  ;;  %v1794_v29 = vadd.f32 %v1787_v14, %v3195_v24  ;;  %v1830_v59 = vadd.f32 %v1823_v16, %v3195_v24  ;;  %v1866_v35 = vadd.f32 %v1859_v19, %v3195_v24 }
 0x1cc   : > { %v1766_v38 = vadd.f32 %v3195_v24, %v1756_v21  ;;  %v1795_v10 = vadd.f32 %v1788_v22, %v3195_v24  ;;  %v1831_v40 = vadd.f32 %v1824_v23, %v3195_v24  ;;  %v1867_v42 = vadd.f32 %v1860_v25, %v3195_v24  ;;  %v1785_v25 = vld [vmem:[#allocation2 + $0x60] sm:$0xff] }
 0x1cd   : > { %v1772_v43 = vmax.f32 %v1765_v33, 0.0  ;;  %v1801_v34 = vmax.f32 %v1794_v29, 0.0  ;;  %v1837_v39 = vmax.f32 %v1830_v59, 0.0  ;;  %v1873_v45 = vmax.f32 %v1866_v35, 0.0 }
 0x1ce   : > { %v1773_v47 = vmax.f32 %v1766_v38, 0.0  ;;  %v1802_v48 = vmax.f32 %v1795_v10, 0.0  ;;  %v1838_v49 = vmax.f32 %v1831_v40, 0.0  ;;  %v1874_v44 = vmax.f32 %v1867_v42, 0.0  ;;  %v1751_v38 = vld [vmem:[#allocation2 + $0x30] sm:$0x3] }
 0x1cf   : > { %v1808_v37 = vmax.f32 %v1772_v43, %v1801_v34  ;;  %v1767_v46 = vadd.f32 %v3195_v24, %v1757_v26  ;;  %v1796_v50 = vadd.f32 %v1789_v27, %v3195_v24  ;;  %v1832_v52 = vadd.f32 %v1825_v30, %v3195_v24  ;;  %v1821_v26 = vld [vmem:[#allocation2 + $0x98] sm:$0xff]  ;;  %v1786_v34 = vld [vmem:[#allocation2 + $0x68] sm:$0x3] }
 0x1d0   : > { %v1809_v53 = vmax.f32 %v1773_v47, %v1802_v48  ;;  %v1868_v54 = vadd.f32 %v1861_v31, %v3195_v24  ;;  %v1768_v51 = vadd.f32 %v3195_v24, %v1758_v32  ;;  %v1797_v56 = vadd.f32 %v1790_v15, %v3195_v24  ;;  %v1857_v15 = vld [vmem:[#allocation2 + $0xd0] sm:$0xff] }
 0x1d1   : > { %v1844_v36 = vmax.f32 %v1808_v37, %v1837_v39  ;;  %v1774_v41 = vmax.f32 %v1767_v46, 0.0  ;;  %v1803_v58 = vmax.f32 %v1796_v50, 0.0  ;;  %v1839_v61 = vmax.f32 %v1832_v52, 0.0  ;;  %v1822_v39 = vld [vmem:[#allocation2 + $0xa0] sm:$0x3] }
 0x1d2   : > { %v1845_v62 = vmax.f32 %v1809_v53, %v1838_v49  ;;  %v1875_v63 = vmax.f32 %v1868_v54, 0.0  ;;  %v1775_v1 = vmax.f32 %v1768_v51, 0.0  ;;  %v1804_v2 = vmax.f32 %v1797_v56, 0.0 }
 0x1d3   : > { %v1880_v3 = vmax.f32 %v1844_v36, %v1873_v45  ;;  %v1810_v18 = vmax.f32 %v1774_v41, %v1803_v58  ;;  %v1826_v5 = vmul.f32 %v1819_v9, %v3186_v4  ;;  %v1862_v6 = vmul.f32 %v1855_v60, %v3186_v4 }
 0x1d4   : > { %v1881_v8 = vmax.f32 %v1845_v62, %v1874_v44  ;;  %v1811_v12 = vmax.f32 %v1775_v1, %v1804_v2  ;;  %v1759_v13 = vmul.f32 %v3186_v4, %v1749_v55  ;;  %v1791_v14 = vmul.f32 %v1784_v57, %v3186_v4  ;;  %v1858_v44 = vld [vmem:[#allocation2 + $0xd8] sm:$0x3] }
 0x1d5   : > { %1887 = vst.msk [vmem:[%s3281_s4] sm:$0xff] %vm1273_vm0, %v1880_v3  ;;  %v1846_v16 = vmax.f32 %v1810_v18, %v1839_v61  ;;  %v1833_v7 = vadd.f32 %v1826_v5, %v3195_v24  ;;  %v1869_v17 = vadd.f32 %v1862_v6, %v3195_v24  ;;  %v1827_v28 = vmul.f32 %v1820_v0, %v3186_v4 }
 0x1d6   : > { %1888 = vst.msk [vmem:[%s3281_s4 + $0x8] sm:$0xff] %vm1273_vm0, %v1881_v8  ;;  %v1769_v19 = vadd.f32 %v3195_v24, %v1759_v13  ;;  %v1798_v21 = vadd.f32 %v1791_v14, %v3195_v24  ;;  %v1863_v22 = vmul.f32 %v1856_v11, %v3186_v4  ;;  %v1760_v23 = vmul.f32 %v3186_v4, %v1750_v20 }
 0x1d7   : > { %v1882_v27 = vmax.f32 %v1846_v16, %v1875_v63  ;;  %v1840_v30 = vmax.f32 %v1833_v7, 0.0  ;;  %v1876_v31 = vmax.f32 %v1869_v17, 0.0  ;;  %v1834_v32 = vadd.f32 %v1827_v28, %v3195_v24 }
 0x1d8   : > { %v1776_v33 = vmax.f32 %v1769_v19, 0.0  ;;  %v1805_v29 = vmax.f32 %v1798_v21, 0.0  ;;  %v1870_v59 = vadd.f32 %v1863_v22, %v3195_v24  ;;  %v1770_v35 = vadd.f32 %v3195_v24, %v1760_v23 }
 0x1d9   : > { %1889 = vst.msk [vmem:[%s3281_s4 + $0x10] sm:$0xff] %vm1273_vm0, %v1882_v27  ;;  %v1847_v10 = vmax.f32 %v1811_v12, %v1840_v30  ;;  %v1841_v40 = vmax.f32 %v1834_v32, 0.0  ;;  %v1792_v42 = vmul.f32 %v1785_v25, %v3186_v4  ;;  %v1828_v43 = vmul.f32 %v1821_v26, %v3186_v4 }
 0x1da   : > { %v1812_v45 = vmax.f32 %v1776_v33, %v1805_v29  ;;  %v1877_v47 = vmax.f32 %v1870_v59, 0.0  ;;  %v1777_v48 = vmax.f32 %v1770_v35, 0.0  ;;  %v1864_v49 = vmul.f32 %v1857_v15, %v3186_v4 }
 0x1db   : > { %v1883_v37 = vmax.f32 %v1847_v10, %v1876_v31  ;;  %v1799_v46 = vadd.f32 %v1792_v42, %v3195_v24  ;;  %v1835_v50 = vadd.f32 %v1828_v43, %v3195_v24  ;;  %v1761_v52 = vmul.f32 %v3186_v4, %v1751_v38 }
 0x1dc   : > { %v1848_v53 = vmax.f32 %v1812_v45, %v1841_v40  ;;  %v1871_v54 = vadd.f32 %v1864_v49, %v3195_v24  ;;  %v1793_v51 = vmul.f32 %v1786_v34, %v3186_v4  ;;  %v1829_v56 = vmul.f32 %v1822_v39, %v3186_v4 }
 0x1dd   : > { %1890 = vst.msk [vmem:[%s3281_s4 + $0x18] sm:$0xff] %vm1273_vm0, %v1883_v37  ;;  %v1806_v9 = vmax.f32 %v1799_v46, 0.0  ;;  %v1842_v60 = vmax.f32 %v1835_v50, 0.0  ;;  %v1771_v36 = vadd.f32 %v3195_v24, %v1761_v52  ;;  %v1865_v41 = vmul.f32 %v1858_v44, %v3186_v4 }
 0x1de   : > { %v1884_v58 = vmax.f32 %v1848_v53, %v1877_v47  ;;  %v1800_v61 = vadd.f32 %v1793_v51, %v3195_v24  ;;  %v1836_v55 = vadd.f32 %v1829_v56, %v3195_v24  ;;  %v1878_v62 = vmax.f32 %v1871_v54, 0.0 }
 0x1df   : > { %v1813_v57 = vmax.f32 %v1777_v48, %v1806_v9  ;;  %v1778_v63 = vmax.f32 %v1771_v36, 0.0  ;;  %v1872_v1 = vadd.f32 %v1865_v41, %v3195_v24 }
 0x1e0   : > { %1891 = vst.msk [vmem:[%s3281_s4 + $0x20] sm:$0xff] %vm1273_vm0, %v1884_v58  ;;  %v1807_v2 = vmax.f32 %v1800_v61, 0.0  ;;  %v1843_v0 = vmax.f32 %v1836_v55, 0.0 }
 0x1e1   : > { %v1849_v3 = vmax.f32 %v1813_v57, %v1842_v60  ;;  %v1879_v4 = vmax.f32 %v1872_v1, 0.0 }
 0x1e2   : > { %v1814_v18 = vmax.f32 %v1778_v63, %v1807_v2 }
 0x1e3   : > { %v1885_v5 = vmax.f32 %v1849_v3, %v1878_v62 }
 0x1e4   : > { %v1850_v6 = vmax.f32 %v1814_v18, %v1843_v0 }
 0x1e5   : > { %1892 = vst.msk [vmem:[%s3281_s4 + $0x28] sm:$0xff] %vm1273_vm0, %v1885_v5 }
 0x1e6   : > { %v1886_v11 = vmax.f32 %v1850_v6, %v1879_v4 }
 0x1e8   : > { %1893 = vst.msk [vmem:[%s3281_s4 + $0x30] sm:$0x3] %vm1658_vm1, %v1886_v11 }
 0x1e9 PF: > { %s14_s15 = sadd.s32 1, %s2662_s15  }
 0x1ea   : > { %p11_p6 = scmp.ge.s32.totalorder %s14_s15, 6  }
 0x1ec   :  { %13 = sbr.rel (!%p11_p6) target bundleno = 1 (0x1), region = 74 }

// kernel: cnn_forward.5
= control target key start
LH: loop header
LB: loop body
LE: loop exit
PB: predicated region body
PF: predicated region fallthrough
CT: control target
= control target key end

     0   :  { %s7237_s0 = inlined_call_operand.vmem [shape: bf16[2,1600], index: 0, kind: input, shape index: {}]   ;;  %s7238_s1 = inlined_call_operand.vmem [shape: bf16[1600,384], index: 1, kind: input, shape index: {}]   ;;  %s7239_s2 = inlined_call_operand.vmem [shape: f32[1,384], index: 2, kind: input, shape index: {}]   ;;  %s7240_s3 = inlined_call_operand.vmem [shape: bf16[384,192], index: 3, kind: input, shape index: {}]   ;;  %s7241_s4 = inlined_call_operand.vmem [shape: f32[1,192], index: 4, kind: input, shape index: {}]   ;;  %s7242_s5 = inlined_call_operand.vmem [shape: bf16[192,10], index: 5, kind: input, shape index: {}]   ;;  %s7243_s6 = inlined_call_operand.vmem [shape: f32[1,10], index: 6, kind: input, shape index: {}]   ;;  %s7244_s7 = inlined_call_operand.hbm [shape: f32[2,10], index: 7, kind: output, shape index: {}]  }
   0x1   :  { %v3192_v0 = vld [vmem:[%s7238_s1 + $0xa8] sm:$0xf]  ;;  %v4572_v1 = vld [vmem:[%s7238_s1 + $0xb0] sm:$0xf0]  ;;  %v3180_v11 = vld [vmem:[%s7238_s1 + $0x90] sm:$0xf] }
   0x2   :  { %v3288_v2 = vld [vmem:[%s7238_s1 + $0x168] sm:$0xf]  ;;  %v3193_v3 = vor.u32 %v4572_v1, %v3192_v0  ;;  %v4596_v4 = vld [vmem:[%s7238_s1 + $0x170] sm:$0xf0]  ;;  %v4569_v13 = vld [vmem:[%s7238_s1 + $0x98] sm:$0xf0] }
   0x3   :  { %v3384_v5 = vld [vmem:[%s7238_s1 + $0x228] sm:$0xf]  ;;  %v4620_v6 = vld [vmem:[%s7238_s1 + $0x230] sm:$0xf0]  ;;  %v3289_v7 = vor.u32 %v4596_v4, %v3288_v2  ;;  %v3276_v14 = vld [vmem:[%s7238_s1 + $0x150] sm:$0xf]  ;;  %v3181_v16 = vor.u32 %v4569_v13, %v3180_v11 }
   0x4   :  { %v3385_v8 = vor.u32 %v4620_v6, %v3384_v5  ;;  %v3480_v9 = vld [vmem:[%s7238_s1 + $0x2e8] sm:$0xf]  ;;  %v4644_v10 = vld [vmem:[%s7238_s1 + $0x2f0] sm:$0xf0]  ;;  %2070 = vmatpush.bf16.msra.mxu0 %v3193_v3  ;;  %v4593_v15 = vld [vmem:[%s7238_s1 + $0x158] sm:$0xf0] }
   0x5   :  { %v3481_v12 = vor.u32 %v4644_v10, %v3480_v9  ;;  %2083 = vmatpush.bf16.msra.mxu1 %v3289_v7  ;;  %v3277_v17 = vor.u32 %v4593_v15, %v3276_v14  ;;  %v3372_v18 = vld [vmem:[%s7238_s1 + $0x210] sm:$0xf]  ;;  %v4617_v19 = vld [vmem:[%s7238_s1 + $0x218] sm:$0xf0]  ;;  %v3168_v23 = vld [vmem:[%s7238_s1 + $0x78] sm:$0xf] }
   0x6   :  { %2096 = vmatpush.bf16.msra.mxu2 %v3385_v8  ;;  %v3468_v20 = vld [vmem:[%s7238_s1 + $0x2d0] sm:$0xf]  ;;  %v3373_v21 = vor.u32 %v4617_v19, %v3372_v18  ;;  %v4641_v22 = vld [vmem:[%s7238_s1 + $0x2d8] sm:$0xf0]  ;;  %v4566_v24 = vld [vmem:[%s7238_s1 + $0x80] sm:$0xf0] }
   0x7   :  { %2109 = vmatpush.bf16.msra.mxu3 %v3481_v12  ;;  %v3469_v25 = vor.u32 %v4641_v22, %v3468_v20  ;;  %v3264_v26 = vld [vmem:[%s7238_s1 + $0x138] sm:$0xf]  ;;  %v4590_v27 = vld [vmem:[%s7238_s1 + $0x140] sm:$0xf0]  ;;  %v3169_v29 = vor.u32 %v4566_v24, %v3168_v23  ;;  %v3156_v35 = vld [vmem:[%s7238_s1 + $0x60] sm:$0xf] }
   0x8   :  { %v3360_v28 = vld [vmem:[%s7238_s1 + $0x1f8] sm:$0xf]  ;;  %2071 = vmatpush.bf16.msra.mxu0 %v3181_v16  ;;  %v4614_v30 = vld [vmem:[%s7238_s1 + $0x200] sm:$0xf0]  ;;  %v3265_v33 = vor.u32 %v4590_v27, %v3264_v26  ;;  %v4563_v36 = vld [vmem:[%s7238_s1 + $0x68] sm:$0xf0] }
   0x9   :  { %v3456_v31 = vld [vmem:[%s7238_s1 + $0x2b8] sm:$0xf]  ;;  %v4638_v32 = vld [vmem:[%s7238_s1 + $0x2c0] sm:$0xf0]  ;;  %2084 = vmatpush.bf16.msra.mxu1 %v3277_v17  ;;  %v3361_v34 = vor.u32 %v4614_v30, %v3360_v28  ;;  %v3252_v37 = vld [vmem:[%s7238_s1 + $0x120] sm:$0xf]  ;;  %v3157_v44 = vor.u32 %v4563_v36, %v3156_v35 }
   0xa   :  { %2097 = vmatpush.bf16.msra.mxu2 %v3373_v21  ;;  %v3457_v38 = vor.u32 %v4638_v32, %v3456_v31  ;;  %v4587_v39 = vld [vmem:[%s7238_s1 + $0x128] sm:$0xf0]  ;;  %v3348_v40 = vld [vmem:[%s7238_s1 + $0x1e0] sm:$0xf]  ;;  %v3144_v47 = vld [vmem:[%s7238_s1 + $0x48] sm:$0xf] }
   0xb   :  { %2110 = vmatpush.bf16.msra.mxu3 %v3469_v25  ;;  %v4611_v41 = vld [vmem:[%s7238_s1 + $0x1e8] sm:$0xf0]  ;;  %v3444_v42 = vld [vmem:[%s7238_s1 + $0x2a0] sm:$0xf]  ;;  %v3253_v45 = vor.u32 %v4587_v39, %v3252_v37  ;;  %v4560_v48 = vld [vmem:[%s7238_s1 + $0x50] sm:$0xf0] }
   0xc   :  { %v4635_v43 = vld [vmem:[%s7238_s1 + $0x2a8] sm:$0xf0]  ;;  %2072 = vmatpush.bf16.msra.mxu0 %v3169_v29  ;;  %v3349_v46 = vor.u32 %v4611_v41, %v3348_v40  ;;  %v3240_v49 = vld [vmem:[%s7238_s1 + $0x108] sm:$0xf]  ;;  %v4584_v51 = vld [vmem:[%s7238_s1 + $0x110] sm:$0xf0]  ;;  %v3145_v56 = vor.u32 %v4560_v48, %v3144_v47 }
   0xd   :  { %2085 = vmatpush.bf16.msra.mxu1 %v3265_v33  ;;  %v3445_v50 = vor.u32 %v4635_v43, %v3444_v42  ;;  %v3336_v52 = vld [vmem:[%s7238_s1 + $0x1c8] sm:$0xf]  ;;  %v4608_v53 = vld [vmem:[%s7238_s1 + $0x1d0] sm:$0xf0]  ;;  %v3241_v57 = vor.u32 %v4584_v51, %v3240_v49  ;;  %v3132_v59 = vld [vmem:[%s7238_s1 + $0x30] sm:$0xf] }
   0xe   :  { %2098 = vmatpush.bf16.msra.mxu2 %v3361_v34  ;;  %v3432_v54 = vld [vmem:[%s7238_s1 + $0x288] sm:$0xf]  ;;  %v4632_v55 = vld [vmem:[%s7238_s1 + $0x290] sm:$0xf0]  ;;  %v3337_v58 = vor.u32 %v4608_v53, %v3336_v52  ;;  %v4557_v60 = vld [vmem:[%s7238_s1 + $0x38] sm:$0xf0] }
   0xf   :  { %2111 = vmatpush.bf16.msra.mxu3 %v3457_v38  ;;  %v3228_v61 = vld [vmem:[%s7238_s1 + $0xf0] sm:$0xf]  ;;  %v3433_v62 = vor.u32 %v4632_v55, %v3432_v54  ;;  %v4581_v63 = vld [vmem:[%s7238_s1 + $0xf8] sm:$0xf0]  ;;  %v3133_v4 = vor.u32 %v4557_v60, %v3132_v59  ;;  %v3120_v7 = vld [vmem:[%s7238_s1 + $0x18] sm:$0xf] }
  0x10   :  { %2073 = vmatpush.bf16.msra.mxu0 %v3157_v44  ;;  %v3324_v0 = vld [vmem:[%s7238_s1 + $0x1b0] sm:$0xf]  ;;  %v4605_v1 = vld [vmem:[%s7238_s1 + $0x1b8] sm:$0xf0]  ;;  %v3229_v5 = vor.u32 %v4581_v63, %v3228_v61  ;;  %v4554_v8 = vld [vmem:[%s7238_s1 + $0x20] sm:$0xf0] }
  0x11   :  { %2086 = vmatpush.bf16.msra.mxu1 %v3253_v45  ;;  %v3420_v2 = vld [vmem:[%s7238_s1 + $0x270] sm:$0xf]  ;;  %v4629_v3 = vld [vmem:[%s7238_s1 + $0x278] sm:$0xf0]  ;;  %v3325_v6 = vor.u32 %v4605_v1, %v3324_v0  ;;  %v3216_v9 = vld [vmem:[%s7238_s1 + $0xd8] sm:$0xf]  ;;  %v3121_v16 = vor.u32 %v4554_v8, %v3120_v7 }
  0x12   :  { %2099 = vmatpush.bf16.msra.mxu2 %v3349_v46  ;;  %v3421_v10 = vor.u32 %v4629_v3, %v3420_v2  ;;  %v4578_v11 = vld [vmem:[%s7238_s1 + $0xe0] sm:$0xf0]  ;;  %v3312_v12 = vld [vmem:[%s7238_s1 + $0x198] sm:$0xf]  ;;  %v3108_v17 = vld [vmem:[%s7238_s1] sm:$0xf] }
  0x13   :  { %2112 = vmatpush.bf16.msra.mxu3 %v3445_v50  ;;  %v4602_v13 = vld [vmem:[%s7238_s1 + $0x1a0] sm:$0xf0]  ;;  %v3408_v14 = vld [vmem:[%s7238_s1 + $0x258] sm:$0xf]  ;;  %v4551_v18 = vld [vmem:[%s7238_s1 + $0x8] sm:$0xf0]  ;;  %v3217_v19 = vor.u32 %v4578_v11, %v3216_v9 }
  0x14   :  { %2074 = vmatpush.bf16.msra.mxu0 %v3145_v56  ;;  %v4626_v15 = vld [vmem:[%s7238_s1 + $0x260] sm:$0xf0]  ;;  %v3313_v20 = vor.u32 %v4602_v13, %v3312_v12  ;;  %v3204_v21 = vld [vmem:[%s7238_s1 + $0xc0] sm:$0xf]  ;;  %v4575_v22 = vld [vmem:[%s7238_s1 + $0xc8] sm:$0xf0]  ;;  %v3109_v31 = vor.u32 %v4551_v18, %v3108_v17 }
  0x15   :  { %2087 = vmatpush.bf16.msra.mxu1 %v3241_v57  ;;  %v3300_v23 = vld [vmem:[%s7238_s1 + $0x180] sm:$0xf]  ;;  %v3409_v24 = vor.u32 %v4626_v15, %v3408_v14  ;;  %v4599_v25 = vld [vmem:[%s7238_s1 + $0x188] sm:$0xf0]  ;;  %v3576_v28 = vld [vmem:[%s7238_s1 + $0x3a8] sm:$0xf]  ;;  %v3205_v35 = vor.u32 %v4575_v22, %v3204_v21 }
  0x16   :  { %2100 = vmatpush.bf16.msra.mxu2 %v3337_v58  ;;  %v3396_v26 = vld [vmem:[%s7238_s1 + $0x240] sm:$0xf]  ;;  %v4623_v27 = vld [vmem:[%s7238_s1 + $0x248] sm:$0xf0]  ;;  %v4668_v29 = vld [vmem:[%s7238_s1 + $0x3b0] sm:$0xf0]  ;;  %v3301_v36 = vor.u32 %v4599_v25, %v3300_v23 }
  0x17   :  { %2113 = vmatpush.bf16.msra.mxu3 %v3433_v62  ;;  %v3672_v30 = vld [vmem:[%s7238_s1 + $0x468] sm:$0xf]  ;;  %v4692_v32 = vld [vmem:[%s7238_s1 + $0x470] sm:$0xf0]  ;;  %v3397_v39 = vor.u32 %v4623_v27, %v3396_v26  ;;  %v3577_v40 = vor.u32 %v4668_v29, %v3576_v28  ;;  %v3564_v43 = vld [vmem:[%s7238_s1 + $0x390] sm:$0xf] }
  0x18   :  { %2075 = vmatpush.bf16.msra.mxu0 %v3133_v4  ;;  %v3768_v33 = vld [vmem:[%s7238_s1 + $0x528] sm:$0xf]  ;;  %v4716_v34 = vld [vmem:[%s7238_s1 + $0x530] sm:$0xf0]  ;;  %v3673_v41 = vor.u32 %v4692_v32, %v3672_v30  ;;  %v4665_v44 = vld [vmem:[%s7238_s1 + $0x398] sm:$0xf0] }
  0x19   :  { %2088 = vmatpush.bf16.msra.mxu1 %v3229_v5  ;;  %v3864_v37 = vld [vmem:[%s7238_s1 + $0x5e8] sm:$0xf]  ;;  %v4740_v38 = vld [vmem:[%s7238_s1 + $0x5f0] sm:$0xf0]  ;;  %v3769_v42 = vor.u32 %v4716_v34, %v3768_v33  ;;  %v3660_v45 = vld [vmem:[%s7238_s1 + $0x450] sm:$0xf]  ;;  %v3565_v52 = vor.u32 %v4665_v44, %v3564_v43 }
  0x1a   :  { %2101 = vmatpush.bf16.msra.mxu2 %v3325_v6  ;;  %v3865_v46 = vor.u32 %v4740_v38, %v3864_v37  ;;  %v4689_v47 = vld [vmem:[%s7238_s1 + $0x458] sm:$0xf0]  ;;  %v3756_v48 = vld [vmem:[%s7238_s1 + $0x510] sm:$0xf]  ;;  %v3552_v55 = vld [vmem:[%s7238_s1 + $0x378] sm:$0xf] }
  0x1b   :  { %2114 = vmatpush.bf16.msra.mxu3 %v3421_v10  ;;  %v4713_v49 = vld [vmem:[%s7238_s1 + $0x518] sm:$0xf0]  ;;  %v3852_v50 = vld [vmem:[%s7238_s1 + $0x5d0] sm:$0xf]  ;;  %v3661_v53 = vor.u32 %v4689_v47, %v3660_v45  ;;  %v4662_v56 = vld [vmem:[%s7238_s1 + $0x380] sm:$0xf0] }
  0x1c   :  { %2076 = vmatpush.bf16.msra.mxu0 %v3121_v16  ;;  %v4737_v51 = vld [vmem:[%s7238_s1 + $0x5d8] sm:$0xf0]  ;;  %v3757_v54 = vor.u32 %v4713_v49, %v3756_v48  ;;  %v3648_v57 = vld [vmem:[%s7238_s1 + $0x438] sm:$0xf]  ;;  %v4686_v59 = vld [vmem:[%s7238_s1 + $0x440] sm:$0xf0]  ;;  %v3553_v0 = vor.u32 %v4662_v56, %v3552_v55 }
  0x1d   :  { %2089 = vmatpush.bf16.msra.mxu1 %v3217_v19  ;;  %v3853_v58 = vor.u32 %v4737_v51, %v3852_v50  ;;  %v3744_v60 = vld [vmem:[%s7238_s1 + $0x4f8] sm:$0xf]  ;;  %v4710_v61 = vld [vmem:[%s7238_s1 + $0x500] sm:$0xf0]  ;;  %v3540_v1 = vld [vmem:[%s7238_s1 + $0x360] sm:$0xf]  ;;  %v3649_v3 = vor.u32 %v4686_v59, %v3648_v57 }
  0x1e   :  { %2102 = vmatpush.bf16.msra.mxu2 %v3313_v20  ;;  %v3840_v62 = vld [vmem:[%s7238_s1 + $0x5b8] sm:$0xf]  ;;  %v4734_v63 = vld [vmem:[%s7238_s1 + $0x5c0] sm:$0xf0]  ;;  %v3745_v4 = vor.u32 %v4710_v61, %v3744_v60  ;;  %v4659_v5 = vld [vmem:[%s7238_s1 + $0x368] sm:$0xf0] }
  0x1f   :  { %2115 = vmatpush.bf16.msra.mxu3 %v3409_v24  ;;  %v28_v2 = vld [vmem:[%s7237_s0] sm:$0xff]  ;;  %v3841_v7 = vor.u32 %v4734_v63, %v3840_v62  ;;  %v4683_v8 = vld [vmem:[%s7238_s1 + $0x428] sm:$0xf0]  ;;  %v3541_v13 = vor.u32 %v4659_v5, %v3540_v1  ;;  %v3528_v16 = vld [vmem:[%s7238_s1 + $0x348] sm:$0xf] }
  0x20   :  { %2077 = vmatpush.bf16.msra.mxu0 %v3109_v31  ;;  %v3636_v6 = vld [vmem:[%s7238_s1 + $0x420] sm:$0xf]  ;;  %439 = vst [vmem:[#allocation1] ss:$9 sm:$0xff] %v28_v2  ;;  %v4707_v10 = vld [vmem:[%s7238_s1 + $0x4e8] sm:$0xf0] }
  0x21   :  { %2090 = vmatpush.bf16.msra.mxu1 %v3205_v35  ;;  %v3732_v9 = vld [vmem:[%s7238_s1 + $0x4e0] sm:$0xf]  ;;  %v4731_v12 = vld [vmem:[%s7238_s1 + $0x5a8] sm:$0xf0]  ;;  %v3637_v14 = vor.u32 %v4683_v8, %v3636_v6  ;;  %v4656_v17 = vld [vmem:[%s7238_s1 + $0x350] sm:$0xf0] }
  0x22   :  { %2103 = vmatpush.bf16.msra.mxu2 %v3301_v36  ;;  %v3828_v11 = vld [vmem:[%s7238_s1 + $0x5a0] sm:$0xf]  ;;  %v3733_v15 = vor.u32 %v4707_v10, %v3732_v9  ;;  %v3624_v18 = vld [vmem:[%s7238_s1 + $0x408] sm:$0xf]  ;;  %v4680_v20 = vld [vmem:[%s7238_s1 + $0x410] sm:$0xf0]  ;;  %v3529_v26 = vor.u32 %v4656_v17, %v3528_v16 }
  0x23   :  { %2116 = vmatpush.bf16.msra.mxu3 %v3397_v39  ;;  %v3829_v19 = vor.u32 %v4731_v12, %v3828_v11  ;;  %v3720_v21 = vld [vmem:[%s7238_s1 + $0x4c8] sm:$0xf]  ;;  %v4704_v22 = vld [vmem:[%s7238_s1 + $0x4d0] sm:$0xf0]  ;;  %v3516_v25 = vld [vmem:[%s7238_s1 + $0x330] sm:$0xf]  ;;  %v3625_v30 = vor.u32 %v4680_v20, %v3624_v18 }
  0x24   :  { %2122 = vmatpush.bf16.msrb.mxu0 %v3577_v40  ;;  %v3816_v23 = vld [vmem:[%s7238_s1 + $0x588] sm:$0xf]  ;;  %v4728_v24 = vld [vmem:[%s7238_s1 + $0x590] sm:$0xf0]  ;;  %v3721_v31 = vor.u32 %v4704_v22, %v3720_v21  ;;  %v4653_v32 = vld [vmem:[%s7238_s1 + $0x338] sm:$0xf0] }
  0x25   :  { %2135 = vmatpush.bf16.msrb.mxu1 %v3673_v41  ;;  %v3612_v33 = vld [vmem:[%s7238_s1 + $0x3f0] sm:$0xf]  ;;  %v3817_v35 = vor.u32 %v4728_v24, %v3816_v23  ;;  %v4677_v36 = vld [vmem:[%s7238_s1 + $0x3f8] sm:$0xf0]  ;;  %v3517_v41 = vor.u32 %v4653_v32, %v3516_v25  ;;  %v4650_v45 = vld [vmem:[%s7238_s1 + $0x320] sm:$0xf0] }
  0x26   :  { %2148 = vmatpush.bf16.msrb.mxu2 %v3769_v42  ;;  %v3708_v37 = vld [vmem:[%s7238_s1 + $0x4b0] sm:$0xf]  ;;  %v4701_v38 = vld [vmem:[%s7238_s1 + $0x4b8] sm:$0xf0]  ;;  %v3504_v42 = vld [vmem:[%s7238_s1 + $0x318] sm:$0xf]  ;;  %v3613_v43 = vor.u32 %v4677_v36, %v3612_v33 }
  0x27   :  { %2161 = vmatpush.bf16.msrb.mxu3 %v3865_v46  ;;  %v5303_v27 = vld [vmem:[#allocation1 + $0x12] sm:$0xff]  ;;  %v5305_v28 = vld [vmem:[#allocation1] sm:$0xff]  ;;  %v5315_v34 = vld [vmem:[#allocation1 + $0x9] sm:$0xff]  ;;  %v3709_v44 = vor.u32 %v4701_v38, %v3708_v37  ;;  %v3505_v55 = vor.u32 %v4650_v45, %v3504_v42 }
  0x28   :  { %2123 = vmatpush.bf16.msrb.mxu0 %v3565_v52  ;;  %v5307_v29 = vld [vmem:[#allocation1 + $0x1b] sm:$0xff]  ;;  %2104 = vmatmul.bf16.vlgmr.msra.gmra.mxu2 %v5303_v27  ;;  %v3804_v39 = vld [vmem:[%s7238_s1 + $0x570] sm:$0xf]  ;;  %v4674_v47 = vld [vmem:[%s7238_s1 + $0x3e0] sm:$0xf0] }
  0x29   :  { %2136 = vmatpush.bf16.msrb.mxu1 %v3661_v53  ;;  %v4725_v40 = vld [vmem:[%s7238_s1 + $0x578] sm:$0xf0]  ;;  %2078 = vmatmul.bf16.vlgmr.msra.gmra.mxu0 %v5305_v28  ;;  %v3600_v46 = vld [vmem:[%s7238_s1 + $0x3d8] sm:$0xf]  ;;  %v4698_v50 = vld [vmem:[%s7238_s1 + $0x4a0] sm:$0xf0] }
  0x2a   :  { %2149 = vmatpush.bf16.msrb.mxu2 %v3757_v54  ;;  %2117 = vmatmul.bf16.vlgmr.msra.gmra.mxu3 %v5307_v29  ;;  %v3805_v48 = vor.u32 %v4725_v40, %v3804_v39  ;;  %v3696_v49 = vld [vmem:[%s7238_s1 + $0x498] sm:$0xf]  ;;  %v4722_v52 = vld [vmem:[%s7238_s1 + $0x560] sm:$0xf0]  ;;  %v3492_v53 = vld [vmem:[%s7238_s1 + $0x300] sm:$0xf]  ;;  %v3601_v62 = vor.u32 %v4674_v47, %v3600_v46 }
  0x2b   :  { %2162 = vmatpush.bf16.msrb.mxu3 %v3853_v58  ;;  %2091 = vmatmul.bf16.vlgmr.msra.gmra.mxu1 %v5315_v34  ;;  %v3792_v51 = vld [vmem:[%s7238_s1 + $0x558] sm:$0xf]  ;;  %v4647_v54 = vld [vmem:[%s7238_s1 + $0x308] sm:$0xf0]  ;;  %v3588_v56 = vld [vmem:[%s7238_s1 + $0x3c0] sm:$0xf]  ;;  %v3697_v63 = vor.u32 %v4698_v50, %v3696_v49 }
  0x2c   :  { %2124 = vmatpush.bf16.msrb.mxu0 %v3553_v0  ;;  %v4671_v57 = vld [vmem:[%s7238_s1 + $0x3c8] sm:$0xf0]  ;;  %v3684_v58 = vld [vmem:[%s7238_s1 + $0x480] sm:$0xf]  ;;  %v5378_v60 = vld [vmem:[#allocation1 + $0x36] sm:$0xff]  ;;  %v3493_v9 = vor.u32 %v4647_v54, %v3492_v53 }
  0x2d   :  { %2137 = vmatpush.bf16.msrb.mxu1 %v3649_v3  ;;  %v4695_v59 = vld [vmem:[%s7238_s1 + $0x488] sm:$0xf0]  ;;  %v5383_v0 = vld [vmem:[#allocation1 + $0x24] sm:$0xff]  ;;  %v3793_v3 = vor.u32 %v4722_v52, %v3792_v51  ;;  %v4788_v10 = vld [vmem:[%s7238_s1 + $0x770] sm:$0xf0] }
  0x2e   :  { %2150 = vmatpush.bf16.msrb.mxu2 %v3745_v4  ;;  %v29_v61 = vld [vmem:[%s7237_s0 + $0x8] sm:$0x1f]  ;;  %v5385_v1 = vld [vmem:[#allocation1 + $0x3f] sm:$0xff]  ;;  %v5387_v2 = vld [vmem:[#allocation1 + $0x2d] sm:$0xff] }
  0x2f   :  { %2163 = vmatpush.bf16.msrb.mxu3 %v3841_v7  ;;  %v3780_v4 = vld [vmem:[%s7238_s1 + $0x540] sm:$0xf]  ;;  %v4719_v5 = vld [vmem:[%s7238_s1 + $0x548] sm:$0xf0]  ;;  %449 = vst [vmem:[#allocation1] ss:$9 sm:$0xff] %v29_v61 }
  0x30   :  { %2125 = vmatpush.bf16.msrb.mxu0 %v3541_v13  ;;  %v3960_v6 = vld [vmem:[%s7238_s1 + $0x6a8] sm:$0xf]  ;;  %v4764_v7 = vld [vmem:[%s7238_s1 + $0x6b0] sm:$0xf0]  ;;  %v3589_v13 = vor.u32 %v4671_v57, %v3588_v56  ;;  %v3781_v17 = vor.u32 %v4719_v5, %v3780_v4  ;;  %v3948_v21 = vld [vmem:[%s7238_s1 + $0x690] sm:$0xf] }
  0x31   :  { %2138 = vmatpush.bf16.msrb.mxu1 %v3637_v14  ;;  %v4056_v8 = vld [vmem:[%s7238_s1 + $0x768] sm:$0xf]  ;;  %v4812_v12 = vld [vmem:[%s7238_s1 + $0x830] sm:$0xf0]  ;;  %v3685_v14 = vor.u32 %v4695_v59, %v3684_v58  ;;  %v3961_v18 = vor.u32 %v4764_v7, %v3960_v6  ;;  %v4761_v22 = vld [vmem:[%s7238_s1 + $0x698] sm:$0xf0] }
  0x32   :  { %2151 = vmatpush.bf16.msrb.mxu2 %v3733_v15  ;;  %v4152_v11 = vld [vmem:[%s7238_s1 + $0x828] sm:$0xf]  ;;  %v4836_v16 = vld [vmem:[%s7238_s1 + $0x8f0] sm:$0xf0]  ;;  %v4044_v23 = vld [vmem:[%s7238_s1 + $0x750] sm:$0xf]  ;;  %v3949_v33 = vor.u32 %v4761_v22, %v3948_v21 }
  0x33   :  { %2164 = vmatpush.bf16.msrb.mxu3 %v3829_v19  ;;  %v4248_v15 = vld [vmem:[%s7238_s1 + $0x8e8] sm:$0xf]  ;;  %v4057_v19 = vor.u32 %v4788_v10, %v4056_v8  ;;  %v4153_v20 = vor.u32 %v4812_v12, %v4152_v11  ;;  %v4785_v25 = vld [vmem:[%s7238_s1 + $0x758] sm:$0xf0]  ;;  %v3936_v37 = vld [vmem:[%s7238_s1 + $0x678] sm:$0xf] }
  0x34   :  { %2126 = vmatpush.bf16.msrb.mxu0 %v3529_v26  ;;  %v4249_v24 = vor.u32 %v4836_v16, %v4248_v15  ;;  %v4140_v26 = vld [vmem:[%s7238_s1 + $0x810] sm:$0xf]  ;;  %v4833_v32 = vld [vmem:[%s7238_s1 + $0x8d8] sm:$0xf0]  ;;  %v4758_v38 = vld [vmem:[%s7238_s1 + $0x680] sm:$0xf0] }
  0x35   :  { %2139 = vmatpush.bf16.msrb.mxu1 %v3625_v30  ;;  %v4809_v30 = vld [vmem:[%s7238_s1 + $0x818] sm:$0xf0]  ;;  %v4032_v39 = vld [vmem:[%s7238_s1 + $0x738] sm:$0xf]  ;;  %v4830_v45 = vld [vmem:[%s7238_s1 + $0x8c0] sm:$0xf0]  ;;  %v3937_v46 = vor.u32 %v4758_v38, %v3936_v37 }
  0x36   :  { %2152 = vmatpush.bf16.msrb.mxu2 %v3721_v31  ;;  %v4236_v31 = vld [vmem:[%s7238_s1 + $0x8d0] sm:$0xf]  ;;  %v4141_v36 = vor.u32 %v4809_v30, %v4140_v26  ;;  %v4128_v42 = vld [vmem:[%s7238_s1 + $0x7f8] sm:$0xf]  ;;  %v3924_v49 = vld [vmem:[%s7238_s1 + $0x660] sm:$0xf] }
  0x37   :  { %2165 = vmatpush.bf16.msrb.mxu3 %v3817_v35  ;;  %v4045_v35 = vor.u32 %v4785_v25, %v4044_v23  ;;  %v4237_v40 = vor.u32 %v4833_v32, %v4236_v31  ;;  %v4755_v50 = vld [vmem:[%s7238_s1 + $0x668] sm:$0xf0]  ;;  %v4020_v51 = vld [vmem:[%s7238_s1 + $0x720] sm:$0xf]  ;;  %v4776_v5 = vld [vmem:[%s7238_s1 + $0x710] sm:$0xf0] }
  0x38   :  { %2127 = vmatpush.bf16.msrb.mxu0 %v3517_v41  ;;  %v4782_v41 = vld [vmem:[%s7238_s1 + $0x740] sm:$0xf0]  ;;  %v4779_v53 = vld [vmem:[%s7238_s1 + $0x728] sm:$0xf0]  ;;  %v4116_v54 = vld [vmem:[%s7238_s1 + $0x7e0] sm:$0xf]  ;;  %v3925_v58 = vor.u32 %v4755_v50, %v3924_v49 }
  0x39   :  { %2140 = vmatpush.bf16.msrb.mxu1 %v3613_v43  ;;  %v4806_v43 = vld [vmem:[%s7238_s1 + $0x800] sm:$0xf0]  ;;  %v4033_v47 = vor.u32 %v4782_v41, %v4032_v39  ;;  %v4212_v56 = vld [vmem:[%s7238_s1 + $0x8a0] sm:$0xf]  ;;  %v4827_v57 = vld [vmem:[%s7238_s1 + $0x8a8] sm:$0xf0]  ;;  %v4021_v59 = vor.u32 %v4779_v53, %v4020_v51 }
  0x3a   :  { %2153 = vmatpush.bf16.msrb.mxu2 %v3709_v44  ;;  %v4224_v44 = vld [vmem:[%s7238_s1 + $0x8b8] sm:$0xf]  ;;  %v4213_v4 = vor.u32 %v4827_v57, %v4212_v56  ;;  %v4104_v6 = vld [vmem:[%s7238_s1 + $0x7c8] sm:$0xf]  ;;  %v4800_v7 = vld [vmem:[%s7238_s1 + $0x7d0] sm:$0xf0] }
  0x3b   :  { %2166 = vmatpush.bf16.msrb.mxu3 %v3805_v48  ;;  %v4129_v48 = vor.u32 %v4806_v43, %v4128_v42  ;;  %v4225_v52 = vor.u32 %v4830_v45, %v4224_v44  ;;  %v4200_v8 = vld [vmem:[%s7238_s1 + $0x888] sm:$0xf]  ;;  %v4105_v12 = vor.u32 %v4800_v7, %v4104_v6  ;;  %v3996_v15 = vld [vmem:[%s7238_s1 + $0x6f0] sm:$0xf]  ;;  %v4821_v21 = vld [vmem:[%s7238_s1 + $0x878] sm:$0xf0] }
  0x3c   :  { %2128 = vmatpush.bf16.msrb.mxu0 %v3505_v55  ;;  %v4803_v55 = vld [vmem:[%s7238_s1 + $0x7e8] sm:$0xf0]  ;;  %v3888_v25 = vld [vmem:[%s7238_s1 + $0x618] sm:$0xf]  ;;  %v4746_v26 = vld [vmem:[%s7238_s1 + $0x620] sm:$0xf0] }
  0x3d   :  { %2141 = vmatpush.bf16.msrb.mxu1 %v3601_v62  ;;  %v4117_v61 = vor.u32 %v4803_v55, %v4116_v54  ;;  %v3912_v62 = vld [vmem:[%s7238_s1 + $0x648] sm:$0xf]  ;;  %v3984_v30 = vld [vmem:[%s7238_s1 + $0x6d8] sm:$0xf]  ;;  %v4770_v32 = vld [vmem:[%s7238_s1 + $0x6e0] sm:$0xf0]  ;;  %v3889_v38 = vor.u32 %v4746_v26, %v3888_v25 }
  0x3e   :  { %2154 = vmatpush.bf16.msrb.mxu2 %v3697_v63  ;;  %v4752_v63 = vld [vmem:[%s7238_s1 + $0x650] sm:$0xf0]  ;;  %v4818_v37 = vld [vmem:[%s7238_s1 + $0x860] sm:$0xf0]  ;;  %v3876_v39 = vld [vmem:[%s7238_s1 + $0x600] sm:$0xf]  ;;  %v3985_v41 = vor.u32 %v4770_v32, %v3984_v30 }
  0x3f   :  { %2167 = vmatpush.bf16.msrb.mxu3 %v3793_v3  ;;  %v4008_v3 = vld [vmem:[%s7238_s1 + $0x708] sm:$0xf]  ;;  %v3913_v10 = vor.u32 %v4752_v63, %v3912_v62  ;;  %v3972_v43 = vld [vmem:[%s7238_s1 + $0x6c0] sm:$0xf]  ;;  %v4767_v44 = vld [vmem:[%s7238_s1 + $0x6c8] sm:$0xf0] }
  0x40   :  { %2129 = vmatpush.bf16.msrb.mxu0 %v3493_v9  ;;  %v4824_v9 = vld [vmem:[%s7238_s1 + $0x890] sm:$0xf0]  ;;  %v4009_v11 = vor.u32 %v4776_v5, %v4008_v3  ;;  %v4068_v45 = vld [vmem:[%s7238_s1 + $0x780] sm:$0xf]  ;;  %v4815_v49 = vld [vmem:[%s7238_s1 + $0x848] sm:$0xf0]  ;;  %v3973_v57 = vor.u32 %v4767_v44, %v3972_v43 }
  0x41   :  { %2142 = vmatpush.bf16.msrb.mxu1 %v3589_v13  ;;  %v3900_v13 = vld [vmem:[%s7238_s1 + $0x630] sm:$0xf]  ;;  %v4201_v16 = vor.u32 %v4824_v9, %v4200_v8  ;;  %v4296_v50 = vld [vmem:[%s7238_s1 + $0x948] sm:$0xf]  ;;  %v4848_v51 = vld [vmem:[%s7238_s1 + $0x950] sm:$0xf0] }
  0x42   :  { %2155 = vmatpush.bf16.msrb.mxu2 %v3685_v14  ;;  %v4749_v14 = vld [vmem:[%s7238_s1 + $0x638] sm:$0xf0]  ;;  %v3194_v54 = vld [vmem:[%s7238_s1 + $0xb4] sm:$0xf0]  ;;  %v4595_v55 = vld [vmem:[%s7238_s1 + $0x16c] sm:$0xf]  ;;  %v4297_v63 = vor.u32 %v4848_v51, %v4296_v50 }
  0x43   :  { %2168 = vmatpush.bf16.msrb.mxu3 %v3781_v17  ;;  %2130 = vmatmul.bf16.vlgmr.msrb.gmra.mxu0 %v5383_v0  ;;  %v4773_v17 = vld [vmem:[%s7238_s1 + $0x6f8] sm:$0xf0]  ;;  %v3901_v22 = vor.u32 %v4749_v14, %v3900_v13  ;;  %v3290_v56 = vld [vmem:[%s7238_s1 + $0x174] sm:$0xf0]  ;;  %v5615_v5 = vld [vmem:[#allocation1] sm:$0xff] }
  0x44   :  { %2174 = vmatpush.bf16.msra.mxu0 %v3961_v18  ;;  %2143 = vmatmul.bf16.vlgmr.msrb.gmra.mxu1 %v5387_v2  ;;  %v4092_v18 = vld [vmem:[%s7238_s1 + $0x7b0] sm:$0xf]  ;;  %v3997_v23 = vor.u32 %v4773_v17, %v3996_v15  ;;  %v4845_v7 = vld [vmem:[%s7238_s1 + $0x938] sm:$0xf0]  ;;  %v4568_v8 = vld [vmem:[%s7238_s1 + $0x94] sm:$0xf] }
  0x45   :  { %2187 = vmatpush.bf16.msra.mxu1 %v4057_v19  ;;  %2156 = vmatmul.bf16.vlgmr.msrb.gmra.mxu2 %v5378_v60  ;;  %v4797_v19 = vld [vmem:[%s7238_s1 + $0x7b8] sm:$0xf0]  ;;  %v4284_v6 = vld [vmem:[%s7238_s1 + $0x930] sm:$0xf]  ;;  %v4616_v14 = vld [vmem:[%s7238_s1 + $0x214] sm:$0xf] }
  0x46   :  { %2200 = vmatpush.bf16.msra.mxu2 %v4153_v20  ;;  %2169 = vmatmul.bf16.vlgmr.msrb.gmra.mxu3 %v5385_v1  ;;  %v4188_v20 = vld [vmem:[%s7238_s1 + $0x870] sm:$0xf]  ;;  %v3374_v15 = vld [vmem:[%s7238_s1 + $0x21c] sm:$0xf0]  ;;  %v4589_v26 = vld [vmem:[%s7238_s1 + $0x13c] sm:$0xf] }
  0x47   :  { %2213 = vmatpush.bf16.msra.mxu3 %v4249_v24  ;;  %v4093_v24 = vor.u32 %v4797_v19, %v4092_v18  ;;  %v4189_v31 = vor.u32 %v4821_v21, %v4188_v20  ;;  %v5635_v13 = vld [vmem:[#allocation1 + $0x12] sm:$0xff]  ;;  %v5645_v17 = vld [vmem:[#allocation1 + $0x1b] sm:$0xff]  ;;  %v4285_v18 = vor.u32 %v4845_v7, %v4284_v6  ;;  %v3377_v25 = vor.u32 %v4616_v14, %v3374_v15  ;;  %v3266_v30 = vld [vmem:[%s7238_s1 + $0x144] sm:$0xf0] }
  0x48   :  { %2175 = vmatpush.bf16.msra.mxu0 %v3949_v33  ;;  %v4080_v33 = vld [vmem:[%s7238_s1 + $0x798] sm:$0xf]  ;;  %v3362_v32 = vld [vmem:[%s7238_s1 + $0x204] sm:$0xf0] }
  0x49   :  { %2188 = vmatpush.bf16.msra.mxu1 %v4045_v35  ;;  %v4794_v35 = vld [vmem:[%s7238_s1 + $0x7a0] sm:$0xf0]  ;;  %v4272_v19 = vld [vmem:[%s7238_s1 + $0x918] sm:$0xf] }
  0x4a   :  { %2201 = vmatpush.bf16.msra.mxu2 %v4141_v36  ;;  %v4176_v36 = vld [vmem:[%s7238_s1 + $0x858] sm:$0xf]  ;;  %v4081_v42 = vor.u32 %v4794_v35, %v4080_v33 }
  0x4b   :  { %2214 = vmatpush.bf16.msra.mxu3 %v4237_v40  ;;  %v4743_v40 = vld [vmem:[%s7238_s1 + $0x608] sm:$0xf0] }
  0x4c   :  { %2176 = vmatpush.bf16.msra.mxu0 %v3937_v46  ;;  %v4177_v46 = vor.u32 %v4818_v37, %v4176_v36  ;;  %v3877_v53 = vor.u32 %v4743_v40, %v3876_v39 }
  0x4d   :  { %2189 = vmatpush.bf16.msra.mxu1 %v4033_v47  ;;  %v4791_v47 = vld [vmem:[%s7238_s1 + $0x788] sm:$0xf0] }
  0x4e   :  { %2202 = vmatpush.bf16.msra.mxu2 %v4129_v48  ;;  %v4164_v48 = vld [vmem:[%s7238_s1 + $0x840] sm:$0xf] }
  0x4f   :  { %2215 = vmatpush.bf16.msra.mxu3 %v4225_v52  ;;  %v4571_v52 = vld [vmem:[%s7238_s1 + $0xac] sm:$0xf]  ;;  %v4165_v62 = vor.u32 %v4815_v49, %v4164_v48 }
  0x50   :  { %2177 = vmatpush.bf16.msra.mxu0 %v3925_v58  ;;  %v4069_v58 = vor.u32 %v4791_v47, %v4068_v45  ;;  %v3197_v3 = vor.u32 %v4571_v52, %v3194_v54 }
  0x51   :  { %2190 = vmatpush.bf16.msra.mxu1 %v4021_v59  ;;  %v4619_v59 = vld [vmem:[%s7238_s1 + $0x22c] sm:$0xf] }
  0x52   :  { %2203 = vmatpush.bf16.msra.mxu2 %v4117_v61  ;;  %v3386_v61 = vld [vmem:[%s7238_s1 + $0x234] sm:$0xf0] }
  0x53   :  { %2216 = vmatpush.bf16.msra.mxu3 %v4213_v4  ;;  %v3293_v4 = vor.u32 %v4595_v55, %v3290_v56  ;;  %v3389_v9 = vor.u32 %v4619_v59, %v3386_v61 }
  0x54   :  { %2178 = vmatpush.bf16.msra.mxu0 %v3913_v10  ;;  %v3182_v10 = vld [vmem:[%s7238_s1 + $0x9c] sm:$0xf0] }
  0x55   :  { %2191 = vmatpush.bf16.msra.mxu1 %v4009_v11  ;;  %v4592_v11 = vld [vmem:[%s7238_s1 + $0x154] sm:$0xf]  ;;  %v3185_v20 = vor.u32 %v4568_v8, %v3182_v10 }
  0x56   :  { %2204 = vmatpush.bf16.msra.mxu2 %v4105_v12  ;;  %v3278_v12 = vld [vmem:[%s7238_s1 + $0x15c] sm:$0xf0] }
  0x57   :  { %2217 = vmatpush.bf16.msra.mxu3 %v4201_v16  ;;  %v5643_v16 = vld [vmem:[#allocation1 + $0x9] sm:$0xff]  ;;  %v3281_v21 = vor.u32 %v4592_v11, %v3278_v12 }
  0x58   :  { %2179 = vmatpush.bf16.msra.mxu0 %v3901_v22  ;;  %v4842_v22 = vld [vmem:[%s7238_s1 + $0x920] sm:$0xf0] }
  0x59   :  { %2192 = vmatpush.bf16.msra.mxu1 %v3997_v23  ;;  %v4565_v23 = vld [vmem:[%s7238_s1 + $0x7c] sm:$0xf] }
  0x5a   :  { %2205 = vmatpush.bf16.msra.mxu2 %v4093_v24  ;;  %v3170_v24 = vld [vmem:[%s7238_s1 + $0x84] sm:$0xf0] }
  0x5b   :  { %2218 = vmatpush.bf16.msra.mxu3 %v4189_v31  ;;  %v4613_v31 = vld [vmem:[%s7238_s1 + $0x1fc] sm:$0xf] }
  0x5c   :  { %2180 = vmatpush.bf16.msra.mxu0 %v3889_v38 }
  0x5d   :  { %2193 = vmatpush.bf16.msra.mxu1 %v3985_v41 }
  0x5e   :  { %2206 = vmatpush.bf16.msra.mxu2 %v4081_v42 }
  0x5f   :  { %2219 = vmatpush.bf16.msra.mxu3 %v4177_v46 }
  0x60   :  { %2181 = vmatpush.bf16.msra.mxu0 %v3877_v53 }
  0x61   :  { %2194 = vmatpush.bf16.msra.mxu1 %v3973_v57 }
  0x62   :  { %2207 = vmatpush.bf16.msra.mxu2 %v4069_v58 }
  0x63   :  { %2220 = vmatpush.bf16.msra.mxu3 %v4165_v62  ;;  %2182 = vmatmul.bf16.vlgmr.msra.gmra.mxu0 %v5615_v5 }
  0x64   :  { %2230 = vmatpush.bf16.msrb.mxu0 %v4297_v63  ;;  %2195 = vmatmul.bf16.vlgmr.msra.gmra.mxu1 %v5643_v16 }
  0x65   :  { %2239 = vmatpush.bf16.msrb.mxu1 %v3197_v3  ;;  %2208 = vmatmul.bf16.vlgmr.msra.gmra.mxu2 %v5635_v13 }
  0x66   :  { %2252 = vmatpush.bf16.msrb.mxu2 %v3293_v4 }
  0x67   :  { %2265 = vmatpush.bf16.msrb.mxu3 %v3389_v9 }
  0x68   :  { %12 = vsyncpa [#allocation3], 0  ;;  %2221 = vmatmul.bf16.vlgmr.msra.gmra.mxu3 %v5645_v17  ;;  %2231 = vmatpush.bf16.msrb.mxu0 %v4285_v18  ;;  %v4273_v33 = vor.u32 %v4842_v22, %v4272_v19  ;;  %v4260_v35 = vld [vmem:[%s7238_s1 + $0x900] sm:$0xf]  ;;  %v3173_v36 = vor.u32 %v4565_v23, %v3170_v24  ;;  %v3269_v37 = vor.u32 %v4589_v26, %v3266_v30  ;;  %v4839_v38 = vld [vmem:[%s7238_s1 + $0x908] sm:$0xf0] }
  0x69   :  { %2240 = vmatpush.bf16.msrb.mxu1 %v3185_v20  ;;  %v4562_v39 = vld [vmem:[%s7238_s1 + $0x64] sm:$0xf]  ;;  %v3158_v40 = vld [vmem:[%s7238_s1 + $0x6c] sm:$0xf0]  ;;  %v3365_v41 = vor.u32 %v4613_v31, %v3362_v32  ;;  %v4643_v46 = vld [vmem:[%s7238_s1 + $0x2ec] sm:$0xf]  ;;  %v4261_v48 = vor.u32 %v4839_v38, %v4260_v35 }
  0x6a   :  { %2253 = vmatpush.bf16.msrb.mxu2 %v3281_v21  ;;  %v4586_v42 = vld [vmem:[%s7238_s1 + $0x124] sm:$0xf]  ;;  %v3254_v43 = vld [vmem:[%s7238_s1 + $0x12c] sm:$0xf0]  ;;  %v3482_v47 = vld [vmem:[%s7238_s1 + $0x2f4] sm:$0xf0]  ;;  %v3161_v49 = vor.u32 %v4562_v39, %v3158_v40 }
  0x6b   :  { %2266 = vmatpush.bf16.msrb.mxu3 %v3377_v25  ;;  %v4610_v44 = vld [vmem:[%s7238_s1 + $0x1e4] sm:$0xf]  ;;  %v3350_v45 = vld [vmem:[%s7238_s1 + $0x1ec] sm:$0xf0]  ;;  %v3257_v50 = vor.u32 %v4586_v42, %v3254_v43  ;;  %v4559_v51 = vld [vmem:[%s7238_s1 + $0x4c] sm:$0xf]  ;;  %v3485_v54 = vor.u32 %v4643_v46, %v3482_v47 }
  0x6c   :  { %2232 = vmatpush.bf16.msrb.mxu0 %v4273_v33  ;;  %v3146_v52 = vld [vmem:[%s7238_s1 + $0x54] sm:$0xf0]  ;;  %v3353_v53 = vor.u32 %v4610_v44, %v3350_v45  ;;  %v4583_v55 = vld [vmem:[%s7238_s1 + $0x10c] sm:$0xf]  ;;  %v4640_v59 = vld [vmem:[%s7238_s1 + $0x2d4] sm:$0xf] }
  0x6d   :  { %2241 = vmatpush.bf16.msrb.mxu1 %v3173_v36  ;;  %v3242_v56 = vld [vmem:[%s7238_s1 + $0x114] sm:$0xf0]  ;;  %v4607_v57 = vld [vmem:[%s7238_s1 + $0x1cc] sm:$0xf]  ;;  %v3470_v61 = vld [vmem:[%s7238_s1 + $0x2dc] sm:$0xf0]  ;;  %v3149_v62 = vor.u32 %v4559_v51, %v3146_v52 }
  0x6e   :  { %2254 = vmatpush.bf16.msrb.mxu2 %v3269_v37  ;;  %v3338_v58 = vld [vmem:[%s7238_s1 + $0x1d4] sm:$0xf0]  ;;  %v3245_v63 = vor.u32 %v4583_v55, %v3242_v56  ;;  %v4556_v3 = vld [vmem:[%s7238_s1 + $0x34] sm:$0xf]  ;;  %v3134_v4 = vld [vmem:[%s7238_s1 + $0x3c] sm:$0xf0]  ;;  %v3473_v7 = vor.u32 %v4640_v59, %v3470_v61 }
  0x6f   :  { %2267 = vmatpush.bf16.msrb.mxu3 %v3365_v41  ;;  %v3341_v6 = vor.u32 %v4607_v57, %v3338_v58  ;;  %v4580_v8 = vld [vmem:[%s7238_s1 + $0xf4] sm:$0xf]  ;;  %v3230_v9 = vld [vmem:[%s7238_s1 + $0xfc] sm:$0xf0]  ;;  %v4637_v12 = vld [vmem:[%s7238_s1 + $0x2bc] sm:$0xf]  ;;  %v3137_v18 = vor.u32 %v4556_v3, %v3134_v4 }
  0x70   :  { %2233 = vmatpush.bf16.msrb.mxu0 %v4261_v48  ;;  %v4604_v10 = vld [vmem:[%s7238_s1 + $0x1b4] sm:$0xf]  ;;  %v3326_v11 = vld [vmem:[%s7238_s1 + $0x1bc] sm:$0xf0]  ;;  %v3458_v14 = vld [vmem:[%s7238_s1 + $0x2c4] sm:$0xf0]  ;;  %v3233_v19 = vor.u32 %v4580_v8, %v3230_v9 }
  0x71   :  { %2242 = vmatpush.bf16.msrb.mxu1 %v3161_v49  ;;  %v5753_v15 = vld [vmem:[#allocation1 + $0x24] sm:$0xff]  ;;  %vm2067_vm0 = vcmask 523264   ;;  %v4553_v20 = vld [vmem:[%s7238_s1 + $0x1c] sm:$0xf]  ;;  %v3329_v22 = vor.u32 %v4604_v10, %v3326_v11  ;;  %v3461_v23 = vor.u32 %v4637_v12, %v3458_v14  ;;  %v3446_v32 = vld [vmem:[%s7238_s1 + $0x2ac] sm:$0xf0] }
  0x72   :  { %2255 = vmatpush.bf16.msrb.mxu2 %v3257_v50  ;;  %v3122_v21 = vld [vmem:[%s7238_s1 + $0x24] sm:$0xf0]  ;;  %v4577_v24 = vld [vmem:[%s7238_s1 + $0xdc] sm:$0xf]  ;;  %v4634_v31 = vld [vmem:[%s7238_s1 + $0x2a4] sm:$0xf] }
  0x73   :  { %2268 = vmatpush.bf16.msrb.mxu3 %v3353_v53  ;;  %v3218_v25 = vld [vmem:[%s7238_s1 + $0xe4] sm:$0xf0]  ;;  %v4601_v26 = vld [vmem:[%s7238_s1 + $0x19c] sm:$0xf]  ;;  %4306 = vmatmul.msk.bf16.vlgmr.msrb.gmra.mxu0 %vm2067_vm0, %v5753_v15  ;;  %v3125_v33 = vor.u32 %v4553_v20, %v3122_v21  ;;  %v4550_v36 = vld [vmem:[%s7238_s1 + $0x4] sm:$0xf]  ;;  %v3449_v40 = vor.u32 %v4634_v31, %v3446_v32 }
  0x74   :  { %2278 = vmatpush.bf16.msra.mxu0 %v3485_v54  ;;  %v3314_v30 = vld [vmem:[%s7238_s1 + $0x1a4] sm:$0xf0]  ;;  %v3221_v35 = vor.u32 %v4577_v24, %v3218_v25  ;;  %v3110_v37 = vld [vmem:[%s7238_s1 + $0xc] sm:$0xf0]  ;;  %v4574_v38 = vld [vmem:[%s7238_s1 + $0xc4] sm:$0xf] }
  0x75   :  { %2243 = vmatpush.bf16.msrb.mxu1 %v3149_v62  ;;  %v3317_v39 = vor.u32 %v4601_v26, %v3314_v30  ;;  %v3206_v41 = vld [vmem:[%s7238_s1 + $0xcc] sm:$0xf0]  ;;  %v4598_v42 = vld [vmem:[%s7238_s1 + $0x184] sm:$0xf]  ;;  %v4631_v44 = vld [vmem:[%s7238_s1 + $0x28c] sm:$0xf]  ;;  %v3113_v50 = vor.u32 %v4550_v36, %v3110_v37 }
  0x76   :  { %2256 = vmatpush.bf16.msrb.mxu2 %v3245_v63  ;;  %v3302_v43 = vld [vmem:[%s7238_s1 + $0x18c] sm:$0xf0]  ;;  %v3434_v45 = vld [vmem:[%s7238_s1 + $0x294] sm:$0xf0]  ;;  %v4667_v46 = vld [vmem:[%s7238_s1 + $0x3ac] sm:$0xf]  ;;  %v3209_v51 = vor.u32 %v4574_v38, %v3206_v41 }
  0x77   :  { %2269 = vmatpush.bf16.msrb.mxu3 %v3341_v6  ;;  %v3578_v47 = vld [vmem:[%s7238_s1 + $0x3b4] sm:$0xf0]  ;;  %v4691_v48 = vld [vmem:[%s7238_s1 + $0x46c] sm:$0xf]  ;;  %v3305_v54 = vor.u32 %v4598_v42, %v3302_v43  ;;  %v3437_v55 = vor.u32 %v4631_v44, %v3434_v45  ;;  %v4628_v58 = vld [vmem:[%s7238_s1 + $0x274] sm:$0xf] }
  0x78   :  { %2279 = vmatpush.bf16.msra.mxu0 %v3473_v7  ;;  %v3674_v49 = vld [vmem:[%s7238_s1 + $0x474] sm:$0xf0]  ;;  %v4715_v52 = vld [vmem:[%s7238_s1 + $0x52c] sm:$0xf]  ;;  %v3581_v56 = vor.u32 %v4667_v46, %v3578_v47  ;;  %v3422_v59 = vld [vmem:[%s7238_s1 + $0x27c] sm:$0xf0] }
  0x79   :  { %2244 = vmatpush.bf16.msrb.mxu1 %v3137_v18  ;;  %v3770_v53 = vld [vmem:[%s7238_s1 + $0x534] sm:$0xf0]  ;;  %v3677_v57 = vor.u32 %v4691_v48, %v3674_v49  ;;  %v4664_v61 = vld [vmem:[%s7238_s1 + $0x394] sm:$0xf]  ;;  %v3566_v63 = vld [vmem:[%s7238_s1 + $0x39c] sm:$0xf0]  ;;  %v3425_v8 = vor.u32 %v4628_v58, %v3422_v59 }
  0x7a   :  { %2257 = vmatpush.bf16.msrb.mxu2 %v3233_v19  ;;  %v3773_v62 = vor.u32 %v4715_v52, %v3770_v53  ;;  %v4688_v3 = vld [vmem:[%s7238_s1 + $0x454] sm:$0xf]  ;;  %v3662_v4 = vld [vmem:[%s7238_s1 + $0x45c] sm:$0xf0]  ;;  %v3569_v9 = vor.u32 %v4664_v61, %v3566_v63  ;;  %v4625_v11 = vld [vmem:[%s7238_s1 + $0x25c] sm:$0xf] }
  0x7b   :  { %2270 = vmatpush.bf16.msrb.mxu3 %v3329_v22  ;;  %v4712_v6 = vld [vmem:[%s7238_s1 + $0x514] sm:$0xf]  ;;  %v3758_v7 = vld [vmem:[%s7238_s1 + $0x51c] sm:$0xf0]  ;;  %v3665_v10 = vor.u32 %v4688_v3, %v3662_v4  ;;  %v3410_v12 = vld [vmem:[%s7238_s1 + $0x264] sm:$0xf0] }
  0x7c   :  { %2280 = vmatpush.bf16.msra.mxu0 %v3461_v23  ;;  %v4661_v14 = vld [vmem:[%s7238_s1 + $0x37c] sm:$0xf]  ;;  %v3761_v18 = vor.u32 %v4712_v6, %v3758_v7  ;;  %v3554_v19 = vld [vmem:[%s7238_s1 + $0x384] sm:$0xf0]  ;;  %v3413_v24 = vor.u32 %v4625_v11, %v3410_v12  ;;  %v4622_v25 = vld [vmem:[%s7238_s1 + $0x244] sm:$0xf] }
  0x7d   :  { %2245 = vmatpush.bf16.msrb.mxu1 %v3125_v33  ;;  %v4685_v20 = vld [vmem:[%s7238_s1 + $0x43c] sm:$0xf]  ;;  %v3650_v21 = vld [vmem:[%s7238_s1 + $0x444] sm:$0xf0]  ;;  %v3557_v26 = vor.u32 %v4661_v14, %v3554_v19  ;;  %v3398_v31 = vld [vmem:[%s7238_s1 + $0x24c] sm:$0xf0] }
  0x7e   :  { %2258 = vmatpush.bf16.msrb.mxu2 %v3221_v35  ;;  %v4709_v22 = vld [vmem:[%s7238_s1 + $0x4fc] sm:$0xf]  ;;  %v3746_v23 = vld [vmem:[%s7238_s1 + $0x504] sm:$0xf0]  ;;  %v3653_v30 = vor.u32 %v4685_v20, %v3650_v21  ;;  %v4658_v32 = vld [vmem:[%s7238_s1 + $0x364] sm:$0xf]  ;;  %v3401_v42 = vor.u32 %v4622_v25, %v3398_v31 }
  0x7f   :  { %2271 = vmatpush.bf16.msrb.mxu3 %v3317_v39  ;;  %v3542_v33 = vld [vmem:[%s7238_s1 + $0x36c] sm:$0xf0]  ;;  %v3749_v35 = vor.u32 %v4709_v22, %v3746_v23  ;;  %v4682_v36 = vld [vmem:[%s7238_s1 + $0x424] sm:$0xf]  ;;  %v3866_v41 = vld [vmem:[%s7238_s1 + $0x5f4] sm:$0xf0] }
  0x80   :  { %2281 = vmatpush.bf16.msra.mxu0 %v3449_v40  ;;  %v3638_v37 = vld [vmem:[%s7238_s1 + $0x42c] sm:$0xf0]  ;;  %v4706_v38 = vld [vmem:[%s7238_s1 + $0x4e4] sm:$0xf]  ;;  %v4739_v40 = vld [vmem:[%s7238_s1 + $0x5ec] sm:$0xf]  ;;  %v3545_v43 = vor.u32 %v4658_v32, %v3542_v33 }
  0x81   :  { %2246 = vmatpush.bf16.msrb.mxu1 %v3113_v50  ;;  %v3734_v39 = vld [vmem:[%s7238_s1 + $0x4ec] sm:$0xf0]  ;;  %v3641_v44 = vor.u32 %v4682_v36, %v3638_v37  ;;  %v4655_v45 = vld [vmem:[%s7238_s1 + $0x34c] sm:$0xf]  ;;  %v3530_v46 = vld [vmem:[%s7238_s1 + $0x354] sm:$0xf0]  ;;  %v3869_v48 = vor.u32 %v4739_v40, %v3866_v41 }
  0x82   :  { %2259 = vmatpush.bf16.msrb.mxu2 %v3209_v51  ;;  %v3737_v47 = vor.u32 %v4706_v38, %v3734_v39  ;;  %v4679_v49 = vld [vmem:[%s7238_s1 + $0x40c] sm:$0xf]  ;;  %v3626_v50 = vld [vmem:[%s7238_s1 + $0x414] sm:$0xf0]  ;;  %v4736_v53 = vld [vmem:[%s7238_s1 + $0x5d4] sm:$0xf] }
  0x83   :  { %2272 = vmatpush.bf16.msrb.mxu3 %v3305_v54  ;;  %v4703_v51 = vld [vmem:[%s7238_s1 + $0x4cc] sm:$0xf]  ;;  %v3722_v52 = vld [vmem:[%s7238_s1 + $0x4d4] sm:$0xf0]  ;;  %v3854_v54 = vld [vmem:[%s7238_s1 + $0x5dc] sm:$0xf0] }
  0x84   :  { %2282 = vmatpush.bf16.msra.mxu0 %v3437_v55  ;;  %2247 = vmatmul.bf16.vlgmr.msrb.gmra.mxu1 %v5305_v28  ;;  %v3533_v55 = vor.u32 %v4655_v45, %v3530_v46  ;;  %v3518_v58 = vld [vmem:[%s7238_s1 + $0x33c] sm:$0xf0]  ;;  %v3725_v59 = vor.u32 %v4703_v51, %v3722_v52  ;;  %v3857_v61 = vor.u32 %v4736_v53, %v3854_v54  ;;  %v4700_v3 = vld [vmem:[%s7238_s1 + $0x4b4] sm:$0xf]  ;;  %v4733_v6 = vld [vmem:[%s7238_s1 + $0x5bc] sm:$0xf] }
  0x85   :  { %2291 = vmatpush.bf16.msra.mxu1 %v3581_v56  ;;  %2260 = vmatmul.bf16.vlgmr.msrb.gmra.mxu2 %v5315_v34  ;;  %v3629_v56 = vor.u32 %v4679_v49, %v3626_v50  ;;  %v3614_v63 = vld [vmem:[%s7238_s1 + $0x3fc] sm:$0xf0]  ;;  %v3842_v7 = vld [vmem:[%s7238_s1 + $0x5c4] sm:$0xf0]  ;;  %v4697_v20 = vld [vmem:[%s7238_s1 + $0x49c] sm:$0xf] }
  0x86   :  { %2304 = vmatpush.bf16.msra.mxu2 %v3677_v57  ;;  %2273 = vmatmul.bf16.vlgmr.msrb.gmra.mxu3 %v5303_v27  ;;  %v4652_v57 = vld [vmem:[%s7238_s1 + $0x334] sm:$0xf]  ;;  %v3710_v4 = vld [vmem:[%s7238_s1 + $0x4bc] sm:$0xf0]  ;;  %v3506_v11 = vld [vmem:[%s7238_s1 + $0x324] sm:$0xf0]  ;;  %v3845_v14 = vor.u32 %v4733_v6, %v3842_v7 }
  0x87   :  { %2317 = vmatpush.bf16.msra.mxu3 %v3773_v62  ;;  %v4676_v62 = vld [vmem:[%s7238_s1 + $0x3f4] sm:$0xf]  ;;  %v3713_v12 = vor.u32 %v4700_v3, %v3710_v4  ;;  %v3602_v19 = vld [vmem:[%s7238_s1 + $0x3e4] sm:$0xf0]  ;;  %v4730_v22 = vld [vmem:[%s7238_s1 + $0x5a4] sm:$0xf] }
  0x88   :  { %2283 = vmatpush.bf16.msra.mxu0 %v3425_v8  ;;  %v3521_v8 = vor.u32 %v4652_v57, %v3518_v58  ;;  %v3698_v21 = vld [vmem:[%s7238_s1 + $0x4a4] sm:$0xf0]  ;;  %v3830_v23 = vld [vmem:[%s7238_s1 + $0x5ac] sm:$0xf0]  ;;  %v4670_v31 = vld [vmem:[%s7238_s1 + $0x3c4] sm:$0xf] }
  0x89   :  { %2292 = vmatpush.bf16.msra.mxu1 %v3569_v9  ;;  %v3617_v9 = vor.u32 %v4676_v62, %v3614_v63  ;;  %v3701_v32 = vor.u32 %v4697_v20, %v3698_v21  ;;  %v3833_v33 = vor.u32 %v4730_v22, %v3830_v23  ;;  %v4694_v36 = vld [vmem:[%s7238_s1 + $0x484] sm:$0xf]  ;;  %v3686_v37 = vld [vmem:[%s7238_s1 + $0x48c] sm:$0xf0]  ;;  %v4727_v38 = vld [vmem:[%s7238_s1 + $0x58c] sm:$0xf] }
  0x8a   :  { %2305 = vmatpush.bf16.msra.mxu2 %v3665_v10  ;;  %v4649_v10 = vld [vmem:[%s7238_s1 + $0x31c] sm:$0xf]  ;;  %v3818_v39 = vld [vmem:[%s7238_s1 + $0x594] sm:$0xf0]  ;;  %v4763_v40 = vld [vmem:[%s7238_s1 + $0x6ac] sm:$0xf] }
  0x8b   :  { %2318 = vmatpush.bf16.msra.mxu3 %v3761_v18  ;;  %v4673_v18 = vld [vmem:[%s7238_s1 + $0x3dc] sm:$0xf]  ;;  %v3962_v41 = vld [vmem:[%s7238_s1 + $0x6b4] sm:$0xf0]  ;;  %v4811_v46 = vld [vmem:[%s7238_s1 + $0x82c] sm:$0xf]  ;;  %v3821_v49 = vor.u32 %v4727_v38, %v3818_v39 }
  0x8c   :  { %2284 = vmatpush.bf16.msra.mxu0 %v3413_v24  ;;  %v3509_v24 = vor.u32 %v4649_v10, %v3506_v11  ;;  %v3605_v25 = vor.u32 %v4673_v18, %v3602_v19  ;;  %v3965_v50 = vor.u32 %v4763_v40, %v3962_v41  ;;  %v4724_v52 = vld [vmem:[%s7238_s1 + $0x574] sm:$0xf]  ;;  %v3806_v53 = vld [vmem:[%s7238_s1 + $0x57c] sm:$0xf0]  ;;  %v4721_v4 = vld [vmem:[%s7238_s1 + $0x55c] sm:$0xf] }
  0x8d   :  { %2293 = vmatpush.bf16.msra.mxu1 %v3557_v26  ;;  %v4646_v26 = vld [vmem:[%s7238_s1 + $0x304] sm:$0xf]  ;;  %v4760_v54 = vld [vmem:[%s7238_s1 + $0x694] sm:$0xf]  ;;  %v4046_v58 = vld [vmem:[%s7238_s1 + $0x75c] sm:$0xf0]  ;;  %v3809_v62 = vor.u32 %v4724_v52, %v3806_v53 }
  0x8e   :  { %2306 = vmatpush.bf16.msra.mxu2 %v3653_v30  ;;  %v3494_v30 = vld [vmem:[%s7238_s1 + $0x30c] sm:$0xf0]  ;;  %v4784_v57 = vld [vmem:[%s7238_s1 + $0x754] sm:$0xf]  ;;  %v3794_v6 = vld [vmem:[%s7238_s1 + $0x564] sm:$0xf0] }
  0x8f   :  { %2319 = vmatpush.bf16.msra.mxu3 %v3749_v35  ;;  %v3590_v35 = vld [vmem:[%s7238_s1 + $0x3cc] sm:$0xf0]  ;;  %v4049_v3 = vor.u32 %v4784_v57, %v4046_v58  ;;  %v4757_v7 = vld [vmem:[%s7238_s1 + $0x67c] sm:$0xf]  ;;  %v4034_v11 = vld [vmem:[%s7238_s1 + $0x744] sm:$0xf0]  ;;  %v3797_v18 = vor.u32 %v4721_v4, %v3794_v6 }
  0x90   :  { %2285 = vmatpush.bf16.msra.mxu0 %v3401_v42  ;;  %v4787_v42 = vld [vmem:[%s7238_s1 + $0x76c] sm:$0xf]  ;;  %v3593_v45 = vor.u32 %v4670_v31, %v3590_v35  ;;  %v4781_v10 = vld [vmem:[%s7238_s1 + $0x73c] sm:$0xf]  ;;  %v4718_v19 = vld [vmem:[%s7238_s1 + $0x544] sm:$0xf] }
  0x91   :  { %2294 = vmatpush.bf16.msra.mxu1 %v3545_v43  ;;  %v4058_v43 = vld [vmem:[%s7238_s1 + $0x774] sm:$0xf0]  ;;  %v4037_v21 = vor.u32 %v4781_v10, %v4034_v11  ;;  %v3782_v22 = vld [vmem:[%s7238_s1 + $0x54c] sm:$0xf0]  ;;  %v4754_v23 = vld [vmem:[%s7238_s1 + $0x664] sm:$0xf] }
  0x92   :  { %2307 = vmatpush.bf16.msra.mxu2 %v3641_v44  ;;  %v3497_v44 = vor.u32 %v4646_v26, %v3494_v30  ;;  %v4061_v51 = vor.u32 %v4787_v42, %v4058_v43  ;;  %v4778_v26 = vld [vmem:[%s7238_s1 + $0x724] sm:$0xf]  ;;  %v4022_v30 = vld [vmem:[%s7238_s1 + $0x72c] sm:$0xf0]  ;;  %v4250_v35 = vld [vmem:[%s7238_s1 + $0x8f4] sm:$0xf0] }
  0x93   :  { %2320 = vmatpush.bf16.msra.mxu3 %v3737_v47  ;;  %2286 = vmatmul.bf16.vlgmr.msra.gmra.mxu0 %v5307_v29  ;;  %v4154_v47 = vld [vmem:[%s7238_s1 + $0x834] sm:$0xf0]  ;;  %v4802_v31 = vld [vmem:[%s7238_s1 + $0x7e4] sm:$0xf]  ;;  %v4025_v38 = vor.u32 %v4778_v26, %v4022_v30  ;;  %v4751_v39 = vld [vmem:[%s7238_s1 + $0x64c] sm:$0xf] }
  0x94   :  { %2330 = vmatpush.bf16.msrb.mxu0 %v3869_v48  ;;  %v3689_v48 = vor.u32 %v4694_v36, %v3686_v37  ;;  %v3785_v36 = vor.u32 %v4718_v19, %v3782_v22  ;;  %v3914_v40 = vld [vmem:[%s7238_s1 + $0x654] sm:$0xf0]  ;;  %v4775_v43 = vld [vmem:[%s7238_s1 + $0x70c] sm:$0xf]  ;;  %v3902_v52 = vld [vmem:[%s7238_s1 + $0x63c] sm:$0xf0] }
  0x95   :  { %2295 = vmatpush.bf16.msra.mxu1 %v3533_v55  ;;  %v4157_v55 = vor.u32 %v4811_v46, %v4154_v47  ;;  %v4106_v46 = vld [vmem:[%s7238_s1 + $0x7d4] sm:$0xf0]  ;;  %v4832_v47 = vld [vmem:[%s7238_s1 + $0x8d4] sm:$0xf]  ;;  %v430_v58 = vld [vmem:[%s7239_s2] sm:$0x7] }
  0x96   :  { %2308 = vmatpush.bf16.msra.mxu2 %v3629_v56  ;;  %v3950_v56 = vld [vmem:[%s7238_s1 + $0x69c] sm:$0xf0]  ;;  %v4772_v53 = vld [vmem:[%s7238_s1 + $0x6f4] sm:$0xf]  ;;  %v4745_v4 = vld [vmem:[%s7238_s1 + $0x61c] sm:$0xf] }
  0x97   :  { %2321 = vmatpush.bf16.msra.mxu3 %v3725_v59  ;;  %v4808_v59 = vld [vmem:[%s7238_s1 + $0x814] sm:$0xf]  ;;  %v3953_v63 = vor.u32 %v4760_v54, %v3950_v56  ;;  %v3998_v56 = vld [vmem:[%s7238_s1 + $0x6fc] sm:$0xf0]  ;;  %v3890_v6 = vld [vmem:[%s7238_s1 + $0x624] sm:$0xf0] }
  0x98   :  { %2331 = vmatpush.bf16.msrb.mxu0 %v3857_v61  ;;  %v4142_v61 = vld [vmem:[%s7238_s1 + $0x81c] sm:$0xf0]  ;;  %v4796_v57 = vld [vmem:[%s7238_s1 + $0x7b4] sm:$0xf]  ;;  %v4769_v10 = vld [vmem:[%s7238_s1 + $0x6dc] sm:$0xf] }
  0x99   :  { %2296 = vmatpush.bf16.msra.mxu1 %v3521_v8  ;;  %v4145_v8 = vor.u32 %v4808_v59, %v4142_v61  ;;  %v4094_v59 = vld [vmem:[%s7238_s1 + $0x7bc] sm:$0xf0]  ;;  %v4829_v61 = vld [vmem:[%s7238_s1 + $0x8bc] sm:$0xf]  ;;  %v3986_v11 = vld [vmem:[%s7238_s1 + $0x6e4] sm:$0xf0] }
  0x9a   :  { %2309 = vmatpush.bf16.msra.mxu2 %v3617_v9  ;;  %v3938_v9 = vld [vmem:[%s7238_s1 + $0x684] sm:$0xf0]  ;;  %v4214_v19 = vld [vmem:[%s7238_s1 + $0x8ac] sm:$0xf0]  ;;  %v3989_v22 = vor.u32 %v4769_v10, %v3986_v11  ;;  %v4817_v11 = vld [vmem:[%s7238_s1 + $0x85c] sm:$0xf] }
  0x9b   :  { %2322 = vmatpush.bf16.msra.mxu3 %v3713_v12  ;;  %v4805_v12 = vld [vmem:[%s7238_s1 + $0x7fc] sm:$0xf]  ;;  %v3941_v20 = vor.u32 %v4757_v7, %v3938_v9  ;;  %v432_v7 = vperm.slane %v430_v58, 0  ;;  %s3097_s0 = sshll.u32 %s7244_s7, 4  ;;  %vm3088_vm1 = vcmask 74752   ;;  %s3098_s0 = int_to_ptr.hbm [resolvable:$true] %s3097_s0 }
  0x9c   :  { %2332 = vmatpush.bf16.msrb.mxu0 %v3845_v14  ;;  %v4130_v14 = vld [vmem:[%s7238_s1 + $0x804] sm:$0xf0] }
  0x9d   :  { %2297 = vmatpush.bf16.msra.mxu1 %v3509_v24  ;;  %v3926_v24 = vld [vmem:[%s7238_s1 + $0x66c] sm:$0xf0] }
  0x9e   :  { %2310 = vmatpush.bf16.msra.mxu2 %v3605_v25  ;;  %v4133_v25 = vor.u32 %v4805_v12, %v4130_v14  ;;  %v3929_v37 = vor.u32 %v4754_v23, %v3926_v24  ;;  %v4793_v12 = vld [vmem:[%s7238_s1 + $0x79c] sm:$0xf]  ;;  %v4082_v14 = vld [vmem:[%s7238_s1 + $0x7a4] sm:$0xf0]  ;;  %v4742_v23 = vld [vmem:[%s7238_s1 + $0x604] sm:$0xf] }
  0x9f   :  { %2323 = vmatpush.bf16.msra.mxu3 %v3701_v32  ;;  %v4118_v32 = vld [vmem:[%s7238_s1 + $0x7ec] sm:$0xf0] }
  0xa0   :  { %2333 = vmatpush.bf16.msrb.mxu0 %v3833_v33  ;;  %v4835_v33 = vld [vmem:[%s7238_s1 + $0x8ec] sm:$0xf]  ;;  %v4121_v41 = vor.u32 %v4802_v31, %v4118_v32  ;;  %v3878_v24 = vld [vmem:[%s7238_s1 + $0x60c] sm:$0xf0]  ;;  %v4085_v31 = vor.u32 %v4793_v12, %v4082_v14  ;;  %v4178_v12 = vld [vmem:[%s7238_s1 + $0x864] sm:$0xf0] }
  0xa1   :  { %2298 = vmatpush.bf16.msra.mxu1 %v3497_v44  ;;  %v4253_v42 = vor.u32 %v4835_v33, %v4250_v35  ;;  %v4010_v44 = vld [vmem:[%s7238_s1 + $0x714] sm:$0xf0]  ;;  %v3974_v33 = vld [vmem:[%s7238_s1 + $0x6cc] sm:$0xf0]  ;;  %v4790_v35 = vld [vmem:[%s7238_s1 + $0x784] sm:$0xf] }
  0xa2   :  { %2311 = vmatpush.bf16.msra.mxu2 %v3593_v45  ;;  %v4799_v45 = vld [vmem:[%s7238_s1 + $0x7cc] sm:$0xf]  ;;  %v4841_v14 = vld [vmem:[%s7238_s1 + $0x91c] sm:$0xf] }
  0xa3   :  { %2324 = vmatpush.bf16.msra.mxu3 %v3689_v48  ;;  %v4238_v48 = vld [vmem:[%s7238_s1 + $0x8dc] sm:$0xf0]  ;;  %v4109_v54 = vor.u32 %v4799_v45, %v4106_v46  ;;  %v3296_v46 = vld [vmem:[%s7238_s1 + $0x170] sm:$0xf] }
  0xa4   :  { %2334 = vmatpush.bf16.msrb.mxu0 %v3821_v49  ;;  %2299 = vmatmul.bf16.vlgmr.msra.gmra.mxu1 %v5383_v0  ;;  %v3917_v49 = vor.u32 %v4751_v39, %v3914_v40  ;;  %v4847_v39 = vld [vmem:[%s7238_s1 + $0x94c] sm:$0xf] }
  0xa5   :  { %2343 = vmatpush.bf16.msrb.mxu1 %v3965_v50  ;;  %2312 = vmatmul.bf16.vlgmr.msra.gmra.mxu2 %v5387_v2  ;;  %v4013_v50 = vor.u32 %v4775_v43, %v4010_v44  ;;  %v4573_v43 = vld [vmem:[%s7238_s1 + $0xb8] sm:$0xf0]  ;;  %v3881_v44 = vor.u32 %v4742_v23, %v3878_v24  ;;  %v4181_v24 = vor.u32 %v4817_v11, %v4178_v12  ;;  %v4582_v12 = vld [vmem:[%s7238_s1 + $0x100] sm:$0xf0] }
  0xa6   :  { %2356 = vmatpush.bf16.msrb.mxu2 %v4061_v51  ;;  %2325 = vmatmul.bf16.vlgmr.msra.gmra.mxu3 %v5378_v60  ;;  %v4748_v51 = vld [vmem:[%s7238_s1 + $0x634] sm:$0xf] }
  0xa7   :  { %2369 = vmatpush.bf16.msrb.mxu3 %v4157_v55  ;;  %v4241_v55 = vor.u32 %v4832_v47, %v4238_v48  ;;  %v4597_v47 = vld [vmem:[%s7238_s1 + $0x178] sm:$0xf0] }
  0xa8   :  { %2335 = vmatpush.bf16.msrb.mxu0 %v3809_v62  ;;  %v4226_v62 = vld [vmem:[%s7238_s1 + $0x8c4] sm:$0xf0]  ;;  %v2092_v30 = vpop.f32.mrf.mxu1  ;;  %v3297_v58 = vor.u32 %v4597_v47, %v3296_v46 }
  0xa9   :  { %2344 = vmatpush.bf16.msrb.mxu1 %v3953_v63  ;;  %v3905_v63 = vor.u32 %v4748_v51, %v3902_v52  ;;  %v4229_v9 = vor.u32 %v4829_v61, %v4226_v62  ;;  %v3188_v61 = vld [vmem:[%s7238_s1 + $0x98] sm:$0xf]  ;;  %v4570_v62 = vld [vmem:[%s7238_s1 + $0xa0] sm:$0xf0] }
  0xaa   :  { %2357 = vmatpush.bf16.msrb.mxu2 %v4049_v3  ;;  %v4001_v3 = vor.u32 %v4772_v53, %v3998_v56  ;;  %v4190_v56 = vld [vmem:[%s7238_s1 + $0x87c] sm:$0xf0]  ;;  %v3189_v10 = vor.u32 %v4570_v62, %v3188_v61  ;;  %v4642_v61 = vld [vmem:[%s7238_s1 + $0x2e0] sm:$0xf0] }
  0xab   :  { %2370 = vmatpush.bf16.msrb.mxu3 %v4145_v8  ;;  %v4097_v8 = vor.u32 %v4796_v57, %v4094_v59  ;;  %v2105_v48 = vpop.f32.mrf.mxu2  ;;  %v4844_v57 = vld [vmem:[%s7238_s1 + $0x934] sm:$0xf]  ;;  %v4286_v59 = vld [vmem:[%s7238_s1 + $0x93c] sm:$0xf0] }
  0xac   :  { %2336 = vmatpush.bf16.msrb.mxu0 %v3797_v18  ;;  %v4826_v18 = vld [vmem:[%s7238_s1 + $0x8a4] sm:$0xf] }
  0xad   :  { %2345 = vmatpush.bf16.msrb.mxu1 %v3941_v20  ;;  %v2079_v20 = vpop.f32.mrf.mxu0  ;;  %v4217_v32 = vor.u32 %v4826_v18, %v4214_v19  ;;  %v2118_v52 = vpop.f32.mrf.mxu3  ;;  %v4274_v19 = vld [vmem:[%s7238_s1 + $0x924] sm:$0xf0] }
  0xae   :  { %2358 = vmatpush.bf16.msrb.mxu2 %v4037_v21  ;;  %v3893_v21 = vor.u32 %v4745_v4, %v3890_v6  ;;  %v2080_v26 = vadd.f32 %v2079_v20, %v432_v7  ;;  %v3284_v4 = vld [vmem:[%s7238_s1 + $0x158] sm:$0xf]  ;;  %v4594_v6 = vld [vmem:[%s7238_s1 + $0x160] sm:$0xf0]  ;;  %v3176_v20 = vld [vmem:[%s7238_s1 + $0x80] sm:$0xf] }
  0xaf   :  { %2371 = vmatpush.bf16.msrb.mxu3 %v4133_v25  ;;  %v4766_v25 = vld [vmem:[%s7238_s1 + $0x6c4] sm:$0xf]  ;;  %v3285_v18 = vor.u32 %v4594_v6, %v3284_v4  ;;  %v3140_v6 = vld [vmem:[%s7238_s1 + $0x38] sm:$0xf] }
  0xb0   :  { %2337 = vmatpush.bf16.msrb.mxu0 %v3785_v36  ;;  %v4070_v36 = vld [vmem:[%s7238_s1 + $0x78c] sm:$0xf0]  ;;  %v2093_v40 = vadd.f32 %v2092_v30, %v2080_v26  ;;  %v3977_v45 = vor.u32 %v4766_v25, %v3974_v33  ;;  %v2094_v7 = vpop.f32.mrf.mxu1  ;;  %v4814_v25 = vld [vmem:[%s7238_s1 + $0x844] sm:$0xf] }
  0xb1   :  { %2346 = vmatpush.bf16.msrb.mxu1 %v3929_v37  ;;  %v4823_v37 = vld [vmem:[%s7238_s1 + $0x88c] sm:$0xf]  ;;  %v4166_v30 = vld [vmem:[%s7238_s1 + $0x84c] sm:$0xf0]  ;;  %v4558_v7 = vld [vmem:[%s7238_s1 + $0x40] sm:$0xf0] }
  0xb2   :  { %2359 = vmatpush.bf16.msrb.mxu2 %v4025_v38  ;;  %v4202_v38 = vld [vmem:[%s7238_s1 + $0x894] sm:$0xf0]  ;;  %v2106_v51 = vadd.f32 %v2105_v48, %v2093_v40  ;;  %v4621_v40 = vld [vmem:[%s7238_s1 + $0x238] sm:$0xf0] }
  0xb3   :  { %2372 = vmatpush.bf16.msrb.mxu3 %v4121_v41  ;;  %2338 = vmatmul.bf16.vlgmr.msrb.gmra.mxu0 %v5385_v1  ;;  %v4298_v41 = vld [vmem:[%s7238_s1 + $0x954] sm:$0xf0]  ;;  %v2107_v23 = vpop.f32.mrf.mxu2 }
  0xb4   :  { %2382 = vmatpush.bf16.msra.mxu0 %v4253_v42  ;;  %v3200_v42 = vld [vmem:[%s7238_s1 + $0xb0] sm:$0xf]  ;;  %v4301_v53 = vor.u32 %v4847_v39, %v4298_v41  ;;  %v4169_v41 = vor.u32 %v4814_v25, %v4166_v30  ;;  %v3128_v25 = vld [vmem:[%s7238_s1 + $0x20] sm:$0xf]  ;;  %v4579_v30 = vld [vmem:[%s7238_s1 + $0xe8] sm:$0xf0] }
  0xb5   :  { %2347 = vmatpush.bf16.msrb.mxu1 %v3917_v49  ;;  %v4073_v49 = vor.u32 %v4790_v35, %v4070_v36  ;;  %v2120_v26 = vpop.f32.mrf.mxu3  ;;  %v3164_v35 = vld [vmem:[%s7238_s1 + $0x68] sm:$0xf]  ;;  %v4564_v36 = vld [vmem:[%s7238_s1 + $0x70] sm:$0xf0]  ;;  %v3392_v39 = vld [vmem:[%s7238_s1 + $0x230] sm:$0xf] }
  0xb6   :  { %2360 = vmatpush.bf16.msrb.mxu2 %v4013_v50  ;;  %v4205_v50 = vor.u32 %v4823_v37, %v4202_v38  ;;  %v3260_v37 = vld [vmem:[%s7238_s1 + $0x128] sm:$0xf]  ;;  %v4588_v38 = vld [vmem:[%s7238_s1 + $0x130] sm:$0xf0]  ;;  %v3165_v46 = vor.u32 %v4564_v36, %v3164_v35  ;;  %v4555_v26 = vld [vmem:[%s7238_s1 + $0x28] sm:$0xf0] }
  0xb7   :  { %2373 = vmatpush.bf16.msrb.mxu3 %v4109_v54  ;;  %v3201_v54 = vor.u32 %v4573_v43, %v3200_v42  ;;  %v3488_v42 = vld [vmem:[%s7238_s1 + $0x2f0] sm:$0xf]  ;;  %v4645_v43 = vld [vmem:[%s7238_s1 + $0x2f8] sm:$0xf0]  ;;  %v4636_v35 = vld [vmem:[%s7238_s1 + $0x2b0] sm:$0xf0]  ;;  %v3129_v36 = vor.u32 %v4555_v26, %v3128_v25 }
  0xb8   :  { %2383 = vmatpush.bf16.msra.mxu0 %v4241_v55  ;;  %v4820_v55 = vld [vmem:[%s7238_s1 + $0x874] sm:$0xf] }
  0xb9   :  { %2348 = vmatpush.bf16.msrb.mxu1 %v3905_v63  ;;  %v2119_v63 = vadd.f32 %v2118_v52, %v2106_v51  ;;  %v3152_v51 = vld [vmem:[%s7238_s1 + $0x50] sm:$0xf]  ;;  %v4561_v52 = vld [vmem:[%s7238_s1 + $0x58] sm:$0xf0]  ;;  %v4600_v26 = vld [vmem:[%s7238_s1 + $0x190] sm:$0xf0] }
  0xba   :  { %2361 = vmatpush.bf16.msrb.mxu2 %v4001_v3  ;;  %v2081_v3 = vpop.f32.mrf.mxu0  ;;  %v3153_v62 = vor.u32 %v4561_v52, %v3152_v51  ;;  %v3680_v52 = vld [vmem:[%s7238_s1 + $0x470] sm:$0xf] }
  0xbb   :  { %2374 = vmatpush.bf16.msrb.mxu3 %v4097_v8  ;;  %v4193_v8 = vor.u32 %v4820_v55, %v4190_v56  ;;  %v4585_v55 = vld [vmem:[%s7238_s1 + $0x118] sm:$0xf0]  ;;  %v3380_v56 = vld [vmem:[%s7238_s1 + $0x218] sm:$0xf] }
  0xbc   :  { %2384 = vmatpush.bf16.msra.mxu0 %v4229_v9  ;;  %v4289_v9 = vor.u32 %v4844_v57, %v4286_v59  ;;  %v4618_v57 = vld [vmem:[%s7238_s1 + $0x220] sm:$0xf0]  ;;  %v3476_v59 = vld [vmem:[%s7238_s1 + $0x2d8] sm:$0xf] }
  0xbd   :  { %2349 = vmatpush.bf16.msrb.mxu1 %v3893_v21  ;;  %v4567_v21 = vld [vmem:[%s7238_s1 + $0x88] sm:$0xf0]  ;;  %v3381_v4 = vor.u32 %v4618_v57, %v3380_v56  ;;  %v3477_v11 = vor.u32 %v4642_v61, %v3476_v59  ;;  %v4606_v59 = vld [vmem:[%s7238_s1 + $0x1c0] sm:$0xf0]  ;;  %v3428_v61 = vld [vmem:[%s7238_s1 + $0x278] sm:$0xf] }
  0xbe   :  { %2362 = vmatpush.bf16.msrb.mxu2 %v3989_v22  ;;  %v4591_v22 = vld [vmem:[%s7238_s1 + $0x148] sm:$0xf0] }
  0xbf   :  { %2375 = vmatpush.bf16.msrb.mxu3 %v4085_v31  ;;  %v4838_v31 = vld [vmem:[%s7238_s1 + $0x904] sm:$0xf] }
  0xc0   :  { %2385 = vmatpush.bf16.msra.mxu0 %v4217_v32  ;;  %v4262_v32 = vld [vmem:[%s7238_s1 + $0x90c] sm:$0xf0] }
  0xc1   :  { %2350 = vmatpush.bf16.msrb.mxu1 %v3881_v44  ;;  %v2144_v48 = vpop.f32.mrf.mxu1 }
  0xc2   :  { %2363 = vmatpush.bf16.msrb.mxu2 %v3977_v45  ;;  %v2131_v44 = vpop.f32.mrf.mxu0  ;;  %v4265_v45 = vor.u32 %v4838_v31, %v4262_v32  ;;  %v3356_v31 = vld [vmem:[%s7238_s1 + $0x1e8] sm:$0xf]  ;;  %v4612_v32 = vld [vmem:[%s7238_s1 + $0x1f0] sm:$0xf0] }
  0xc3   :  { %2376 = vmatpush.bf16.msrb.mxu3 %v4073_v49  ;;  %v2132_v47 = vadd.f32 %v2131_v44, %v2119_v63  ;;  %v3261_v49 = vor.u32 %v4588_v38, %v3260_v37  ;;  %v3116_v37 = vld [vmem:[%s7238_s1 + $0x8] sm:$0xf] }
  0xc4   :  { %2386 = vmatpush.bf16.msra.mxu0 %v4205_v50  ;;  %2351 = vmatmul.bf16.vlgmr.msrb.gmra.mxu1 %v5615_v5  ;;  %v3272_v5 = vld [vmem:[%s7238_s1 + $0x140] sm:$0xf]  ;;  %v3393_v50 = vor.u32 %v4621_v40, %v3392_v39  ;;  %v3357_v40 = vor.u32 %v4612_v32, %v3356_v31  ;;  %v4660_v31 = vld [vmem:[%s7238_s1 + $0x370] sm:$0xf0]  ;;  %v3644_v32 = vld [vmem:[%s7238_s1 + $0x428] sm:$0xf] }
  0xc5   :  { %2399 = vmatpush.bf16.msra.mxu1 %v4301_v53  ;;  %2364 = vmatmul.bf16.vlgmr.msrb.gmra.mxu2 %v5643_v16  ;;  %v4277_v16 = vor.u32 %v4841_v14, %v4274_v19  ;;  %v3273_v33 = vor.u32 %v4591_v22, %v3272_v5  ;;  %v3248_v53 = vld [vmem:[%s7238_s1 + $0x110] sm:$0xf]  ;;  %v3368_v14 = vld [vmem:[%s7238_s1 + $0x200] sm:$0xf]  ;;  %v3141_v5 = vor.u32 %v4558_v7, %v3140_v6  ;;  %v3668_v6 = vld [vmem:[%s7238_s1 + $0x458] sm:$0xf] }
  0xc6   :  { %2408 = vmatpush.bf16.msra.mxu2 %v3201_v54  ;;  %2377 = vmatmul.bf16.vlgmr.msrb.gmra.mxu3 %v5635_v13  ;;  %v3177_v13 = vor.u32 %v4567_v21, %v3176_v20  ;;  %v3489_v54 = vor.u32 %v4645_v43, %v3488_v42  ;;  %v3249_v3 = vor.u32 %v4585_v55, %v3248_v53  ;;  %v3464_v19 = vld [vmem:[%s7238_s1 + $0x2c0] sm:$0xf]  ;;  %v4576_v42 = vld [vmem:[%s7238_s1 + $0xd0] sm:$0xf0]  ;;  %v4693_v53 = vld [vmem:[%s7238_s1 + $0x478] sm:$0xf0] }
  0xc7   :  { %2421 = vmatpush.bf16.msra.mxu3 %v3297_v58  ;;  %v2145_v58 = vadd.f32 %v2144_v48, %v2132_v47  ;;  %v3440_v47 = vld [vmem:[%s7238_s1 + $0x290] sm:$0xf]  ;;  %v4633_v48 = vld [vmem:[%s7238_s1 + $0x298] sm:$0xf0]  ;;  %v4690_v7 = vld [vmem:[%s7238_s1 + $0x460] sm:$0xf0] }
  0xc8   :  { %2387 = vmatpush.bf16.msra.mxu0 %v4193_v8  ;;  %v2157_v63 = vpop.f32.mrf.mxu2  ;;  %v3236_v8 = vld [vmem:[%s7238_s1 + $0xf8] sm:$0xf]  ;;  %v3441_v56 = vor.u32 %v4633_v48, %v3440_v47  ;;  %v4657_v47 = vld [vmem:[%s7238_s1 + $0x358] sm:$0xf0]  ;;  %v3632_v48 = vld [vmem:[%s7238_s1 + $0x410] sm:$0xf] }
  0xc9   :  { %2400 = vmatpush.bf16.msra.mxu1 %v4289_v9  ;;  %v2158_v9 = vadd.f32 %v2157_v63, %v2145_v58  ;;  %v2146_v22 = vpop.f32.mrf.mxu1  ;;  %v3237_v23 = vor.u32 %v4582_v12, %v3236_v8  ;;  %v3332_v58 = vld [vmem:[%s7238_s1 + $0x1b8] sm:$0xf]  ;;  %v4630_v63 = vld [vmem:[%s7238_s1 + $0x280] sm:$0xf0]  ;;  %v4603_v12 = vld [vmem:[%s7238_s1 + $0x1a8] sm:$0xf0] }
  0xca   :  { %2409 = vmatpush.bf16.msra.mxu2 %v3189_v10  ;;  %v2170_v10 = vpop.f32.mrf.mxu3  ;;  %v2133_v21 = vpop.f32.mrf.mxu0  ;;  %v3333_v8 = vor.u32 %v4606_v59, %v3332_v58  ;;  %v4687_v22 = vld [vmem:[%s7238_s1 + $0x448] sm:$0xf0]  ;;  %v3524_v59 = vld [vmem:[%s7238_s1 + $0x338] sm:$0xf] }
  0xcb   :  { %2422 = vmatpush.bf16.msra.mxu3 %v3285_v18  ;;  %v4615_v18 = vld [vmem:[%s7238_s1 + $0x208] sm:$0xf0]  ;;  %v6354_v20 = vadd.f32 %v2170_v10, %v2158_v9  ;;  %v3429_v9 = vor.u32 %v4630_v63, %v3428_v61  ;;  %v4654_v61 = vld [vmem:[%s7238_s1 + $0x340] sm:$0xf0] }
  0xcc   :  { %2388 = vmatpush.bf16.msra.mxu0 %v4181_v24  ;;  %v3369_v24 = vor.u32 %v4615_v18, %v3368_v14  ;;  %v3416_v14 = vld [vmem:[%s7238_s1 + $0x260] sm:$0xf]  ;;  %v3669_v18 = vor.u32 %v4690_v7, %v3668_v6  ;;  %v4663_v21 = vld [vmem:[%s7238_s1 + $0x388] sm:$0xf0]  ;;  %v4678_v7 = vld [vmem:[%s7238_s1 + $0x400] sm:$0xf0] }
  0xcd   :  { %2401 = vmatpush.bf16.msra.mxu1 %v4277_v16  ;;  %v3224_v16 = vld [vmem:[%s7238_s1 + $0xe0] sm:$0xf] }
  0xce   :  { %2410 = vmatpush.bf16.msra.mxu2 %v3177_v13  ;;  %v3225_v39 = vor.u32 %v4579_v30, %v3224_v16  ;;  %v3404_v16 = vld [vmem:[%s7238_s1 + $0x248] sm:$0xf] }
  0xcf   :  { %2423 = vmatpush.bf16.msra.mxu3 %v3273_v33  ;;  %v3452_v33 = vld [vmem:[%s7238_s1 + $0x2a8] sm:$0xf] }
  0xd0   :  { %2389 = vmatpush.bf16.msra.mxu0 %v4169_v41  ;;  %v2159_v38 = vpop.f32.mrf.mxu2  ;;  %v3212_v41 = vld [vmem:[%s7238_s1 + $0xc8] sm:$0xf]  ;;  %v3453_v44 = vor.u32 %v4636_v35, %v3452_v33  ;;  %v4684_v35 = vld [vmem:[%s7238_s1 + $0x430] sm:$0xf0] }
  0xd1   :  { %2402 = vmatpush.bf16.msra.mxu1 %v4265_v45  ;;  %v3344_v45 = vld [vmem:[%s7238_s1 + $0x1d0] sm:$0xf]  ;;  %v3548_v30 = vld [vmem:[%s7238_s1 + $0x368] sm:$0xf] }
  0xd2   :  { %2411 = vmatpush.bf16.msra.mxu2 %v3165_v46  ;;  %v2172_v43 = vpop.f32.mrf.mxu3  ;;  %v4609_v46 = vld [vmem:[%s7238_s1 + $0x1d8] sm:$0xf0] }
  0xd3   :  { %2424 = vmatpush.bf16.msra.mxu3 %v3261_v49  ;;  %2390 = vmatmul.bf16.vlgmr.msra.gmra.mxu0 %v5645_v17  ;;  %v4639_v17 = vld [vmem:[%s7238_s1 + $0x2c8] sm:$0xf0]  ;;  %v3584_v49 = vld [vmem:[%s7238_s1 + $0x3b0] sm:$0xf]  ;;  %v3345_v55 = vor.u32 %v4609_v46, %v3344_v45  ;;  %v3549_v43 = vor.u32 %v4660_v31, %v3548_v30  ;;  %v4648_v30 = vld [vmem:[%s7238_s1 + $0x310] sm:$0xf0] }
  0xd4   :  { %2434 = vmatpush.bf16.msrb.mxu0 %v3393_v50  ;;  %v3465_v13 = vor.u32 %v4639_v17, %v3464_v19  ;;  %4307 = vmatmul.msk.bf16.vlgmr.msra.gmra.mxu1 %vm2067_vm0, %v5753_v15  ;;  %v4552_v15 = vld [vmem:[%s7238_s1 + $0x10] sm:$0xf0]  ;;  %v4669_v50 = vld [vmem:[%s7238_s1 + $0x3b8] sm:$0xf0]  ;;  %v4627_v19 = vld [vmem:[%s7238_s1 + $0x268] sm:$0xf0] }
  0xd5   :  { %2447 = vmatpush.bf16.msrb.mxu1 %v3489_v54  ;;  %v3117_v51 = vor.u32 %v4552_v15, %v3116_v37  ;;  %v3213_v54 = vor.u32 %v4576_v42, %v3212_v41  ;;  %v3585_v57 = vor.u32 %v4669_v50, %v3584_v49  ;;  %v3560_v17 = vld [vmem:[%s7238_s1 + $0x380] sm:$0xf]  ;;  %v3417_v25 = vor.u32 %v4627_v19, %v3416_v14  ;;  %v4717_v37 = vld [vmem:[%s7238_s1 + $0x538] sm:$0xf0]  ;;  %v3872_v15 = vld [vmem:[%s7238_s1 + $0x5f0] sm:$0xf] }
  0xd6   :  { %2412 = vmatpush.bf16.msra.mxu2 %v3153_v62  ;;  %v3681_v62 = vor.u32 %v4693_v53, %v3680_v52  ;;  %v4741_v41 = vld [vmem:[%s7238_s1 + $0x5f8] sm:$0xf0]  ;;  %v4714_v52 = vld [vmem:[%s7238_s1 + $0x520] sm:$0xf0]  ;;  %v3860_v53 = vld [vmem:[%s7238_s1 + $0x5d8] sm:$0xf] }
  0xd7   :  { %2425 = vmatpush.bf16.msra.mxu3 %v3249_v3  ;;  %v3572_v3 = vld [vmem:[%s7238_s1 + $0x398] sm:$0xf]  ;;  %v3873_v49 = vor.u32 %v4741_v41, %v3872_v15  ;;  %v4681_v50 = vld [vmem:[%s7238_s1 + $0x418] sm:$0xf0]  ;;  %v3596_v31 = vld [vmem:[%s7238_s1 + $0x3c8] sm:$0xf] }
  0xd8   :  { %2435 = vmatpush.bf16.msrb.mxu0 %v3381_v4  ;;  %v4666_v4 = vld [vmem:[%s7238_s1 + $0x3a0] sm:$0xf0]  ;;  %v4729_v15 = vld [vmem:[%s7238_s1 + $0x598] sm:$0xf0]  ;;  %v3968_v41 = vld [vmem:[%s7238_s1 + $0x6b0] sm:$0xf] }
  0xd9   :  { %2448 = vmatpush.bf16.msrb.mxu1 %v3477_v11  ;;  %v3573_v10 = vor.u32 %v4666_v4, %v3572_v3  ;;  %v3320_v11 = vld [vmem:[%s7238_s1 + $0x1a0] sm:$0xf] }
  0xda   :  { %2413 = vmatpush.bf16.msra.mxu2 %v3141_v5  ;;  %v3656_v5 = vld [vmem:[%s7238_s1 + $0x440] sm:$0xf] }
  0xdb   :  { %2426 = vmatpush.bf16.msra.mxu3 %v3237_v23  ;;  %v3321_v23 = vor.u32 %v4603_v12, %v3320_v11  ;;  %v4735_v11 = vld [vmem:[%s7238_s1 + $0x5c8] sm:$0xf0] }
  0xdc   :  { %2436 = vmatpush.bf16.msrb.mxu0 %v3369_v24  ;;  %v3308_v24 = vld [vmem:[%s7238_s1 + $0x188] sm:$0xf] }
  0xdd   :  { %2449 = vmatpush.bf16.msrb.mxu1 %v3465_v13  ;;  %v3657_v13 = vor.u32 %v4687_v22, %v3656_v5  ;;  %v4675_v22 = vld [vmem:[%s7238_s1 + $0x3e8] sm:$0xf0] }
  0xde   :  { %2414 = vmatpush.bf16.msra.mxu2 %v3129_v36  ;;  %v3776_v36 = vld [vmem:[%s7238_s1 + $0x530] sm:$0xf] }
  0xdf   :  { %2427 = vmatpush.bf16.msra.mxu3 %v3225_v39  ;;  %v3309_v39 = vor.u32 %v4600_v26, %v3308_v24  ;;  %v3777_v46 = vor.u32 %v4717_v37, %v3776_v36  ;;  %v4708_v24 = vld [vmem:[%s7238_s1 + $0x4f0] sm:$0xf0]  ;;  %v3728_v36 = vld [vmem:[%s7238_s1 + $0x4d0] sm:$0xf]  ;;  %v4705_v37 = vld [vmem:[%s7238_s1 + $0x4d8] sm:$0xf0] }
  0xe0   :  { %2437 = vmatpush.bf16.msrb.mxu0 %v3357_v40  ;;  %v2183_v33 = vpop.f32.mrf.mxu0 }
  0xe1   :  { %2450 = vmatpush.bf16.msrb.mxu1 %v3453_v44  ;;  %v2184_v38 = vadd.f32 %v2183_v33, %v6354_v20  ;;  %v2196_v40 = vpop.f32.mrf.mxu1  ;;  %v3645_v44 = vor.u32 %v4684_v35, %v3644_v32  ;;  %v3536_v20 = vld [vmem:[%s7238_s1 + $0x350] sm:$0xf]  ;;  %v4672_v32 = vld [vmem:[%s7238_s1 + $0x3d0] sm:$0xf0] }
  0xe2   :  { %2415 = vmatpush.bf16.msra.mxu2 %v3117_v51  ;;  %v3764_v51 = vld [vmem:[%s7238_s1 + $0x518] sm:$0xf] }
  0xe3   :  { %2428 = vmatpush.bf16.msra.mxu3 %v3213_v54  ;;  %v2197_v45 = vadd.f32 %v2196_v40, %v2184_v38  ;;  %v4738_v54 = vld [vmem:[%s7238_s1 + $0x5e0] sm:$0xf0]  ;;  %v3765_v58 = vor.u32 %v4714_v52, %v3764_v51  ;;  %v3824_v38 = vld [vmem:[%s7238_s1 + $0x590] sm:$0xf]  ;;  %v3812_v51 = vld [vmem:[%s7238_s1 + $0x578] sm:$0xf] }
  0xe4   :  { %2438 = vmatpush.bf16.msrb.mxu0 %v3345_v55  ;;  %v3537_v55 = vor.u32 %v4657_v47, %v3536_v20  ;;  %v3861_v3 = vor.u32 %v4738_v54, %v3860_v53  ;;  %v3729_v20 = vor.u32 %v4705_v37, %v3728_v36  ;;  %v3825_v47 = vor.u32 %v4729_v15, %v3824_v38  ;;  %v4726_v53 = vld [vmem:[%s7238_s1 + $0x580] sm:$0xf0]  ;;  %v3956_v54 = vld [vmem:[%s7238_s1 + $0x698] sm:$0xf]  ;;  %v4016_v36 = vld [vmem:[%s7238_s1 + $0x710] sm:$0xf] }
  0xe5   :  { %2451 = vmatpush.bf16.msrb.mxu1 %v3441_v56  ;;  %2416 = vmatmul.bf16.vlgmr.msra.gmra.mxu2 %v5305_v28  ;;  %v3561_v28 = vor.u32 %v4663_v21, %v3560_v17  ;;  %v3633_v56 = vor.u32 %v4681_v50, %v3632_v48  ;;  %v4651_v21 = vld [vmem:[%s7238_s1 + $0x328] sm:$0xf0]  ;;  %v4702_v50 = vld [vmem:[%s7238_s1 + $0x4c0] sm:$0xf0]  ;;  %v4777_v38 = vld [vmem:[%s7238_s1 + $0x718] sm:$0xf0] }
  0xe6   :  { %2460 = vmatpush.bf16.msrb.mxu2 %v3585_v57  ;;  %2429 = vmatmul.bf16.vlgmr.msra.gmra.mxu3 %v5315_v34  ;;  %v4624_v34 = vld [vmem:[%s7238_s1 + $0x250] sm:$0xf0]  ;;  %v4810_v15 = vld [vmem:[%s7238_s1 + $0x820] sm:$0xf0] }
  0xe7   :  { %2473 = vmatpush.bf16.msrb.mxu3 %v3681_v62  ;;  %v3405_v42 = vor.u32 %v4624_v34, %v3404_v16  ;;  %v3620_v62 = vld [vmem:[%s7238_s1 + $0x3f8] sm:$0xf]  ;;  %v3500_v16 = vld [vmem:[%s7238_s1 + $0x308] sm:$0xf] }
  0xe8   :  { %2439 = vmatpush.bf16.msrb.mxu0 %v3333_v8  ;;  %v2209_v57 = vpop.f32.mrf.mxu2  ;;  %v2185_v4 = vpop.f32.mrf.mxu0  ;;  %v3752_v8 = vld [vmem:[%s7238_s1 + $0x500] sm:$0xf]  ;;  %v3621_v19 = vor.u32 %v4678_v7, %v3620_v62 }
  0xe9   :  { %2452 = vmatpush.bf16.msrb.mxu1 %v3429_v9  ;;  %v2210_v63 = vadd.f32 %v2209_v57, %v2197_v45  ;;  %v4711_v9 = vld [vmem:[%s7238_s1 + $0x508] sm:$0xf0]  ;;  %v2198_v12 = vpop.f32.mrf.mxu1  ;;  %v4789_v45 = vld [vmem:[%s7238_s1 + $0x778] sm:$0xf0]  ;;  %v4786_v57 = vld [vmem:[%s7238_s1 + $0x760] sm:$0xf0] }
  0xea   :  { %2461 = vmatpush.bf16.msrb.mxu2 %v3573_v10  ;;  %v3848_v10 = vld [vmem:[%s7238_s1 + $0x5c0] sm:$0xf]  ;;  %v3753_v17 = vor.u32 %v4711_v9, %v3752_v8  ;;  %v4759_v8 = vld [vmem:[%s7238_s1 + $0x688] sm:$0xf0]  ;;  %v3692_v12 = vld [vmem:[%s7238_s1 + $0x488] sm:$0xf] }
  0xeb   :  { %2474 = vmatpush.bf16.msrb.mxu3 %v3669_v18  ;;  %v2222_v6 = vpop.f32.mrf.mxu3  ;;  %v3525_v18 = vor.u32 %v4654_v61, %v3524_v59  ;;  %v3849_v5 = vor.u32 %v4735_v11, %v3848_v10  ;;  %v3813_v59 = vor.u32 %v4726_v53, %v3812_v51  ;;  %v3704_v62 = vld [vmem:[%s7238_s1 + $0x4a0] sm:$0xf]  ;;  %v4774_v51 = vld [vmem:[%s7238_s1 + $0x700] sm:$0xf0]  ;;  %v4807_v53 = vld [vmem:[%s7238_s1 + $0x808] sm:$0xf0] }
  0xec   :  { %2440 = vmatpush.bf16.msrb.mxu0 %v3321_v23  ;;  %v6555_v14 = vadd.f32 %v2222_v6, %v2210_v63  ;;  %v3740_v23 = vld [vmem:[%s7238_s1 + $0x4e8] sm:$0xf]  ;;  %v4699_v63 = vld [vmem:[%s7238_s1 + $0x4a8] sm:$0xf0]  ;;  %v3944_v7 = vld [vmem:[%s7238_s1 + $0x680] sm:$0xf] }
  0xed   :  { %2453 = vmatpush.bf16.msrb.mxu1 %v3417_v25  ;;  %v3836_v25 = vld [vmem:[%s7238_s1 + $0x5a8] sm:$0xf]  ;;  %v4723_v6 = vld [vmem:[%s7238_s1 + $0x568] sm:$0xf0]  ;;  %v4040_v10 = vld [vmem:[%s7238_s1 + $0x740] sm:$0xf]  ;;  %v3705_v11 = vor.u32 %v4699_v63, %v3704_v62 }
  0xee   :  { %2462 = vmatpush.bf16.msrb.mxu2 %v3561_v28  ;;  %v4732_v28 = vld [vmem:[%s7238_s1 + $0x5b0] sm:$0xf0]  ;;  %v4771_v63 = vld [vmem:[%s7238_s1 + $0x6e8] sm:$0xf0] }
  0xef   :  { %2475 = vmatpush.bf16.msrb.mxu3 %v3657_v13  ;;  %v3741_v13 = vor.u32 %v4708_v24, %v3740_v23  ;;  %v3837_v35 = vor.u32 %v4732_v28, %v3836_v25  ;;  %v4780_v23 = vld [vmem:[%s7238_s1 + $0x730] sm:$0xf0]  ;;  %v4160_v24 = vld [vmem:[%s7238_s1 + $0x830] sm:$0xf]  ;;  %v4813_v25 = vld [vmem:[%s7238_s1 + $0x838] sm:$0xf0] }
  0xf0   :  { %2441 = vmatpush.bf16.msrb.mxu0 %v3309_v39  ;;  %v2211_v33 = vpop.f32.mrf.mxu2  ;;  %v6602_v40 = vpop.f32.mrf.mxu0 }
  0xf1   :  { %2454 = vmatpush.bf16.msrb.mxu1 %v3405_v42  ;;  %v4765_v42 = vld [vmem:[%s7238_s1 + $0x6b8] sm:$0xf0]  ;;  %v3920_v33 = vld [vmem:[%s7238_s1 + $0x650] sm:$0xf] }
  0xf2   :  { %2463 = vmatpush.bf16.msrb.mxu2 %v3549_v43  ;;  %v3501_v43 = vor.u32 %v4648_v30, %v3500_v16  ;;  %v3969_v48 = vor.u32 %v4765_v42, %v3968_v41  ;;  %v4837_v16 = vld [vmem:[%s7238_s1 + $0x8f8] sm:$0xf0]  ;;  %v4244_v41 = vld [vmem:[%s7238_s1 + $0x8d8] sm:$0xf]  ;;  %v4834_v42 = vld [vmem:[%s7238_s1 + $0x8e0] sm:$0xf0] }
  0xf3   :  { %2476 = vmatpush.bf16.msrb.mxu3 %v3645_v44  ;;  %2442 = vmatmul.bf16.vlgmr.msrb.gmra.mxu0 %v5303_v27  ;;  %v3512_v27 = vld [vmem:[%s7238_s1 + $0x320] sm:$0xf]  ;;  %v2224_v39 = vpop.f32.mrf.mxu3  ;;  %v4064_v44 = vld [vmem:[%s7238_s1 + $0x770] sm:$0xf] }
  0xf4   :  { %2486 = vmatpush.bf16.msra.mxu0 %v3777_v46  ;;  %2455 = vmatmul.bf16.vlgmr.msrb.gmra.mxu1 %v5307_v29  ;;  %v3608_v29 = vld [vmem:[%s7238_s1 + $0x3e0] sm:$0xf]  ;;  %v3513_v26 = vor.u32 %v4651_v21, %v3512_v27  ;;  %v3597_v46 = vor.u32 %v4672_v32, %v3596_v31  ;;  %v4065_v52 = vor.u32 %v4789_v45, %v4064_v44  ;;  %v3788_v27 = vld [vmem:[%s7238_s1 + $0x548] sm:$0xf]  ;;  %v4148_v39 = vld [vmem:[%s7238_s1 + $0x818] sm:$0xf] }
  0xf5   :  { %2499 = vmatpush.bf16.msra.mxu1 %v3873_v49  ;;  %v3609_v34 = vor.u32 %v4675_v22, %v3608_v29  ;;  %v3716_v49 = vld [vmem:[%s7238_s1 + $0x4b8] sm:$0xf]  ;;  %v3932_v29 = vld [vmem:[%s7238_s1 + $0x668] sm:$0xf]  ;;  %v4161_v32 = vor.u32 %v4813_v25, %v4160_v24  ;;  %v4017_v45 = vor.u32 %v4777_v38, %v4016_v36  ;;  %v4849_v24 = vld [vmem:[%s7238_s1 + $0x958] sm:$0xf0] }
  0xf6   :  { %2464 = vmatpush.bf16.msrb.mxu2 %v3537_v55  ;;  %v4762_v55 = vld [vmem:[%s7238_s1 + $0x6a0] sm:$0xf0]  ;;  %v4028_v22 = vld [vmem:[%s7238_s1 + $0x728] sm:$0xf]  ;;  %v4292_v38 = vld [vmem:[%s7238_s1 + $0x938] sm:$0xf] }
  0xf7   :  { %2477 = vmatpush.bf16.msrb.mxu3 %v3633_v56  ;;  %v4052_v56 = vld [vmem:[%s7238_s1 + $0x758] sm:$0xf]  ;;  %v3957_v61 = vor.u32 %v4762_v55, %v3956_v54  ;;  %v4029_v31 = vor.u32 %v4780_v23, %v4028_v22  ;;  %v4232_v54 = vld [vmem:[%s7238_s1 + $0x8c0] sm:$0xf]  ;;  %v4825_v22 = vld [vmem:[%s7238_s1 + $0x898] sm:$0xf0] }
  0xf8   :  { %2487 = vmatpush.bf16.msra.mxu0 %v3765_v58  ;;  %v3717_v58 = vor.u32 %v4702_v50, %v3716_v49  ;;  %v4053_v4 = vor.u32 %v4786_v57, %v4052_v56  ;;  %v2237_v9 = vpop.f32.mrf.mxu0  ;;  %v4245_v50 = vor.u32 %v4834_v42, %v4244_v41  ;;  %v4304_v23 = vld [vmem:[%s7238_s1 + $0x950] sm:$0xf]  ;;  %v4359_v41 = vld [vmem:[%s7240_s3 + $0x60] sm:$0xf]  ;;  %v4863_v42 = vld [vmem:[%s7240_s3 + $0x64] sm:$0xf0] }
  0xf9   :  { %2500 = vmatpush.bf16.msra.mxu1 %v3861_v3  ;;  %v3800_v3 = vld [vmem:[%s7238_s1 + $0x560] sm:$0xf] }
  0xfa   :  { %2465 = vmatpush.bf16.msrb.mxu2 %v3525_v18  ;;  %v3801_v18 = vor.u32 %v4723_v6, %v3800_v3  ;;  %v4124_v3 = vld [vmem:[%s7238_s1 + $0x7e8] sm:$0xf] }
  0xfb   :  { %2478 = vmatpush.bf16.msrb.mxu3 %v3621_v19  ;;  %v3945_v19 = vor.u32 %v4759_v8, %v3944_v7  ;;  %v4220_v6 = vld [vmem:[%s7238_s1 + $0x8a8] sm:$0xf]  ;;  %v4828_v7 = vld [vmem:[%s7238_s1 + $0x8b0] sm:$0xf0] }
  0xfc   :  { %2488 = vmatpush.bf16.msra.mxu0 %v3753_v17  ;;  %v4696_v17 = vld [vmem:[%s7238_s1 + $0x490] sm:$0xf0] }
  0xfd   :  { %2501 = vmatpush.bf16.msra.mxu1 %v3849_v5  ;;  %v4756_v5 = vld [vmem:[%s7238_s1 + $0x670] sm:$0xf0]  ;;  %v3693_v28 = vor.u32 %v4696_v17, %v3692_v12 }
  0xfe   :  { %2466 = vmatpush.bf16.msrb.mxu2 %v3513_v26  ;;  %v4256_v26 = vld [vmem:[%s7238_s1 + $0x8f0] sm:$0xf]  ;;  %v3933_v30 = vor.u32 %v4756_v5, %v3932_v29  ;;  %v4768_v17 = vld [vmem:[%s7238_s1 + $0x6d0] sm:$0xf0]  ;;  %v4801_v29 = vld [vmem:[%s7238_s1 + $0x7d8] sm:$0xf0] }
  0xff   :  { %2479 = vmatpush.bf16.msrb.mxu3 %v3609_v34  ;;  %v4257_v37 = vor.u32 %v4837_v16, %v4256_v26  ;;  %v4208_v5 = vld [vmem:[%s7238_s1 + $0x890] sm:$0xf]  ;;  %v4865_v26 = vld [vmem:[%s7240_s3 + $0x74] sm:$0xf0] }
 0x100   :  { %2489 = vmatpush.bf16.msra.mxu0 %v3741_v13 }
 0x101   :  { %2502 = vmatpush.bf16.msra.mxu1 %v3837_v35  ;;  %v6705_v34 = vpop.f32.mrf.mxu1  ;;  %v4753_v35 = vld [vmem:[%s7238_s1 + $0x658] sm:$0xf0] }
 0x102   :  { %2467 = vmatpush.bf16.msrb.mxu2 %v3501_v43  ;;  %v3921_v43 = vor.u32 %v4753_v35, %v3920_v33  ;;  %v4798_v33 = vld [vmem:[%s7238_s1 + $0x7c0] sm:$0xf0]  ;;  %v4196_v35 = vld [vmem:[%s7238_s1 + $0x878] sm:$0xf] }
 0x103   :  { %2480 = vmatpush.bf16.msrb.mxu3 %v3597_v46  ;;  %v4149_v46 = vor.u32 %v4810_v15, %v4148_v39  ;;  %v4846_v39 = vld [vmem:[%s7238_s1 + $0x940] sm:$0xf0] }
 0x104   :  { %2490 = vmatpush.bf16.msra.mxu0 %v3729_v20  ;;  %v3908_v20 = vld [vmem:[%s7238_s1 + $0x638] sm:$0xf] }
 0x105   :  { %2503 = vmatpush.bf16.msra.mxu1 %v3825_v47  ;;  %2468 = vmatmul.bf16.vlgmr.msrb.gmra.mxu2 %v5383_v0  ;;  %v4783_v0 = vld [vmem:[%s7238_s1 + $0x748] sm:$0xf0]  ;;  %v4750_v47 = vld [vmem:[%s7238_s1 + $0x640] sm:$0xf0] }
 0x106   :  { %2512 = vmatpush.bf16.msra.mxu2 %v3969_v48  ;;  %2481 = vmatmul.bf16.vlgmr.msrb.gmra.mxu3 %v5387_v2  ;;  %v4720_v2 = vld [vmem:[%s7238_s1 + $0x550] sm:$0xf0]  ;;  %v4041_v21 = vor.u32 %v4783_v0, %v4040_v10  ;;  %v4004_v48 = vld [vmem:[%s7238_s1 + $0x6f8] sm:$0xf]  ;;  %v3909_v56 = vor.u32 %v4750_v47, %v3908_v20  ;;  %v3884_v10 = vld [vmem:[%s7238_s1 + $0x608] sm:$0xf] }
 0x107   :  { %2525 = vmatpush.bf16.msra.mxu3 %v4065_v52  ;;  %v3789_v13 = vor.u32 %v4720_v2, %v3788_v27  ;;  %v4136_v52 = vld [vmem:[%s7238_s1 + $0x800] sm:$0xf]  ;;  %v4005_v57 = vor.u32 %v4774_v51, %v4004_v48  ;;  %v4221_v2 = vor.u32 %v4828_v7, %v4220_v6  ;;  %v4795_v47 = vld [vmem:[%s7238_s1 + $0x7a8] sm:$0xf0]  ;;  %v4360_v51 = vor.u32 %v4863_v42, %v4359_v41  ;;  %v4840_v6 = vld [vmem:[%s7238_s1 + $0x910] sm:$0xf0] }
 0x108   :  { %2491 = vmatpush.bf16.msra.mxu0 %v3717_v58  ;;  %v6731_v44 = vpop.f32.mrf.mxu2  ;;  %v4137_v58 = vor.u32 %v4807_v53, %v4136_v52  ;;  %v4088_v20 = vld [vmem:[%s7238_s1 + $0x7a0] sm:$0xf]  ;;  %v4819_v52 = vld [vmem:[%s7238_s1 + $0x868] sm:$0xf0]  ;;  %v4415_v42 = vld [vmem:[%s7240_s3 + $0xd0] sm:$0xf] }
 0x109   :  { %2504 = vmatpush.bf16.msra.mxu1 %v3813_v59  ;;  %v6742_v49 = vpop.f32.mrf.mxu3  ;;  %v2250_v55 = vpop.f32.mrf.mxu1  ;;  %v3896_v59 = vld [vmem:[%s7238_s1 + $0x620] sm:$0xf] }
 0x10a   :  { %2513 = vmatpush.bf16.msra.mxu2 %v3957_v61  ;;  %v3992_v61 = vld [vmem:[%s7238_s1 + $0x6e0] sm:$0xf]  ;;  %v4351_v55 = vld [vmem:[%s7240_s3 + $0x50] sm:$0xf] }
 0x10b   :  { %2526 = vmatpush.bf16.msra.mxu3 %v4053_v4  ;;  %v4804_v4 = vld [vmem:[%s7238_s1 + $0x7f0] sm:$0xf0]  ;;  %v4184_v48 = vld [vmem:[%s7238_s1 + $0x860] sm:$0xf] }
 0x10c   :  { %2492 = vmatpush.bf16.msra.mxu0 %v3705_v11  ;;  %v3993_v11 = vor.u32 %v4771_v63, %v3992_v61  ;;  %v4125_v12 = vor.u32 %v4804_v4, %v4124_v3  ;;  %v4280_v53 = vld [vmem:[%s7238_s1 + $0x920] sm:$0xf]  ;;  %v4792_v61 = vld [vmem:[%s7238_s1 + $0x790] sm:$0xf0]  ;;  %v4268_v4 = vld [vmem:[%s7238_s1 + $0x908] sm:$0xf] }
 0x10d   :  { %2505 = vmatpush.bf16.msra.mxu1 %v3801_v18  ;;  %v4744_v18 = vld [vmem:[%s7238_s1 + $0x610] sm:$0xf0]  ;;  %v4343_v7 = vld [vmem:[%s7240_s3 + $0x40] sm:$0xf] }
 0x10e   :  { %2514 = vmatpush.bf16.msra.mxu2 %v3945_v19  ;;  %v3980_v19 = vld [vmem:[%s7238_s1 + $0x6c8] sm:$0xf]  ;;  %v3885_v25 = vor.u32 %v4744_v18, %v3884_v10  ;;  %v4816_v63 = vld [vmem:[%s7238_s1 + $0x850] sm:$0xf0] }
 0x10f   :  { %2527 = vmatpush.bf16.msra.mxu3 %v4041_v21  ;;  %v4112_v21 = vld [vmem:[%s7238_s1 + $0x7d0] sm:$0xf]  ;;  %v3981_v16 = vor.u32 %v4768_v17, %v3980_v19  ;;  %v4864_v10 = vld [vmem:[%s7240_s3 + $0x74] sm:$0xf]  ;;  %v4269_v19 = vor.u32 %v4840_v6, %v4268_v4  ;;  %v4873_v6 = vld [vmem:[%s7240_s3 + $0xb4] sm:$0xf0] }
 0x110   :  { %2493 = vmatpush.bf16.msra.mxu0 %v3693_v28  ;;  %v6785_v8 = vpop.f32.mrf.mxu0  ;;  %v2263_v0 = vpop.f32.mrf.mxu2  ;;  %v4367_v28 = vld [vmem:[%s7240_s3 + $0x70] sm:$0xf] }
 0x111   :  { %2506 = vmatpush.bf16.msra.mxu1 %v3789_v13  ;;  %v2276_v27 = vpop.f32.mrf.mxu3  ;;  %v4113_v13 = vor.u32 %v4801_v29, %v4112_v21  ;;  %v4368_v36 = vor.u32 %v4865_v26, %v4367_v28  ;;  %v4369_v0 = vld [vmem:[%s7240_s3 + $0x78] sm:$0xf0]  ;;  %v4431_v17 = vld [vmem:[%s7240_s3 + $0xf0] sm:$0xf] }
 0x112   :  { %2515 = vmatpush.bf16.msra.mxu2 %v3933_v30  ;;  %v4209_v30 = vor.u32 %v4825_v22, %v4208_v5  ;;  %v4881_v27 = vld [vmem:[%s7240_s3 + $0xf4] sm:$0xf0]  ;;  %v4372_v5 = vor.u32 %v4864_v10, %v4369_v0  ;;  %v4335_v22 = vld [vmem:[%s7240_s3 + $0x30] sm:$0xf] }
 0x113   :  { %2528 = vmatpush.bf16.msra.mxu3 %v4029_v31  ;;  %2494 = vmatmul.bf16.vlgmr.msra.gmra.mxu0 %v5378_v60  ;;  %v4831_v60 = vld [vmem:[%s7238_s1 + $0x8c8] sm:$0xf0]  ;;  %v4305_v31 = vor.u32 %v4849_v24, %v4304_v23  ;;  %v4857_v23 = vld [vmem:[%s7240_s3 + $0x34] sm:$0xf0]  ;;  %v4862_v24 = vld [vmem:[%s7240_s3 + $0x64] sm:$0xf]  ;;  %v4432_v28 = vor.u32 %v4881_v27, %v4431_v17 }
 0x114   :  { %2538 = vmatpush.bf16.msrb.mxu0 %v4161_v32  ;;  %2507 = vmatmul.bf16.vlgmr.msra.gmra.mxu1 %v5385_v1  ;;  %v4747_v1 = vld [vmem:[%s7238_s1 + $0x628] sm:$0xf0]  ;;  %v4233_v62 = vor.u32 %v4831_v60, %v4232_v54  ;;  %v4100_v32 = vld [vmem:[%s7238_s1 + $0x7b8] sm:$0xf]  ;;  %v4399_v4 = vld [vmem:[%s7240_s3 + $0xb0] sm:$0xf] }
 0x115   :  { %2551 = vmatpush.bf16.msrb.mxu1 %v4257_v37  ;;  %v3897_v9 = vor.u32 %v4747_v1, %v3896_v59  ;;  %v4822_v37 = vld [vmem:[%s7238_s1 + $0x880] sm:$0xf0]  ;;  %v4843_v54 = vld [vmem:[%s7238_s1 + $0x928] sm:$0xf0]  ;;  %v4185_v59 = vor.u32 %v4819_v52, %v4184_v48 }
 0x116   :  { %2516 = vmatpush.bf16.msra.mxu2 %v3921_v43  ;;  %v4101_v43 = vor.u32 %v4798_v33, %v4100_v32  ;;  %v4913_v60 = vld [vmem:[#allocation1 + $0x9] sm:$0xff]  ;;  %v4281_v1 = vor.u32 %v4843_v54, %v4280_v53  ;;  %v4327_v33 = vld [vmem:[%s7240_s3 + $0x20] sm:$0xf]  ;;  %v4878_v17 = vld [vmem:[%s7240_s3 + $0xe4] sm:$0xf] }
 0x117   :  { %2529 = vmatpush.bf16.msra.mxu3 %v4017_v45  ;;  %v4197_v45 = vor.u32 %v4822_v37, %v4196_v35  ;;  %v4855_v37 = vld [vmem:[%s7240_s3 + $0x24] sm:$0xf0] }
 0x118   :  { %2539 = vmatpush.bf16.msrb.mxu0 %v4149_v46  ;;  %v2289_v15 = vpop.f32.mrf.mxu0  ;;  %v4293_v46 = vor.u32 %v4846_v39, %v4292_v38  ;;  %v4353_v38 = vld [vmem:[%s7240_s3 + $0x58] sm:$0xf0]  ;;  %v4917_v48 = vld [vmem:[#allocation1 + $0x24] sm:$0xff] }
 0x119   :  { %2552 = vmatpush.bf16.msrb.mxu1 %v4245_v50  ;;  %v4912_v50 = vld [vmem:[#allocation1] sm:$0xff] }
 0x11a   :  { %2517 = vmatpush.bf16.msra.mxu2 %v3909_v56  ;;  %v4861_v56 = vld [vmem:[%s7240_s3 + $0x54] sm:$0xf0] }
 0x11b   :  { %2530 = vmatpush.bf16.msra.mxu3 %v4005_v57  ;;  %v4089_v57 = vor.u32 %v4795_v47, %v4088_v20  ;;  %v4352_v3 = vor.u32 %v4861_v56, %v4351_v55  ;;  %v4916_v39 = vld [vmem:[#allocation1 + $0x1b] sm:$0xff]  ;;  %v4319_v47 = vld [vmem:[%s7240_s3 + $0x10] sm:$0xf]  ;;  %v4875_v55 = vld [vmem:[%s7240_s3 + $0xc4] sm:$0xf0] }
 0x11c   :  { %2540 = vmatpush.bf16.msrb.mxu0 %v4137_v58  ;;  %v4076_v58 = vld [vmem:[%s7238_s1 + $0x788] sm:$0xf] }
 0x11d   :  { %2553 = vmatpush.bf16.msrb.mxu1 %v4233_v62  ;;  %v4172_v62 = vld [vmem:[%s7238_s1 + $0x848] sm:$0xf] }
 0x11e   :  { %2518 = vmatpush.bf16.msra.mxu2 %v3897_v9  ;;  %v4859_v9 = vld [vmem:[%s7240_s3 + $0x44] sm:$0xf0]  ;;  %v4173_v18 = vor.u32 %v4816_v63, %v4172_v62  ;;  %v4337_v63 = vld [vmem:[%s7240_s3 + $0x38] sm:$0xf0] }
 0x11f   :  { %2531 = vmatpush.bf16.msra.mxu3 %v3993_v11  ;;  %v4077_v11 = vor.u32 %v4792_v61, %v4076_v58  ;;  %v4344_v29 = vor.u32 %v4859_v9, %v4343_v7  ;;  %v2236_v61 = vadd.f32 %v6602_v40, %v6555_v14  ;;  %v4851_v62 = vld [vmem:[%s7240_s3 + $0x4] sm:$0xf0]  ;;  %v4433_v14 = vld [vmem:[%s7240_s3 + $0xf8] sm:$0xf0] }
 0x120   :  { %2541 = vmatpush.bf16.msrb.mxu0 %v4125_v12 }
 0x121   :  { %2554 = vmatpush.bf16.msrb.mxu1 %v4221_v2  ;;  %v6901_v12 = vpop.f32.mrf.mxu1  ;;  %v6912_v2 = vld [vmem:[%s7239_s2] sm:$0x7]  ;;  %v2577_v0 = vmax.f32 %v2236_v61, 0.0 }
 0x122   :  { %2519 = vmatpush.bf16.msra.mxu2 %v3885_v25  ;;  %v433_v21 = vperm.slane %v6912_v2, 1  ;;  %v4361_v25 = vld [vmem:[%s7240_s3 + $0x68] sm:$0xf0] }
 0x123   :  { %2532 = vmatpush.bf16.msra.mxu3 %v3981_v16  ;;  %v4423_v16 = vld [vmem:[%s7240_s3 + $0xe0] sm:$0xf]  ;;  %v4364_v32 = vor.u32 %v4862_v24, %v4361_v25  ;;  %v2580_v24 = vpack.c.bf16 %v2577_v0, %v2577_v0 }
 0x124   :  { %2542 = vmatpush.bf16.msrb.mxu0 %v4113_v13  ;;  %v4879_v13 = vld [vmem:[%s7240_s3 + $0xe4] sm:$0xf0] }
 0x125   :  { %2555 = vmatpush.bf16.msrb.mxu1 %v4209_v30  ;;  %2520 = vmatmul.bf16.vlgmr.msra.gmra.mxu2 %v4912_v50  ;;  %v2249_v30 = vadd.f32 %v6705_v34, %v433_v21  ;;  %v4860_v34 = vld [vmem:[%s7240_s3 + $0x54] sm:$0xf]  ;;  %v4424_v41 = vor.u32 %v4879_v13, %v4423_v16  ;;  %v4853_v50 = vld [vmem:[%s7240_s3 + $0x14] sm:$0xf0]  ;;  %v4400_v21 = vor.u32 %v4873_v6, %v4399_v4  ;;  %v4321_v16 = vld [vmem:[%s7240_s3 + $0x18] sm:$0xf0] }
 0x126   :  { %2568 = vmatpush.bf16.msrb.mxu2 %v4305_v31  ;;  %2533 = vmatmul.bf16.vlgmr.msra.gmra.mxu3 %v4913_v60  ;;  %v4336_v31 = vor.u32 %v4857_v23, %v4335_v22  ;;  %v4356_v20 = vor.u32 %v4860_v34, %v4353_v38  ;;  %v4407_v60 = vld [vmem:[%s7240_s3 + $0xc0] sm:$0xf]  ;;  %v4876_v13 = vld [vmem:[%s7240_s3 + $0xd4] sm:$0xf]  ;;  %v4850_v34 = vld [vmem:[%s7240_s3 + $0x4] sm:$0xf] }
 0x127   :  { %2877 = vmatpush.bf16.msrb.mxu3 %v4368_v36  ;;  %v4915_v36 = vld [vmem:[#allocation1 + $0x12] sm:$0xff]  ;;  %v4408_v40 = vor.u32 %v4875_v55, %v4407_v60  ;;  %v4313_v38 = vld [vmem:[%s7240_s3 + $0x8] sm:$0xf0]  ;;  %v4870_v60 = vld [vmem:[%s7240_s3 + $0xa4] sm:$0xf] }
 0x128   :  { %2543 = vmatpush.bf16.msrb.mxu0 %v4101_v43  ;;  %v6927_v26 = vpop.f32.mrf.mxu2  ;;  %v4877_v43 = vld [vmem:[%s7240_s3 + $0xd4] sm:$0xf0]  ;;  %v4393_v55 = vld [vmem:[%s7240_s3 + $0xa8] sm:$0xf0] }
 0x129   :  { %2556 = vmatpush.bf16.msrb.mxu1 %v4197_v45  ;;  %v6939_v35 = vpop.f32.mrf.mxu3  ;;  %v2302_v15 = vpop.f32.mrf.mxu1  ;;  %v2262_v45 = vadd.f32 %v6731_v44, %v2249_v30  ;;  %v4345_v44 = vld [vmem:[%s7240_s3 + $0x48] sm:$0xf0]  ;;  %v4416_v53 = vor.u32 %v4877_v43, %v4415_v42  ;;  %v4375_v42 = vld [vmem:[%s7240_s3 + $0x80] sm:$0xf]  ;;  %v4867_v43 = vld [vmem:[%s7240_s3 + $0x84] sm:$0xf0] }
 0x12a   :  { %2569 = vmatpush.bf16.msrb.mxu2 %v4293_v46  ;;  %v4328_v46 = vor.u32 %v4855_v37, %v4327_v33 }
 0x12b   :  { %2878 = vmatpush.bf16.msrb.mxu3 %v4360_v51  ;;  %v4858_v51 = vld [vmem:[%s7240_s3 + $0x44] sm:$0xf]  ;;  %v2275_v56 = vadd.f32 %v6742_v49, %v2262_v45  ;;  %v4856_v49 = vld [vmem:[%s7240_s3 + $0x34] sm:$0xf] }
 0x12c   :  { %2544 = vmatpush.bf16.msrb.mxu0 %v4089_v57  ;;  %v4320_v57 = vor.u32 %v4853_v50, %v4319_v47  ;;  %v4348_v58 = vor.u32 %v4858_v51, %v4345_v44  ;;  %v4340_v10 = vor.u32 %v4856_v49, %v4337_v63  ;;  %v4872_v47 = vld [vmem:[%s7240_s3 + $0xb4] sm:$0xf]  ;;  %v4376_v50 = vor.u32 %v4867_v43, %v4375_v42  ;;  %v4866_v63 = vld [vmem:[%s7240_s3 + $0x84] sm:$0xf]  ;;  %v4471_v42 = vld [vmem:[%s7240_s3 + $0x140] sm:$0xf] }
 0x12d   :  { %2557 = vmatpush.bf16.msrb.mxu1 %v4185_v59  ;;  %v4311_v59 = vld [vmem:[%s7240_s3] sm:$0xf]  ;;  %v2288_v7 = vadd.f32 %v6785_v8, %v2275_v56  ;;  %v4425_v8 = vld [vmem:[%s7240_s3 + $0xe8] sm:$0xf0]  ;;  %v4891_v43 = vld [vmem:[%s7240_s3 + $0x144] sm:$0xf0] }
 0x12e   :  { %2570 = vmatpush.bf16.msrb.mxu2 %v4281_v1  ;;  %v4312_v9 = vor.u32 %v4851_v62, %v4311_v59  ;;  %v4428_v25 = vor.u32 %v4878_v17, %v4425_v8  ;;  %v4385_v59 = vld [vmem:[%s7240_s3 + $0x98] sm:$0xf0] }
 0x12f   :  { %2879 = vmatpush.bf16.msrb.mxu3 %v4352_v3  ;;  %v4880_v3 = vld [vmem:[%s7240_s3 + $0xf4] sm:$0xf]  ;;  %v2301_v22 = vadd.f32 %v6901_v12, %v2288_v7  ;;  %v4417_v12 = vld [vmem:[%s7240_s3 + $0xd8] sm:$0xf0] }
 0x130   :  { %2545 = vmatpush.bf16.msrb.mxu0 %v4077_v11  ;;  %v6970_v52 = vpop.f32.mrf.mxu0  ;;  %v2315_v54 = vpop.f32.mrf.mxu2  ;;  %v4436_v11 = vor.u32 %v4880_v3, %v4433_v14  ;;  %v4420_v37 = vor.u32 %v4876_v13, %v4417_v12  ;;  %v4377_v3 = vld [vmem:[%s7240_s3 + $0x88] sm:$0xf0]  ;;  %v4894_v13 = vld [vmem:[%s7240_s3 + $0x164] sm:$0xf] }
 0x131   :  { %2558 = vmatpush.bf16.msrb.mxu1 %v4173_v18  ;;  %v2328_v1 = vpop.f32.mrf.mxu3  ;;  %v4854_v18 = vld [vmem:[%s7240_s3 + $0x24] sm:$0xf]  ;;  %v2314_v33 = vadd.f32 %v6927_v26, %v2301_v22  ;;  %v4409_v26 = vld [vmem:[%s7240_s3 + $0xc8] sm:$0xf0]  ;;  %v4380_v6 = vor.u32 %v4866_v63, %v4377_v3  ;;  %v4447_v63 = vld [vmem:[%s7240_s3 + $0x110] sm:$0xf] }
 0x132   :  { %2571 = vmatpush.bf16.msrb.mxu2 %v4269_v19  ;;  %v4329_v19 = vld [vmem:[%s7240_s3 + $0x28] sm:$0xf0]  ;;  %v4885_v3 = vld [vmem:[%s7240_s3 + $0x114] sm:$0xf0] }
 0x133   :  { %2880 = vmatpush.bf16.msrb.mxu3 %v4344_v29  ;;  %2546 = vmatmul.bf16.vlgmr.msrb.gmra.mxu0 %v4915_v36  ;;  %v4391_v29 = vld [vmem:[%s7240_s3 + $0xa0] sm:$0xf]  ;;  %v4332_v23 = vor.u32 %v4854_v18, %v4329_v19  ;;  %v2327_v45 = vadd.f32 %v6939_v35, %v2314_v33 }
 0x134   :  { %2559 = vmatmul.bf16.vlgmr.msrb.gmra.mxu1 %v4916_v39  ;;  %2890 = vmatpush.bf16.msra.mxu0 %v4432_v28  ;;  %v4852_v28 = vld [vmem:[%s7240_s3 + $0x14] sm:$0xf]  ;;  %v4874_v39 = vld [vmem:[%s7240_s3 + $0xc4] sm:$0xf] }
 0x135   :  { %4308 = vmatmul.msk.bf16.vlgmr.msrb.gmra.mxu2 %vm2067_vm0, %v4917_v48  ;;  %v4324_v36 = vor.u32 %v4852_v28, %v4321_v16  ;;  %v4401_v48 = vld [vmem:[%s7240_s3 + $0xb8] sm:$0xf0]  ;;  %v2340_v51 = vadd.f32 %v6970_v52, %v2327_v45  ;;  %v4396_v52 = vor.u32 %v4870_v60, %v4393_v55  ;;  %v4487_v28 = vld [vmem:[%s7240_s3 + $0x160] sm:$0xf]  ;;  %v4895_v16 = vld [vmem:[%s7240_s3 + $0x164] sm:$0xf0] }
 0x136   :  { %2916 = vmatpush.bf16.msra.mxu2 %v4372_v5  ;;  %v4871_v5 = vld [vmem:[%s7240_s3 + $0xa4] sm:$0xf0]  ;;  %v4404_v44 = vor.u32 %v4872_v47, %v4401_v48  ;;  %v4488_v12 = vor.u32 %v4895_v16, %v4487_v28  ;;  %v4890_v45 = vld [vmem:[%s7240_s3 + $0x144] sm:$0xf]  ;;  %v4473_v47 = vld [vmem:[%s7240_s3 + $0x148] sm:$0xf0] }
 0x137   :  { %2881 = vmatpush.bf16.msrb.mxu3 %v4336_v31  ;;  %v4392_v30 = vor.u32 %v4871_v5, %v4391_v29  ;;  %v4383_v31 = vld [vmem:[%s7240_s3 + $0x90] sm:$0xf]  ;;  %v4897_v29 = vld [vmem:[%s7240_s3 + $0x174] sm:$0xf0]  ;;  %v4896_v5 = vld [vmem:[%s7240_s3 + $0x174] sm:$0xf]  ;;  %v4476_v48 = vor.u32 %v4890_v45, %v4473_v47 }
 0x138   :  { %2891 = vmatpush.bf16.msra.mxu0 %v4424_v41  ;;  %v2341_v27 = vpop.f32.mrf.mxu0 }
 0x13a   :  { %2917 = vmatpush.bf16.msra.mxu2 %v4364_v32  ;;  %v4869_v32 = vld [vmem:[%s7240_s3 + $0x94] sm:$0xf0] }
 0x13b   :  { %2882 = vmatpush.bf16.msrb.mxu3 %v4328_v46  ;;  %v4384_v15 = vor.u32 %v4869_v32, %v4383_v31  ;;  %v4316_v46 = vor.u32 %v4850_v34, %v4313_v38  ;;  %v4892_v34 = vld [vmem:[%s7240_s3 + $0x154] sm:$0xf] }
 0x13c   :  { %2892 = vmatpush.bf16.msra.mxu0 %v4416_v53 }
 0x13e   :  { %2918 = vmatpush.bf16.msra.mxu2 %v4356_v20  ;;  %v4412_v20 = vor.u32 %v4874_v39, %v4409_v26  ;;  %v4481_v39 = vld [vmem:[%s7240_s3 + $0x158] sm:$0xf0] }
 0x13f   :  { %2883 = vmatpush.bf16.msrb.mxu3 %v4320_v57  ;;  %v4484_v26 = vor.u32 %v4892_v34, %v4481_v39 }
 0x140   :  { %2893 = vmatpush.bf16.msra.mxu0 %v4408_v40 }
 0x141   :  { %v2352_v41 = vpop.f32.mrf.mxu1 }
 0x142   :  { %2919 = vmatpush.bf16.msra.mxu2 %v4348_v58  ;;  %v2353_v35 = vadd.f32 %v2352_v41, %v2340_v51  ;;  %v4868_v58 = vld [vmem:[%s7240_s3 + $0x94] sm:$0xf]  ;;  %v4889_v51 = vld [vmem:[%s7240_s3 + $0x134] sm:$0xf0] }
 0x143   :  { %2884 = vmatpush.bf16.msrb.mxu3 %v4312_v9  ;;  %v4388_v62 = vor.u32 %v4868_v58, %v4385_v59  ;;  %v4886_v58 = vld [vmem:[%s7240_s3 + $0x124] sm:$0xf] }
 0x144   :  { %2894 = vmatpush.bf16.msra.mxu0 %v4400_v21  ;;  %v4495_v21 = vld [vmem:[%s7240_s3 + $0x170] sm:$0xf] }
 0x146   :  { %2920 = vmatpush.bf16.msra.mxu2 %v4340_v10  ;;  %2885 = vmatmul.bf16.vlgmr.msrb.gmra.mxu3 %v2580_v24 }
 0x147   :  { %2929 = vmatpush.bf16.msra.mxu3 %v4436_v11 }
 0x148   :  { %2895 = vmatpush.bf16.msra.mxu0 %v4392_v30  ;;  %v2365_v53 = vpop.f32.mrf.mxu2  ;;  %v4489_v30 = vld [vmem:[%s7240_s3 + $0x168] sm:$0xf0] }
 0x149   :  { %v2378_v54 = vpop.f32.mrf.mxu3  ;;  %v2354_v56 = vpop.f32.mrf.mxu1  ;;  %v2366_v57 = vadd.f32 %v2365_v53, %v2353_v35  ;;  %v4492_v32 = vor.u32 %v4894_v13, %v4489_v30  ;;  %v4465_v53 = vld [vmem:[%s7240_s3 + $0x138] sm:$0xf0] }
 0x14a   :  { %2921 = vmatpush.bf16.msra.mxu2 %v4332_v23  ;;  %v4496_v23 = vor.u32 %v4897_v29, %v4495_v21 }
 0x14b   :  { %2930 = vmatpush.bf16.msra.mxu3 %v4428_v25  ;;  %v2379_v1 = vadd.f32 %v2378_v54, %v2366_v57  ;;  %v4455_v57 = vld [vmem:[%s7240_s3 + $0x120] sm:$0xf] }
 0x14c   :  { %2896 = vmatpush.bf16.msra.mxu0 %v4384_v15  ;;  %2903 = vmatpush.bf16.msra.mxu1 %v4496_v23 }
 0x14e   :  { %2922 = vmatpush.bf16.msra.mxu2 %v4324_v36  ;;  %v4479_v36 = vld [vmem:[%s7240_s3 + $0x150] sm:$0xf] }
 0x14f   :  { %2931 = vmatpush.bf16.msra.mxu3 %v4420_v37  ;;  %v4893_v37 = vld [vmem:[%s7240_s3 + $0x154] sm:$0xf0] }
 0x150   :  { %2897 = vmatpush.bf16.msra.mxu0 %v4376_v50  ;;  %v2391_v61 = vpop.f32.mrf.mxu0  ;;  %v2367_v14 = vpop.f32.mrf.mxu2  ;;  %2904 = vmatpush.bf16.msra.mxu1 %v4488_v12  ;;  %v4480_v38 = vor.u32 %v4893_v37, %v4479_v36  ;;  %v4463_v50 = vld [vmem:[%s7240_s3 + $0x130] sm:$0xf] }
 0x151   :  { %v2392_v49 = vadd.f32 %v2391_v61, %v2379_v1  ;;  %v2380_v40 = vpop.f32.mrf.mxu3  ;;  %v2404_v4 = vpop.f32.mrf.mxu1  ;;  %v4464_v35 = vor.u32 %v4889_v51, %v4463_v50  ;;  %v4457_v61 = vld [vmem:[%s7240_s3 + $0x128] sm:$0xf0]  ;;  %v4884_v14 = vld [vmem:[%s7240_s3 + $0x114] sm:$0xf]  ;;  %v2631_v50 = vld [vmem:[%s7241_s4] sm:$0x3] }
 0x152   :  { %2923 = vmatpush.bf16.msra.mxu2 %v4316_v46  ;;  %v434_v46 = vperm.slane %v6912_v2, 2  ;;  %v4888_v2 = vld [vmem:[%s7240_s3 + $0x134] sm:$0xf]  ;;  %v4902_v51 = vld [vmem:[%s7242_s5 + $0x20] sm:$0xff] }
 0x153   :  { %2932 = vmatpush.bf16.msra.mxu3 %v4412_v20  ;;  %v2405_v7 = vadd.f32 %v2404_v4, %v2392_v49  ;;  %v4472_v20 = vor.u32 %v4891_v43, %v4471_v42  ;;  %v4468_v60 = vor.u32 %v4888_v2, %v4465_v53  ;;  %v4460_v49 = vor.u32 %v4886_v58, %v4457_v61  ;;  %v4909_v42 = vld [vmem:[%s7242_s5 + $0x58] sm:$0xff]  ;;  %v4904_v43 = vld [vmem:[%s7242_s5 + $0x30] sm:$0xff]  ;;  %v4899_v61 = vld [vmem:[%s7242_s5 + $0x8] sm:$0xff] }
 0x154   :  { %2905 = vmatpush.bf16.msra.mxu1 %v4480_v38  ;;  %v4448_v4 = vor.u32 %v4885_v3, %v4447_v63  ;;  %v2633_v2 = vperm.slane %v2631_v50, 0 }
 0x155   :  { %2924 = vmatmul.bf16.vlgmr.msra.gmra.mxu2 %v2580_v24  ;;  %v2578_v9 = vmax.f32 %v2405_v7, 0.0  ;;  %v4497_v24 = vld [vmem:[%s7240_s3 + $0x178] sm:$0xf0] }
 0x156   :  { %v4500_v25 = vor.u32 %v4896_v5, %v4497_v24  ;;  %3079 = vmatpush.bf16.msrb.mxu2 %v4909_v42 }
 0x157   :  { %2933 = vmatpush.bf16.msra.mxu3 %v4404_v44  ;;  %v2581_v0 = vpack.c.bf16 %v2578_v9, %v2578_v9 }
 0x158   :  { %v2393_v10 = vpop.f32.mrf.mxu0  ;;  %2942 = vmatpush.bf16.msrb.mxu0 %v4500_v25  ;;  %2906 = vmatpush.bf16.msra.mxu1 %v4472_v20  ;;  %v4903_v20 = vld [vmem:[%s7242_s5 + $0x28] sm:$0xff] }
 0x159   :  { %2898 = vmatmul.bf16.vlgmr.msra.gmra.mxu0 %v2581_v0  ;;  %v2406_v11 = vpop.f32.mrf.mxu1 }
 0x15a   :  { %v4883_v11 = vld [vmem:[%s7240_s3 + $0x104] sm:$0xf0] }
 0x15b   :  { %2934 = vmatpush.bf16.msra.mxu3 %v4396_v52  ;;  %v4887_v52 = vld [vmem:[%s7240_s3 + $0x124] sm:$0xf0] }
 0x15c   :  { %2943 = vmatpush.bf16.msrb.mxu0 %v4492_v32  ;;  %2907 = vmatpush.bf16.msra.mxu1 %v4464_v35  ;;  %v4456_v1 = vor.u32 %v4887_v52, %v4455_v57 }
 0x15f   :  { %2935 = vmatpush.bf16.msra.mxu3 %v4388_v62 }
 0x160   :  { %2944 = vmatpush.bf16.msrb.mxu0 %v4484_v26  ;;  %2908 = vmatpush.bf16.msra.mxu1 %v4456_v1 }
 0x163   :  { %2936 = vmatpush.bf16.msra.mxu3 %v4380_v6  ;;  %v4449_v6 = vld [vmem:[%s7240_s3 + $0x118] sm:$0xf0] }
 0x164   :  { %2945 = vmatpush.bf16.msrb.mxu0 %v4476_v48  ;;  %v4452_v9 = vor.u32 %v4884_v14, %v4449_v6  ;;  %2909 = vmatpush.bf16.msra.mxu1 %v4448_v4  ;;  %v4907_v48 = vld [vmem:[%s7242_s5 + $0x48] sm:$0xff] }
 0x166   :  { %2937 = vmatmul.bf16.vlgmr.msra.gmra.mxu3 %v2581_v0  ;;  %v4439_v0 = vld [vmem:[%s7240_s3 + $0x100] sm:$0xf] }
 0x168   :  { %v2417_v18 = vpop.f32.mrf.mxu2  ;;  %2946 = vmatpush.bf16.msrb.mxu0 %v4468_v60  ;;  %v4900_v60 = vld [vmem:[%s7242_s5 + $0x10] sm:$0xff] }
 0x169   :  { %v2430_v19 = vpop.f32.mrf.mxu3  ;;  %v2418_v44 = vadd.f32 %v2417_v18, %v434_v46  ;;  %v4882_v18 = vld [vmem:[%s7240_s3 + $0x104] sm:$0xf]  ;;  %v4908_v46 = vld [vmem:[%s7242_s5 + $0x50] sm:$0xff] }
 0x16a   :  { %3080 = vmatpush.bf16.msrb.mxu2 %v4908_v46 }
 0x16b   :  { %v2431_v62 = vadd.f32 %v2430_v19, %v2418_v44  ;;  %v4901_v44 = vld [vmem:[%s7242_s5 + $0x18] sm:$0xff] }
 0x16c   :  { %2947 = vmatpush.bf16.msrb.mxu0 %v4460_v49  ;;  %v4898_v49 = vld [vmem:[%s7242_s5] sm:$0xff] }
 0x16e   :  { %3081 = vmatpush.bf16.msrb.mxu2 %v4907_v48 }
 0x170   :  { %v7088_v17 = vpop.f32.mrf.mxu0  ;;  %v2419_v27 = vpop.f32.mrf.mxu2  ;;  %2948 = vmatpush.bf16.msrb.mxu0 %v4452_v9 }
 0x171   :  { %v7090_v8 = vpop.f32.mrf.mxu1  ;;  %v2432_v22 = vpop.f32.mrf.mxu3  ;;  %v2444_v40 = vadd.f32 %v7088_v17, %v2431_v62  ;;  %v4440_v17 = vor.u32 %v4883_v11, %v4439_v0  ;;  %v4441_v27 = vld [vmem:[%s7240_s3 + $0x108] sm:$0xf0]  ;;  %v4906_v62 = vld [vmem:[%s7242_s5 + $0x40] sm:$0xff] }
 0x172   :  { %v4444_v21 = vor.u32 %v4882_v18, %v4441_v27  ;;  %3082 = vmatpush.bf16.msrb.mxu2 %v4906_v62  ;;  %v4911_v18 = vld [vmem:[%s7243_s6] ss:$0 sm:$0xff] }
 0x173   :  { %v2457_v19 = vadd.f32 %v7090_v8, %v2444_v40  ;;  %2910 = vmatpush.bf16.msra.mxu1 %v4440_v17 }
 0x174   :  { %2949 = vmatpush.bf16.msrb.mxu0 %v4444_v21 }
 0x178   :  { %v2445_v31 = vpop.f32.mrf.mxu0 }
 0x179   :  { %v2458_v33 = vpop.f32.mrf.mxu1 }
 0x188   :  { %v2469_v15 = vpop.f32.mrf.mxu2 }
 0x189   :  { %v2482_v41 = vpop.f32.mrf.mxu3  ;;  %v2470_v29 = vadd.f32 %v2469_v15, %v2457_v19 }
 0x18b   :  { %v2483_v5 = vadd.f32 %v2482_v41, %v2470_v29  ;;  %v4905_v41 = vld [vmem:[%s7242_s5 + $0x38] sm:$0xff]  ;;  %s4944_s5 = smov [#allocation2]  }
 0x18c   :  { %3062 = vmatpush.bf16.msrb.mxu1 %v4905_v41  ;;  %s3095_s3 = sshll.u32 %s4944_s5, 4  ;;  %s3096_s3 = int_to_ptr.vmem [resolvable:$true] %s3095_s3 }
 0x190   :  { %v2495_v54 = vpop.f32.mrf.mxu0  ;;  %v2471_v56 = vpop.f32.mrf.mxu2  ;;  %3063 = vmatpush.bf16.msrb.mxu1 %v4904_v43 }
 0x191   :  { %v2508_v55 = vpop.f32.mrf.mxu1  ;;  %v2484_v59 = vpop.f32.mrf.mxu3  ;;  %v2496_v22 = vadd.f32 %v2495_v54, %v2483_v5 }
 0x193   :  { %v2509_v25 = vadd.f32 %v2508_v55, %v2496_v22  ;;  %v2634_v55 = vperm.slane %v2631_v50, 1 }
 0x194   :  { %3064 = vmatpush.bf16.msrb.mxu1 %v4903_v20 }
 0x198   :  { %v2497_v7 = vpop.f32.mrf.mxu0  ;;  %3065 = vmatpush.bf16.msrb.mxu1 %v4902_v51 }
 0x199   :  { %v2510_v10 = vpop.f32.mrf.mxu1 }
 0x19c   :  { %3066 = vmatpush.bf16.msrb.mxu1 %v4901_v44 }
 0x1a0   :  { %3067 = vmatpush.bf16.msrb.mxu1 %v4900_v60 }
 0x1a4   :  { %3068 = vmatpush.bf16.msrb.mxu1 %v4899_v61 }
 0x1a8   :  { %v2521_v23 = vpop.f32.mrf.mxu2  ;;  %3069 = vmatpush.bf16.msrb.mxu1 %v4898_v49 }
 0x1a9   :  { %v2534_v24 = vpop.f32.mrf.mxu3  ;;  %v2522_v28 = vadd.f32 %v2521_v23, %v2509_v25 }
 0x1ab   :  { %v2535_v8 = vadd.f32 %v2534_v24, %v2522_v28 }
 0x1b0   :  { %v2547_v16 = vpop.f32.mrf.mxu0  ;;  %v2523_v12 = vpop.f32.mrf.mxu2 }
 0x1b1   :  { %v2560_v13 = vpop.f32.mrf.mxu1  ;;  %v2536_v30 = vpop.f32.mrf.mxu3  ;;  %v2548_v31 = vadd.f32 %v2547_v16, %v2535_v8 }
 0x1b3   :  { %v2561_v33 = vadd.f32 %v2560_v13, %v2548_v31 }
 0x1b8   :  { %v2549_v32 = vpop.f32.mrf.mxu0  ;;  %v2573_v37 = vpop.f32.mrf.mxu2 }
 0x1b9   :  { %v2562_v36 = vpop.f32.mrf.mxu1  ;;  %v2574_v34 = vadd.f32 %v2573_v37, %v2561_v33 }
 0x1bb   :  { %v2579_v38 = vmax.f32 %v2574_v34, 0.0 }
 0x1bd   :  { %v2582_v39 = vpack.c.bf16 %v2579_v38, %v2579_v38 }
 0x1bf   :  { %2911 = vmatmul.bf16.vlgmr.msra.gmra.mxu1 %v2582_v39  ;;  %2950 = vmatmul.bf16.vlgmr.msrb.gmra.mxu0 %v2582_v39 }
 0x1c0   :  { %v2575_v26 = vpop.f32.mrf.mxu2 }
 0x1c9   :  { %v2886_v15 = vpop.f32.mrf.mxu3 }
 0x1ca   :  { %v2887_v53 = vadd.f32 %v2886_v15, %v2633_v2 }
 0x1d1   :  { %v2888_v45 = vpop.f32.mrf.mxu3 }
 0x1d6   :  { %v2899_v54 = vpop.f32.mrf.mxu0 }
 0x1d7   :  { %v2900_v56 = vadd.f32 %v2899_v54, %v2887_v53 }
 0x1d8   :  { %v2925_v47 = vpop.f32.mrf.mxu2 }
 0x1d9   :  { %v2926_v57 = vadd.f32 %v2925_v47, %v2634_v55 }
 0x1de   :  { %v2901_v59 = vpop.f32.mrf.mxu0 }
 0x1e0   :  { %v2927_v35 = vpop.f32.mrf.mxu2 }
 0x1e9   :  { %v2938_v52 = vpop.f32.mrf.mxu3 }
 0x1ea   :  { %v2939_v58 = vadd.f32 %v2938_v52, %v2926_v57 }
 0x1f1   :  { %v2940_v1 = vpop.f32.mrf.mxu3 }
 0x23c   :  { %v2912_v63 = vpop.f32.mrf.mxu1  ;;  %v2951_v3 = vpop.f32.mrf.mxu0 }
 0x23d   :  { %v2913_v14 = vadd.f32 %v2912_v63, %v2900_v56  ;;  %v2952_v40 = vadd.f32 %v2951_v3, %v2939_v58 }
 0x23f   :  { %v2955_v4 = vmax.f32 %v2913_v14, 0.0  ;;  %v2956_v6 = vmax.f32 %v2952_v40, 0.0 }
 0x241   :  { %v2957_v7 = vpack.c.bf16 %v2955_v4, %v2955_v4  ;;  %v2958_v9 = vpack.c.bf16 %v2956_v6, %v2956_v6 }
 0x243   :  { %3070 = vmatmul.bf16.vlgmr.msrb.gmra.mxu1 %v2957_v7  ;;  %4549 = vmatmul.msk.bf16.vlgmr.msrb.gmra.mxu2 %vm2067_vm0, %v2958_v9 }
 0x244   :  { %v2914_v10 = vpop.f32.mrf.mxu1  ;;  %v2953_v0 = vpop.f32.mrf.mxu0 }
 0x2c0   :  { %v3071_v11 = vpop.f32.mrf.mxu1 }
 0x2c1   :  { %v3072_v19 = vadd.f32 %v4911_v18, %v3071_v11 }
 0x2c6   :  { %v3084_v17 = vpop.f32.mrf.mxu2 }
 0x2c7   :  { %v3085_v27 = vadd.f32 %v3084_v17, %v3072_v19 }
 0x2c8   :  { %v3073_v21 = vpop.f32.mrf.mxu1 }
 0x2c9   :  { %3089 = vst.msk [vmem:[#allocation2] sm:$0x3] %vm3088_vm1, %v3085_v27 }
 0x2ca   :  { %3100 = dma.vmem_to_hbm [thread:$0]  %s3096_s3, 32, %s3098_s0, [#allocation3]  }
 0x2ce   :  { %v3086_v29 = vpop.f32.mrf.mxu2 }
 0x2cf   :  { %4942 = dma.done.wait [#allocation3], 32  }
 0x2d0   :  { %4943 = vsyncadd [#allocation3], 4294967264 }
 0x2d1   :  { %3105 = vsyncpa [#allocation3], 1 }

</bundles_post_ra>
